<compile_context>
chip_gen: v5e
topology: v5e:2x2
jax: 0.10.0
libtpu: 0.0.40
codegen_flags: <defaults>
</compile_context>

<pallas_src>
import functools

import jax
import jax.numpy as jnp
from jax import lax
from jax.experimental import pallas as pl
from jax.experimental.pallas import tpu as pltpu

EPS = 1e-3        # BatchNorm2d eps from the module (explicitly 0.001)
KW = 7            # (1, 7) kernel width
PADW = 3          # (0, 3) padding
CPAD = 256        # output-channel lane padding (multiple of 128, lane-dense store)


# ----------------------------------------------------------------------------
# Fused kernel: matmul -> BN -> ReLU -> (1,KW) conv (KW rolled matmuls) -> BN
# ----------------------------------------------------------------------------
def _make_fused_kernel(P, W, Cmid, Cpad, eps):
    inv_p = 1.0 / float(P)

    def kernel(x_ref, w1_ref, w2_hbm, bn1_ref, bn2_ref, o_ref, w2_vmem, sem):
        # Stream conv2 weights HBM->VMEM; overlaps conv1/BN1/ReLU below.
        w2_copy = pltpu.make_async_copy(w2_hbm, w2_vmem, sem)
        w2_copy.start()

        # ---- 1x1 conv: (P, Cin) @ (Cin, Cmid); bf16 operands, f32 accum ----
        y = jnp.dot(x_ref[...], w1_ref[...],
                    preferred_element_type=jnp.float32)            # (P, Cmid) f32

        g1, b1 = bn1_ref[0:1, :], bn1_ref[1:2, :]                  # (1, Cmid) f32
        g2, b2 = bn2_ref[0:1, :], bn2_ref[1:2, :]                  # (1, Cpad) f32

        # ---- BatchNorm 1 (training stats, one pass) + ReLU, affine folded ----
        mean1 = jnp.sum(y, axis=0, keepdims=True) * inv_p
        var1 = jnp.maximum(
            jnp.sum(y * y, axis=0, keepdims=True) * inv_p - mean1 * mean1, 0.0)
        scale1 = g1 * lax.rsqrt(var1 + eps)
        shift1 = b1 - mean1 * scale1
        y1 = jnp.maximum(y * scale1 + shift1, 0.0)                  # (P, Cmid) f32

        # Width coordinate per flattened row.  P is (N, H, W) flattened
        # row-major, so p % W is the W coordinate; the rolls below wrap across
        # row/image boundaries exactly where this mask zeroes the contribution.
        wcol = lax.broadcasted_iota(jnp.int32, (P, 1), 0) % W       # (P, 1)

        w2_copy.wait()

        # ---- (1, KW) conv along W: KW row-rolled matmuls, f32 accumulate ----
        acc = jnp.zeros((P, Cpad), jnp.float32)
        for k in range(KW):                         # static, fully unrolled
            d = k - PADW                            # tap offset along W
            if d == 0:
                z = y1
            else:
                z = pltpu.roll(y1, shift=(-d) % P, axis=0)          # z[p] = y1[p+d]
                valid = jnp.logical_and(wcol >= -d, wcol < W - d)
                z = jnp.where(valid, z, 0.0)
            acc = acc + jnp.dot(z.astype(jnp.bfloat16), w2_vmem[k],
                                preferred_element_type=jnp.float32)

        # ---- BatchNorm 2 (training stats, no ReLU) ----
        mean2 = jnp.sum(acc, axis=0, keepdims=True) * inv_p
        var2 = jnp.maximum(
            jnp.sum(acc * acc, axis=0, keepdims=True) * inv_p - mean2 * mean2, 0.0)
        scale2 = g2 * lax.rsqrt(var2 + eps)
        shift2 = b2 - mean2 * scale2
        o_ref[...] = acc * scale2 + shift2                          # lane-dense store

    return kernel


def _fused_conv_bn_chain(x, w1k, w2k, bn1, bn2, *, width, eps):
    """x: (P, Cin) bf16, w1k: (Cin, Cmid) bf16, w2k: (KW, Cmid, Cpad) bf16,
    bn1: (2, Cmid) f32 [gamma1, beta1], bn2: (2, Cpad) f32 [gamma2, beta2]
    -> (P, Cpad) f32."""
    P, Cin = x.shape
    kw, Cmid, Cpad = w2k.shape
    kernel = _make_fused_kernel(P, width, Cmid, Cpad, eps)
    flops = 2 * P * Cin * Cmid + 2 * kw * P * Cmid * Cpad
    bytes_accessed = (x.size * 2 + w1k.size * 2 + w2k.size * 2
                      + bn1.size * 4 + bn2.size * 4 + P * Cpad * 4)
    return pl.pallas_call(
        kernel,
        out_shape=jax.ShapeDtypeStruct((P, Cpad), jnp.float32),
        grid=(1,),
        in_specs=[
            pl.BlockSpec((P, Cin), lambda i: (0, 0)),
            pl.BlockSpec((Cin, Cmid), lambda i: (0, 0)),
            pl.BlockSpec(memory_space=pl.ANY),          # w2 stays in HBM, manual DMA
            pl.BlockSpec((2, Cmid), lambda i: (0, 0)),
            pl.BlockSpec((2, Cpad), lambda i: (0, 0)),
        ],
        out_specs=pl.BlockSpec((P, Cpad), lambda i: (0, 0)),
        scratch_shapes=[
            pltpu.VMEM((kw, Cmid, Cpad), jnp.bfloat16),  # conv2 weights (streamed)
            pltpu.SemaphoreType.DMA(()),
        ],
        compiler_params=pltpu.CompilerParams(
            dimension_semantics=("arbitrary",)),
        cost_estimate=pl.CostEstimate(flops=flops, transcendentals=2 * Cpad,
                                      bytes_accessed=bytes_accessed),
    )(x, w1k, w2k, bn1, bn2)


# ----------------------------------------------------------------------------
# Parameter prep (call ONCE, outside the per-call jitted path) and wrapper.
# ----------------------------------------------------------------------------
def prepare_params(params):
    """torch-layout params -> kernel operands.  Only the final output channel
    dim is zero-padded to CPAD lanes; gamma2/beta2 MUST be zero-padded too so
    the pad lanes produce exact zeros (var=0 -> scale=gamma_pad*rsqrt(eps)=0)."""
    w1, g1, b1, w2, g2, b2 = params
    cmid, cin = w1.shape[0], w1.shape[1]
    cout = w2.shape[0]
    assert cout <= CPAD and cmid % 8 == 0
    # (Cmid, Cin, 1, 1) -> (Cin, Cmid); contraction dim left unpadded.
    w1k = w1.reshape(cmid, cin).T.astype(jnp.bfloat16)
    # (Cout, Cmid, 1, KW) -> (KW, Cmid, Cout); pad only the OUTPUT channels.
    w2k = jnp.pad(jnp.transpose(w2[:, :, 0, :], (2, 1, 0)).astype(jnp.float32),
                  ((0, 0), (0, 0), (0, CPAD - cout))).astype(jnp.bfloat16)
    bn1 = jnp.stack([g1, b1], axis=0).astype(jnp.float32)            # (2, Cmid)
    pad1 = lambda v: jnp.pad(v.astype(jnp.float32), (0, CPAD - v.shape[0]))
    bn2 = jnp.stack([pad1(g2), pad1(b2)], axis=0)                     # (2, CPAD)
    return w1k, w2k, bn1, bn2


@functools.partial(jax.jit, static_argnames=("cout",))
def forward(x_nchw, kparams, cout):
    w1k, w2k, bn1, bn2 = kparams
    n, cin, h, w = x_nchw.shape
    p = n * h * w
    # NCHW -> (P, Cin): channels on lanes; bf16 MXU operand.
    x = jnp.transpose(x_nchw, (0, 2, 3, 1)).reshape(p, cin).astype(jnp.bfloat16)
    out = _fused_conv_bn_chain(x, w1k, w2k, bn1, bn2, width=w, eps=EPS)
    out = out[:, :cout].reshape(n, h, w, cout)
    # TODO(synk): BatchNorm running_mean/running_var buffer updates (training-
    # mode side effects) are not emitted; the forward output does not use them.
    return jnp.transpose(out, (0, 3, 1, 2))


# ----------------------------------------------------------------------------
# Pure-JAX f32 reference (for correctness check)
# ----------------------------------------------------------------------------
def _bn_train(x_nchw, gamma, beta, eps):
    mean = x_nchw.mean(axis=(0, 2, 3), keepdims=True)
    var = ((x_nchw - mean) ** 2).mean(axis=(0, 2, 3), keepdims=True)
    return (x_nchw - mean) * lax.rsqrt(var + eps) * gamma.reshape(1, -1, 1, 1) \
        + beta.reshape(1, -1, 1, 1)


def reference(x_nchw, params):
    w1, g1, b1, w2, g2, b2 = params
    dn = ("NCHW", "OIHW", "NCHW")
    y = lax.conv_general_dilated(x_nchw, w1, (1, 1), "VALID",
                                 dimension_numbers=dn,
                                 precision=lax.Precision.HIGHEST)
    y = jnp.maximum(_bn_train(y, g1, b1, EPS), 0.0)
    y = lax.conv_general_dilated(y, w2, (1, 1), ((0, 0), (PADW, PADW)),
                                 dimension_numbers=dn,
                                 precision=lax.Precision.HIGHEST)
    return _bn_train(y, g2, b2, EPS)


# ----------------------------------------------------------------------------
if __name__ == "__main__":
    key = jax.random.PRNGKey(0)
    kx, k1, k2, k3, k4, k5, k6 = jax.random.split(key, 7)

    N, CIN, H, W = 1, 768, 12, 12
    CMID, COUT = 160, 160

    # Deterministic parameter init (torch layouts).
    w1 = 0.05 * jax.random.normal(k1, (CMID, CIN, 1, 1), jnp.float32)
    g1 = 1.0 + 0.1 * jax.random.normal(k2, (CMID,), jnp.float32)
    b1 = 0.1 * jax.random.normal(k3, (CMID,), jnp.float32)
    w2 = 0.05 * jax.random.normal(k4, (COUT, CMID, 1, KW), jnp.float32)
    g2 = 1.0 + 0.1 * jax.random.normal(k5, (COUT,), jnp.float32)
    b2 = 0.1 * jax.random.normal(k6, (COUT,), jnp.float32)
    params = (w1, g1, b1, w2, g2, b2)

    x145 = jax.random.normal(kx, (N, CIN, H, W), jnp.float32)

    kparams = prepare_params(params)            # hoisted out of per-call path
    out = jax.block_until_ready(forward(x145, kparams, cout=COUT))
    assert out.shape == (N, COUT, H, W), out.shape

    ref = jax.block_until_ready(reference(x145, params))
    err = jnp.abs(out - ref)
    # bf16 MXU operands vs. f32 HIGHEST-precision reference: loose max, tight RMS.
    assert float(err.max()) < 5e-2, float(err.max())
    assert float(jnp.sqrt(jnp.mean(err * err))) < 1e-2, \
        float(jnp.sqrt(jnp.mean(err * err)))

    print("KERNEL_OK")
</pallas_src>

<mosaic_0001>
module attributes {stable_mosaic.version = 11 : i64} {
  func.func @kernel(%arg0: i32, %arg1: memref<144x768xbf16, #tpu.memory_space<vmem>>, %arg2: memref<768x160xbf16, #tpu.memory_space<vmem>>, %arg3: memref<7x160x256xbf16, #tpu.memory_space<any>>, %arg4: memref<2x160xf32, #tpu.memory_space<vmem>>, %arg5: memref<2x256xf32, #tpu.memory_space<vmem>>, %arg6: memref<144x256xf32, #tpu.memory_space<vmem>>, %arg7: memref<7x160x256xbf16, #tpu.memory_space<vmem>>, %arg8: memref<!tpu.dma_semaphore, #tpu.memory_space<semaphore_mem>>) attributes {dimension_semantics = [#tpu.dimension_semantics<arbitrary>], iteration_bounds = array<i64: 1>, scalar_prefetch = 0 : i64, scratch_operands = 2 : i64, tpu.core_type = #tpu.core_type<tc>, window_params = [{pipeline_mode = #tpu.pipeline_mode<synchronous>, transform_indices = @transform_0, window_bounds = array<i64: 144, 768>}, {pipeline_mode = #tpu.pipeline_mode<synchronous>, transform_indices = @transform_1, window_bounds = array<i64: 768, 160>}, {}, {pipeline_mode = #tpu.pipeline_mode<synchronous>, transform_indices = @transform_3, window_bounds = array<i64: 2, 160>}, {pipeline_mode = #tpu.pipeline_mode<synchronous>, transform_indices = @transform_4, window_bounds = array<i64: 2, 256>}, {pipeline_mode = #tpu.pipeline_mode<synchronous>, transform_indices = @transform_5, window_bounds = array<i64: 144, 256>}]} {
    tpu.enqueue_dma source(%arg3 : memref<7x160x256xbf16, #tpu.memory_space<any>>) target(%arg7 : memref<7x160x256xbf16, #tpu.memory_space<vmem>>) target_semaphore(%arg8 : memref<!tpu.dma_semaphore, #tpu.memory_space<semaphore_mem>>)
    %c0 = arith.constant 0 : index
    %c0_0 = arith.constant 0 : index
    %0 = vector.load %arg1[%c0, %c0_0] : memref<144x768xbf16, #tpu.memory_space<vmem>>, vector<144x768xbf16>
    %c0_1 = arith.constant 0 : index
    %c0_2 = arith.constant 0 : index
    %1 = vector.load %arg2[%c0_1, %c0_2] : memref<768x160xbf16, #tpu.memory_space<vmem>>, vector<768x160xbf16>
    %cst = arith.constant dense<0.000000e+00> : vector<144x160xf32>
    %2 = tpu.matmul %0, %1, %cst {dimension_numbers = #tpu.dot_dimension_numbers<[1], [0], [0], [1], [0, 0, 1, 1], [], []>} : vector<144x768xbf16>, vector<768x160xbf16>, vector<144x160xf32> -> vector<144x160xf32>
    %c0_3 = arith.constant 0 : index
    %c0_4 = arith.constant 0 : index
    %3 = vector.load %arg4[%c0_3, %c0_4] : memref<2x160xf32, #tpu.memory_space<vmem>>, vector<1x160xf32>
    %c1 = arith.constant 1 : index
    %c0_5 = arith.constant 0 : index
    %4 = vector.load %arg4[%c1, %c0_5] : memref<2x160xf32, #tpu.memory_space<vmem>>, vector<1x160xf32>
    %c0_6 = arith.constant 0 : index
    %c0_7 = arith.constant 0 : index
    %5 = vector.load %arg5[%c0_6, %c0_7] : memref<2x256xf32, #tpu.memory_space<vmem>>, vector<1x256xf32>
    %c1_8 = arith.constant 1 : index
    %c0_9 = arith.constant 0 : index
    %6 = vector.load %arg5[%c1_8, %c0_9] : memref<2x256xf32, #tpu.memory_space<vmem>>, vector<1x256xf32>
    %cst_10 = arith.constant dense<0.000000e+00> : vector<160xf32>
    %7 = vector.multi_reduction <add>, %2, %cst_10 [0] : vector<144x160xf32> to vector<160xf32>
    %8 = vector.shape_cast %7 : vector<160xf32> to vector<1x160xf32>
    %cst_11 = arith.constant 0.0069444445 : f32
    %9 = vector.broadcast %cst_11 : f32 to vector<1x160xf32>
    %10 = arith.mulf %8, %9 : vector<1x160xf32>
    %11 = arith.mulf %2, %2 : vector<144x160xf32>
    %cst_12 = arith.constant dense<0.000000e+00> : vector<160xf32>
    %12 = vector.multi_reduction <add>, %11, %cst_12 [0] : vector<144x160xf32> to vector<160xf32>
    %13 = vector.shape_cast %12 : vector<160xf32> to vector<1x160xf32>
    %cst_13 = arith.constant 0.0069444445 : f32
    %14 = vector.broadcast %cst_13 : f32 to vector<1x160xf32>
    %15 = arith.mulf %13, %14 : vector<1x160xf32>
    %16 = arith.mulf %10, %10 : vector<1x160xf32>
    %17 = arith.subf %15, %16 : vector<1x160xf32>
    %cst_14 = arith.constant 0.000000e+00 : f32
    %18 = vector.broadcast %cst_14 : f32 to vector<1x160xf32>
    %19 = arith.maximumf %17, %18 : vector<1x160xf32>
    %cst_15 = arith.constant 1.000000e-03 : f32
    %20 = vector.broadcast %cst_15 : f32 to vector<1x160xf32>
    %21 = arith.addf %19, %20 : vector<1x160xf32>
    %22 = math.rsqrt %21 : vector<1x160xf32>
    %23 = arith.mulf %3, %22 : vector<1x160xf32>
    %24 = arith.mulf %10, %23 : vector<1x160xf32>
    %25 = arith.subf %4, %24 : vector<1x160xf32>
    %26 = vector.broadcast %23 : vector<1x160xf32> to vector<144x160xf32>
    %27 = arith.mulf %2, %26 : vector<144x160xf32>
    %28 = vector.broadcast %25 : vector<1x160xf32> to vector<144x160xf32>
    %29 = arith.addf %27, %28 : vector<144x160xf32>
    %cst_16 = arith.constant 0.000000e+00 : f32
    %30 = vector.broadcast %cst_16 : f32 to vector<144x160xf32>
    %31 = arith.maximumf %29, %30 : vector<144x160xf32>
    %32 = tpu.iota {dimensions = array<i32: 0>} : vector<144x1xi32>
    %c12_i32 = arith.constant 12 : i32
    %c0_i32 = arith.constant 0 : i32
    %33 = arith.cmpi eq, %c12_i32, %c0_i32 : i32
    %c1_i32 = arith.constant 1 : i32
    %34 = arith.select %33, %c1_i32, %c12_i32 : i32
    %35 = vector.broadcast %34 : i32 to vector<144x1xi32>
    %36 = arith.remsi %32, %35 : vector<144x1xi32>
    %c0_i32_17 = arith.constant 0 : i32
    %37 = vector.broadcast %c0_i32_17 : i32 to vector<144x1xi32>
    %38 = arith.cmpi ne, %36, %37 : vector<144x1xi32>
    %c0_i32_18 = arith.constant 0 : i32
    %39 = vector.broadcast %c0_i32_18 : i32 to vector<144x1xi32>
    %40 = arith.cmpi slt, %36, %39 : vector<144x1xi32>
    %c0_i32_19 = arith.constant 0 : i32
    %41 = arith.cmpi slt, %34, %c0_i32_19 : i32
    %42 = vector.broadcast %41 : i1 to vector<144x1xi1>
    %43 = vector.broadcast %42 : vector<144x1xi1> to vector<144x1xi1>
    %44 = arith.xori %40, %43 : vector<144x1xi1>
    %45 = arith.andi %44, %38 : vector<144x1xi1>
    %46 = vector.broadcast %34 : i32 to vector<144x1xi32>
    %47 = arith.addi %36, %46 : vector<144x1xi32>
    %48 = arith.select %45, %47, %36 : vector<144x1xi1>, vector<144x1xi32>
    tpu.wait_dma2 semaphore(%arg8 : memref<!tpu.dma_semaphore, #tpu.memory_space<semaphore_mem>>) src(%arg3 : memref<7x160x256xbf16, #tpu.memory_space<any>>) dst(%arg7 : memref<7x160x256xbf16, #tpu.memory_space<vmem>>)
    %cst_20 = arith.constant 0.000000e+00 : f32
    %49 = vector.broadcast %cst_20 : f32 to vector<144x256xf32>
    %c3_i32 = arith.constant 3 : i32
    %50 = tpu.dynamic_rotate %31 by %c3_i32 dim 0 : vector<144x160xf32>, i32 -> vector<144x160xf32>
    %c3_i32_21 = arith.constant 3 : i32
    %51 = vector.broadcast %c3_i32_21 : i32 to vector<144x1xi32>
    %52 = arith.cmpi sge, %48, %51 : vector<144x1xi32>
    %c15_i32 = arith.constant 15 : i32
    %53 = vector.broadcast %c15_i32 : i32 to vector<144x1xi32>
    %54 = arith.cmpi slt, %48, %53 : vector<144x1xi32>
    %55 = arith.andi %52, %54 : vector<144x1xi1>
    %cst_22 = arith.constant 0.000000e+00 : f32
    %56 = vector.shape_cast %55 : vector<144x1xi1> to vector<144x1xi1>
    %57 = vector.broadcast %56 : vector<144x1xi1> to vector<144x160xi1>
    %58 = vector.broadcast %cst_22 : f32 to vector<144x160xf32>
    %59 = arith.select %57, %50, %58 : vector<144x160xi1>, vector<144x160xf32>
    %60 = arith.truncf %59 : vector<144x160xf32> to vector<144x160xbf16>
    %c0_23 = arith.constant 0 : index
    %c0_24 = arith.constant 0 : index
    %c0_25 = arith.constant 0 : index
    %61 = vector.load %arg7[%c0_23, %c0_24, %c0_25] : memref<7x160x256xbf16, #tpu.memory_space<vmem>>, vector<1x160x256xbf16>
    %62 = vector.shape_cast %61 : vector<1x160x256xbf16> to vector<160x256xbf16>
    %cst_26 = arith.constant dense<0.000000e+00> : vector<144x256xf32>
    %63 = tpu.matmul %60, %62, %cst_26 {dimension_numbers = #tpu.dot_dimension_numbers<[1], [0], [0], [1], [0, 0, 1, 1], [], []>} : vector<144x160xbf16>, vector<160x256xbf16>, vector<144x256xf32> -> vector<144x256xf32>
    %64 = arith.addf %49, %63 : vector<144x256xf32>
    %c2_i32 = arith.constant 2 : i32
    %65 = tpu.dynamic_rotate %31 by %c2_i32 dim 0 : vector<144x160xf32>, i32 -> vector<144x160xf32>
    %c2_i32_27 = arith.constant 2 : i32
    %66 = vector.broadcast %c2_i32_27 : i32 to vector<144x1xi32>
    %67 = arith.cmpi sge, %48, %66 : vector<144x1xi32>
    %c14_i32 = arith.constant 14 : i32
    %68 = vector.broadcast %c14_i32 : i32 to vector<144x1xi32>
    %69 = arith.cmpi slt, %48, %68 : vector<144x1xi32>
    %70 = arith.andi %67, %69 : vector<144x1xi1>
    %cst_28 = arith.constant 0.000000e+00 : f32
    %71 = vector.shape_cast %70 : vector<144x1xi1> to vector<144x1xi1>
    %72 = vector.broadcast %71 : vector<144x1xi1> to vector<144x160xi1>
    %73 = vector.broadcast %cst_28 : f32 to vector<144x160xf32>
    %74 = arith.select %72, %65, %73 : vector<144x160xi1>, vector<144x160xf32>
    %75 = arith.truncf %74 : vector<144x160xf32> to vector<144x160xbf16>
    %c1_29 = arith.constant 1 : index
    %c0_30 = arith.constant 0 : index
    %c0_31 = arith.constant 0 : index
    %76 = vector.load %arg7[%c1_29, %c0_30, %c0_31] : memref<7x160x256xbf16, #tpu.memory_space<vmem>>, vector<1x160x256xbf16>
    %77 = vector.shape_cast %76 : vector<1x160x256xbf16> to vector<160x256xbf16>
    %cst_32 = arith.constant dense<0.000000e+00> : vector<144x256xf32>
    %78 = tpu.matmul %75, %77, %cst_32 {dimension_numbers = #tpu.dot_dimension_numbers<[1], [0], [0], [1], [0, 0, 1, 1], [], []>} : vector<144x160xbf16>, vector<160x256xbf16>, vector<144x256xf32> -> vector<144x256xf32>
    %79 = arith.addf %64, %78 : vector<144x256xf32>
    %c1_i32_33 = arith.constant 1 : i32
    %80 = tpu.dynamic_rotate %31 by %c1_i32_33 dim 0 : vector<144x160xf32>, i32 -> vector<144x160xf32>
    %c1_i32_34 = arith.constant 1 : i32
    %81 = vector.broadcast %c1_i32_34 : i32 to vector<144x1xi32>
    %82 = arith.cmpi sge, %48, %81 : vector<144x1xi32>
    %c13_i32 = arith.constant 13 : i32
    %83 = vector.broadcast %c13_i32 : i32 to vector<144x1xi32>
    %84 = arith.cmpi slt, %48, %83 : vector<144x1xi32>
    %85 = arith.andi %82, %84 : vector<144x1xi1>
    %cst_35 = arith.constant 0.000000e+00 : f32
    %86 = vector.shape_cast %85 : vector<144x1xi1> to vector<144x1xi1>
    %87 = vector.broadcast %86 : vector<144x1xi1> to vector<144x160xi1>
    %88 = vector.broadcast %cst_35 : f32 to vector<144x160xf32>
    %89 = arith.select %87, %80, %88 : vector<144x160xi1>, vector<144x160xf32>
    %90 = arith.truncf %89 : vector<144x160xf32> to vector<144x160xbf16>
    %c2 = arith.constant 2 : index
    %c0_36 = arith.constant 0 : index
    %c0_37 = arith.constant 0 : index
    %91 = vector.load %arg7[%c2, %c0_36, %c0_37] : memref<7x160x256xbf16, #tpu.memory_space<vmem>>, vector<1x160x256xbf16>
    %92 = vector.shape_cast %91 : vector<1x160x256xbf16> to vector<160x256xbf16>
    %cst_38 = arith.constant dense<0.000000e+00> : vector<144x256xf32>
    %93 = tpu.matmul %90, %92, %cst_38 {dimension_numbers = #tpu.dot_dimension_numbers<[1], [0], [0], [1], [0, 0, 1, 1], [], []>} : vector<144x160xbf16>, vector<160x256xbf16>, vector<144x256xf32> -> vector<144x256xf32>
    %94 = arith.addf %79, %93 : vector<144x256xf32>
    %95 = arith.truncf %31 : vector<144x160xf32> to vector<144x160xbf16>
    %c3 = arith.constant 3 : index
    %c0_39 = arith.constant 0 : index
    %c0_40 = arith.constant 0 : index
    %96 = vector.load %arg7[%c3, %c0_39, %c0_40] : memref<7x160x256xbf16, #tpu.memory_space<vmem>>, vector<1x160x256xbf16>
    %97 = vector.shape_cast %96 : vector<1x160x256xbf16> to vector<160x256xbf16>
    %cst_41 = arith.constant dense<0.000000e+00> : vector<144x256xf32>
    %98 = tpu.matmul %95, %97, %cst_41 {dimension_numbers = #tpu.dot_dimension_numbers<[1], [0], [0], [1], [0, 0, 1, 1], [], []>} : vector<144x160xbf16>, vector<160x256xbf16>, vector<144x256xf32> -> vector<144x256xf32>
    %99 = arith.addf %94, %98 : vector<144x256xf32>
    %c143_i32 = arith.constant 143 : i32
    %100 = tpu.dynamic_rotate %31 by %c143_i32 dim 0 : vector<144x160xf32>, i32 -> vector<144x160xf32>
    %c-1_i32 = arith.constant -1 : i32
    %101 = vector.broadcast %c-1_i32 : i32 to vector<144x1xi32>
    %102 = arith.cmpi sge, %48, %101 : vector<144x1xi32>
    %c11_i32 = arith.constant 11 : i32
    %103 = vector.broadcast %c11_i32 : i32 to vector<144x1xi32>
    %104 = arith.cmpi slt, %48, %103 : vector<144x1xi32>
    %105 = arith.andi %102, %104 : vector<144x1xi1>
    %cst_42 = arith.constant 0.000000e+00 : f32
    %106 = vector.shape_cast %105 : vector<144x1xi1> to vector<144x1xi1>
    %107 = vector.broadcast %106 : vector<144x1xi1> to vector<144x160xi1>
    %108 = vector.broadcast %cst_42 : f32 to vector<144x160xf32>
    %109 = arith.select %107, %100, %108 : vector<144x160xi1>, vector<144x160xf32>
    %110 = arith.truncf %109 : vector<144x160xf32> to vector<144x160xbf16>
    %c4 = arith.constant 4 : index
    %c0_43 = arith.constant 0 : index
    %c0_44 = arith.constant 0 : index
    %111 = vector.load %arg7[%c4, %c0_43, %c0_44] : memref<7x160x256xbf16, #tpu.memory_space<vmem>>, vector<1x160x256xbf16>
    %112 = vector.shape_cast %111 : vector<1x160x256xbf16> to vector<160x256xbf16>
    %cst_45 = arith.constant dense<0.000000e+00> : vector<144x256xf32>
    %113 = tpu.matmul %110, %112, %cst_45 {dimension_numbers = #tpu.dot_dimension_numbers<[1], [0], [0], [1], [0, 0, 1, 1], [], []>} : vector<144x160xbf16>, vector<160x256xbf16>, vector<144x256xf32> -> vector<144x256xf32>
    %114 = arith.addf %99, %113 : vector<144x256xf32>
    %c142_i32 = arith.constant 142 : i32
    %115 = tpu.dynamic_rotate %31 by %c142_i32 dim 0 : vector<144x160xf32>, i32 -> vector<144x160xf32>
    %c-2_i32 = arith.constant -2 : i32
    %116 = vector.broadcast %c-2_i32 : i32 to vector<144x1xi32>
    %117 = arith.cmpi sge, %48, %116 : vector<144x1xi32>
    %c10_i32 = arith.constant 10 : i32
    %118 = vector.broadcast %c10_i32 : i32 to vector<144x1xi32>
    %119 = arith.cmpi slt, %48, %118 : vector<144x1xi32>
    %120 = arith.andi %117, %119 : vector<144x1xi1>
    %cst_46 = arith.constant 0.000000e+00 : f32
    %121 = vector.shape_cast %120 : vector<144x1xi1> to vector<144x1xi1>
    %122 = vector.broadcast %121 : vector<144x1xi1> to vector<144x160xi1>
    %123 = vector.broadcast %cst_46 : f32 to vector<144x160xf32>
    %124 = arith.select %122, %115, %123 : vector<144x160xi1>, vector<144x160xf32>
    %125 = arith.truncf %124 : vector<144x160xf32> to vector<144x160xbf16>
    %c5 = arith.constant 5 : index
    %c0_47 = arith.constant 0 : index
    %c0_48 = arith.constant 0 : index
    %126 = vector.load %arg7[%c5, %c0_47, %c0_48] : memref<7x160x256xbf16, #tpu.memory_space<vmem>>, vector<1x160x256xbf16>
    %127 = vector.shape_cast %126 : vector<1x160x256xbf16> to vector<160x256xbf16>
    %cst_49 = arith.constant dense<0.000000e+00> : vector<144x256xf32>
    %128 = tpu.matmul %125, %127, %cst_49 {dimension_numbers = #tpu.dot_dimension_numbers<[1], [0], [0], [1], [0, 0, 1, 1], [], []>} : vector<144x160xbf16>, vector<160x256xbf16>, vector<144x256xf32> -> vector<144x256xf32>
    %129 = arith.addf %114, %128 : vector<144x256xf32>
    %c141_i32 = arith.constant 141 : i32
    %130 = tpu.dynamic_rotate %31 by %c141_i32 dim 0 : vector<144x160xf32>, i32 -> vector<144x160xf32>
    %c-3_i32 = arith.constant -3 : i32
    %131 = vector.broadcast %c-3_i32 : i32 to vector<144x1xi32>
    %132 = arith.cmpi sge, %48, %131 : vector<144x1xi32>
    %c9_i32 = arith.constant 9 : i32
    %133 = vector.broadcast %c9_i32 : i32 to vector<144x1xi32>
    %134 = arith.cmpi slt, %48, %133 : vector<144x1xi32>
    %135 = arith.andi %132, %134 : vector<144x1xi1>
    %cst_50 = arith.constant 0.000000e+00 : f32
    %136 = vector.shape_cast %135 : vector<144x1xi1> to vector<144x1xi1>
    %137 = vector.broadcast %136 : vector<144x1xi1> to vector<144x160xi1>
    %138 = vector.broadcast %cst_50 : f32 to vector<144x160xf32>
    %139 = arith.select %137, %130, %138 : vector<144x160xi1>, vector<144x160xf32>
    %140 = arith.truncf %139 : vector<144x160xf32> to vector<144x160xbf16>
    %c6 = arith.constant 6 : index
    %c0_51 = arith.constant 0 : index
    %c0_52 = arith.constant 0 : index
    %141 = vector.load %arg7[%c6, %c0_51, %c0_52] : memref<7x160x256xbf16, #tpu.memory_space<vmem>>, vector<1x160x256xbf16>
    %142 = vector.shape_cast %141 : vector<1x160x256xbf16> to vector<160x256xbf16>
    %cst_53 = arith.constant dense<0.000000e+00> : vector<144x256xf32>
    %143 = tpu.matmul %140, %142, %cst_53 {dimension_numbers = #tpu.dot_dimension_numbers<[1], [0], [0], [1], [0, 0, 1, 1], [], []>} : vector<144x160xbf16>, vector<160x256xbf16>, vector<144x256xf32> -> vector<144x256xf32>
    %144 = arith.addf %129, %143 : vector<144x256xf32>
    %cst_54 = arith.constant dense<0.000000e+00> : vector<256xf32>
    %145 = vector.multi_reduction <add>, %144, %cst_54 [0] : vector<144x256xf32> to vector<256xf32>
    %146 = vector.shape_cast %145 : vector<256xf32> to vector<1x256xf32>
    %cst_55 = arith.constant 0.0069444445 : f32
    %147 = vector.broadcast %cst_55 : f32 to vector<1x256xf32>
    %148 = arith.mulf %146, %147 : vector<1x256xf32>
    %149 = arith.mulf %144, %144 : vector<144x256xf32>
    %cst_56 = arith.constant dense<0.000000e+00> : vector<256xf32>
    %150 = vector.multi_reduction <add>, %149, %cst_56 [0] : vector<144x256xf32> to vector<256xf32>
    %151 = vector.shape_cast %150 : vector<256xf32> to vector<1x256xf32>
    %cst_57 = arith.constant 0.0069444445 : f32
    %152 = vector.broadcast %cst_57 : f32 to vector<1x256xf32>
    %153 = arith.mulf %151, %152 : vector<1x256xf32>
    %154 = arith.mulf %148, %148 : vector<1x256xf32>
    %155 = arith.subf %153, %154 : vector<1x256xf32>
    %cst_58 = arith.constant 0.000000e+00 : f32
    %156 = vector.broadcast %cst_58 : f32 to vector<1x256xf32>
    %157 = arith.maximumf %155, %156 : vector<1x256xf32>
    %cst_59 = arith.constant 1.000000e-03 : f32
    %158 = vector.broadcast %cst_59 : f32 to vector<1x256xf32>
    %159 = arith.addf %157, %158 : vector<1x256xf32>
    %160 = math.rsqrt %159 : vector<1x256xf32>
    %161 = arith.mulf %5, %160 : vector<1x256xf32>
    %162 = arith.mulf %148, %161 : vector<1x256xf32>
    %163 = arith.subf %6, %162 : vector<1x256xf32>
    %164 = vector.broadcast %161 : vector<1x256xf32> to vector<144x256xf32>
    %165 = arith.mulf %144, %164 : vector<144x256xf32>
    %166 = vector.broadcast %163 : vector<1x256xf32> to vector<144x256xf32>
    %167 = arith.addf %165, %166 : vector<144x256xf32>
    %c0_60 = arith.constant 0 : index
    %c0_61 = arith.constant 0 : index
    %168 = vector.load %arg6[%c0_60, %c0_61] : memref<144x256xf32, #tpu.memory_space<vmem>>, vector<144x256xf32>
    tpu.vector_store %arg6[%c0_60, %c0_61], %167 {strides = array<i32>} : memref<144x256xf32, #tpu.memory_space<vmem>>, vector<144x256xf32>,
    return
  }
  func.func @transform_0(%arg0: i32) -> (i32, i32) {
    %c0_i32 = arith.constant 0 : i32
    %c0_i32_0 = arith.constant 0 : i32
    %c0_i32_1 = arith.constant 0 : i32
    return %c0_i32, %c0_i32_0 : i32, i32
  }
  func.func @transform_1(%arg0: i32) -> (i32, i32) {
    %c0_i32 = arith.constant 0 : i32
    %c0_i32_0 = arith.constant 0 : i32
    %c0_i32_1 = arith.constant 0 : i32
    return %c0_i32, %c0_i32_0 : i32, i32
  }
  func.func @transform_3(%arg0: i32) -> (i32, i32) {
    %c0_i32 = arith.constant 0 : i32
    %c0_i32_0 = arith.constant 0 : i32
    %c0_i32_1 = arith.constant 0 : i32
    return %c0_i32, %c0_i32_0 : i32, i32
  }
  func.func @transform_4(%arg0: i32) -> (i32, i32) {
    %c0_i32 = arith.constant 0 : i32
    %c0_i32_0 = arith.constant 0 : i32
    %c0_i32_1 = arith.constant 0 : i32
    return %c0_i32, %c0_i32_0 : i32, i32
  }
  func.func @transform_5(%arg0: i32) -> (i32, i32) {
    %c0_i32 = arith.constant 0 : i32
    %c0_i32_0 = arith.constant 0 : i32
    %c0_i32_1 = arith.constant 0 : i32
    return %c0_i32, %c0_i32_0 : i32, i32
  }
}

</mosaic_0001>

<bundles_post_ra>
// kernel: forward.1
= control target key start
LH: loop header
LB: loop body
LE: loop exit
PB: predicated region body
PF: predicated region fallthrough
CT: control target
= control target key end

     0   :  { %s14824_s0 = inlined_call_operand.vmem [shape: bf16[144,768], index: 0, kind: input, shape index: {}]   ;;  %s14825_s1 = inlined_call_operand.vmem [shape: bf16[768,160], index: 1, kind: input, shape index: {}]   ;;  %s14826_s2 = inlined_call_operand.vmem [shape: bf16[7,160,256], index: 2, kind: input, shape index: {}]   ;;  %s14827_s3 = inlined_call_operand.vmem [shape: f32[2,160], index: 3, kind: input, shape index: {}]   ;;  %s14828_s4 = inlined_call_operand.vmem [shape: f32[2,256], index: 4, kind: input, shape index: {}]   ;;  %s14829_s5 = inlined_call_operand.vmem [shape: f32[144,256], index: 5, kind: output, shape index: {}]  }
   0x1   :  { %v29_v0 = vld [vmem:[%s14826_s2] sm:$0xff]  ;;  %v31_v1 = vld [vmem:[%s14826_s2 + $0x8] sm:$0xff]  ;;  %v33_v2 = vld [vmem:[%s14826_s2 + $0x10] sm:$0xff] }
   0x2   :  { %30 = vst [vmem:[#allocation2] sm:$0xff] %v29_v0  ;;  %v35_v3 = vld [vmem:[%s14826_s2 + $0x18] sm:$0xff]  ;;  %v37_v4 = vld [vmem:[%s14826_s2 + $0x20] sm:$0xff]  ;;  %v39_v5 = vld [vmem:[%s14826_s2 + $0x28] sm:$0xff] }
   0x3   :  { %32 = vst [vmem:[#allocation2 + $0x8] sm:$0xff] %v31_v1  ;;  %v41_v6 = vld [vmem:[%s14826_s2 + $0x30] sm:$0xff]  ;;  %v43_v7 = vld [vmem:[%s14826_s2 + $0x38] sm:$0xff]  ;;  %v45_v8 = vld [vmem:[%s14826_s2 + $0x40] sm:$0xff] }
   0x4   :  { %34 = vst [vmem:[#allocation2 + $0x10] sm:$0xff] %v33_v2  ;;  %v47_v9 = vld [vmem:[%s14826_s2 + $0x48] sm:$0xff]  ;;  %v49_v10 = vld [vmem:[%s14826_s2 + $0x50] sm:$0xff]  ;;  %v51_v11 = vld [vmem:[%s14826_s2 + $0x58] sm:$0xff] }
   0x5   :  { %36 = vst [vmem:[#allocation2 + $0x18] sm:$0xff] %v35_v3  ;;  %v53_v12 = vld [vmem:[%s14826_s2 + $0x60] sm:$0xff]  ;;  %v55_v13 = vld [vmem:[%s14826_s2 + $0x68] sm:$0xff]  ;;  %v57_v14 = vld [vmem:[%s14826_s2 + $0x70] sm:$0xff] }
   0x6   :  { %38 = vst [vmem:[#allocation2 + $0x20] sm:$0xff] %v37_v4  ;;  %v59_v15 = vld [vmem:[%s14826_s2 + $0x78] sm:$0xff]  ;;  %v61_v16 = vld [vmem:[%s14826_s2 + $0x80] sm:$0xff]  ;;  %v63_v17 = vld [vmem:[%s14826_s2 + $0x88] sm:$0xff] }
   0x7   :  { %40 = vst [vmem:[#allocation2 + $0x28] sm:$0xff] %v39_v5  ;;  %v65_v18 = vld [vmem:[%s14826_s2 + $0x90] sm:$0xff]  ;;  %v67_v19 = vld [vmem:[%s14826_s2 + $0x98] sm:$0xff]  ;;  %v69_v20 = vld [vmem:[%s14826_s2 + $0xa0] sm:$0xff] }
   0x8   :  { %42 = vst [vmem:[#allocation2 + $0x30] sm:$0xff] %v41_v6  ;;  %v71_v21 = vld [vmem:[%s14826_s2 + $0xa8] sm:$0xff]  ;;  %v73_v22 = vld [vmem:[%s14826_s2 + $0xb0] sm:$0xff]  ;;  %v75_v23 = vld [vmem:[%s14826_s2 + $0xb8] sm:$0xff] }
   0x9   :  { %44 = vst [vmem:[#allocation2 + $0x38] sm:$0xff] %v43_v7  ;;  %v77_v24 = vld [vmem:[%s14826_s2 + $0xc0] sm:$0xff]  ;;  %v79_v25 = vld [vmem:[%s14826_s2 + $0xc8] sm:$0xff]  ;;  %v81_v26 = vld [vmem:[%s14826_s2 + $0xd0] sm:$0xff] }
   0xa   :  { %46 = vst [vmem:[#allocation2 + $0x40] sm:$0xff] %v45_v8  ;;  %v83_v27 = vld [vmem:[%s14826_s2 + $0xd8] sm:$0xff]  ;;  %v85_v28 = vld [vmem:[%s14826_s2 + $0xe0] sm:$0xff]  ;;  %v87_v29 = vld [vmem:[%s14826_s2 + $0xe8] sm:$0xff] }
   0xb   :  { %48 = vst [vmem:[#allocation2 + $0x48] sm:$0xff] %v47_v9  ;;  %v89_v30 = vld [vmem:[%s14826_s2 + $0xf0] sm:$0xff]  ;;  %v91_v31 = vld [vmem:[%s14826_s2 + $0xf8] sm:$0xff]  ;;  %v93_v32 = vld [vmem:[%s14826_s2 + $0x100] sm:$0xff] }
   0xc   :  { %50 = vst [vmem:[#allocation2 + $0x50] sm:$0xff] %v49_v10  ;;  %v95_v33 = vld [vmem:[%s14826_s2 + $0x108] sm:$0xff]  ;;  %v97_v34 = vld [vmem:[%s14826_s2 + $0x110] sm:$0xff]  ;;  %v99_v35 = vld [vmem:[%s14826_s2 + $0x118] sm:$0xff] }
   0xd   :  { %52 = vst [vmem:[#allocation2 + $0x58] sm:$0xff] %v51_v11  ;;  %v101_v36 = vld [vmem:[%s14826_s2 + $0x120] sm:$0xff]  ;;  %v103_v37 = vld [vmem:[%s14826_s2 + $0x128] sm:$0xff]  ;;  %v105_v38 = vld [vmem:[%s14826_s2 + $0x130] sm:$0xff] }
   0xe   :  { %54 = vst [vmem:[#allocation2 + $0x60] sm:$0xff] %v53_v12  ;;  %v107_v39 = vld [vmem:[%s14826_s2 + $0x138] sm:$0xff]  ;;  %v109_v40 = vld [vmem:[%s14826_s2 + $0x140] sm:$0xff]  ;;  %v111_v41 = vld [vmem:[%s14826_s2 + $0x148] sm:$0xff] }
   0xf   :  { %56 = vst [vmem:[#allocation2 + $0x68] sm:$0xff] %v55_v13  ;;  %v113_v42 = vld [vmem:[%s14826_s2 + $0x150] sm:$0xff]  ;;  %v115_v43 = vld [vmem:[%s14826_s2 + $0x158] sm:$0xff]  ;;  %v117_v44 = vld [vmem:[%s14826_s2 + $0x160] sm:$0xff] }
  0x10   :  { %58 = vst [vmem:[#allocation2 + $0x70] sm:$0xff] %v57_v14  ;;  %v119_v45 = vld [vmem:[%s14826_s2 + $0x168] sm:$0xff]  ;;  %v121_v46 = vld [vmem:[%s14826_s2 + $0x170] sm:$0xff]  ;;  %v123_v47 = vld [vmem:[%s14826_s2 + $0x178] sm:$0xff] }
  0x11   :  { %60 = vst [vmem:[#allocation2 + $0x78] sm:$0xff] %v59_v15  ;;  %v125_v48 = vld [vmem:[%s14826_s2 + $0x180] sm:$0xff]  ;;  %v127_v49 = vld [vmem:[%s14826_s2 + $0x188] sm:$0xff]  ;;  %v129_v50 = vld [vmem:[%s14826_s2 + $0x190] sm:$0xff] }
  0x12   :  { %62 = vst [vmem:[#allocation2 + $0x80] sm:$0xff] %v61_v16  ;;  %v131_v51 = vld [vmem:[%s14826_s2 + $0x198] sm:$0xff]  ;;  %v133_v52 = vld [vmem:[%s14826_s2 + $0x1a0] sm:$0xff]  ;;  %v135_v53 = vld [vmem:[%s14826_s2 + $0x1a8] sm:$0xff] }
  0x13   :  { %64 = vst [vmem:[#allocation2 + $0x88] sm:$0xff] %v63_v17  ;;  %v137_v54 = vld [vmem:[%s14826_s2 + $0x1b0] sm:$0xff]  ;;  %v139_v55 = vld [vmem:[%s14826_s2 + $0x1b8] sm:$0xff]  ;;  %v141_v56 = vld [vmem:[%s14826_s2 + $0x1c0] sm:$0xff] }
  0x14   :  { %66 = vst [vmem:[#allocation2 + $0x90] sm:$0xff] %v65_v18  ;;  %v143_v57 = vld [vmem:[%s14826_s2 + $0x1c8] sm:$0xff]  ;;  %v145_v58 = vld [vmem:[%s14826_s2 + $0x1d0] sm:$0xff]  ;;  %v147_v59 = vld [vmem:[%s14826_s2 + $0x1d8] sm:$0xff] }
  0x15   :  { %68 = vst [vmem:[#allocation2 + $0x98] sm:$0xff] %v67_v19  ;;  %v149_v60 = vld [vmem:[%s14826_s2 + $0x1e0] sm:$0xff]  ;;  %v151_v61 = vld [vmem:[%s14826_s2 + $0x1e8] sm:$0xff]  ;;  %v153_v62 = vld [vmem:[%s14826_s2 + $0x1f0] sm:$0xff] }
  0x16   :  { %70 = vst [vmem:[#allocation2 + $0xa0] sm:$0xff] %v69_v20  ;;  %v155_v63 = vld [vmem:[%s14826_s2 + $0x1f8] sm:$0xff]  ;;  %v157_v0 = vld [vmem:[%s14826_s2 + $0x200] sm:$0xff]  ;;  %v159_v1 = vld [vmem:[%s14826_s2 + $0x208] sm:$0xff] }
  0x17   :  { %72 = vst [vmem:[#allocation2 + $0xa8] sm:$0xff] %v71_v21  ;;  %v161_v2 = vld [vmem:[%s14826_s2 + $0x210] sm:$0xff]  ;;  %v163_v3 = vld [vmem:[%s14826_s2 + $0x218] sm:$0xff]  ;;  %v165_v4 = vld [vmem:[%s14826_s2 + $0x220] sm:$0xff] }
  0x18   :  { %74 = vst [vmem:[#allocation2 + $0xb0] sm:$0xff] %v73_v22  ;;  %v167_v5 = vld [vmem:[%s14826_s2 + $0x228] sm:$0xff]  ;;  %v169_v6 = vld [vmem:[%s14826_s2 + $0x230] sm:$0xff]  ;;  %v171_v7 = vld [vmem:[%s14826_s2 + $0x238] sm:$0xff] }
  0x19   :  { %76 = vst [vmem:[#allocation2 + $0xb8] sm:$0xff] %v75_v23  ;;  %v173_v8 = vld [vmem:[%s14826_s2 + $0x240] sm:$0xff]  ;;  %v175_v9 = vld [vmem:[%s14826_s2 + $0x248] sm:$0xff]  ;;  %v177_v10 = vld [vmem:[%s14826_s2 + $0x250] sm:$0xff] }
  0x1a   :  { %78 = vst [vmem:[#allocation2 + $0xc0] sm:$0xff] %v77_v24  ;;  %v179_v11 = vld [vmem:[%s14826_s2 + $0x258] sm:$0xff]  ;;  %v181_v12 = vld [vmem:[%s14826_s2 + $0x260] sm:$0xff]  ;;  %v183_v13 = vld [vmem:[%s14826_s2 + $0x268] sm:$0xff] }
  0x1b   :  { %80 = vst [vmem:[#allocation2 + $0xc8] sm:$0xff] %v79_v25  ;;  %v185_v14 = vld [vmem:[%s14826_s2 + $0x270] sm:$0xff]  ;;  %v187_v15 = vld [vmem:[%s14826_s2 + $0x278] sm:$0xff]  ;;  %v189_v16 = vld [vmem:[%s14826_s2 + $0x280] sm:$0xff] }
  0x1c   :  { %82 = vst [vmem:[#allocation2 + $0xd0] sm:$0xff] %v81_v26  ;;  %v191_v17 = vld [vmem:[%s14826_s2 + $0x288] sm:$0xff]  ;;  %v193_v18 = vld [vmem:[%s14826_s2 + $0x290] sm:$0xff]  ;;  %v195_v19 = vld [vmem:[%s14826_s2 + $0x298] sm:$0xff] }
  0x1d   :  { %84 = vst [vmem:[#allocation2 + $0xd8] sm:$0xff] %v83_v27  ;;  %v197_v20 = vld [vmem:[%s14826_s2 + $0x2a0] sm:$0xff]  ;;  %v199_v21 = vld [vmem:[%s14826_s2 + $0x2a8] sm:$0xff]  ;;  %v201_v22 = vld [vmem:[%s14826_s2 + $0x2b0] sm:$0xff] }
  0x1e   :  { %86 = vst [vmem:[#allocation2 + $0xe0] sm:$0xff] %v85_v28  ;;  %v203_v23 = vld [vmem:[%s14826_s2 + $0x2b8] sm:$0xff]  ;;  %v205_v24 = vld [vmem:[%s14826_s2 + $0x2c0] sm:$0xff]  ;;  %v207_v25 = vld [vmem:[%s14826_s2 + $0x2c8] sm:$0xff] }
  0x1f   :  { %88 = vst [vmem:[#allocation2 + $0xe8] sm:$0xff] %v87_v29  ;;  %v209_v26 = vld [vmem:[%s14826_s2 + $0x2d0] sm:$0xff]  ;;  %v211_v27 = vld [vmem:[%s14826_s2 + $0x2d8] sm:$0xff]  ;;  %v213_v28 = vld [vmem:[%s14826_s2 + $0x2e0] sm:$0xff] }
  0x20   :  { %90 = vst [vmem:[#allocation2 + $0xf0] sm:$0xff] %v89_v30  ;;  %v215_v29 = vld [vmem:[%s14826_s2 + $0x2e8] sm:$0xff]  ;;  %v217_v30 = vld [vmem:[%s14826_s2 + $0x2f0] sm:$0xff] }
  0x21   :  { %92 = vst [vmem:[#allocation2 + $0xf8] sm:$0xff] %v91_v31  ;;  %v219_v31 = vld [vmem:[%s14826_s2 + $0x2f8] sm:$0xff] }
  0x22   :  { %94 = vst [vmem:[#allocation2 + $0x100] sm:$0xff] %v93_v32  ;;  %v221_v32 = vld [vmem:[%s14826_s2 + $0x300] sm:$0xff] }
  0x23   :  { %96 = vst [vmem:[#allocation2 + $0x108] sm:$0xff] %v95_v33  ;;  %v223_v33 = vld [vmem:[%s14826_s2 + $0x308] sm:$0xff] }
  0x24   :  { %98 = vst [vmem:[#allocation2 + $0x110] sm:$0xff] %v97_v34  ;;  %v225_v34 = vld [vmem:[%s14826_s2 + $0x310] sm:$0xff] }
  0x25   :  { %100 = vst [vmem:[#allocation2 + $0x118] sm:$0xff] %v99_v35  ;;  %v227_v35 = vld [vmem:[%s14826_s2 + $0x318] sm:$0xff] }
  0x26   :  { %102 = vst [vmem:[#allocation2 + $0x120] sm:$0xff] %v101_v36  ;;  %v229_v36 = vld [vmem:[%s14826_s2 + $0x320] sm:$0xff] }
  0x27   :  { %104 = vst [vmem:[#allocation2 + $0x128] sm:$0xff] %v103_v37  ;;  %v231_v37 = vld [vmem:[%s14826_s2 + $0x328] sm:$0xff] }
  0x28   :  { %106 = vst [vmem:[#allocation2 + $0x130] sm:$0xff] %v105_v38  ;;  %v233_v38 = vld [vmem:[%s14826_s2 + $0x330] sm:$0xff] }
  0x29   :  { %108 = vst [vmem:[#allocation2 + $0x138] sm:$0xff] %v107_v39  ;;  %v235_v39 = vld [vmem:[%s14826_s2 + $0x338] sm:$0xff] }
  0x2a   :  { %110 = vst [vmem:[#allocation2 + $0x140] sm:$0xff] %v109_v40  ;;  %v237_v40 = vld [vmem:[%s14826_s2 + $0x340] sm:$0xff] }
  0x2b   :  { %112 = vst [vmem:[#allocation2 + $0x148] sm:$0xff] %v111_v41  ;;  %v239_v41 = vld [vmem:[%s14826_s2 + $0x348] sm:$0xff] }
  0x2c   :  { %114 = vst [vmem:[#allocation2 + $0x150] sm:$0xff] %v113_v42  ;;  %v241_v42 = vld [vmem:[%s14826_s2 + $0x350] sm:$0xff] }
  0x2d   :  { %116 = vst [vmem:[#allocation2 + $0x158] sm:$0xff] %v115_v43  ;;  %v243_v43 = vld [vmem:[%s14826_s2 + $0x358] sm:$0xff] }
  0x2e   :  { %118 = vst [vmem:[#allocation2 + $0x160] sm:$0xff] %v117_v44  ;;  %v245_v44 = vld [vmem:[%s14826_s2 + $0x360] sm:$0xff] }
  0x2f   :  { %120 = vst [vmem:[#allocation2 + $0x168] sm:$0xff] %v119_v45  ;;  %v247_v45 = vld [vmem:[%s14826_s2 + $0x368] sm:$0xff] }
  0x30   :  { %122 = vst [vmem:[#allocation2 + $0x170] sm:$0xff] %v121_v46  ;;  %v249_v46 = vld [vmem:[%s14826_s2 + $0x370] sm:$0xff] }
  0x31   :  { %124 = vst [vmem:[#allocation2 + $0x178] sm:$0xff] %v123_v47  ;;  %v251_v47 = vld [vmem:[%s14826_s2 + $0x378] sm:$0xff] }
  0x32   :  { %126 = vst [vmem:[#allocation2 + $0x180] sm:$0xff] %v125_v48  ;;  %v253_v48 = vld [vmem:[%s14826_s2 + $0x380] sm:$0xff] }
  0x33   :  { %128 = vst [vmem:[#allocation2 + $0x188] sm:$0xff] %v127_v49  ;;  %v255_v49 = vld [vmem:[%s14826_s2 + $0x388] sm:$0xff] }
  0x34   :  { %130 = vst [vmem:[#allocation2 + $0x190] sm:$0xff] %v129_v50  ;;  %v257_v50 = vld [vmem:[%s14826_s2 + $0x390] sm:$0xff] }
  0x35   :  { %132 = vst [vmem:[#allocation2 + $0x198] sm:$0xff] %v131_v51  ;;  %v259_v51 = vld [vmem:[%s14826_s2 + $0x398] sm:$0xff] }
  0x36   :  { %134 = vst [vmem:[#allocation2 + $0x1a0] sm:$0xff] %v133_v52  ;;  %v261_v52 = vld [vmem:[%s14826_s2 + $0x3a0] sm:$0xff] }
  0x37   :  { %136 = vst [vmem:[#allocation2 + $0x1a8] sm:$0xff] %v135_v53  ;;  %v263_v53 = vld [vmem:[%s14826_s2 + $0x3a8] sm:$0xff] }
  0x38   :  { %138 = vst [vmem:[#allocation2 + $0x1b0] sm:$0xff] %v137_v54  ;;  %v265_v54 = vld [vmem:[%s14826_s2 + $0x3b0] sm:$0xff] }
  0x39   :  { %140 = vst [vmem:[#allocation2 + $0x1b8] sm:$0xff] %v139_v55  ;;  %v267_v55 = vld [vmem:[%s14826_s2 + $0x3b8] sm:$0xff] }
  0x3a   :  { %142 = vst [vmem:[#allocation2 + $0x1c0] sm:$0xff] %v141_v56  ;;  %v269_v56 = vld [vmem:[%s14826_s2 + $0x3c0] sm:$0xff] }
  0x3b   :  { %144 = vst [vmem:[#allocation2 + $0x1c8] sm:$0xff] %v143_v57  ;;  %v271_v57 = vld [vmem:[%s14826_s2 + $0x3c8] sm:$0xff] }
  0x3c   :  { %146 = vst [vmem:[#allocation2 + $0x1d0] sm:$0xff] %v145_v58  ;;  %v273_v58 = vld [vmem:[%s14826_s2 + $0x3d0] sm:$0xff] }
  0x3d   :  { %148 = vst [vmem:[#allocation2 + $0x1d8] sm:$0xff] %v147_v59  ;;  %v275_v59 = vld [vmem:[%s14826_s2 + $0x3d8] sm:$0xff] }
  0x3e   :  { %150 = vst [vmem:[#allocation2 + $0x1e0] sm:$0xff] %v149_v60  ;;  %v277_v60 = vld [vmem:[%s14826_s2 + $0x3e0] sm:$0xff] }
  0x3f   :  { %152 = vst [vmem:[#allocation2 + $0x1e8] sm:$0xff] %v151_v61  ;;  %v279_v61 = vld [vmem:[%s14826_s2 + $0x3e8] sm:$0xff] }
  0x40   :  { %154 = vst [vmem:[#allocation2 + $0x1f0] sm:$0xff] %v153_v62  ;;  %v281_v62 = vld [vmem:[%s14826_s2 + $0x3f0] sm:$0xff] }
  0x41   :  { %156 = vst [vmem:[#allocation2 + $0x1f8] sm:$0xff] %v155_v63  ;;  %v283_v63 = vld [vmem:[%s14826_s2 + $0x3f8] sm:$0xff] }
  0x42   :  { %158 = vst [vmem:[#allocation2 + $0x200] sm:$0xff] %v157_v0  ;;  %v285_v0 = vld [vmem:[%s14826_s2 + $0x400] sm:$0xff] }
  0x43   :  { %160 = vst [vmem:[#allocation2 + $0x208] sm:$0xff] %v159_v1  ;;  %v287_v1 = vld [vmem:[%s14826_s2 + $0x408] sm:$0xff] }
  0x44   :  { %162 = vst [vmem:[#allocation2 + $0x210] sm:$0xff] %v161_v2  ;;  %v289_v2 = vld [vmem:[%s14826_s2 + $0x410] sm:$0xff] }
  0x45   :  { %164 = vst [vmem:[#allocation2 + $0x218] sm:$0xff] %v163_v3  ;;  %v291_v3 = vld [vmem:[%s14826_s2 + $0x418] sm:$0xff] }
  0x46   :  { %166 = vst [vmem:[#allocation2 + $0x220] sm:$0xff] %v165_v4  ;;  %v293_v4 = vld [vmem:[%s14826_s2 + $0x420] sm:$0xff] }
  0x47   :  { %168 = vst [vmem:[#allocation2 + $0x228] sm:$0xff] %v167_v5  ;;  %v295_v5 = vld [vmem:[%s14826_s2 + $0x428] sm:$0xff] }
  0x48   :  { %170 = vst [vmem:[#allocation2 + $0x230] sm:$0xff] %v169_v6  ;;  %v297_v6 = vld [vmem:[%s14826_s2 + $0x430] sm:$0xff] }
  0x49   :  { %172 = vst [vmem:[#allocation2 + $0x238] sm:$0xff] %v171_v7  ;;  %v299_v7 = vld [vmem:[%s14826_s2 + $0x438] sm:$0xff] }
  0x4a   :  { %174 = vst [vmem:[#allocation2 + $0x240] sm:$0xff] %v173_v8  ;;  %v301_v8 = vld [vmem:[%s14826_s2 + $0x440] sm:$0xff] }
  0x4b   :  { %176 = vst [vmem:[#allocation2 + $0x248] sm:$0xff] %v175_v9  ;;  %v303_v9 = vld [vmem:[%s14826_s2 + $0x448] sm:$0xff] }
  0x4c   :  { %178 = vst [vmem:[#allocation2 + $0x250] sm:$0xff] %v177_v10  ;;  %v305_v10 = vld [vmem:[%s14826_s2 + $0x450] sm:$0xff] }
  0x4d   :  { %180 = vst [vmem:[#allocation2 + $0x258] sm:$0xff] %v179_v11  ;;  %v307_v11 = vld [vmem:[%s14826_s2 + $0x458] sm:$0xff] }
  0x4e   :  { %182 = vst [vmem:[#allocation2 + $0x260] sm:$0xff] %v181_v12 }
  0x4f   :  { %184 = vst [vmem:[#allocation2 + $0x268] sm:$0xff] %v183_v13 }
  0x50   :  { %186 = vst [vmem:[#allocation2 + $0x270] sm:$0xff] %v185_v14 }
  0x51   :  { %188 = vst [vmem:[#allocation2 + $0x278] sm:$0xff] %v187_v15 }
  0x52   :  { %190 = vst [vmem:[#allocation2 + $0x280] sm:$0xff] %v189_v16 }
  0x53   :  { %192 = vst [vmem:[#allocation2 + $0x288] sm:$0xff] %v191_v17 }
  0x54   :  { %194 = vst [vmem:[#allocation2 + $0x290] sm:$0xff] %v193_v18 }
  0x55   :  { %196 = vst [vmem:[#allocation2 + $0x298] sm:$0xff] %v195_v19 }
  0x56   :  { %198 = vst [vmem:[#allocation2 + $0x2a0] sm:$0xff] %v197_v20 }
  0x57   :  { %200 = vst [vmem:[#allocation2 + $0x2a8] sm:$0xff] %v199_v21 }
  0x58   :  { %202 = vst [vmem:[#allocation2 + $0x2b0] sm:$0xff] %v201_v22 }
  0x59   :  { %204 = vst [vmem:[#allocation2 + $0x2b8] sm:$0xff] %v203_v23 }
  0x5a   :  { %206 = vst [vmem:[#allocation2 + $0x2c0] sm:$0xff] %v205_v24 }
  0x5b   :  { %208 = vst [vmem:[#allocation2 + $0x2c8] sm:$0xff] %v207_v25 }
  0x5c   :  { %210 = vst [vmem:[#allocation2 + $0x2d0] sm:$0xff] %v209_v26 }
  0x5d   :  { %212 = vst [vmem:[#allocation2 + $0x2d8] sm:$0xff] %v211_v27 }
  0x5e   :  { %214 = vst [vmem:[#allocation2 + $0x2e0] sm:$0xff] %v213_v28 }
  0x5f   :  { %216 = vst [vmem:[#allocation2 + $0x2e8] sm:$0xff] %v215_v29 }
  0x60   :  { %218 = vst [vmem:[#allocation2 + $0x2f0] sm:$0xff] %v217_v30 }
  0x61   :  { %220 = vst [vmem:[#allocation2 + $0x2f8] sm:$0xff] %v219_v31 }
  0x62   :  { %222 = vst [vmem:[#allocation2 + $0x300] sm:$0xff] %v221_v32 }
  0x63   :  { %224 = vst [vmem:[#allocation2 + $0x308] sm:$0xff] %v223_v33 }
  0x64   :  { %226 = vst [vmem:[#allocation2 + $0x310] sm:$0xff] %v225_v34 }
  0x65   :  { %228 = vst [vmem:[#allocation2 + $0x318] sm:$0xff] %v227_v35 }
  0x66   :  { %230 = vst [vmem:[#allocation2 + $0x320] sm:$0xff] %v229_v36 }
  0x67   :  { %232 = vst [vmem:[#allocation2 + $0x328] sm:$0xff] %v231_v37 }
  0x68   :  { %234 = vst [vmem:[#allocation2 + $0x330] sm:$0xff] %v233_v38 }
  0x69   :  { %236 = vst [vmem:[#allocation2 + $0x338] sm:$0xff] %v235_v39 }
  0x6a   :  { %238 = vst [vmem:[#allocation2 + $0x340] sm:$0xff] %v237_v40 }
  0x6b   :  { %240 = vst [vmem:[#allocation2 + $0x348] sm:$0xff] %v239_v41 }
  0x6c   :  { %242 = vst [vmem:[#allocation2 + $0x350] sm:$0xff] %v241_v42 }
  0x6d   :  { %244 = vst [vmem:[#allocation2 + $0x358] sm:$0xff] %v243_v43 }
  0x6e   :  { %246 = vst [vmem:[#allocation2 + $0x360] sm:$0xff] %v245_v44 }
  0x6f   :  { %248 = vst [vmem:[#allocation2 + $0x368] sm:$0xff] %v247_v45 }
  0x70   :  { %250 = vst [vmem:[#allocation2 + $0x370] sm:$0xff] %v249_v46 }
  0x71   :  { %252 = vst [vmem:[#allocation2 + $0x378] sm:$0xff] %v251_v47 }
  0x72   :  { %254 = vst [vmem:[#allocation2 + $0x380] sm:$0xff] %v253_v48 }
  0x73   :  { %256 = vst [vmem:[#allocation2 + $0x388] sm:$0xff] %v255_v49 }
  0x74   :  { %258 = vst [vmem:[#allocation2 + $0x390] sm:$0xff] %v257_v50 }
  0x75   :  { %260 = vst [vmem:[#allocation2 + $0x398] sm:$0xff] %v259_v51 }
  0x76   :  { %262 = vst [vmem:[#allocation2 + $0x3a0] sm:$0xff] %v261_v52 }
  0x77   :  { %264 = vst [vmem:[#allocation2 + $0x3a8] sm:$0xff] %v263_v53 }
  0x78   :  { %266 = vst [vmem:[#allocation2 + $0x3b0] sm:$0xff] %v265_v54 }
  0x79   :  { %268 = vst [vmem:[#allocation2 + $0x3b8] sm:$0xff] %v267_v55 }
  0x7a   :  { %270 = vst [vmem:[#allocation2 + $0x3c0] sm:$0xff] %v269_v56 }
  0x7b   :  { %272 = vst [vmem:[#allocation2 + $0x3c8] sm:$0xff] %v271_v57 }
  0x7c   :  { %274 = vst [vmem:[#allocation2 + $0x3d0] sm:$0xff] %v273_v58 }
  0x7d   :  { %276 = vst [vmem:[#allocation2 + $0x3d8] sm:$0xff] %v275_v59 }
  0x7e   :  { %278 = vst [vmem:[#allocation2 + $0x3e0] sm:$0xff] %v277_v60 }
  0x7f   :  { %280 = vst [vmem:[#allocation2 + $0x3e8] sm:$0xff] %v279_v61 }
  0x80   :  { %282 = vst [vmem:[#allocation2 + $0x3f0] sm:$0xff] %v281_v62 }
  0x81   :  { %284 = vst [vmem:[#allocation2 + $0x3f8] sm:$0xff] %v283_v63 }
  0x82   :  { %286 = vst [vmem:[#allocation2 + $0x400] sm:$0xff] %v285_v0 }
  0x83   :  { %288 = vst [vmem:[#allocation2 + $0x408] sm:$0xff] %v287_v1 }
  0x84   :  { %290 = vst [vmem:[#allocation2 + $0x410] sm:$0xff] %v289_v2 }
  0x85   :  { %292 = vst [vmem:[#allocation2 + $0x418] sm:$0xff] %v291_v3 }
  0x86   :  { %294 = vst [vmem:[#allocation2 + $0x420] sm:$0xff] %v293_v4 }
  0x87   :  { %296 = vst [vmem:[#allocation2 + $0x428] sm:$0xff] %v295_v5 }
  0x88   :  { %298 = vst [vmem:[#allocation2 + $0x430] sm:$0xff] %v297_v6 }
  0x89   :  { %300 = vst [vmem:[#allocation2 + $0x438] sm:$0xff] %v299_v7 }
  0x8a   :  { %302 = vst [vmem:[#allocation2 + $0x440] sm:$0xff] %v301_v8 }
  0x8b   :  { %304 = vst [vmem:[#allocation2 + $0x448] sm:$0xff] %v303_v9 }
  0x8c   :  { %306 = vst [vmem:[#allocation2 + $0x450] sm:$0xff] %v305_v10 }
  0x8d   :  { %308 = vst [vmem:[#allocation2 + $0x458] sm:$0xff] %v307_v11 }
  0x8e   :  { %314 = vsyncadd [#allocation3], 17920  ;;  %v7462_v12 = vld [vmem:[%s14825_s1 + $0x70] sm:$0xf]  ;;  %v8870_v13 = vld [vmem:[%s14825_s1 + $0x74] sm:$0xf0] }
  0x8f   :  { %v7463_v14 = vor.u32 %v8870_v13, %v7462_v12  ;;  %v7526_v15 = vld [vmem:[%s14825_s1 + $0xf0] sm:$0xf]  ;;  %v8886_v16 = vld [vmem:[%s14825_s1 + $0xf4] sm:$0xf0]  ;;  %v7454_v24 = vld [vmem:[%s14825_s1 + $0x60] sm:$0xf] }
  0x90   :  { %v7590_v17 = vld [vmem:[%s14825_s1 + $0x170] sm:$0xf]  ;;  %v7527_v18 = vor.u32 %v8886_v16, %v7526_v15  ;;  %v8902_v19 = vld [vmem:[%s14825_s1 + $0x174] sm:$0xf0]  ;;  %v8868_v25 = vld [vmem:[%s14825_s1 + $0x64] sm:$0xf0] }
  0x91   :  { %v7654_v20 = vld [vmem:[%s14825_s1 + $0x1f0] sm:$0xf]  ;;  %v8918_v21 = vld [vmem:[%s14825_s1 + $0x1f4] sm:$0xf0]  ;;  %1215 = vmatpush.bf16.msra.mxu0 %v7463_v14  ;;  %v7591_v22 = vor.u32 %v8902_v19, %v7590_v17  ;;  %v7518_v26 = vld [vmem:[%s14825_s1 + $0xe0] sm:$0xf]  ;;  %v7455_v27 = vor.u32 %v8868_v25, %v7454_v24 }
  0x92   :  { %v7655_v23 = vor.u32 %v8918_v21, %v7654_v20  ;;  %1269 = vmatpush.bf16.msra.mxu1 %v7527_v18  ;;  %v8884_v28 = vld [vmem:[%s14825_s1 + $0xe4] sm:$0xf0]  ;;  %v7582_v29 = vld [vmem:[%s14825_s1 + $0x160] sm:$0xf]  ;;  %v7446_v35 = vld [vmem:[%s14825_s1 + $0x50] sm:$0xf] }
  0x93   :  { %v8900_v30 = vld [vmem:[%s14825_s1 + $0x164] sm:$0xf0]  ;;  %1323 = vmatpush.bf16.msra.mxu2 %v7591_v22  ;;  %v7519_v31 = vor.u32 %v8884_v28, %v7518_v26  ;;  %v7646_v33 = vld [vmem:[%s14825_s1 + $0x1e0] sm:$0xf]  ;;  %v8866_v37 = vld [vmem:[%s14825_s1 + $0x54] sm:$0xf0] }
  0x94   :  { %1377 = vmatpush.bf16.msra.mxu3 %v7655_v23  ;;  %v7583_v32 = vor.u32 %v8900_v30, %v7582_v29  ;;  %v8916_v34 = vld [vmem:[%s14825_s1 + $0x1e4] sm:$0xf0]  ;;  %v7510_v38 = vld [vmem:[%s14825_s1 + $0xd0] sm:$0xf]  ;;  %v8882_v39 = vld [vmem:[%s14825_s1 + $0xd4] sm:$0xf0]  ;;  %v7447_v40 = vor.u32 %v8866_v37, %v7446_v35 }
  0x95   :  { %v7647_v36 = vor.u32 %v8916_v34, %v7646_v33  ;;  %1216 = vmatpush.bf16.msra.mxu0 %v7455_v27  ;;  %v7574_v41 = vld [vmem:[%s14825_s1 + $0x150] sm:$0xf]  ;;  %v8898_v42 = vld [vmem:[%s14825_s1 + $0x154] sm:$0xf0]  ;;  %v7511_v44 = vor.u32 %v8882_v39, %v7510_v38  ;;  %v7438_v46 = vld [vmem:[%s14825_s1 + $0x40] sm:$0xf] }
  0x96   :  { %v7638_v43 = vld [vmem:[%s14825_s1 + $0x1d0] sm:$0xf]  ;;  %1270 = vmatpush.bf16.msra.mxu1 %v7519_v31  ;;  %v8914_v45 = vld [vmem:[%s14825_s1 + $0x1d4] sm:$0xf0]  ;;  %v8864_v47 = vld [vmem:[%s14825_s1 + $0x44] sm:$0xf0]  ;;  %v7575_v48 = vor.u32 %v8898_v42, %v7574_v41 }
  0x97   :  { %1324 = vmatpush.bf16.msra.mxu2 %v7583_v32  ;;  %v7639_v49 = vor.u32 %v8914_v45, %v7638_v43  ;;  %v7502_v50 = vld [vmem:[%s14825_s1 + $0xc0] sm:$0xf]  ;;  %v8880_v51 = vld [vmem:[%s14825_s1 + $0xc4] sm:$0xf0]  ;;  %v7439_v56 = vor.u32 %v8864_v47, %v7438_v46  ;;  %v7430_v58 = vld [vmem:[%s14825_s1 + $0x30] sm:$0xf] }
  0x98   :  { %1378 = vmatpush.bf16.msra.mxu3 %v7647_v36  ;;  %v7566_v52 = vld [vmem:[%s14825_s1 + $0x140] sm:$0xf]  ;;  %v8896_v53 = vld [vmem:[%s14825_s1 + $0x144] sm:$0xf0]  ;;  %v7503_v57 = vor.u32 %v8880_v51, %v7502_v50  ;;  %v8862_v59 = vld [vmem:[%s14825_s1 + $0x34] sm:$0xf0] }
  0x99   :  { %v7630_v54 = vld [vmem:[%s14825_s1 + $0x1c0] sm:$0xf]  ;;  %v8912_v55 = vld [vmem:[%s14825_s1 + $0x1c4] sm:$0xf0]  ;;  %1217 = vmatpush.bf16.msra.mxu0 %v7447_v40  ;;  %v7567_v60 = vor.u32 %v8896_v53, %v7566_v52  ;;  %v7494_v62 = vld [vmem:[%s14825_s1 + $0xb0] sm:$0xf]  ;;  %v7431_v4 = vor.u32 %v8862_v59, %v7430_v58 }
  0x9a   :  { %1271 = vmatpush.bf16.msra.mxu1 %v7511_v44  ;;  %v7631_v61 = vor.u32 %v8912_v55, %v7630_v54  ;;  %v8878_v63 = vld [vmem:[%s14825_s1 + $0xb4] sm:$0xf0]  ;;  %v7558_v0 = vld [vmem:[%s14825_s1 + $0x130] sm:$0xf]  ;;  %v7422_v6 = vld [vmem:[%s14825_s1 + $0x20] sm:$0xf] }
  0x9b   :  { %1325 = vmatpush.bf16.msra.mxu2 %v7575_v48  ;;  %v8894_v1 = vld [vmem:[%s14825_s1 + $0x134] sm:$0xf0]  ;;  %v7622_v2 = vld [vmem:[%s14825_s1 + $0x1b0] sm:$0xf]  ;;  %v7495_v5 = vor.u32 %v8878_v63, %v7494_v62  ;;  %v8860_v7 = vld [vmem:[%s14825_s1 + $0x24] sm:$0xf0] }
  0x9c   :  { %1379 = vmatpush.bf16.msra.mxu3 %v7639_v49  ;;  %v8910_v3 = vld [vmem:[%s14825_s1 + $0x1b4] sm:$0xf0]  ;;  %v7559_v8 = vor.u32 %v8894_v1, %v7558_v0  ;;  %v7486_v10 = vld [vmem:[%s14825_s1 + $0xa0] sm:$0xf]  ;;  %v8876_v11 = vld [vmem:[%s14825_s1 + $0xa4] sm:$0xf0]  ;;  %v7423_v16 = vor.u32 %v8860_v7, %v7422_v6 }
  0x9d   :  { %1218 = vmatpush.bf16.msra.mxu0 %v7439_v56  ;;  %v7623_v9 = vor.u32 %v8910_v3, %v7622_v2  ;;  %v7550_v12 = vld [vmem:[%s14825_s1 + $0x120] sm:$0xf]  ;;  %v8892_v13 = vld [vmem:[%s14825_s1 + $0x124] sm:$0xf0]  ;;  %v7487_v17 = vor.u32 %v8876_v11, %v7486_v10  ;;  %v7414_v18 = vld [vmem:[%s14825_s1 + $0x10] sm:$0xf] }
  0x9e   :  { %1272 = vmatpush.bf16.msra.mxu1 %v7503_v57  ;;  %v7614_v14 = vld [vmem:[%s14825_s1 + $0x1a0] sm:$0xf]  ;;  %v8908_v15 = vld [vmem:[%s14825_s1 + $0x1a4] sm:$0xf0]  ;;  %v8858_v19 = vld [vmem:[%s14825_s1 + $0x14] sm:$0xf0]  ;;  %v7551_v21 = vor.u32 %v8892_v13, %v7550_v12 }
  0x9f   :  { %1326 = vmatpush.bf16.msra.mxu2 %v7567_v60  ;;  %v7478_v20 = vld [vmem:[%s14825_s1 + $0x90] sm:$0xf]  ;;  %v7615_v22 = vor.u32 %v8908_v15, %v7614_v14  ;;  %v8874_v23 = vld [vmem:[%s14825_s1 + $0x94] sm:$0xf0]  ;;  %v7406_v28 = vld [vmem:[%s14825_s1] sm:$0xf]  ;;  %v7415_v29 = vor.u32 %v8858_v19, %v7414_v18 }
  0xa0   :  { %1380 = vmatpush.bf16.msra.mxu3 %v7631_v61  ;;  %v7542_v24 = vld [vmem:[%s14825_s1 + $0x110] sm:$0xf]  ;;  %v8890_v25 = vld [vmem:[%s14825_s1 + $0x114] sm:$0xf0]  ;;  %v8856_v30 = vld [vmem:[%s14825_s1 + $0x4] sm:$0xf0]  ;;  %v7479_v33 = vor.u32 %v8874_v23, %v7478_v20 }
  0xa1   :  { %1219 = vmatpush.bf16.msra.mxu0 %v7431_v4  ;;  %v7606_v26 = vld [vmem:[%s14825_s1 + $0x190] sm:$0xf]  ;;  %v8906_v27 = vld [vmem:[%s14825_s1 + $0x194] sm:$0xf0]  ;;  %v7470_v31 = vld [vmem:[%s14825_s1 + $0x80] sm:$0xf]  ;;  %v7543_v38 = vor.u32 %v8890_v25, %v7542_v24  ;;  %v7407_v46 = vor.u32 %v8856_v30, %v7406_v28 }
  0xa2   :  { %1273 = vmatpush.bf16.msra.mxu1 %v7495_v5  ;;  %v8872_v32 = vld [vmem:[%s14825_s1 + $0x84] sm:$0xf0]  ;;  %v7534_v34 = vld [vmem:[%s14825_s1 + $0x100] sm:$0xf]  ;;  %v7607_v39 = vor.u32 %v8906_v27, %v7606_v26  ;;  %v7718_v41 = vld [vmem:[%s14825_s1 + $0x270] sm:$0xf] }
  0xa3   :  { %1327 = vmatpush.bf16.msra.mxu2 %v7559_v8  ;;  %v8888_v35 = vld [vmem:[%s14825_s1 + $0x104] sm:$0xf0]  ;;  %v7598_v36 = vld [vmem:[%s14825_s1 + $0x180] sm:$0xf]  ;;  %v8934_v42 = vld [vmem:[%s14825_s1 + $0x274] sm:$0xf0]  ;;  %v7471_v50 = vor.u32 %v8872_v32, %v7470_v31 }
  0xa4   :  { %1381 = vmatpush.bf16.msra.mxu3 %v7623_v9  ;;  %v8904_v37 = vld [vmem:[%s14825_s1 + $0x184] sm:$0xf0]  ;;  %v7190_v40 = vld [vmem:[%s14824_s0] sm:$0xf]  ;;  %v8804_v43 = vld [vmem:[%s14824_s0 + $0x14] sm:$0xf0]  ;;  %v7719_v52 = vor.u32 %v8934_v42, %v7718_v41  ;;  %v7535_v55 = vor.u32 %v8888_v35, %v7534_v34 }
  0xa5   :  { %1220 = vmatpush.bf16.msra.mxu0 %v7423_v16  ;;  %v8801_v44 = vld [vmem:[%s14824_s0 + $0x4] sm:$0xf]  ;;  %v7192_v45 = vld [vmem:[%s14824_s0 + $0x18] sm:$0xf0]  ;;  %v7198_v47 = vld [vmem:[%s14824_s0 + $0x8] sm:$0xf]  ;;  %v7599_v56 = vor.u32 %v8904_v37, %v7598_v36  ;;  %v9790_v60 = vor.u32 %v8804_v43, %v7190_v40 }
  0xa6   :  { %1274 = vmatpush.bf16.msra.mxu1 %v7487_v17  ;;  %v8869_v48 = vld [vmem:[%s14825_s1 + $0x74] sm:$0xf]  ;;  %v7464_v49 = vld [vmem:[%s14825_s1 + $0x78] sm:$0xf0]  ;;  %v8805_v51 = vld [vmem:[%s14824_s0 + $0x1c] sm:$0xf0]  ;;  %v9801_v1 = vor.u32 %v8801_v44, %v7192_v45 }
  0xa7   :  { %1328 = vmatpush.bf16.msra.mxu2 %v7551_v21  ;;  %v8885_v53 = vld [vmem:[%s14825_s1 + $0xf4] sm:$0xf]  ;;  %v7528_v54 = vld [vmem:[%s14825_s1 + $0xf8] sm:$0xf0]  ;;  %v8802_v57 = vld [vmem:[%s14824_s0 + $0xc] sm:$0xf]  ;;  %v7467_v61 = vor.u32 %v8869_v48, %v7464_v49  ;;  %v9809_v5 = vor.u32 %v8805_v51, %v7198_v47 }
  0xa8   :  { %1382 = vmatpush.bf16.msra.mxu3 %v7615_v22  ;;  %v7200_v58 = vld [vmem:[%s14824_s0 + $0x20] sm:$0xf0]  ;;  %v7782_v59 = vld [vmem:[%s14825_s1 + $0x2f0] sm:$0xf]  ;;  %v8950_v62 = vld [vmem:[%s14825_s1 + $0x2f4] sm:$0xf0]  ;;  %v7531_v2 = vor.u32 %v8885_v53, %v7528_v54 }
  0xa9   :  { %1221 = vmatpush.bf16.msra.mxu0 %v7415_v29  ;;  %v7710_v63 = vld [vmem:[%s14825_s1 + $0x260] sm:$0xf]  ;;  %v8932_v0 = vld [vmem:[%s14825_s1 + $0x264] sm:$0xf0]  ;;  %v8867_v3 = vld [vmem:[%s14825_s1 + $0x64] sm:$0xf]  ;;  %v9811_v6 = vor.u32 %v8802_v57, %v7200_v58  ;;  %v7783_v9 = vor.u32 %v8950_v62, %v7782_v59 }
  0xaa   :  { %1275 = vmatpush.bf16.msra.mxu1 %v7479_v33  ;;  %v7456_v4 = vld [vmem:[%s14825_s1 + $0x68] sm:$0xf0]  ;;  %v8883_v7 = vld [vmem:[%s14825_s1 + $0xe4] sm:$0xf]  ;;  %v7711_v10 = vor.u32 %v8932_v0, %v7710_v63  ;;  %v7774_v12 = vld [vmem:[%s14825_s1 + $0x2e0] sm:$0xf] }
  0xab   :  { %1329 = vmatpush.bf16.msra.mxu2 %v7543_v38  ;;  %v7520_v8 = vld [vmem:[%s14825_s1 + $0xe8] sm:$0xf0]  ;;  %v7459_v11 = vor.u32 %v8867_v3, %v7456_v4  ;;  %v8948_v13 = vld [vmem:[%s14825_s1 + $0x2e4] sm:$0xf0]  ;;  %v8865_v15 = vld [vmem:[%s14825_s1 + $0x54] sm:$0xf] }
  0xac   :  { %1383 = vmatpush.bf16.msra.mxu3 %v7607_v39  ;;  %v7523_v14 = vor.u32 %v8883_v7, %v7520_v8  ;;  %v7448_v16 = vld [vmem:[%s14825_s1 + $0x58] sm:$0xf0]  ;;  %v7702_v17 = vld [vmem:[%s14825_s1 + $0x250] sm:$0xf]  ;;  %v7775_v18 = vor.u32 %v8948_v13, %v7774_v12  ;;  %v8930_v19 = vld [vmem:[%s14825_s1 + $0x254] sm:$0xf0] }
  0xad   :  { %1222 = vmatpush.bf16.msra.mxu0 %v7407_v46  ;;  %v8881_v20 = vld [vmem:[%s14825_s1 + $0xd4] sm:$0xf]  ;;  %v7512_v21 = vld [vmem:[%s14825_s1 + $0xd8] sm:$0xf0]  ;;  %v7451_v22 = vor.u32 %v8865_v15, %v7448_v16  ;;  %v7703_v23 = vor.u32 %v8930_v19, %v7702_v17  ;;  %v7766_v24 = vld [vmem:[%s14825_s1 + $0x2d0] sm:$0xf] }
  0xae   :  { %1276 = vmatpush.bf16.msra.mxu1 %v7471_v50  ;;  %v8946_v25 = vld [vmem:[%s14825_s1 + $0x2d4] sm:$0xf0]  ;;  %v7515_v26 = vor.u32 %v8881_v20, %v7512_v21  ;;  %v7214_v28 = vld [vmem:[%s14824_s0 + $0x30] sm:$0xf]  ;;  %v8810_v29 = vld [vmem:[%s14824_s0 + $0x44] sm:$0xf0] }
  0xaf   :  { %1330 = vmatpush.bf16.msra.mxu2 %v7535_v55  ;;  %v7767_v27 = vor.u32 %v8946_v25, %v7766_v24  ;;  %v8807_v30 = vld [vmem:[%s14824_s0 + $0x34] sm:$0xf]  ;;  %v7216_v31 = vld [vmem:[%s14824_s0 + $0x48] sm:$0xf0]  ;;  %v7222_v32 = vld [vmem:[%s14824_s0 + $0x38] sm:$0xf]  ;;  %v9877_v36 = vor.u32 %v8810_v29, %v7214_v28 }
  0xb0   :  { %1384 = vmatpush.bf16.msra.mxu3 %v7599_v56  ;;  %1223 = vmatmul.bf16.vlgmr.msra.gmra.mxu0 %v9790_v60  ;;  %v8811_v33 = vld [vmem:[%s14824_s0 + $0x4c] sm:$0xf0]  ;;  %v8808_v34 = vld [vmem:[%s14824_s0 + $0x3c] sm:$0xf]  ;;  %v7224_v35 = vld [vmem:[%s14824_s0 + $0x50] sm:$0xf0]  ;;  %v9879_v37 = vor.u32 %v8807_v30, %v7216_v31 }
  0xb1   :  { %1431 = vmatpush.bf16.msrb.mxu0 %v7719_v52  ;;  %1277 = vmatmul.bf16.vlgmr.msra.gmra.mxu1 %v9801_v1  ;;  %v9881_v38 = vor.u32 %v8811_v33, %v7222_v32  ;;  %v9883_v39 = vor.u32 %v8808_v34, %v7224_v35  ;;  %v8863_v40 = vld [vmem:[%s14825_s1 + $0x44] sm:$0xf]  ;;  %v7440_v41 = vld [vmem:[%s14825_s1 + $0x48] sm:$0xf0]  ;;  %v7694_v42 = vld [vmem:[%s14825_s1 + $0x240] sm:$0xf] }
  0xb2   :  { %1331 = vmatmul.bf16.vlgmr.msra.gmra.mxu2 %v9809_v5  ;;  %1485 = vmatpush.bf16.msrb.mxu1 %v7783_v9  ;;  %v7443_v43 = vor.u32 %v8863_v40, %v7440_v41  ;;  %v8928_v44 = vld [vmem:[%s14825_s1 + $0x244] sm:$0xf0]  ;;  %v8879_v45 = vld [vmem:[%s14825_s1 + $0xc4] sm:$0xf]  ;;  %v7504_v46 = vld [vmem:[%s14825_s1 + $0xc8] sm:$0xf0] }
  0xb3   :  { %1539 = vmatpush.bf16.msrb.mxu2 %v7467_v61  ;;  %1385 = vmatmul.bf16.vlgmr.msra.gmra.mxu3 %v9811_v6  ;;  %v7695_v47 = vor.u32 %v8928_v44, %v7694_v42  ;;  %v7507_v48 = vor.u32 %v8879_v45, %v7504_v46  ;;  %v7758_v49 = vld [vmem:[%s14825_s1 + $0x2c0] sm:$0xf]  ;;  %v8944_v50 = vld [vmem:[%s14825_s1 + $0x2c4] sm:$0xf0]  ;;  %v8816_v53 = vld [vmem:[%s14824_s0 + $0x74] sm:$0xf0] }
  0xb4   :  { %1593 = vmatpush.bf16.msrb.mxu3 %v7531_v2  ;;  %v7759_v51 = vor.u32 %v8944_v50, %v7758_v49  ;;  %v7238_v52 = vld [vmem:[%s14824_s0 + $0x60] sm:$0xf]  ;;  %v8813_v54 = vld [vmem:[%s14824_s0 + $0x64] sm:$0xf]  ;;  %v7240_v55 = vld [vmem:[%s14824_s0 + $0x78] sm:$0xf0] }
  0xb5   :  { %1432 = vmatpush.bf16.msrb.mxu0 %v7711_v10  ;;  %v7246_v56 = vld [vmem:[%s14824_s0 + $0x68] sm:$0xf]  ;;  %v8817_v57 = vld [vmem:[%s14824_s0 + $0x7c] sm:$0xf0]  ;;  %v8814_v58 = vld [vmem:[%s14824_s0 + $0x6c] sm:$0xf]  ;;  %v9937_v61 = vor.u32 %v8816_v53, %v7238_v52  ;;  %v9939_v62 = vor.u32 %v8813_v54, %v7240_v55 }
  0xb6   :  { %1486 = vmatpush.bf16.msrb.mxu1 %v7775_v18  ;;  %v7248_v59 = vld [vmem:[%s14824_s0 + $0x80] sm:$0xf0]  ;;  %v9941_v63 = vor.u32 %v8817_v57, %v7246_v56  ;;  %v8861_v2 = vld [vmem:[%s14825_s1 + $0x34] sm:$0xf]  ;;  %v7432_v3 = vld [vmem:[%s14825_s1 + $0x38] sm:$0xf0] }
  0xb7   :  { %1540 = vmatpush.bf16.msrb.mxu2 %v7459_v11  ;;  %v9943_v0 = vor.u32 %v8814_v58, %v7248_v59  ;;  %v7686_v4 = vld [vmem:[%s14825_s1 + $0x230] sm:$0xf]  ;;  %v7435_v7 = vor.u32 %v8861_v2, %v7432_v3  ;;  %v8926_v8 = vld [vmem:[%s14825_s1 + $0x234] sm:$0xf0]  ;;  %v8877_v9 = vld [vmem:[%s14825_s1 + $0xb4] sm:$0xf] }
  0xb8   :  { %1594 = vmatpush.bf16.msrb.mxu3 %v7523_v14  ;;  %v7496_v10 = vld [vmem:[%s14825_s1 + $0xb8] sm:$0xf0]  ;;  %v7687_v11 = vor.u32 %v8926_v8, %v7686_v4  ;;  %v7750_v13 = vld [vmem:[%s14825_s1 + $0x2b0] sm:$0xf]  ;;  %v8942_v14 = vld [vmem:[%s14825_s1 + $0x2b4] sm:$0xf0] }
  0xb9   :  { %1433 = vmatpush.bf16.msrb.mxu0 %v7703_v23  ;;  %v7499_v12 = vor.u32 %v8877_v9, %v7496_v10  ;;  %v7751_v15 = vor.u32 %v8942_v14, %v7750_v13  ;;  %v7262_v16 = vld [vmem:[%s14824_s0 + $0x90] sm:$0xf]  ;;  %v8822_v17 = vld [vmem:[%s14824_s0 + $0xa4] sm:$0xf0]  ;;  %v8819_v18 = vld [vmem:[%s14824_s0 + $0x94] sm:$0xf] }
  0xba   :  { %1487 = vmatpush.bf16.msrb.mxu1 %v7767_v27  ;;  %v7264_v19 = vld [vmem:[%s14824_s0 + $0xa8] sm:$0xf0]  ;;  %v7270_v20 = vld [vmem:[%s14824_s0 + $0x98] sm:$0xf]  ;;  %v8823_v21 = vld [vmem:[%s14824_s0 + $0xac] sm:$0xf0]  ;;  %v9997_v24 = vor.u32 %v8822_v17, %v7262_v16 }
  0xbb   :  { %1541 = vmatpush.bf16.msrb.mxu2 %v7451_v22  ;;  %v8820_v22 = vld [vmem:[%s14824_s0 + $0x9c] sm:$0xf]  ;;  %v7272_v23 = vld [vmem:[%s14824_s0 + $0xb0] sm:$0xf0]  ;;  %v9999_v25 = vor.u32 %v8819_v18, %v7264_v19  ;;  %v8859_v28 = vld [vmem:[%s14825_s1 + $0x24] sm:$0xf] }
  0xbc   :  { %1595 = vmatpush.bf16.msrb.mxu3 %v7515_v26  ;;  %v10001_v26 = vor.u32 %v8823_v21, %v7270_v20  ;;  %v10003_v27 = vor.u32 %v8820_v22, %v7272_v23  ;;  %v7424_v29 = vld [vmem:[%s14825_s1 + $0x28] sm:$0xf0]  ;;  %v7678_v30 = vld [vmem:[%s14825_s1 + $0x220] sm:$0xf]  ;;  %v8924_v32 = vld [vmem:[%s14825_s1 + $0x224] sm:$0xf0] }
  0xbd   :  { %1434 = vmatpush.bf16.msrb.mxu0 %v7695_v47  ;;  %v7427_v31 = vor.u32 %v8859_v28, %v7424_v29  ;;  %v8875_v33 = vld [vmem:[%s14825_s1 + $0xa4] sm:$0xf]  ;;  %v7488_v34 = vld [vmem:[%s14825_s1 + $0xa8] sm:$0xf0]  ;;  %v7679_v35 = vor.u32 %v8924_v32, %v7678_v30  ;;  %v7742_v41 = vld [vmem:[%s14825_s1 + $0x2a0] sm:$0xf] }
  0xbe   :  { %1488 = vmatpush.bf16.msrb.mxu1 %v7759_v51  ;;  %v7491_v40 = vor.u32 %v8875_v33, %v7488_v34  ;;  %v8940_v42 = vld [vmem:[%s14825_s1 + $0x2a4] sm:$0xf0]  ;;  %v7286_v44 = vld [vmem:[%s14824_s0 + $0xc0] sm:$0xf]  ;;  %v8828_v45 = vld [vmem:[%s14824_s0 + $0xd4] sm:$0xf0] }
  0xbf   :  { %1542 = vmatpush.bf16.msrb.mxu2 %v7443_v43  ;;  %v7743_v43 = vor.u32 %v8940_v42, %v7742_v41  ;;  %v8825_v46 = vld [vmem:[%s14824_s0 + $0xc4] sm:$0xf]  ;;  %v7288_v47 = vld [vmem:[%s14824_s0 + $0xd8] sm:$0xf0]  ;;  %v8829_v49 = vld [vmem:[%s14824_s0 + $0xdc] sm:$0xf0]  ;;  %v10057_v52 = vor.u32 %v8828_v45, %v7286_v44 }
  0xc0   :  { %1228 = vmatmul.bf16.gmra.mxu0 %v9877_v36  ;;  %1596 = vmatpush.bf16.msrb.mxu3 %v7507_v48  ;;  %v7294_v48 = vld [vmem:[%s14824_s0 + $0xc8] sm:$0xf]  ;;  %v8826_v50 = vld [vmem:[%s14824_s0 + $0xcc] sm:$0xf]  ;;  %v7296_v51 = vld [vmem:[%s14824_s0 + $0xe0] sm:$0xf0]  ;;  %v10059_v53 = vor.u32 %v8825_v46, %v7288_v47 }
  0xc1   :  { %1282 = vmatmul.bf16.gmra.mxu1 %v9879_v37  ;;  %1435 = vmatpush.bf16.msrb.mxu0 %v7687_v11  ;;  %v10061_v54 = vor.u32 %v8829_v49, %v7294_v48  ;;  %v10063_v55 = vor.u32 %v8826_v50, %v7296_v51  ;;  %v8857_v56 = vld [vmem:[%s14825_s1 + $0x14] sm:$0xf]  ;;  %v7416_v57 = vld [vmem:[%s14825_s1 + $0x18] sm:$0xf0]  ;;  %v7670_v58 = vld [vmem:[%s14825_s1 + $0x210] sm:$0xf] }
  0xc2   :  { %1336 = vmatmul.bf16.gmra.mxu2 %v9881_v38  ;;  %1489 = vmatpush.bf16.msrb.mxu1 %v7751_v15  ;;  %v7419_v59 = vor.u32 %v8857_v56, %v7416_v57  ;;  %v8922_v2 = vld [vmem:[%s14825_s1 + $0x214] sm:$0xf0]  ;;  %v8873_v3 = vld [vmem:[%s14825_s1 + $0x94] sm:$0xf]  ;;  %v7480_v4 = vld [vmem:[%s14825_s1 + $0x98] sm:$0xf0] }
  0xc3   :  { %1390 = vmatmul.bf16.gmra.mxu3 %v9883_v39  ;;  %1543 = vmatpush.bf16.msrb.mxu2 %v7435_v7  ;;  %v7671_v7 = vor.u32 %v8922_v2, %v7670_v58  ;;  %v7483_v8 = vor.u32 %v8873_v3, %v7480_v4  ;;  %v7310_v9 = vld [vmem:[%s14824_s0 + $0xf0] sm:$0xf]  ;;  %v8834_v10 = vld [vmem:[%s14824_s0 + $0x104] sm:$0xf0]  ;;  %v8831_v11 = vld [vmem:[%s14824_s0 + $0xf4] sm:$0xf] }
  0xc4   :  { %1597 = vmatpush.bf16.msrb.mxu3 %v7499_v12  ;;  %v7312_v12 = vld [vmem:[%s14824_s0 + $0x108] sm:$0xf0]  ;;  %v7318_v13 = vld [vmem:[%s14824_s0 + $0xf8] sm:$0xf]  ;;  %v8835_v14 = vld [vmem:[%s14824_s0 + $0x10c] sm:$0xf0]  ;;  %v10111_v17 = vor.u32 %v8834_v10, %v7310_v9 }
  0xc5   :  { %1436 = vmatpush.bf16.msrb.mxu0 %v7679_v35  ;;  %v8832_v15 = vld [vmem:[%s14824_s0 + $0xfc] sm:$0xf]  ;;  %v7320_v16 = vld [vmem:[%s14824_s0 + $0x110] sm:$0xf0]  ;;  %v10113_v18 = vor.u32 %v8831_v11, %v7312_v12  ;;  %v10115_v19 = vor.u32 %v8835_v14, %v7318_v13  ;;  %v7734_v21 = vld [vmem:[%s14825_s1 + $0x290] sm:$0xf] }
  0xc6   :  { %1490 = vmatpush.bf16.msrb.mxu1 %v7743_v43  ;;  %v10117_v20 = vor.u32 %v8832_v15, %v7320_v16  ;;  %v8938_v22 = vld [vmem:[%s14825_s1 + $0x294] sm:$0xf0]  ;;  %v7334_v28 = vld [vmem:[%s14824_s0 + $0x120] sm:$0xf]  ;;  %v8837_v30 = vld [vmem:[%s14824_s0 + $0x124] sm:$0xf] }
  0xc7   :  { %1544 = vmatpush.bf16.msrb.mxu2 %v7427_v31  ;;  %v7735_v23 = vor.u32 %v8938_v22, %v7734_v21  ;;  %v8840_v29 = vld [vmem:[%s14824_s0 + $0x134] sm:$0xf0]  ;;  %v7336_v31 = vld [vmem:[%s14824_s0 + $0x138] sm:$0xf0]  ;;  %v7342_v32 = vld [vmem:[%s14824_s0 + $0x128] sm:$0xf] }
  0xc8   :  { %1598 = vmatpush.bf16.msrb.mxu3 %v7491_v40  ;;  %v8841_v33 = vld [vmem:[%s14824_s0 + $0x13c] sm:$0xf0]  ;;  %v8838_v34 = vld [vmem:[%s14824_s0 + $0x12c] sm:$0xf]  ;;  %v7344_v35 = vld [vmem:[%s14824_s0 + $0x140] sm:$0xf0]  ;;  %v10153_v40 = vor.u32 %v8840_v29, %v7334_v28  ;;  %v10155_v41 = vor.u32 %v8837_v30, %v7336_v31 }
  0xc9   :  { %1437 = vmatpush.bf16.msrb.mxu0 %v7671_v7  ;;  %v10157_v42 = vor.u32 %v8841_v33, %v7342_v32  ;;  %v10159_v43 = vor.u32 %v8838_v34, %v7344_v35  ;;  %v8855_v44 = vld [vmem:[%s14825_s1 + $0x4] sm:$0xf]  ;;  %v7408_v45 = vld [vmem:[%s14825_s1 + $0x8] sm:$0xf0]  ;;  %v7662_v47 = vld [vmem:[%s14825_s1 + $0x200] sm:$0xf] }
  0xca   :  { %1491 = vmatpush.bf16.msrb.mxu1 %v7735_v23  ;;  %v7411_v46 = vor.u32 %v8855_v44, %v7408_v45  ;;  %v8920_v48 = vld [vmem:[%s14825_s1 + $0x204] sm:$0xf0]  ;;  %v8871_v50 = vld [vmem:[%s14825_s1 + $0x84] sm:$0xf]  ;;  %v7472_v51 = vld [vmem:[%s14825_s1 + $0x88] sm:$0xf0] }
  0xcb   :  { %1545 = vmatpush.bf16.msrb.mxu2 %v7419_v59  ;;  %v7663_v49 = vor.u32 %v8920_v48, %v7662_v47  ;;  %v7726_v56 = vld [vmem:[%s14825_s1 + $0x280] sm:$0xf]  ;;  %v7475_v57 = vor.u32 %v8871_v50, %v7472_v51  ;;  %v8936_v58 = vld [vmem:[%s14825_s1 + $0x284] sm:$0xf0]  ;;  %v7358_v2 = vld [vmem:[%s14824_s0 + $0x150] sm:$0xf] }
  0xcc   :  { %1599 = vmatpush.bf16.msrb.mxu3 %v7483_v8  ;;  %v7727_v59 = vor.u32 %v8936_v58, %v7726_v56  ;;  %v8846_v3 = vld [vmem:[%s14824_s0 + $0x164] sm:$0xf0]  ;;  %v8843_v4 = vld [vmem:[%s14824_s0 + $0x154] sm:$0xf]  ;;  %v7360_v7 = vld [vmem:[%s14824_s0 + $0x168] sm:$0xf0] }
  0xcd   :  { %1438 = vmatpush.bf16.msrb.mxu0 %v7663_v49  ;;  %v7366_v8 = vld [vmem:[%s14824_s0 + $0x158] sm:$0xf]  ;;  %v8847_v9 = vld [vmem:[%s14824_s0 + $0x16c] sm:$0xf0]  ;;  %v8844_v10 = vld [vmem:[%s14824_s0 + $0x15c] sm:$0xf]  ;;  %v10213_v12 = vor.u32 %v8846_v3, %v7358_v2  ;;  %v10215_v13 = vor.u32 %v8843_v4, %v7360_v7 }
  0xce   :  { %1492 = vmatpush.bf16.msrb.mxu1 %v7727_v59  ;;  %v7368_v11 = vld [vmem:[%s14824_s0 + $0x170] sm:$0xf0]  ;;  %v10217_v14 = vor.u32 %v8847_v9, %v7366_v8  ;;  %v7720_v21 = vld [vmem:[%s14825_s1 + $0x278] sm:$0xf0]  ;;  %v7382_v35 = vld [vmem:[%s14824_s0 + $0x180] sm:$0xf] }
  0xcf   :  { %1546 = vmatpush.bf16.msrb.mxu2 %v7411_v46  ;;  %v10219_v15 = vor.u32 %v8844_v10, %v7368_v11  ;;  %v8933_v16 = vld [vmem:[%s14825_s1 + $0x274] sm:$0xf]  ;;  %v7592_v28 = vld [vmem:[%s14825_s1 + $0x178] sm:$0xf0]  ;;  %v8852_v44 = vld [vmem:[%s14824_s0 + $0x194] sm:$0xf0] }
  0xd0   :  { %1233 = vmatmul.bf16.gmra.mxu0 %v9937_v61  ;;  %1600 = vmatpush.bf16.msrb.mxu3 %v7475_v57  ;;  %15051 = vst [vmem:[#allocation6_spill] sm:$0xff] %v10217_v14  ;;  %v8901_v22 = vld [vmem:[%s14825_s1 + $0x174] sm:$0xf]  ;;  %v7723_v23 = vor.u32 %v8933_v16, %v7720_v21  ;;  %v7784_v30 = vld [vmem:[%s14825_s1 + $0x2f8] sm:$0xf0]  ;;  %v10273_v56 = vor.u32 %v8852_v44, %v7382_v35  ;;  %vm14892_vm0 = vcmask 261120  }
  0xd1   :  { %1287 = vmatmul.bf16.gmra.mxu1 %v9939_v62  ;;  %15052 = vst [vmem:[#allocation7_spill] sm:$0xff] %v10219_v15  ;;  %v8949_v29 = vld [vmem:[%s14825_s1 + $0x2f4] sm:$0xf]  ;;  %v7595_v31 = vor.u32 %v8901_v22, %v7592_v28  ;;  %v7656_v34 = vld [vmem:[%s14825_s1 + $0x1f8] sm:$0xf0]  ;;  %vm14891_vm8 = vcmask 1040384  }
  0xd2   :  { %1341 = vmatmul.bf16.gmra.mxu2 %v9941_v63  ;;  %v7787_v32 = vor.u32 %v8949_v29, %v7784_v30  ;;  %v8917_v33 = vld [vmem:[%s14825_s1 + $0x1f4] sm:$0xf]  ;;  %v8849_v46 = vld [vmem:[%s14824_s0 + $0x184] sm:$0xf]  ;;  %v7384_v47 = vld [vmem:[%s14824_s0 + $0x198] sm:$0xf0] }
  0xd3   :  { %1395 = vmatmul.bf16.gmra.mxu3 %v9943_v0  ;;  %1755 = vmatpush.bf16.msra.mxu2 %v7723_v23  ;;  %v7659_v45 = vor.u32 %v8917_v33, %v7656_v34  ;;  %v7390_v48 = vld [vmem:[%s14824_s0 + $0x188] sm:$0xf]  ;;  %v8853_v49 = vld [vmem:[%s14824_s0 + $0x19c] sm:$0xf0]  ;;  %v8850_v50 = vld [vmem:[%s14824_s0 + $0x18c] sm:$0xf]  ;;  %v10275_v58 = vor.u32 %v8849_v46, %v7384_v47 }
  0xd4   :  { %1647 = vmatpush.bf16.msra.mxu0 %v7595_v31  ;;  %1809 = vmatpush.bf16.msra.mxu3 %v7787_v32  ;;  %v7392_v51 = vld [vmem:[%s14824_s0 + $0x1a0] sm:$0xf0]  ;;  %v10277_v2 = vor.u32 %v8853_v49, %v7390_v48  ;;  %v7712_v8 = vld [vmem:[%s14825_s1 + $0x268] sm:$0xf0]  ;;  %v7206_v28 = vld [vmem:[%s14824_s0 + $0x10] sm:$0xf] }
  0xd5   :  { %1701 = vmatpush.bf16.msra.mxu1 %v7659_v45  ;;  %v10279_v3 = vor.u32 %v8850_v50, %v7392_v51  ;;  %v8931_v7 = vld [vmem:[%s14825_s1 + $0x264] sm:$0xf]  ;;  %v8806_v29 = vld [vmem:[%s14824_s0 + $0x24] sm:$0xf0]  ;;  %v7584_v32 = vld [vmem:[%s14825_s1 + $0x168] sm:$0xf0] }
  0xd6   :  { %15053 = vst [vmem:[#allocation8_spill] sm:$0xff] %v10277_v2  ;;  %v7715_v9 = vor.u32 %v8931_v7, %v7712_v8  ;;  %v8899_v31 = vld [vmem:[%s14825_s1 + $0x164] sm:$0xf]  ;;  %v7776_v35 = vld [vmem:[%s14825_s1 + $0x2e8] sm:$0xf0]  ;;  %v10323_v50 = vor.u32 %v8806_v29, %v7206_v28 }
  0xd7   :  { %15054 = vst [vmem:[#allocation9_spill] sm:$0xff] %v10279_v3  ;;  %v8947_v33 = vld [vmem:[%s14825_s1 + $0x2e4] sm:$0xf]  ;;  %v7587_v34 = vor.u32 %v8899_v31, %v7584_v32  ;;  %v7648_v45 = vld [vmem:[%s14825_s1 + $0x1e8] sm:$0xf0] }
  0xd8   :  { %1756 = vmatpush.bf16.msra.mxu2 %v7715_v9  ;;  %v8915_v44 = vld [vmem:[%s14825_s1 + $0x1e4] sm:$0xf]  ;;  %v8803_v46 = vld [vmem:[%s14824_s0 + $0x14] sm:$0xf]  ;;  %v7208_v47 = vld [vmem:[%s14824_s0 + $0x28] sm:$0xf0]  ;;  %v7779_v48 = vor.u32 %v8947_v33, %v7776_v35 }
  0xd9   :  { %v7651_v49 = vor.u32 %v8915_v44, %v7648_v45  ;;  %1648 = vmatpush.bf16.msra.mxu0 %v7587_v34  ;;  %v8812_v31 = vld [vmem:[%s14824_s0 + $0x54] sm:$0xf0]  ;;  %v7704_v33 = vld [vmem:[%s14825_s1 + $0x258] sm:$0xf0]  ;;  %v8897_v34 = vld [vmem:[%s14825_s1 + $0x154] sm:$0xf] }
  0xda   :  { %1810 = vmatpush.bf16.msra.mxu3 %v7779_v48  ;;  %v7576_v44 = vld [vmem:[%s14825_s1 + $0x158] sm:$0xf0]  ;;  %v8945_v45 = vld [vmem:[%s14825_s1 + $0x2d4] sm:$0xf] }
  0xdb   :  { %1702 = vmatpush.bf16.msra.mxu1 %v7651_v49  ;;  %v7579_v48 = vor.u32 %v8897_v34, %v7576_v44  ;;  %v8818_v44 = vld [vmem:[%s14824_s0 + $0x84] sm:$0xf0] }
  0xdd   :  { %1649 = vmatpush.bf16.msra.mxu0 %v7579_v48 }
  0xe0   :  { %1238 = vmatmul.bf16.gmra.mxu0 %v9997_v24 }
  0xe1   :  { %1292 = vmatmul.bf16.gmra.mxu1 %v9999_v25 }
  0xe2   :  { %1346 = vmatmul.bf16.gmra.mxu2 %v10001_v26 }
  0xe3   :  { %1400 = vmatmul.bf16.gmra.mxu3 %v10003_v27 }
  0xf0   :  { %1243 = vmatmul.bf16.gmra.mxu0 %v10057_v52 }
  0xf1   :  { %1297 = vmatmul.bf16.gmra.mxu1 %v10059_v53 }
  0xf2   :  { %1351 = vmatmul.bf16.gmra.mxu2 %v10061_v54 }
  0xf3   :  { %1405 = vmatmul.bf16.gmra.mxu3 %v10063_v55 }
 0x100   :  { %1248 = vmatmul.bf16.gmra.mxu0 %v10111_v17 }
 0x101   :  { %1302 = vmatmul.bf16.gmra.mxu1 %v10113_v18 }
 0x102   :  { %1356 = vmatmul.bf16.gmra.mxu2 %v10115_v19 }
 0x103   :  { %1410 = vmatmul.bf16.gmra.mxu3 %v10117_v20 }
 0x110   :  { %1253 = vmatmul.bf16.gmra.mxu0 %v10153_v40 }
 0x111   :  { %1307 = vmatmul.bf16.gmra.mxu1 %v10155_v41 }
 0x112   :  { %1361 = vmatmul.bf16.gmra.mxu2 %v10157_v42 }
 0x113   :  { %1415 = vmatmul.bf16.gmra.mxu3 %v10159_v43 }
 0x120   :  { %1258 = vmatmul.bf16.gmra.mxu0 %v10213_v12 }
 0x121   :  { %1312 = vmatmul.bf16.gmra.mxu1 %v10215_v13 }
 0x122   :  { %1366 = vmatmul.bf16.gmra.mxu2 %v10217_v14 }
 0x123   :  { %1420 = vmatmul.bf16.gmra.mxu3 %v10219_v15 }
 0x12d   :  { %v1224_v57 = vpop.f32.mrf.mxu0 }
 0x12e   :  { %v1278_v59 = vpop.f32.mrf.mxu1 }
 0x12f   :  { %v1279_v4 = vadd.f32 %v1278_v59, %v1224_v57  ;;  %v10325_v59 = vor.u32 %v8803_v46, %v7208_v47  ;;  %v7768_v46 = vld [vmem:[%s14825_s1 + $0x2d8] sm:$0xf0] }
 0x130   :  { %1263 = vmatmul.bf16.gmra.mxu0 %v10273_v56  ;;  %v7232_v47 = vld [vmem:[%s14824_s0 + $0x58] sm:$0xf0]  ;;  %v7771_v49 = vor.u32 %v8945_v45, %v7768_v46  ;;  %v7696_v46 = vld [vmem:[%s14825_s1 + $0x248] sm:$0xf0] }
 0x131   :  { %1317 = vmatmul.bf16.gmra.mxu1 %v10275_v58 }
 0x132   :  { %1371 = vmatmul.bf16.gmra.mxu2 %v10277_v2  ;;  %1811 = vmatpush.bf16.msra.mxu3 %v7771_v49  ;;  %v7568_v49 = vld [vmem:[%s14825_s1 + $0x148] sm:$0xf0] }
 0x133   :  { %1425 = vmatmul.bf16.gmra.mxu3 %v10279_v3 }
 0x135   :  { %v1332_v10 = vpop.f32.mrf.mxu2  ;;  %v1226_v21 = vpop.f32.mrf.mxu0 }
 0x136   :  { %v1386_v11 = vpop.f32.mrf.mxu3  ;;  %v1333_v16 = vadd.f32 %v1332_v10, %v1279_v4  ;;  %v1280_v22 = vpop.f32.mrf.mxu1 }
 0x137   :  { %v1281_v23 = vadd.f32 %v1280_v22, %v1226_v21 }
 0x138   :  { %v10297_v30 = vadd.f32 %v1386_v11, %v1333_v16 }
 0x13d   :  { %v1334_v51 = vpop.f32.mrf.mxu2  ;;  %v1229_v7 = vpop.f32.mrf.mxu0 }
 0x13e   :  { %v1388_v57 = vpop.f32.mrf.mxu3  ;;  %v1335_v4 = vadd.f32 %v1334_v51, %v1281_v23  ;;  %v1283_v8 = vpop.f32.mrf.mxu1  ;;  %v7230_v23 = vld [vmem:[%s14824_s0 + $0x40] sm:$0xf]  ;;  %v8913_v51 = vld [vmem:[%s14825_s1 + $0x1d4] sm:$0xf] }
 0x13f   :  { %v1284_v9 = vadd.f32 %v1283_v8, %v1229_v7  ;;  %v10371_v7 = vor.u32 %v8812_v31, %v7230_v23 }
 0x140   :  { %v10327_v10 = vadd.f32 %v1388_v57, %v1335_v4  ;;  %1439 = vmatmul.bf16.vlgmr.msrb.gmra.mxu0 %v10323_v50  ;;  %v7640_v57 = vld [vmem:[%s14825_s1 + $0x1d8] sm:$0xf0] }
 0x141   :  { %1493 = vmatmul.bf16.vlgmr.msrb.gmra.mxu1 %v10325_v59  ;;  %v7643_v4 = vor.u32 %v8913_v51, %v7640_v57  ;;  %v8943_v51 = vld [vmem:[%s14825_s1 + $0x2c4] sm:$0xf]  ;;  %v7760_v57 = vld [vmem:[%s14825_s1 + $0x2c8] sm:$0xf0] }
 0x142   :  { %1547 = vmatmul.bf16.vlgmr.msrb.gmra.mxu2 %v9790_v60  ;;  %v8809_v60 = vld [vmem:[%s14824_s0 + $0x44] sm:$0xf] }
 0x143   :  { %1601 = vmatmul.bf16.vlgmr.msrb.gmra.mxu3 %v9801_v1  ;;  %v8929_v1 = vld [vmem:[%s14825_s1 + $0x254] sm:$0xf]  ;;  %1703 = vmatpush.bf16.msra.mxu1 %v7643_v4  ;;  %v7256_v4 = vld [vmem:[%s14824_s0 + $0x88] sm:$0xf0] }
 0x144   :  { %v7707_v35 = vor.u32 %v8929_v1, %v7704_v33 }
 0x145   :  { %v1337_v11 = vpop.f32.mrf.mxu2  ;;  %v1231_v22 = vpop.f32.mrf.mxu0 }
 0x146   :  { %v1391_v16 = vpop.f32.mrf.mxu3  ;;  %v1338_v21 = vadd.f32 %v1337_v11, %v1284_v9  ;;  %v1285_v28 = vpop.f32.mrf.mxu1  ;;  %1757 = vmatpush.bf16.msra.mxu2 %v7707_v35  ;;  %v10373_v11 = vor.u32 %v8809_v60, %v7232_v47  ;;  %v8895_v47 = vld [vmem:[%s14825_s1 + $0x144] sm:$0xf] }
 0x147   :  { %v1286_v29 = vadd.f32 %v1285_v28, %v1231_v22 }
 0x148   :  { %v10339_v32 = vadd.f32 %v1391_v16, %v1338_v21 }
 0x14d   :  { %v1339_v8 = vpop.f32.mrf.mxu2  ;;  %v1234_v21 = vpop.f32.mrf.mxu0 }
 0x14e   :  { %v1393_v9 = vpop.f32.mrf.mxu3  ;;  %v1340_v16 = vadd.f32 %v1339_v8, %v1286_v29  ;;  %v1288_v22 = vpop.f32.mrf.mxu1  ;;  %v7254_v29 = vld [vmem:[%s14824_s0 + $0x70] sm:$0xf]  ;;  %v7571_v8 = vor.u32 %v8895_v47, %v7568_v49 }
 0x14f   :  { %v1289_v28 = vadd.f32 %v1288_v22, %v1234_v21  ;;  %v7632_v21 = vld [vmem:[%s14825_s1 + $0x1c8] sm:$0xf0] }
 0x150   :  { %v10375_v1 = vadd.f32 %v1393_v9, %v1340_v16  ;;  %1444 = vmatmul.bf16.gmra.mxu0 %v10371_v7  ;;  %v7763_v9 = vor.u32 %v8943_v51, %v7760_v57  ;;  %v8911_v16 = vld [vmem:[%s14825_s1 + $0x1c4] sm:$0xf]  ;;  %v8824_v57 = vld [vmem:[%s14824_s0 + $0xb4] sm:$0xf0] }
 0x151   :  { %1498 = vmatmul.bf16.gmra.mxu1 %v10373_v11  ;;  %v7635_v22 = vor.u32 %v8911_v16, %v7632_v21  ;;  %1650 = vmatpush.bf16.msra.mxu0 %v7571_v8  ;;  %v8893_v8 = vld [vmem:[%s14825_s1 + $0x134] sm:$0xf]  ;;  %v7560_v16 = vld [vmem:[%s14825_s1 + $0x138] sm:$0xf0] }
 0x152   :  { %1552 = vmatmul.bf16.gmra.mxu2 %v9877_v36  ;;  %v8815_v36 = vld [vmem:[%s14824_s0 + $0x74] sm:$0xf]  ;;  %1812 = vmatpush.bf16.msra.mxu3 %v7763_v9 }
 0x153   :  { %1606 = vmatmul.bf16.gmra.mxu3 %v9879_v37  ;;  %v8927_v37 = vld [vmem:[%s14825_s1 + $0x244] sm:$0xf]  ;;  %1704 = vmatpush.bf16.msra.mxu1 %v7635_v22  ;;  %v8941_v21 = vld [vmem:[%s14825_s1 + $0x2b4] sm:$0xf]  ;;  %v7752_v22 = vld [vmem:[%s14825_s1 + $0x2b8] sm:$0xf0] }
 0x154   :  { %v7699_v48 = vor.u32 %v8927_v37, %v7696_v46 }
 0x155   :  { %v1342_v23 = vpop.f32.mrf.mxu2  ;;  %v1236_v60 = vpop.f32.mrf.mxu0 }
 0x156   :  { %v1396_v31 = vpop.f32.mrf.mxu3  ;;  %v1343_v33 = vadd.f32 %v1342_v23, %v1289_v28  ;;  %v1290_v34 = vpop.f32.mrf.mxu1  ;;  %1758 = vmatpush.bf16.msra.mxu2 %v7699_v48  ;;  %v10419_v28 = vor.u32 %v8818_v44, %v7254_v29 }
 0x157   :  { %v1291_v35 = vadd.f32 %v1290_v34, %v1236_v60 }
 0x158   :  { %v10387_v45 = vadd.f32 %v1396_v31, %v1343_v33  ;;  %v10421_v33 = vor.u32 %v8815_v36, %v7256_v4 }
 0x15d   :  { %v1344_v23 = vpop.f32.mrf.mxu2  ;;  %v1239_v34 = vpop.f32.mrf.mxu0 }
 0x15e   :  { %v1398_v31 = vpop.f32.mrf.mxu3  ;;  %v1345_v60 = vadd.f32 %v1344_v23, %v1291_v35  ;;  %v1293_v37 = vpop.f32.mrf.mxu1  ;;  %v7278_v35 = vld [vmem:[%s14824_s0 + $0xa0] sm:$0xf]  ;;  %v8821_v23 = vld [vmem:[%s14824_s0 + $0xa4] sm:$0xf] }
 0x15f   :  { %v1294_v46 = vadd.f32 %v1293_v37, %v1239_v34  ;;  %v7755_v34 = vor.u32 %v8941_v21, %v7752_v22  ;;  %v10461_v37 = vor.u32 %v8824_v57, %v7278_v35  ;;  %v7624_v35 = vld [vmem:[%s14825_s1 + $0x1b8] sm:$0xf0] }
 0x160   :  { %v10423_v47 = vadd.f32 %v1398_v31, %v1345_v60  ;;  %1449 = vmatmul.bf16.gmra.mxu0 %v10419_v28  ;;  %v7280_v31 = vld [vmem:[%s14824_s0 + $0xb8] sm:$0xf0]  ;;  %v7563_v60 = vor.u32 %v8893_v8, %v7560_v16  ;;  %v8909_v8 = vld [vmem:[%s14825_s1 + $0x1b4] sm:$0xf] }
 0x161   :  { %1503 = vmatmul.bf16.gmra.mxu1 %v10421_v33  ;;  %1813 = vmatpush.bf16.msra.mxu3 %v7755_v34  ;;  %v7627_v57 = vor.u32 %v8909_v8, %v7624_v35  ;;  %v7680_v34 = vld [vmem:[%s14825_s1 + $0x228] sm:$0xf0] }
 0x162   :  { %1557 = vmatmul.bf16.gmra.mxu2 %v9937_v61  ;;  %v8925_v61 = vld [vmem:[%s14825_s1 + $0x234] sm:$0xf]  ;;  %1651 = vmatpush.bf16.msra.mxu0 %v7563_v60  ;;  %v8923_v60 = vld [vmem:[%s14825_s1 + $0x224] sm:$0xf] }
 0x163   :  { %1611 = vmatmul.bf16.gmra.mxu3 %v9939_v62  ;;  %v7688_v62 = vld [vmem:[%s14825_s1 + $0x238] sm:$0xf0]  ;;  %1705 = vmatpush.bf16.msra.mxu1 %v7627_v57 }
 0x164   :  { %v7691_v9 = vor.u32 %v8925_v61, %v7688_v62 }
 0x165   :  { %v1347_v29 = vpop.f32.mrf.mxu2  ;;  %v1241_v36 = vpop.f32.mrf.mxu0 }
 0x166   :  { %v1401_v44 = vpop.f32.mrf.mxu3  ;;  %v1348_v48 = vadd.f32 %v1347_v29, %v1294_v46  ;;  %v1295_v49 = vpop.f32.mrf.mxu1  ;;  %1759 = vmatpush.bf16.msra.mxu2 %v7691_v9 }
 0x167   :  { %v1296_v51 = vadd.f32 %v1295_v49, %v1241_v36 }
 0x168   :  { %v10435_v4 = vadd.f32 %v1401_v44, %v1348_v48  ;;  %v10463_v44 = vor.u32 %v8821_v23, %v7280_v31 }
 0x16d   :  { %v1349_v46 = vpop.f32.mrf.mxu2  ;;  %v1244_v36 = vpop.f32.mrf.mxu0 }
 0x16e   :  { %v1403_v29 = vpop.f32.mrf.mxu3  ;;  %v1350_v48 = vadd.f32 %v1349_v46, %v1296_v51  ;;  %v1298_v49 = vpop.f32.mrf.mxu1  ;;  %v7683_v46 = vor.u32 %v8923_v60, %v7680_v34  ;;  %v8939_v60 = vld [vmem:[%s14825_s1 + $0x2a4] sm:$0xf]  ;;  %v7744_v34 = vld [vmem:[%s14825_s1 + $0x2a8] sm:$0xf0] }
 0x16f   :  { %v1299_v61 = vadd.f32 %v1298_v49, %v1244_v36 }
 0x170   :  { %v10465_v62 = vadd.f32 %v1403_v29, %v1350_v48  ;;  %1454 = vmatmul.bf16.gmra.mxu0 %v10461_v37  ;;  %v8827_v29 = vld [vmem:[%s14824_s0 + $0xd4] sm:$0xf]  ;;  %v7304_v48 = vld [vmem:[%s14824_s0 + $0xe8] sm:$0xf0]  ;;  %1760 = vmatpush.bf16.msra.mxu2 %v7683_v46  ;;  %v7747_v46 = vor.u32 %v8939_v60, %v7744_v34 }
 0x171   :  { %1508 = vmatmul.bf16.gmra.mxu1 %v10463_v44  ;;  %v10499_v8 = vor.u32 %v8827_v29, %v7304_v48 }
 0x172   :  { %1562 = vmatmul.bf16.gmra.mxu2 %v9997_v24  ;;  %v7302_v24 = vld [vmem:[%s14824_s0 + $0xd0] sm:$0xf]  ;;  %1814 = vmatpush.bf16.msra.mxu3 %v7747_v46 }
 0x173   :  { %1616 = vmatmul.bf16.gmra.mxu3 %v9999_v25  ;;  %v8830_v25 = vld [vmem:[%s14824_s0 + $0xe4] sm:$0xf0] }
 0x174   :  { %v10497_v36 = vor.u32 %v8830_v25, %v7302_v24  ;;  %v8907_v24 = vld [vmem:[%s14825_s1 + $0x1a4] sm:$0xf]  ;;  %v7616_v25 = vld [vmem:[%s14825_s1 + $0x1a8] sm:$0xf0] }
 0x175   :  { %v1352_v51 = vpop.f32.mrf.mxu2  ;;  %v1246_v21 = vpop.f32.mrf.mxu0  ;;  %v7619_v29 = vor.u32 %v8907_v24, %v7616_v25 }
 0x176   :  { %v1406_v9 = vpop.f32.mrf.mxu3  ;;  %v1353_v16 = vadd.f32 %v1352_v51, %v1299_v61  ;;  %v1300_v22 = vpop.f32.mrf.mxu1 }
 0x177   :  { %v1301_v23 = vadd.f32 %v1300_v22, %v1246_v21  ;;  %v8891_v21 = vld [vmem:[%s14825_s1 + $0x124] sm:$0xf]  ;;  %v7552_v22 = vld [vmem:[%s14825_s1 + $0x128] sm:$0xf0]  ;;  %1706 = vmatpush.bf16.msra.mxu1 %v7619_v29 }
 0x178   :  { %v10477_v31 = vadd.f32 %v1406_v9, %v1353_v16 }
 0x17d   :  { %v1354_v49 = vpop.f32.mrf.mxu2  ;;  %v1249_v57 = vpop.f32.mrf.mxu0 }
 0x17e   :  { %v1408_v61 = vpop.f32.mrf.mxu3  ;;  %v1355_v35 = vadd.f32 %v1354_v49, %v1301_v23  ;;  %v1303_v51 = vpop.f32.mrf.mxu1  ;;  %v7555_v23 = vor.u32 %v8891_v21, %v7552_v22  ;;  %v7326_v22 = vld [vmem:[%s14824_s0 + $0x100] sm:$0xf] }
 0x17f   :  { %v1304_v9 = vadd.f32 %v1303_v51, %v1249_v57 }
 0x180   :  { %v10501_v16 = vadd.f32 %v1408_v61, %v1355_v35  ;;  %1459 = vmatmul.bf16.gmra.mxu0 %v10497_v36 }
 0x181   :  { %1513 = vmatmul.bf16.gmra.mxu1 %v10499_v8  ;;  %1652 = vmatpush.bf16.msra.mxu0 %v7555_v23 }
 0x182   :  { %1567 = vmatmul.bf16.gmra.mxu2 %v10057_v52  ;;  %v8836_v52 = vld [vmem:[%s14824_s0 + $0x114] sm:$0xf0] }
 0x183   :  { %1621 = vmatmul.bf16.gmra.mxu3 %v10059_v53  ;;  %v8833_v53 = vld [vmem:[%s14824_s0 + $0x104] sm:$0xf]  ;;  %v10539_v60 = vor.u32 %v8836_v52, %v7326_v22  ;;  %v7544_v22 = vld [vmem:[%s14825_s1 + $0x118] sm:$0xf0]  ;;  %v8937_v52 = vld [vmem:[%s14825_s1 + $0x294] sm:$0xf] }
 0x185   :  { %v1357_v48 = vpop.f32.mrf.mxu2  ;;  %v1251_v35 = vpop.f32.mrf.mxu0 }
 0x186   :  { %v1411_v49 = vpop.f32.mrf.mxu3  ;;  %v1358_v61 = vadd.f32 %v1357_v48, %v1304_v9  ;;  %v1305_v57 = vpop.f32.mrf.mxu1  ;;  %v7328_v9 = vld [vmem:[%s14824_s0 + $0x118] sm:$0xf0] }
 0x187   :  { %v1306_v51 = vadd.f32 %v1305_v57, %v1251_v35  ;;  %v10541_v24 = vor.u32 %v8833_v53, %v7328_v9  ;;  %v7672_v35 = vld [vmem:[%s14825_s1 + $0x218] sm:$0xf0]  ;;  %v8889_v57 = vld [vmem:[%s14825_s1 + $0x114] sm:$0xf] }
 0x188   :  { %v10525_v21 = vadd.f32 %v1411_v49, %v1358_v61  ;;  %v8921_v61 = vld [vmem:[%s14825_s1 + $0x214] sm:$0xf]  ;;  %v7736_v53 = vld [vmem:[%s14825_s1 + $0x298] sm:$0xf0]  ;;  %v7547_v9 = vor.u32 %v8889_v57, %v7544_v22 }
 0x18a   :  { %1653 = vmatpush.bf16.msra.mxu0 %v7547_v9 }
 0x18d   :  { %v1359_v23 = vpop.f32.mrf.mxu2  ;;  %v1254_v46 = vpop.f32.mrf.mxu0 }
 0x18e   :  { %v1413_v34 = vpop.f32.mrf.mxu3  ;;  %v1360_v25 = vadd.f32 %v1359_v23, %v1306_v51  ;;  %v1308_v29 = vpop.f32.mrf.mxu1  ;;  %v7675_v51 = vor.u32 %v8921_v61, %v7672_v35  ;;  %v7739_v23 = vor.u32 %v8937_v52, %v7736_v53  ;;  %v7350_v52 = vld [vmem:[%s14824_s0 + $0x130] sm:$0xf]  ;;  %v8839_v53 = vld [vmem:[%s14824_s0 + $0x134] sm:$0xf] }
 0x18f   :  { %v1309_v48 = vadd.f32 %v1308_v29, %v1254_v46 }
 0x190   :  { %v10543_v49 = vadd.f32 %v1413_v34, %v1360_v25  ;;  %1464 = vmatmul.bf16.gmra.mxu0 %v10539_v60  ;;  %v8905_v34 = vld [vmem:[%s14825_s1 + $0x194] sm:$0xf]  ;;  %v7608_v25 = vld [vmem:[%s14825_s1 + $0x198] sm:$0xf0]  ;;  %1761 = vmatpush.bf16.msra.mxu2 %v7675_v51  ;;  %v8842_v51 = vld [vmem:[%s14824_s0 + $0x144] sm:$0xf0] }
 0x191   :  { %1518 = vmatmul.bf16.gmra.mxu1 %v10541_v24  ;;  %v7611_v46 = vor.u32 %v8905_v34, %v7608_v25  ;;  %1815 = vmatpush.bf16.msra.mxu3 %v7739_v23  ;;  %v10587_v9 = vor.u32 %v8842_v51, %v7350_v52  ;;  %v8887_v52 = vld [vmem:[%s14825_s1 + $0x104] sm:$0xf] }
 0x192   :  { %1572 = vmatmul.bf16.gmra.mxu2 %v10111_v17 }
 0x193   :  { %1626 = vmatmul.bf16.gmra.mxu3 %v10113_v18  ;;  %1707 = vmatpush.bf16.msra.mxu1 %v7611_v46 }
 0x195   :  { %v1362_v29 = vpop.f32.mrf.mxu2  ;;  %v1256_v35 = vpop.f32.mrf.mxu0 }
 0x196   :  { %v1416_v61 = vpop.f32.mrf.mxu3  ;;  %v1363_v17 = vadd.f32 %v1362_v29, %v1309_v48  ;;  %v1310_v18 = vpop.f32.mrf.mxu1  ;;  %v7352_v48 = vld [vmem:[%s14824_s0 + $0x148] sm:$0xf0] }
 0x197   :  { %v1311_v57 = vadd.f32 %v1310_v18, %v1256_v35  ;;  %v10589_v25 = vor.u32 %v8839_v53, %v7352_v48  ;;  %v8919_v18 = vld [vmem:[%s14825_s1 + $0x204] sm:$0xf]  ;;  %v7536_v53 = vld [vmem:[%s14825_s1 + $0x108] sm:$0xf0] }
 0x198   :  { %v10573_v22 = vadd.f32 %v1416_v61, %v1363_v17 }
 0x19d   :  { %v1364_v23 = vpop.f32.mrf.mxu2  ;;  %v1259_v29 = vpop.f32.mrf.mxu0 }
 0x19e   :  { %v1418_v34 = vpop.f32.mrf.mxu3  ;;  %v1365_v46 = vadd.f32 %v1364_v23, %v1311_v57  ;;  %v1313_v61 = vpop.f32.mrf.mxu1  ;;  %v7664_v57 = vld [vmem:[%s14825_s1 + $0x208] sm:$0xf0] }
 0x19f   :  { %v1314_v17 = vadd.f32 %v1313_v61, %v1259_v29  ;;  %v7667_v51 = vor.u32 %v8919_v18, %v7664_v57  ;;  %v8903_v29 = vld [vmem:[%s14825_s1 + $0x184] sm:$0xf]  ;;  %v7600_v61 = vld [vmem:[%s14825_s1 + $0x188] sm:$0xf0] }
 0x1a0   :  { %v10591_v35 = vadd.f32 %v1418_v34, %v1365_v46  ;;  %1469 = vmatmul.bf16.gmra.mxu0 %v10587_v9  ;;  %v7539_v34 = vor.u32 %v8887_v52, %v7536_v53  ;;  %v7603_v2 = vor.u32 %v8903_v29, %v7600_v61  ;;  %v7374_v52 = vld [vmem:[%s14824_s0 + $0x160] sm:$0xf]  ;;  %v8848_v53 = vld [vmem:[%s14824_s0 + $0x174] sm:$0xf0] }
 0x1a1   :  { %1523 = vmatmul.bf16.gmra.mxu1 %v10589_v25  ;;  %1762 = vmatpush.bf16.msra.mxu2 %v7667_v51  ;;  %v10635_v51 = vor.u32 %v8848_v53, %v7374_v52 }
 0x1a2   :  { %1577 = vmatmul.bf16.gmra.mxu2 %v10153_v40  ;;  %v8935_v40 = vld [vmem:[%s14825_s1 + $0x284] sm:$0xf]  ;;  %1654 = vmatpush.bf16.msra.mxu0 %v7539_v34 }
 0x1a3   :  { %1631 = vmatmul.bf16.gmra.mxu3 %v10155_v41  ;;  %v7728_v41 = vld [vmem:[%s14825_s1 + $0x288] sm:$0xf0]  ;;  %1708 = vmatpush.bf16.msra.mxu1 %v7603_v2 }
 0x1a4   :  { %v7731_v46 = vor.u32 %v8935_v40, %v7728_v41 }
 0x1a5   :  { %v1367_v48 = vpop.f32.mrf.mxu2  ;;  %v1261_v57 = vpop.f32.mrf.mxu0 }
 0x1a6   :  { %v1421_v23 = vpop.f32.mrf.mxu3  ;;  %v1368_v18 = vadd.f32 %v1367_v48, %v1314_v17  ;;  %v1315_v3 = vpop.f32.mrf.mxu1  ;;  %1816 = vmatpush.bf16.msra.mxu3 %v7731_v46  ;;  %v8845_v17 = vld [vmem:[%s14824_s0 + $0x164] sm:$0xf] }
 0x1a7   :  { %v1316_v15 = vadd.f32 %v1315_v3, %v1261_v57  ;;  %v7376_v3 = vld [vmem:[%s14824_s0 + $0x178] sm:$0xf0] }
 0x1a8   :  { %v10621_v14 = vadd.f32 %v1421_v23, %v1368_v18  ;;  %v10637_v41 = vor.u32 %v8845_v17, %v7376_v3  ;;  %v7398_v3 = vld [vmem:[%s14824_s0 + $0x190] sm:$0xf] }
 0x1ad   :  { %v1369_v40 = vpop.f32.mrf.mxu2  ;;  %v1264_v23 = vpop.f32.mrf.mxu0 }
 0x1ae   :  { %v1423_v2 = vpop.f32.mrf.mxu3  ;;  %v1370_v48 = vadd.f32 %v1369_v40, %v1316_v15  ;;  %v1318_v34 = vpop.f32.mrf.mxu1  ;;  %v8854_v40 = vld [vmem:[%s14824_s0 + $0x1a4] sm:$0xf0] }
 0x1af   :  { %v1319_v46 = vadd.f32 %v1318_v34, %v1264_v23 }
 0x1b0   :  { %v10639_v29 = vadd.f32 %v1423_v2, %v1370_v48  ;;  %1474 = vmatmul.bf16.gmra.mxu0 %v10635_v51  ;;  %v10659_v2 = vor.u32 %v8854_v40, %v7398_v3 }
 0x1b1   :  { %1528 = vmatmul.bf16.gmra.mxu1 %v10637_v41 }
 0x1b2   :  { %1582 = vmatmul.bf16.gmra.mxu2 %v10213_v12  ;;  %v8851_v12 = vld [vmem:[%s14824_s0 + $0x194] sm:$0xf] }
 0x1b3   :  { %1636 = vmatmul.bf16.gmra.mxu3 %v10215_v13  ;;  %v7400_v13 = vld [vmem:[%s14824_s0 + $0x1a8] sm:$0xf0] }
 0x1b4   :  { %v10661_v34 = vor.u32 %v8851_v12, %v7400_v13 }
 0x1b5   :  { %v1372_v61 = vpop.f32.mrf.mxu2  ;;  %v1266_v52 = vpop.f32.mrf.mxu0 }
 0x1b6   :  { %v1426_v18 = vpop.f32.mrf.mxu3  ;;  %v1373_v57 = vadd.f32 %v1372_v61, %v1319_v46  ;;  %v1320_v53 = vpop.f32.mrf.mxu1 }
 0x1b7   :  { %v1321_v17 = vadd.f32 %v1320_v53, %v1266_v52 }
 0x1b8   :  { %v10645_v15 = vadd.f32 %v1426_v18, %v1373_v57 }
 0x1bd   :  { %v1374_v48 = vpop.f32.mrf.mxu2  ;;  %v1440_v61 = vpop.f32.mrf.mxu0 }
 0x1be   :  { %v1428_v23 = vpop.f32.mrf.mxu3  ;;  %v1375_v46 = vadd.f32 %v1374_v48, %v1321_v17  ;;  %v1494_v18 = vpop.f32.mrf.mxu1  ;;  %v1441_v57 = vadd.f32 %v1440_v61, %v10297_v30 }
 0x1c0   :  { %v10664_v52 = vadd.f32 %v1428_v23, %v1375_v46  ;;  %1479 = vmatmul.bf16.gmra.mxu0 %v10659_v2  ;;  %v10667_v53 = vadd.f32 %v1494_v18, %v1441_v57 }
 0x1c1   :  { %1533 = vmatmul.bf16.gmra.mxu1 %v10661_v34 }
 0x1c2   :  { %1587 = vmatmul.bf16.gmra.mxu2 %v10273_v56 }
 0x1c3   :  { %1641 = vmatmul.bf16.gmra.mxu3 %v10275_v58 }
 0x1c5   :  { %v1548_v3 = vpop.f32.mrf.mxu2  ;;  %v1442_v17 = vpop.f32.mrf.mxu0 }
 0x1c6   :  { %v1602_v40 = vpop.f32.mrf.mxu3  ;;  %v1496_v13 = vpop.f32.mrf.mxu1  ;;  %v1443_v30 = vadd.f32 %v1442_v17, %v10327_v10 }
 0x1c7   :  { %v10672_v12 = vadd.f32 %v1602_v40, %v1548_v3 }
 0x1c8   :  { %v10675_v48 = vadd.f32 %v1496_v13, %v1443_v30 }
 0x1cd   :  { %v1550_v23 = vpop.f32.mrf.mxu2  ;;  %v1445_v18 = vpop.f32.mrf.mxu0 }
 0x1ce   :  { %v1604_v46 = vpop.f32.mrf.mxu3  ;;  %v1499_v57 = vpop.f32.mrf.mxu1  ;;  %v1446_v56 = vadd.f32 %v1445_v18, %v10339_v32 }
 0x1cf   :  { %v10677_v61 = vadd.f32 %v1604_v46, %v1550_v23 }
 0x1d0   :  { %1655 = vmatmul.bf16.vlgmr.msra.gmra.mxu0 %v9809_v5  ;;  %v10681_v58 = vadd.f32 %v1499_v57, %v1446_v56 }
 0x1d1   :  { %1709 = vmatmul.bf16.vlgmr.msra.gmra.mxu1 %v9811_v6 }
 0x1d2   :  { %1763 = vmatmul.bf16.vlgmr.msra.gmra.mxu2 %v10323_v50 }
 0x1d3   :  { %1817 = vmatmul.bf16.vlgmr.msra.gmra.mxu3 %v10325_v59 }
 0x1d5   :  { %v1553_v10 = vpop.f32.mrf.mxu2  ;;  %v1447_v17 = vpop.f32.mrf.mxu0 }
 0x1d6   :  { %v1607_v3 = vpop.f32.mrf.mxu3  ;;  %v1501_v13 = vpop.f32.mrf.mxu1  ;;  %v1448_v30 = vadd.f32 %v1447_v17, %v10375_v1 }
 0x1d7   :  { %v10686_v40 = vadd.f32 %v1607_v3, %v1553_v10 }
 0x1d8   :  { %v10689_v23 = vadd.f32 %v1501_v13, %v1448_v30 }
 0x1da   :  { %15055 = vst [vmem:[#allocation10_spill] sm:$0xff] %v10689_v23 }
 0x1dd   :  { %v1555_v32 = vpop.f32.mrf.mxu2  ;;  %v1450_v18 = vpop.f32.mrf.mxu0 }
 0x1de   :  { %v1609_v5 = vpop.f32.mrf.mxu3  ;;  %v1504_v6 = vpop.f32.mrf.mxu1  ;;  %v1451_v50 = vadd.f32 %v1450_v18, %v10387_v45 }
 0x1df   :  { %v10691_v46 = vadd.f32 %v1609_v5, %v1555_v32 }
 0x1e0   :  { %1660 = vmatmul.bf16.gmra.mxu0 %v9881_v38  ;;  %v10695_v59 = vadd.f32 %v1504_v6, %v1451_v50 }
 0x1e1   :  { %1714 = vmatmul.bf16.gmra.mxu1 %v9883_v39 }
 0x1e2   :  { %15056 = vst [vmem:[#allocation11_spill] sm:$0xff] %v10695_v59  ;;  %1768 = vmatmul.bf16.gmra.mxu2 %v10371_v7 }
 0x1e3   :  { %1822 = vmatmul.bf16.gmra.mxu3 %v10373_v11 }
 0x1e5   :  { %v1558_v1 = vpop.f32.mrf.mxu2  ;;  %v1452_v10 = vpop.f32.mrf.mxu0 }
 0x1e6   :  { %v1612_v57 = vpop.f32.mrf.mxu3  ;;  %v1506_v3 = vpop.f32.mrf.mxu1  ;;  %v1453_v17 = vadd.f32 %v1452_v10, %v10423_v47 }
 0x1e7   :  { %v10700_v56 = vadd.f32 %v1612_v57, %v1558_v1 }
 0x1e8   :  { %v10703_v13 = vadd.f32 %v1506_v3, %v1453_v17 }
 0x1ea   :  { %15057 = vst [vmem:[#allocation12_spill] sm:$0xff] %v10703_v13 }
 0x1ed   :  { %v1560_v45 = vpop.f32.mrf.mxu2  ;;  %v1455_v32 = vpop.f32.mrf.mxu0 }
 0x1ee   :  { %v1614_v38 = vpop.f32.mrf.mxu3  ;;  %v1509_v39 = vpop.f32.mrf.mxu1  ;;  %v1456_v7 = vadd.f32 %v1455_v32, %v10435_v4 }
 0x1ef   :  { %v10705_v30 = vadd.f32 %v1614_v38, %v1560_v45 }
 0x1f0   :  { %1665 = vmatmul.bf16.gmra.mxu0 %v9941_v63  ;;  %v10709_v11 = vadd.f32 %v1509_v39, %v1456_v7 }
 0x1f1   :  { %1719 = vmatmul.bf16.gmra.mxu1 %v9943_v0 }
 0x1f2   :  { %15058 = vst [vmem:[#allocation13_spill] sm:$0xff] %v10709_v11  ;;  %1773 = vmatmul.bf16.gmra.mxu2 %v10419_v28 }
 0x1f3   :  { %1827 = vmatmul.bf16.gmra.mxu3 %v10421_v33 }
 0x1f5   :  { %v1563_v47 = vpop.f32.mrf.mxu2  ;;  %v1457_v6 = vpop.f32.mrf.mxu0 }
 0x1f6   :  { %v1617_v5 = vpop.f32.mrf.mxu3  ;;  %v1511_v50 = vpop.f32.mrf.mxu1  ;;  %v1458_v1 = vadd.f32 %v1457_v6, %v10465_v62 }
 0x1f7   :  { %v10714_v18 = vadd.f32 %v1617_v5, %v1563_v47 }
 0x1f8   :  { %v10717_v57 = vadd.f32 %v1511_v50, %v1458_v1  ;;  %v1869_v50 = vadd.f32 %v10675_v48, %v10667_v53 }
 0x1fa   :  { %15059 = vst [vmem:[#allocation14_spill] sm:$0xff] %v10717_v57  ;;  %v1870_v1 = vadd.f32 %v1869_v50, %v10681_v58 }
 0x1fd   :  { %v1565_v4 = vpop.f32.mrf.mxu2  ;;  %v1460_v3 = vpop.f32.mrf.mxu0 }
 0x1fe   :  { %v1619_v63 = vpop.f32.mrf.mxu3  ;;  %v1514_v0 = vpop.f32.mrf.mxu1  ;;  %v1461_v28 = vadd.f32 %v1460_v3, %v10477_v31 }
 0x1ff   :  { %v10719_v10 = vadd.f32 %v1619_v63, %v1565_v4  ;;  %v1942_v4 = vmul.f32 %v10689_v23, %v10689_v23 }
 0x200   :  { %1670 = vmatmul.bf16.gmra.mxu0 %v10001_v26  ;;  %v10723_v33 = vadd.f32 %v1514_v0, %v1461_v28  ;;  %v1871_v28 = vadd.f32 %v1870_v1, %v10689_v23 }
 0x201   :  { %1724 = vmatmul.bf16.gmra.mxu1 %v10003_v27 }
 0x202   :  { %15060 = vst [vmem:[#allocation15_spill] sm:$0xff] %v10723_v33  ;;  %1778 = vmatmul.bf16.gmra.mxu2 %v10461_v37 }
 0x203   :  { %1832 = vmatmul.bf16.gmra.mxu3 %v10463_v44  ;;  %v1938_v44 = vmul.f32 %v10675_v48, %v10675_v48 }
 0x205   :  { %v1568_v62 = vpop.f32.mrf.mxu2  ;;  %v1462_v38 = vpop.f32.mrf.mxu0 }
 0x206   :  { %v1622_v17 = vpop.f32.mrf.mxu3  ;;  %v1516_v32 = vpop.f32.mrf.mxu1  ;;  %v1463_v39 = vadd.f32 %v1462_v38, %v10501_v16  ;;  %v1936_v16 = vmul.f32 %v10667_v53, %v10667_v53 }
 0x207   :  { %v10728_v45 = vadd.f32 %v1622_v17, %v1568_v62  ;;  %v1944_v62 = vmul.f32 %v10695_v59, %v10695_v59 }
 0x208   :  { %v10731_v7 = vadd.f32 %v1516_v32, %v1463_v39  ;;  %v1872_v32 = vadd.f32 %v1871_v28, %v10695_v59  ;;  %v1946_v39 = vmul.f32 %v10703_v13, %v10703_v13 }
 0x20a   :  { %15061 = vst [vmem:[#allocation16_spill] sm:$0xff] %v10731_v7  ;;  %v1954_v28 = vmul.f32 %v10731_v7, %v10731_v7 }
 0x20d   :  { %v1570_v31 = vpop.f32.mrf.mxu2  ;;  %v1465_v5 = vpop.f32.mrf.mxu0 }
 0x20e   :  { %v1624_v26 = vpop.f32.mrf.mxu3  ;;  %v1519_v27 = vpop.f32.mrf.mxu1  ;;  %v1466_v37 = vadd.f32 %v1465_v5, %v10525_v21  ;;  %v1972_v21 = vadd.f32 %v1938_v44, %v1936_v16  ;;  %v1873_v5 = vadd.f32 %v1872_v32, %v10703_v13 }
 0x20f   :  { %v10733_v47 = vadd.f32 %v1624_v26, %v1570_v31 }
 0x210   :  { %1675 = vmatmul.bf16.gmra.mxu0 %v10061_v54  ;;  %v10739_v6 = vadd.f32 %v1519_v27, %v1466_v37  ;;  %v1940_v54 = vmul.f32 %v10681_v58, %v10681_v58  ;;  %v1948_v27 = vmul.f32 %v10709_v11, %v10709_v11  ;;  %v1874_v44 = vadd.f32 %v1873_v5, %v10709_v11 }
 0x211   :  { %1729 = vmatmul.bf16.gmra.mxu1 %v10063_v55 }
 0x212   :  { %15062 = vst [vmem:[#allocation17_spill] sm:$0xff] %v10739_v6  ;;  %1783 = vmatmul.bf16.gmra.mxu2 %v10497_v36  ;;  %v1973_v0 = vadd.f32 %v1972_v21, %v1940_v54 }
 0x213   :  { %1837 = vmatmul.bf16.gmra.mxu3 %v10499_v8 }
 0x214   :  { %v1974_v38 = vadd.f32 %v1973_v0, %v1942_v4 }
 0x215   :  { %v1573_v55 = vpop.f32.mrf.mxu2  ;;  %v1467_v8 = vpop.f32.mrf.mxu0 }
 0x216   :  { %v1627_v63 = vpop.f32.mrf.mxu3  ;;  %v1521_v3 = vpop.f32.mrf.mxu1  ;;  %v1468_v17 = vadd.f32 %v1467_v8, %v10543_v49  ;;  %v1975_v26 = vadd.f32 %v1974_v38, %v1944_v62  ;;  %v1950_v49 = vmul.f32 %v10717_v57, %v10717_v57 }
 0x217   :  { %v10753_v36 = vadd.f32 %v1627_v63, %v1573_v55  ;;  %v1875_v55 = vadd.f32 %v1874_v44, %v10717_v57  ;;  %v1952_v63 = vmul.f32 %v10723_v33, %v10723_v33 }
 0x218   :  { %v10762_v31 = vadd.f32 %v1521_v3, %v1468_v17  ;;  %v1976_v37 = vadd.f32 %v1975_v26, %v1946_v39 }
 0x219   :  { %v1876_v0 = vadd.f32 %v1875_v55, %v10723_v33 }
 0x21a   :  { %15063 = vst [vmem:[#allocation18_spill] sm:$0xff] %v10762_v31  ;;  %v1977_v4 = vadd.f32 %v1976_v37, %v1948_v27  ;;  %v1958_v39 = vmul.f32 %v10762_v31, %v10762_v31 }
 0x21b   :  { %v1877_v38 = vadd.f32 %v1876_v0, %v10731_v7 }
 0x21c   :  { %v1978_v3 = vadd.f32 %v1977_v4, %v1950_v49 }
 0x21d   :  { %v1575_v16 = vpop.f32.mrf.mxu2  ;;  %v1470_v21 = vpop.f32.mrf.mxu0  ;;  %v1878_v32 = vadd.f32 %v1877_v38, %v10739_v6 }
 0x21e   :  { %v1629_v50 = vpop.f32.mrf.mxu3  ;;  %v1524_v1 = vpop.f32.mrf.mxu1  ;;  %v1471_v8 = vadd.f32 %v1470_v21, %v10573_v22  ;;  %v1979_v17 = vadd.f32 %v1978_v3, %v1952_v63 }
 0x21f   :  { %v10770_v54 = vadd.f32 %v1629_v50, %v1575_v16 }
 0x220   :  { %1680 = vmatmul.bf16.gmra.mxu0 %v10115_v19  ;;  %v10780_v62 = vadd.f32 %v1524_v1, %v1471_v8  ;;  %v1956_v19 = vmul.f32 %v10739_v6, %v10739_v6  ;;  %v1980_v22 = vadd.f32 %v1979_v17, %v1954_v28 }
 0x221   :  { %1734 = vmatmul.bf16.gmra.mxu1 %v10117_v20 }
 0x222   :  { %15064 = vst [vmem:[#allocation19_spill] sm:$0xff] %v10780_v62  ;;  %1788 = vmatmul.bf16.gmra.mxu2 %v10539_v60  ;;  %v1981_v37 = vadd.f32 %v1980_v22, %v1956_v19  ;;  %v1960_v44 = vmul.f32 %v10780_v62, %v10780_v62 }
 0x223   :  { %1842 = vmatmul.bf16.gmra.mxu3 %v10541_v24  ;;  %v1879_v24 = vadd.f32 %v1878_v32, %v10762_v31 }
 0x224   :  { %v1982_v16 = vadd.f32 %v1981_v37, %v1958_v39 }
 0x225   :  { %v1578_v26 = vpop.f32.mrf.mxu2  ;;  %v1472_v20 = vpop.f32.mrf.mxu0  ;;  %v1880_v50 = vadd.f32 %v1879_v24, %v10780_v62 }
 0x226   :  { %v1632_v5 = vpop.f32.mrf.mxu3  ;;  %v1526_v60 = vpop.f32.mrf.mxu1  ;;  %v1473_v49 = vadd.f32 %v1472_v20, %v10591_v35  ;;  %v1983_v1 = vadd.f32 %v1982_v16, %v1960_v44 }
 0x227   :  { %v10791_v27 = vadd.f32 %v1632_v5, %v1578_v26 }
 0x228   :  { %v10798_v21 = vadd.f32 %v1526_v60, %v1473_v49 }
 0x22a   :  { %15065 = vst [vmem:[#allocation20_spill] sm:$0xff] %v10798_v21  ;;  %v1881_v4 = vadd.f32 %v1880_v50, %v10798_v21  ;;  %v1962_v55 = vmul.f32 %v10798_v21, %v10798_v21 }
 0x22c   :  { %v1984_v63 = vadd.f32 %v1983_v1, %v1962_v55  ;;  %v15068_v1 = vld [vmem:[#allocation6_spill] sm:$0xff] }
 0x22d   :  { %v1580_v8 = vpop.f32.mrf.mxu2  ;;  %v1475_v28 = vpop.f32.mrf.mxu0 }
 0x22e   :  { %v1634_v3 = vpop.f32.mrf.mxu3  ;;  %v1529_v17 = vpop.f32.mrf.mxu1  ;;  %v1476_v35 = vadd.f32 %v1475_v28, %v10621_v14 }
 0x22f   :  { %v10803_v0 = vadd.f32 %v1634_v3, %v1580_v8 }
 0x230   :  { %1685 = vmatmul.bf16.gmra.mxu0 %v10157_v42  ;;  %v10807_v38 = vadd.f32 %v1529_v17, %v1476_v35 }
 0x231   :  { %1739 = vmatmul.bf16.gmra.mxu1 %v10159_v43 }
 0x232   :  { %15066 = vst [vmem:[#allocation21_spill] sm:$0xff] %v10807_v38  ;;  %1793 = vmatmul.bf16.gmra.mxu2 %v10587_v9  ;;  %v1882_v19 = vadd.f32 %v1881_v4, %v10807_v38  ;;  %v1964_v22 = vmul.f32 %v10807_v38, %v10807_v38 }
 0x233   :  { %1847 = vmatmul.bf16.gmra.mxu3 %v10589_v25 }
 0x234   :  { %v1985_v32 = vadd.f32 %v1984_v63, %v1964_v22 }
 0x235   :  { %v1583_v39 = vpop.f32.mrf.mxu2  ;;  %v1477_v14 = vpop.f32.mrf.mxu0 }
 0x236   :  { %v1637_v26 = vpop.f32.mrf.mxu3  ;;  %v1531_v42 = vpop.f32.mrf.mxu1  ;;  %v1478_v20 = vadd.f32 %v1477_v14, %v10639_v29  ;;  %v15070_v29 = vld [vmem:[#allocation7_spill] sm:$0xff] }
 0x237   :  { %v10815_v5 = vadd.f32 %v1637_v26, %v1583_v39 }
 0x238   :  { %v10818_v60 = vadd.f32 %v1531_v42, %v1478_v20 }
 0x23a   :  { %15067 = vst [vmem:[#allocation22_spill] sm:$0xff] %v10818_v60  ;;  %v1883_v43 = vadd.f32 %v1882_v19, %v10818_v60  ;;  %v1966_v9 = vmul.f32 %v10818_v60, %v10818_v60 }
 0x23c   :  { %v1986_v25 = vadd.f32 %v1985_v32, %v1966_v9 }
 0x23d   :  { %v1585_v37 = vpop.f32.mrf.mxu2  ;;  %v1480_v49 = vpop.f32.mrf.mxu0 }
 0x23e   :  { %v1639_v24 = vpop.f32.mrf.mxu3  ;;  %v1534_v16 = vpop.f32.mrf.mxu1  ;;  %v1481_v50 = vadd.f32 %v1480_v49, %v10645_v15 }
 0x23f   :  { %v10823_v44 = vadd.f32 %v1639_v24, %v1585_v37 }
 0x240   :  { %1690 = vmatmul.bf16.gmra.mxu0 %v15068_v1  ;;  %v10827_v4 = vadd.f32 %v1534_v16, %v1481_v50  ;;  %v15073_v50 = vld [vmem:[#allocation9_spill] sm:$0xff] }
 0x241   :  { %1744 = vmatmul.bf16.gmra.mxu1 %v15070_v29 }
 0x242   :  { %15069 = vst [vmem:[#allocation6_spill] sm:$0xff] %v10827_v4  ;;  %1798 = vmatmul.bf16.gmra.mxu2 %v10635_v51  ;;  %v1884_v55 = vadd.f32 %v1883_v43, %v10827_v4  ;;  %v1968_v63 = vmul.f32 %v10827_v4, %v10827_v4 }
 0x243   :  { %1852 = vmatmul.bf16.gmra.mxu3 %v10637_v41 }
 0x244   :  { %v1987_v8 = vadd.f32 %v1986_v25, %v1968_v63 }
 0x245   :  { %v1588_v3 = vpop.f32.mrf.mxu2  ;;  %v1482_v15 = vpop.f32.mrf.mxu0 }
 0x246   :  { %v1642_v28 = vpop.f32.mrf.mxu3  ;;  %v1536_v35 = vpop.f32.mrf.mxu1  ;;  %v1483_v19 = vadd.f32 %v1482_v15, %v10664_v52  ;;  %v15072_v52 = vld [vmem:[#allocation8_spill] sm:$0xff] }
 0x247   :  { %v10835_v17 = vadd.f32 %v1642_v28, %v1588_v3 }
 0x248   :  { %v10838_v22 = vadd.f32 %v1536_v35, %v1483_v19 }
 0x24a   :  { %15071 = vst [vmem:[#allocation7_spill] sm:$0xff] %v10838_v22  ;;  %v1885_v51 = vadd.f32 %v1884_v55, %v10838_v22  ;;  %v1970_v41 = vmul.f32 %v10838_v22, %v10838_v22 }
 0x24c   :  { %v1886_v32 = vrot.slane %v1885_v51, 4  ;;  %v1988_v39 = vadd.f32 %v1987_v8, %v1970_v41 }
 0x24d   :  { %v1590_v26 = vpop.f32.mrf.mxu2  ;;  %v1656_v20 = vpop.f32.mrf.mxu0 }
 0x24e   :  { %v1644_v14 = vpop.f32.mrf.mxu3  ;;  %v1710_v43 = vpop.f32.mrf.mxu1  ;;  %v1887_v9 = vadd.f32 %v1886_v32, %v1885_v51  ;;  %v1989_v25 = vrot.slane %v1988_v39, 4  ;;  %v1657_v37 = vadd.f32 %v1656_v20, %v10672_v12 }
 0x24f   :  { %v10843_v42 = vadd.f32 %v1644_v14, %v1590_v26 }
 0x250   :  { %1695 = vmatmul.bf16.gmra.mxu0 %v15072_v52  ;;  %v1888_v24 = vrot.slane %v1887_v9, 2  ;;  %v1990_v49 = vadd.f32 %v1989_v25, %v1988_v39  ;;  %v1711_v16 = vadd.f32 %v1710_v43, %v1657_v37 }
 0x251   :  { %1749 = vmatmul.bf16.gmra.mxu1 %v15073_v50 }
 0x252   :  { %1803 = vmatmul.bf16.gmra.mxu2 %v10659_v2  ;;  %v1889_v1 = vadd.f32 %v1888_v24, %v1887_v9  ;;  %v1991_v29 = vrot.slane %v1990_v49, 2 }
 0x253   :  { %1857 = vmatmul.bf16.gmra.mxu3 %v10661_v34 }
 0x254   :  { %v1890_v55 = vrot.slane %v1889_v1, 1  ;;  %v1992_v63 = vadd.f32 %v1991_v29, %v1990_v49 }
 0x255   :  { %v1764_v8 = vpop.f32.mrf.mxu2  ;;  %v1658_v15 = vpop.f32.mrf.mxu0 }
 0x256   :  { %v1818_v3 = vpop.f32.mrf.mxu3  ;;  %v1765_v28 = vadd.f32 %v1764_v8, %v1711_v16  ;;  %v1712_v12 = vpop.f32.mrf.mxu1  ;;  %v1891_v35 = vadd.f32 %v1890_v55, %v1889_v1  ;;  %v1993_v19 = vrot.slane %v1992_v63, 1  ;;  %v1659_v51 = vadd.f32 %v1658_v15, %v10677_v61 }
 0x258   :  { %v10851_v41 = vadd.f32 %v1818_v3, %v1765_v28  ;;  %v10853_v32 = vmul.f32 0.0069444445, %v1891_v35  ;;  %v1994_v2 = vadd.f32 %v1993_v19, %v1992_v63  ;;  %v1713_v39 = vadd.f32 %v1712_v12, %v1659_v51 }
 0x25a   :  { %v10855_v34 = vmul.f32 0.0069444445, %v1994_v2  ;;  %v10859_v26 = vmul.f32 %v10853_v32, %v10853_v32  ;;  %v1937_v14 = vmul.f32 %v10851_v41, %v10851_v41  ;;  %v1893_v38 = vsel %vm14892_vm0, %v10851_v41, 0.0 }
 0x25c   :  { %v1995_v6 = vsel %vm14892_vm0, %v1937_v14, 0.0 }
 0x25d   :  { %v1766_v20 = vpop.f32.mrf.mxu2  ;;  %v1661_v25 = vpop.f32.mrf.mxu0 }
 0x25e   :  { %v1820_v43 = vpop.f32.mrf.mxu3  ;;  %v1767_v9 = vadd.f32 %v1766_v20, %v1713_v39  ;;  %v1715_v61 = vpop.f32.mrf.mxu1  ;;  %v1662_v37 = vadd.f32 %v1661_v25, %v10686_v40 }
 0x260   :  { %v10864_v52 = vadd.f32 %v1820_v43, %v1767_v9  ;;  %v1716_v24 = vadd.f32 %v1715_v61, %v1662_v37 }
 0x262   :  { %v1894_v22 = vsel %vm14892_vm0, %v10864_v52, 0.0 }
 0x263   :  { %v1895_v7 = vadd.f32 %v1894_v22, %v1893_v38 }
 0x265   :  { %v1769_v49 = vpop.f32.mrf.mxu2  ;;  %v1663_v1 = vpop.f32.mrf.mxu0 }
 0x266   :  { %v1823_v16 = vpop.f32.mrf.mxu3  ;;  %v1770_v50 = vadd.f32 %v1769_v49, %v1716_v24  ;;  %v1717_v29 = vpop.f32.mrf.mxu1  ;;  %v1664_v55 = vadd.f32 %v1663_v1, %v10691_v46 }
 0x268   :  { %v10867_v63 = vadd.f32 %v1823_v16, %v1770_v50  ;;  %v1718_v8 = vadd.f32 %v1717_v29, %v1664_v55 }
 0x26a   :  { %15074 = vst [vmem:[#allocation8_spill] sm:$0xff] %v10867_v63  ;;  %v1941_v4 = vmul.f32 %v10867_v63, %v10867_v63 }
 0x26c   :  { %v1998_v57 = vsel %vm14892_vm0, %v1941_v4, 0.0 }
 0x26d   :  { %v1771_v3 = vpop.f32.mrf.mxu2  ;;  %v1666_v12 = vpop.f32.mrf.mxu0 }
 0x26e   :  { %v1825_v28 = vpop.f32.mrf.mxu3  ;;  %v1772_v15 = vadd.f32 %v1771_v3, %v1718_v8  ;;  %v1720_v35 = vpop.f32.mrf.mxu1  ;;  %v1667_v40 = vadd.f32 %v1666_v12, %v10700_v56 }
 0x270   :  { %v10870_v19 = vadd.f32 %v1825_v28, %v1772_v15  ;;  %v1721_v51 = vadd.f32 %v1720_v35, %v1667_v40 }
 0x272   :  { %v1898_v14 = vsel %vm14892_vm0, %v10870_v19, 0.0 }
 0x275   :  { %v1774_v2 = vpop.f32.mrf.mxu2  ;;  %v1668_v43 = vpop.f32.mrf.mxu0 }
 0x276   :  { %v1828_v39 = vpop.f32.mrf.mxu3  ;;  %v1775_v20 = vadd.f32 %v1774_v2, %v1721_v51  ;;  %v1722_v9 = vpop.f32.mrf.mxu1  ;;  %v1669_v46 = vadd.f32 %v1668_v43, %v10705_v30 }
 0x278   :  { %v10873_v25 = vadd.f32 %v1828_v39, %v1775_v20  ;;  %v1723_v61 = vadd.f32 %v1722_v9, %v1669_v46 }
 0x27d   :  { %v1776_v37 = vpop.f32.mrf.mxu2  ;;  %v1671_v16 = vpop.f32.mrf.mxu0 }
 0x27e   :  { %v1830_v24 = vpop.f32.mrf.mxu3  ;;  %v1777_v49 = vadd.f32 %v1776_v37, %v1723_v61  ;;  %v1725_v50 = vpop.f32.mrf.mxu1  ;;  %v1672_v56 = vadd.f32 %v1671_v16, %v10714_v18 }
 0x280   :  { %v10876_v1 = vadd.f32 %v1830_v24, %v1777_v49  ;;  %v1726_v29 = vadd.f32 %v1725_v50, %v1672_v56 }
 0x282   :  { %v1947_v4 = vmul.f32 %v10876_v1, %v10876_v1 }
 0x285   :  { %v1779_v55 = vpop.f32.mrf.mxu2  ;;  %v1673_v28 = vpop.f32.mrf.mxu0 }
 0x286   :  { %v1833_v8 = vpop.f32.mrf.mxu3  ;;  %v1780_v3 = vadd.f32 %v1779_v55, %v1726_v29  ;;  %v1727_v15 = vpop.f32.mrf.mxu1 }
 0x288   :  { %v10878_v12 = vadd.f32 %v1833_v8, %v1780_v3  ;;  %v1939_v8 = vmul.f32 %v10864_v52, %v10864_v52  ;;  %v1674_v3 = vadd.f32 %v1673_v28, %v10719_v10  ;;  %v1896_v10 = vsel %vm14892_vm0, %v10867_v63, 0.0 }
 0x289   :  { %v1943_v28 = vmul.f32 %v10870_v19, %v10870_v19  ;;  %v1897_v23 = vadd.f32 %v1896_v10, %v1895_v7 }
 0x28a   :  { %v1996_v21 = vsel %vm14892_vm0, %v1939_v8, 0.0  ;;  %v1728_v62 = vadd.f32 %v1727_v15, %v1674_v3 }
 0x28b   :  { %v1997_v59 = vadd.f32 %v1996_v21, %v1995_v6  ;;  %v2000_v38 = vsel %vm14892_vm0, %v1943_v28, 0.0  ;;  %v1899_v21 = vadd.f32 %v1898_v14, %v1897_v23 }
 0x28d   :  { %v1781_v30 = vpop.f32.mrf.mxu2  ;;  %v1676_v40 = vpop.f32.mrf.mxu0  ;;  %v1999_v15 = vadd.f32 %v1998_v57, %v1997_v59  ;;  %v1902_v57 = vsel %vm14892_vm0, %v10876_v1, 0.0 }
 0x28e   :  { %v1835_v35 = vpop.f32.mrf.mxu3  ;;  %v1730_v51 = vpop.f32.mrf.mxu1  ;;  %v1677_v60 = vadd.f32 %v1676_v40, %v10728_v45 }
 0x290   :  { %v1731_v8 = vadd.f32 %v1730_v51, %v1677_v60  ;;  %v1900_v60 = vsel %vm14892_vm0, %v10873_v25, 0.0 }
 0x295   :  { %v1784_v2 = vpop.f32.mrf.mxu2  ;;  %v1678_v20 = vpop.f32.mrf.mxu0 }
 0x296   :  { %v1838_v39 = vpop.f32.mrf.mxu3  ;;  %v1732_v43 = vpop.f32.mrf.mxu1  ;;  %v1679_v31 = vadd.f32 %v1678_v20, %v10733_v47  ;;  %v1945_v47 = vmul.f32 %v10873_v25, %v10873_v25  ;;  %v1782_v20 = vadd.f32 %v1781_v30, %v1728_v62  ;;  %v2001_v30 = vadd.f32 %v2000_v38, %v1999_v15 }
 0x298   :  { %v1733_v63 = vadd.f32 %v1732_v43, %v1679_v31  ;;  %v2002_v7 = vsel %vm14892_vm0, %v1945_v47, 0.0  ;;  %v10916_v6 = vadd.f32 %v1835_v35, %v1782_v20  ;;  %v2004_v35 = vsel %vm14892_vm0, %v1947_v4, 0.0 }
 0x299   :  { %v2003_v43 = vadd.f32 %v2002_v7, %v2001_v30 }
 0x29d   :  { %v1786_v9 = vpop.f32.mrf.mxu2  ;;  %v1681_v46 = vpop.f32.mrf.mxu0 }
 0x29e   :  { %v1840_v18 = vpop.f32.mrf.mxu3  ;;  %v1735_v61 = vpop.f32.mrf.mxu1  ;;  %v1682_v33 = vadd.f32 %v1681_v46, %v10753_v36  ;;  %v1785_v36 = vadd.f32 %v1784_v2, %v1731_v8  ;;  %v1787_v46 = vadd.f32 %v1786_v9, %v1733_v63  ;;  %v1901_v2 = vadd.f32 %v1900_v60, %v1899_v21 }
 0x2a0   :  { %v1736_v62 = vadd.f32 %v1735_v61, %v1682_v33  ;;  %v10923_v63 = vadd.f32 %v1838_v39, %v1785_v36  ;;  %v10927_v9 = vadd.f32 %v1840_v18, %v1787_v46  ;;  %v1904_v61 = vsel %vm14892_vm0, %v10878_v12, 0.0 }
 0x2a1   :  { %v1903_v3 = vadd.f32 %v1902_v57, %v1901_v2 }
 0x2a2   :  { %v1953_v10 = vmul.f32 %v10923_v63, %v10923_v63  ;;  %v1955_v8 = vmul.f32 %v10927_v9, %v10927_v9  ;;  %v1908_v38 = vsel %vm14892_vm0, %v10923_v63, 0.0 }
 0x2a4   :  { %v2012_v7 = vsel %vm14892_vm0, %v1955_v8, 0.0 }
 0x2a5   :  { %v1789_v37 = vpop.f32.mrf.mxu2  ;;  %v1683_v49 = vpop.f32.mrf.mxu0 }
 0x2a6   :  { %v10880_v24 = vpop.f32.mrf.mxu3  ;;  %v1737_v16 = vpop.f32.mrf.mxu1  ;;  %v1684_v22 = vadd.f32 %v1683_v49, %v10770_v54  ;;  %v1949_v54 = vmul.f32 %v10878_v12, %v10878_v12  ;;  %v1790_v59 = vadd.f32 %v1789_v37, %v1736_v62  ;;  %v1951_v37 = vmul.f32 %v10916_v6, %v10916_v6 }
 0x2a8   :  { %v1738_v33 = vadd.f32 %v1737_v16, %v1684_v22  ;;  %v10937_v18 = vadd.f32 %v10880_v24, %v1790_v59  ;;  %v2008_v14 = vsel %vm14892_vm0, %v1951_v37, 0.0 }
 0x2aa   :  { %v1912_v21 = vsel %vm14892_vm0, %v10937_v18, 0.0 }
 0x2ad   :  { %v1791_v50 = vpop.f32.mrf.mxu2  ;;  %v1686_v29 = vpop.f32.mrf.mxu0 }
 0x2ae   :  { %v10882_v56 = vpop.f32.mrf.mxu3  ;;  %v1740_v55 = vpop.f32.mrf.mxu1  ;;  %v1687_v31 = vadd.f32 %v1686_v29, %v10791_v27  ;;  %v1792_v49 = vadd.f32 %v1791_v50, %v1738_v33  ;;  %v2005_v50 = vadd.f32 %v2004_v35, %v2003_v43 }
 0x2b0   :  { %v1741_v39 = vadd.f32 %v1740_v55, %v1687_v31  ;;  %v1905_v55 = vadd.f32 %v1904_v61, %v1903_v3  ;;  %v10948_v24 = vadd.f32 %v10882_v56, %v1792_v49 }
 0x2b2   :  { %v1959_v30 = vmul.f32 %v10948_v24, %v10948_v24  ;;  %v1914_v43 = vsel %vm14892_vm0, %v10948_v24, 0.0 }
 0x2b4   :  { %v2016_v49 = vsel %vm14892_vm0, %v1959_v30, 0.0 }
 0x2b5   :  { %v1794_v45 = vpop.f32.mrf.mxu2  ;;  %v1688_v11 = vpop.f32.mrf.mxu0 }
 0x2b6   :  { %v1848_v40 = vpop.f32.mrf.mxu3  ;;  %v1742_v13 = vpop.f32.mrf.mxu1  ;;  %v1689_v51 = vadd.f32 %v1688_v11, %v10803_v0  ;;  %v2006_v11 = vsel %vm14892_vm0, %v1949_v54, 0.0  ;;  %v1906_v0 = vsel %vm14892_vm0, %v10916_v6, 0.0  ;;  %v1795_v28 = vadd.f32 %v1794_v45, %v1741_v39 }
 0x2b7   :  { %v2007_v22 = vadd.f32 %v2006_v11, %v2005_v50  ;;  %v1907_v15 = vadd.f32 %v1906_v0, %v1905_v55  ;;  %v1910_v45 = vsel %vm14892_vm0, %v10927_v9, 0.0 }
 0x2b8   :  { %v1743_v47 = vadd.f32 %v1742_v13, %v1689_v51  ;;  %v1957_v13 = vmul.f32 %v10937_v18, %v10937_v18  ;;  %v10955_v4 = vadd.f32 %v1848_v40, %v1795_v28 }
 0x2b9   :  { %v2009_v62 = vadd.f32 %v2008_v14, %v2007_v22  ;;  %v1909_v60 = vadd.f32 %v1908_v38, %v1907_v15 }
 0x2ba   :  { %v2014_v51 = vsel %vm14892_vm0, %v1957_v13, 0.0  ;;  %v1961_v35 = vmul.f32 %v10955_v4, %v10955_v4  ;;  %v1916_v39 = vsel %vm14892_vm0, %v10955_v4, 0.0 }
 0x2bb   :  { %v1911_v40 = vadd.f32 %v1910_v45, %v1909_v60 }
 0x2bc   :  { %v2018_v11 = vsel %vm14892_vm0, %v1961_v35, 0.0 }
 0x2bd   :  { %v1796_v23 = vpop.f32.mrf.mxu2  ;;  %v1691_v29 = vpop.f32.mrf.mxu0 }
 0x2be   :  { %v1850_v27 = vpop.f32.mrf.mxu3  ;;  %v1745_v16 = vpop.f32.mrf.mxu1  ;;  %v1692_v20 = vadd.f32 %v1691_v29, %v10815_v5  ;;  %v1797_v36 = vadd.f32 %v1796_v23, %v1743_v47  ;;  %v2010_v5 = vsel %vm14892_vm0, %v1953_v10, 0.0 }
 0x2bf   :  { %v2011_v33 = vadd.f32 %v2010_v5, %v2009_v62 }
 0x2c0   :  { %v1746_v46 = vadd.f32 %v1745_v16, %v1692_v20  ;;  %v10962_v54 = vadd.f32 %v1850_v27, %v1797_v36  ;;  %v1913_v27 = vadd.f32 %v1912_v21, %v1911_v40  ;;  %v15075_v21 = vsub.f32 %v10855_v34, %v10859_v26 }
 0x2c1   :  { %v2013_v37 = vadd.f32 %v2012_v7, %v2011_v33 }
 0x2c2   :  { %v1963_v29 = vmul.f32 %v10962_v54, %v10962_v54  ;;  %v1915_v3 = vadd.f32 %v1914_v43, %v1913_v27  ;;  %v1918_v0 = vsel %vm14892_vm0, %v10962_v54, 0.0  ;;  %v2042_v30 = vmax.f32 %v15075_v21, 0.0 }
 0x2c3   :  { %v2015_v16 = vadd.f32 %v2014_v51, %v2013_v37 }
 0x2c4   :  { %v1917_v47 = vadd.f32 %v1916_v39, %v1915_v3  ;;  %v2020_v55 = vsel %vm14892_vm0, %v1963_v29, 0.0  ;;  %v2044_v43 = vadd.f32 0.001, %v2042_v30 }
 0x2c5   :  { %v1799_v56 = vpop.f32.mrf.mxu2  ;;  %v1693_v57 = vpop.f32.mrf.mxu0  ;;  %v2017_v28 = vadd.f32 %v2016_v49, %v2015_v16 }
 0x2c6   :  { %v1853_v31 = vpop.f32.mrf.mxu3  ;;  %v1800_v59 = vadd.f32 %v1799_v56, %v1746_v46  ;;  %v1747_v2 = vpop.f32.mrf.mxu1  ;;  %v1694_v61 = vadd.f32 %v1693_v57, %v10823_v44  ;;  %v1919_v22 = vadd.f32 %v1918_v0, %v1917_v47  ;;  %9092 = vrsqrt.f32 %v2044_v43 }
 0x2c7   :  { %v2019_v36 = vadd.f32 %v2018_v11, %v2017_v28  ;;  %vm2052_vm2 = vweird.f32 %v2044_v43 }
 0x2c8   :  { %v10969_v23 = vadd.f32 %v1853_v31, %v1800_v59  ;;  %v1748_v10 = vadd.f32 %v1747_v2, %v1694_v61 }
 0x2c9   :  { %v2021_v45 = vadd.f32 %v2020_v55, %v2019_v36 }
 0x2ca   :  { %v1965_v44 = vmul.f32 %v10969_v23, %v10969_v23  ;;  %v1920_v8 = vsel %vm14892_vm0, %v10969_v23, 0.0 }
 0x2cb   :  { %v1921_v46 = vadd.f32 %v1920_v8, %v1919_v22 }
 0x2cc   :  { %v2022_v15 = vsel %vm14892_vm0, %v1965_v44, 0.0  ;;  %v11007_v44 = vpop.eup %9092 }
 0x2cd   :  { %v1801_v20 = vpop.f32.mrf.mxu2  ;;  %v1696_v38 = vpop.f32.mrf.mxu0  ;;  %v2023_v56 = vadd.f32 %v2022_v15, %v2021_v45  ;;  %vm2053_vm1 = vweird.f32 %v11007_v44 }
 0x2ce   :  { %v1855_v50 = vpop.f32.mrf.mxu3  ;;  %v1802_v14 = vadd.f32 %v1801_v20, %v1748_v10  ;;  %v1697_v5 = vadd.f32 %v1696_v38, %v10835_v17  ;;  %v1750_v62 = vpop.f32.mrf.mxu1  ;;  %v2047_v20 = vmul.f32 %v11007_v44, %v2044_v43  ;;  %vm11026_vm3 = vmor %vm2052_vm2, %vm2053_vm1 }
 0x2d0   :  { %v10986_v13 = vadd.f32 %v1855_v50, %v1802_v14  ;;  %v1751_v57 = vadd.f32 %v1750_v62, %v1697_v5  ;;  %v2048_v38 = vmul.f32 %v11007_v44, %v2047_v20 }
 0x2d2   :  { %v1922_v60 = vsel %vm14892_vm0, %v10986_v13, 0.0  ;;  %v1967_v7 = vmul.f32 %v10986_v13, %v10986_v13  ;;  %v2049_v45 = vmul.f32 0.5, %v2048_v38 }
 0x2d3   :  { %v1923_v31 = vadd.f32 %v1922_v60, %v1921_v46 }
 0x2d4   :  { %v2024_v59 = vsel %vm14892_vm0, %v1967_v7, 0.0 }
 0x2d5   :  { %v2025_v33 = vadd.f32 %v2024_v59, %v2023_v56  ;;  %v1804_v17 = vpop.f32.mrf.mxu2  ;;  %v1698_v2 = vpop.f32.mrf.mxu0  ;;  %v2050_v56 = vsub.f32 1.5, %v2049_v45 }
 0x2d6   :  { %v1858_v40 = vpop.f32.mrf.mxu3  ;;  %v1805_v51 = vadd.f32 %v1804_v17, %v1751_v57  ;;  %v1699_v61 = vadd.f32 %v1698_v2, %v10843_v42  ;;  %v1752_v27 = vpop.f32.mrf.mxu1  ;;  %v2199_v57 = vlaneseq }
 0x2d8   :  { %v10997_v35 = vadd.f32 %v1858_v40, %v1805_v51  ;;  %v1753_v39 = vadd.f32 %v1752_v27, %v1699_v61  ;;  %v11024_v40 = vshrl.u32 %v2199_v57, 7 }
 0x2da   :  { %v1924_v37 = vsel %vm14892_vm0, %v10997_v35, 0.0  ;;  %v1969_v34 = vmul.f32 %v10997_v35, %v10997_v35  ;;  %15076 = vst [vmem:[#allocation9_spill] sm:$0xff] %v11024_v40  ;;  %v11031_v61 = vadd.s32 8, %v11024_v40  ;;  %v11043_v43 = vadd.s32 24, %v11024_v40 }
 0x2db   :  { %v1925_v26 = vadd.f32 %v1924_v37, %v1923_v31  ;;  %v11046_v27 = vadd.s32 32, %v11024_v40  ;;  %v11074_v20 = vadd.s32 96, %v11024_v40 }
 0x2dc   :  { %v2026_v49 = vsel %vm14892_vm0, %v1969_v34, 0.0  ;;  %15079 = vst [vmem:[#allocation23_spill] sm:$0xff] %v11031_v61 }
 0x2dd   :  { %v2027_v29 = vadd.f32 %v2026_v49, %v2025_v33  ;;  %v1806_v16 = vpop.f32.mrf.mxu2  ;;  %v11021_v33 = vmul.f32 %v11007_v44, %v2050_v56  ;;  %15081 = vst [vmem:[#allocation25_spill] sm:$0xff] %v11043_v43  ;;  %v11049_v49 = vadd.s32 40, %v11024_v40 }
 0x2de   :  { %v1807_v3 = vadd.f32 %v1806_v16, %v1753_v39  ;;  %v1860_v11 = vpop.f32.mrf.mxu3  ;;  %v11052_v39 = vadd.s32 48, %v11024_v40  ;;  %v11059_v16 = vadd.s32 64, %v11024_v40  ;;  %15088 = vst [vmem:[#allocation32_spill] sm:$0xff] %v11074_v20 }
 0x2e0   :  { %v11005_v0 = vadd.f32 %v1860_v11, %v1807_v3  ;;  %15082 = vst [vmem:[#allocation26_spill] sm:$0xff] %v11052_v39  ;;  %v11062_v3 = vadd.s32 72, %v11024_v40  ;;  %v11065_v11 = vadd.s32 80, %v11024_v40 }
 0x2e1   :  { %15084 = vst [vmem:[#allocation28_spill] sm:$0xff] %v11059_v16 }
 0x2e2   :  { %v1926_v42 = vsel %vm14892_vm0, %v11005_v0, 0.0  ;;  %v1971_v10 = vmul.f32 %v11005_v0, %v11005_v0  ;;  %15085 = vst [vmem:[#allocation29_spill] sm:$0xff] %v11062_v3 }
 0x2e3   :  { %v1927_v28 = vadd.f32 %v1926_v42, %v1925_v26  ;;  %v11040_v26 = vadd.s32 16, %v11024_v40  ;;  %15086 = vst [vmem:[#allocation30_spill] sm:$0xff] %v11065_v11  ;;  %v11068_v42 = vadd.s32 88, %v11024_v40 }
 0x2e4   :  { %v2028_v47 = vsel %vm14892_vm0, %v1971_v10, 0.0  ;;  %v2221_v10 = vand.u32 65535, %v11024_v40 }
 0x2e5   :  { %v1928_v50 = vrot.slane %v1927_v28, 4  ;;  %v2029_v55 = vadd.f32 %v2028_v47, %v2027_v29  ;;  %15080 = vst [vmem:[#allocation24_spill] sm:$0xff] %v11040_v26  ;;  %v11055_v29 = vadd.s32 56, %v11024_v40  ;;  %v2250_v47 = vand.u32 65535, %v11031_v61 }
 0x2e6   :  { %15087 = vst [vmem:[#allocation31_spill] sm:$0xff] %v11068_v42  ;;  %v2225_v38 = vmul.u32 43690, %v2221_v10 }
 0x2e7   :  { %v1929_v8 = vadd.f32 %v1928_v50, %v1927_v28  ;;  %v2030_v14 = vrot.slane %v2029_v55, 4  ;;  %15083 = vst [vmem:[#allocation27_spill] sm:$0xff] %v11055_v29  ;;  %v2222_v28 = vshrl.u32 %v11024_v40, 16  ;;  %v11077_v50 = vadd.s32 104, %v11024_v40 }
 0x2e8   :  { %v2254_v45 = vmul.u32 43690, %v2250_v47 }
 0x2e9   :  { %v1930_v36 = vrot.slane %v1929_v8, 2  ;;  %v2031_v22 = vadd.f32 %v2030_v14, %v2029_v55  ;;  %15089 = vst [vmem:[#allocation33_spill] sm:$0xff] %v11077_v50  ;;  %v2251_v55 = vshrl.u32 %v11031_v61, 16  ;;  %v2224_v14 = vmul.u32 43691, %v2221_v10 }
 0x2ea   :  { %v2258_v11 = vshrl.u32 %v2254_v45, 16 }
 0x2eb   :  { %v1931_v15 = vadd.f32 %v1930_v36, %v1929_v8  ;;  %v2032_v5 = vrot.slane %v2031_v22, 2  ;;  %v2279_v8 = vand.u32 65535, %v11040_v26  ;;  %v2226_v36 = vmul.u32 43691, %v2222_v28 }
 0x2ed   :  { %v1932_v46 = vrot.slane %v1931_v15, 1  ;;  %v2033_v62 = vadd.f32 %v2032_v5, %v2031_v22  ;;  %v2280_v22 = vshrl.u32 %v11040_v26, 16  ;;  %v2253_v5 = vmul.u32 43691, %v2250_v47 }
 0x2ee   :  { %v2283_v57 = vmul.u32 43690, %v2279_v8  ;;  %v14859_v47 = vmov 0   ;;  %v2231_v20 = vshrl.u32 %v2226_v36, 16 }
 0x2ef   :  { %v1933_v60 = vadd.f32 %v1932_v46, %v1931_v15  ;;  %v2034_v7 = vrot.slane %v2033_v62, 1  ;;  %v2227_v15 = vmul.u32 43690, %v2222_v28  ;;  %v11082_v46 = vmul.u32 43691, %v2251_v55 }
 0x2f0   :  { %v11087_v10 = vmul.u32 43691, %v2280_v22  ;;  %v2229_v28 = vshrl.u32 %v2225_v38, 16  ;;  %v2285_v16 = vmul.u32 43690, %v2280_v22  ;;  %v2286_v29 = vshll.u32 %v2283_v57, 16 }
 0x2f1   :  { %v11016_v31 = vmul.f32 0.0069444445, %v1933_v60  ;;  %v2035_v21 = vadd.f32 %v2034_v7, %v2033_v62  ;;  %v2228_v62 = vshll.u32 %v2225_v38, 16  ;;  %v2230_v60 = vshll.u32 %v2226_v36, 16 }
 0x2f2   :  { %v2256_v7 = vmul.u32 43690, %v2251_v55  ;;  %v2260_v26 = vshrl.u32 %v11082_v46, 16 }
 0x2f3   :  { %v2037_v30 = vmul.f32 0.0069444445, %v2035_v21  ;;  %v2039_v59 = vmul.f32 %v11016_v31, %v11016_v31  ;;  %v2257_v21 = vshll.u32 %v2254_v45, 16  ;;  %vm2232_vm5 = vc.u32 %v2224_v14, %v2228_v62 }
 0x2f4   :  { %v2233_v37 = vsel %vm2232_vm5, 1, %v14859_v47 }
 0x2f5   :  { %v2041_v17 = vsub.f32 %v2037_v30, %v2039_v59  ;;  %v2259_v30 = vshll.u32 %v11082_v46, 16  ;;  %v2282_v59 = vmul.u32 43691, %v2279_v8  ;;  %vm2261_vm7 = vc.u32 %v2253_v5, %v2257_v21 }
 0x2f6   :  { %v2235_v50 = vadd.s32 %v2233_v37, %v2227_v15  ;;  %v2262_v8 = vsel %vm2261_vm7, 1, %v14859_v47  ;;  %v2263_v3 = vadd.s32 %v2257_v21, %v2253_v5  ;;  %v2308_v5 = vand.u32 65535, %v11043_v43 }
 0x2f7   :  { %v2043_v51 = vmax.f32 %v2041_v17, 0.0  ;;  %v2264_v38 = vadd.s32 %v2262_v8, %v2256_v7  ;;  %vm2290_vm11 = vc.u32 %v2282_v59, %v2286_v29  ;;  %v15094_v8 = vsel %vm11026_vm3, %v11007_v44, %v11021_v33  ;;  %v11137_v44 = vld [vmem:[%s14828_s4 + $0x1] ss:$2 sm:$0x3] }
 0x2f8   :  { %vm2265_vm10 = vc.u32 %v2263_v3, %v2259_v30  ;;  %v2309_v3 = vshrl.u32 %v11043_v43, 16  ;;  %v2311_v7 = vmul.u32 43691, %v2308_v5  ;;  %15096 = vst [vmem:[#allocation39_spill] sm:$0xff] %v11137_v44  ;;  %v15115_v44 = vld [vmem:[#allocation22_spill] sm:$0xff] }
 0x2f9   :  { %v11037_v34 = vadd.f32 0.001, %v2043_v51  ;;  %v2234_v51 = vadd.s32 %v2228_v62, %v2224_v14  ;;  %v2266_v15 = vsel %vm2265_vm10, 1, %v14859_v47 }
 0x2fa   :  { %v2268_v36 = vadd.s32 %v2266_v15, %v2264_v38  ;;  %v2314_v15 = vmul.u32 43690, %v2309_v3 }
 0x2fb   :  { %9094 = vrsqrt.f32 %v11037_v34  ;;  %vm2062_vm4 = vweird.f32 %v11037_v34  ;;  %vm2236_vm9 = vc.u32 %v2234_v51, %v2230_v60  ;;  %v2287_v60 = vshrl.u32 %v2283_v57, 16 }
 0x2fc   :  { %v2237_v42 = vsel %vm2236_vm9, 1, %v14859_v47  ;;  %v2292_v51 = vadd.s32 %v2286_v29, %v2282_v59  ;;  %v2269_v22 = vadd.s32 %v2268_v36, %v2258_v11  ;;  %v11102_v59 = vmul.u32 43690, %v2308_v5 }
 0x2fd   :  { %v2239_v62 = vadd.s32 %v2237_v42, %v2235_v50  ;;  %v2291_v50 = vsel %vm2290_vm11, 1, %v14859_v47  ;;  %v11108_v57 = vadd.s32 112, %v11024_v40  ;;  %v11116_v11 = vadd.s32 128, %v11024_v40 }
 0x2fe   :  { %v2293_v46 = vadd.s32 %v2291_v50, %v2285_v16  ;;  %15090 = vst [vmem:[#allocation34_spill] sm:$0xff] %v11102_v59  ;;  %v11113_v16 = vadd.s32 120, %v11024_v40  ;;  %v11126_v38 = vadd.s32 %v2269_v22, %v2260_v26 }
 0x2ff   :  { %v2240_v37 = vadd.s32 %v2239_v62, %v2229_v28  ;;  %15091 = vst [vmem:[#allocation35_spill] sm:$0xff] %v11108_v57  ;;  %v11110_v28 = vmul.u32 43691, %v2309_v3 }
 0x300   :  { %15092 = vst [vmem:[#allocation36_spill] sm:$0xff] %v11113_v16 }
 0x301   :  { %v9095_v56 = vpop.eup %9094  ;;  %v2241_v42 = vadd.s32 %v2240_v37, %v2231_v20  ;;  %15093 = vst [vmem:[#allocation37_spill] sm:$0xff] %v11116_v11  ;;  %v2317_v36 = vshll.u32 %v11110_v28, 16 }
 0x302   :  { %v2057_v17 = vmul.f32 %v9095_v56, %v11037_v34  ;;  %vm2063_vm6 = vweird.f32 %v9095_v56 }
 0x303   :  { %vm2064_vm12 = vmor %vm2062_vm4, %vm2063_vm6  ;;  %v2242_v30 = vshrl.u32 %v2241_v42, 3 }
 0x304   :  { %v2058_v55 = vmul.f32 %v9095_v56, %v2057_v17  ;;  %v2288_v17 = vshll.u32 %v11087_v10, 16 }
 0x305   :  { %v2243_v62 = vmul.u32 12, %v2242_v30 }
 0x306   :  { %v2059_v14 = vmul.f32 0.5, %v2058_v55  ;;  %vm2294_vm13 = vc.u32 %v2292_v51, %v2288_v17  ;;  %v2315_v55 = vshll.u32 %v11102_v59, 16 }
 0x307   :  { %v2295_v29 = vsel %vm2294_vm13, 1, %v14859_v47  ;;  %v11144_v5 = vsub.s32 %v11024_v40, %v2243_v62 }
 0x308   :  { %v2060_v61 = vsub.f32 1.5, %v2059_v14  ;;  %v2297_v34 = vadd.s32 %v2295_v29, %v2293_v46  ;;  %vm2319_vm14 = vc.u32 %v2311_v7, %v2315_v55  ;;  %v2321_v33 = vadd.s32 %v2315_v55, %v2311_v7 }
 0x309   :  { %v2320_v51 = vsel %vm2319_vm14, 1, %v14859_v47  ;;  %15098 = vst [vmem:[#allocation41_spill] sm:$0xff] %v11144_v5  ;;  %v15114_v47 = vld [vmem:[#allocation21_spill] sm:$0xff] }
 0x30a   :  { %v2061_v45 = vmul.f32 %v9095_v56, %v2060_v61  ;;  %v1863_v61 = vld [vmem:[%s14827_s3] ss:$2 sm:$0x3]  ;;  %v2298_v17 = vadd.s32 %v2297_v34, %v2287_v60  ;;  %v11140_v60 = vadd.s32 136, %v11024_v40  ;;  %v11152_v46 = vadd.s32 %v2320_v51, %v2314_v15  ;;  %v15117_v40 = vld [vmem:[#allocation7_spill] sm:$0xff] }
 0x30b   :  { %vm11154_vm15 = vc.u32 %v2321_v33, %v2317_v36  ;;  %v15106_v33 = vld [vmem:[#allocation13_spill] sm:$0xff] }
 0x30c   :  { %v2065_v21 = vsel %vm2064_vm12, %v9095_v56, %v2061_v45  ;;  %v2289_v56 = vshrl.u32 %v11087_v10, 16  ;;  %v11132_v10 = vld [vmem:[%s14828_s4] ss:$2 sm:$0x3]  ;;  %15097 = vst [vmem:[#allocation40_spill] sm:$0xff] %v11140_v60  ;;  %v15118_v60 = vmov 0  }
 0x30d   :  { %v2068_v20 = vrot.slane %v2065_v21, 7  ;;  %15095 = vst [vmem:[#allocation38_spill] sm:$0xff] %v11132_v10  ;;  %v15116_v10 = vld [vmem:[#allocation6_spill] sm:$0xff] }
 0x30e   :  { %v11147_v42 = vadd.s32 %v2298_v17, %v2289_v56  ;;  %v15102_v56 = vld [vmem:[#allocation8_spill] sm:$0xff] }
 0x30f   :  { %v2070_v14 = vsel %vm14891_vm8, %v15094_v8, %v2068_v20  ;;  %v15103_v8 = vld [vmem:[#allocation10_spill] sm:$0xff] }
 0x310   :  { %v2072_v37 = vmul.f32 %v2070_v14, %v1863_v61  ;;  %15099 = vst [vmem:[#allocation42_spill] sm:$0xff] %v11147_v42  ;;  %v15113_v61 = vld [vmem:[#allocation18_spill] sm:$0xff] }
 0x312   :  { %v2074_v2 = vperm.slane %v2072_v37, 0  ;;  %v2075_v26 = vperm.slane %v2072_v37, 1  ;;  %v15105_v37 = vld [vmem:[#allocation12_spill] sm:$0xff] }
 0x314   :  { %v2078_v3 = vmul.f32 %v2074_v2, %v10853_v32  ;;  %v2079_v22 = vmul.f32 %v2075_v26, %v11016_v31  ;;  %v2086_v21 = vmul.f32 %v2074_v2, %v10667_v53  ;;  %v2087_v30 = vmul.f32 %v2075_v26, %v10851_v41  ;;  %v7788_v32 = vld [vmem:[%s14827_s3 + $0x1] ss:$2 sm:$0x3]  ;;  %v15104_v41 = vld [vmem:[#allocation11_spill] sm:$0xff] }
 0x315   :  { %v2088_v29 = vmul.f32 %v2074_v2, %v10675_v48  ;;  %v2089_v31 = vmul.f32 %v2075_v26, %v10864_v52  ;;  %v2090_v34 = vmul.f32 %v2074_v2, %v10681_v58  ;;  %v2091_v55 = vmul.f32 %v2075_v26, %v15102_v56 }
 0x316   :  { %v2082_v20 = vrot.slane %v2079_v22, 7  ;;  %v2092_v14 = vmul.f32 %v2074_v2, %v15103_v8  ;;  %v2093_v53 = vmul.f32 %v2075_v26, %v10870_v19  ;;  %v2094_v62 = vmul.f32 %v2074_v2, %v15104_v41  ;;  %v15107_v22 = vld [vmem:[#allocation14_spill] sm:$0xff]  ;;  %v15108_v19 = vld [vmem:[#allocation15_spill] sm:$0xff] }
 0x317   :  { %v2095_v48 = vmul.f32 %v2075_v26, %v10873_v25  ;;  %v2096_v15 = vmul.f32 %v2074_v2, %v15105_v37  ;;  %v2097_v36 = vmul.f32 %v2075_v26, %v10876_v1  ;;  %v2098_v52 = vmul.f32 %v2074_v2, %v15106_v33  ;;  %v15109_v25 = vld [vmem:[#allocation16_spill] sm:$0xff]  ;;  %v15111_v33 = vld [vmem:[#allocation19_spill] sm:$0xff] }
 0x318   :  { %v2083_v17 = vsel %vm14891_vm8, %v2078_v3, %v2082_v20  ;;  %v2099_v58 = vmul.f32 %v2075_v26, %v10878_v12  ;;  %v2100_v56 = vmul.f32 %v2074_v2, %v15107_v22  ;;  %v2101_v8 = vmul.f32 %v2075_v26, %v10916_v6  ;;  %v15110_v20 = vld [vmem:[#allocation17_spill] sm:$0xff] }
 0x319   :  { %v2085_v51 = vsub.f32 %v7788_v32, %v2083_v17  ;;  %v2102_v50 = vmul.f32 %v2074_v2, %v15108_v19  ;;  %v2103_v41 = vmul.f32 %v2075_v26, %v10923_v63  ;;  %v2104_v45 = vmul.f32 %v2074_v2, %v15109_v25  ;;  %v15112_v17 = vld [vmem:[#allocation20_spill] sm:$0xff] }
 0x31a   :  { %v2105_v3 = vmul.f32 %v2075_v26, %v10927_v9  ;;  %v2106_v37 = vmul.f32 %v2074_v2, %v15110_v20  ;;  %v2107_v1 = vmul.f32 %v2075_v26, %v10937_v18  ;;  %v2110_v32 = vmul.f32 %v2074_v2, %v15111_v33 }
 0x31b   :  { %v2112_v12 = vmul.f32 %v2074_v2, %v15112_v17  ;;  %v2108_v22 = vmul.f32 %v2074_v2, %v15113_v61  ;;  %v2114_v6 = vmul.f32 %v2074_v2, %v15114_v47  ;;  %v2115_v19 = vmul.f32 %v2075_v26, %v10969_v23 }
 0x31c   :  { %v2116_v63 = vmul.f32 %v2074_v2, %v15115_v44  ;;  %v2117_v25 = vmul.f32 %v2075_v26, %v10986_v13  ;;  %v2118_v9 = vmul.f32 %v2074_v2, %v15116_v10  ;;  %v2119_v20 = vmul.f32 %v2075_v26, %v10997_v35 }
 0x31d   :  { %v2120_v18 = vmul.f32 %v2074_v2, %v15117_v40  ;;  %v2109_v33 = vmul.f32 %v2075_v26, %v10948_v24  ;;  %v2121_v17 = vmul.f32 %v2075_v26, %v11005_v0  ;;  %v2123_v5 = vperm.slane %v2085_v51, 0 }
 0x31e   :  { %v2124_v61 = vperm.slane %v2085_v51, 1  ;;  %v2111_v47 = vmul.f32 %v2075_v26, %v10955_v4  ;;  %v2113_v23 = vmul.f32 %v2075_v26, %v10962_v54  ;;  %v11202_v13 = vsel %vm11154_vm15, 1, %v15118_v60 }
 0x31f   :  { %v2127_v35 = vadd.f32 %v2123_v5, %v2086_v21  ;;  %v2129_v40 = vadd.f32 %v2123_v5, %v2088_v29  ;;  %v2131_v24 = vadd.f32 %v2123_v5, %v2090_v34  ;;  %v2133_v0 = vadd.f32 %v2123_v5, %v2092_v14 }
 0x320   :  { %v2128_v44 = vadd.f32 %v2124_v61, %v2087_v30  ;;  %v2130_v2 = vadd.f32 %v2124_v61, %v2089_v31  ;;  %v2132_v11 = vadd.f32 %v2124_v61, %v2091_v55  ;;  %v2134_v16 = vadd.f32 %v2124_v61, %v2093_v53 }
 0x321   :  { %v2135_v51 = vadd.f32 %v2123_v5, %v2094_v62  ;;  %v2136_v57 = vadd.f32 %v2124_v61, %v2095_v48  ;;  %v2137_v4 = vadd.f32 %v2123_v5, %v2096_v15  ;;  %v2138_v43 = vadd.f32 %v2124_v61, %v2097_v36 }
 0x322   :  { %v2139_v54 = vadd.f32 %v2123_v5, %v2098_v52  ;;  %v2140_v26 = vadd.f32 %v2124_v61, %v2099_v58  ;;  %v2141_v39 = vadd.f32 %v2123_v5, %v2100_v56  ;;  %v2142_v7 = vadd.f32 %v2124_v61, %v2101_v8 }
 0x323   :  { %v2143_v60 = vadd.f32 %v2123_v5, %v2102_v50  ;;  %v2144_v42 = vadd.f32 %v2124_v61, %v2103_v41  ;;  %v2145_v59 = vadd.f32 %v2123_v5, %v2104_v45  ;;  %v2146_v10 = vadd.f32 %v2124_v61, %v2105_v3 }
 0x324   :  { %v2147_v21 = vadd.f32 %v2123_v5, %v2106_v37  ;;  %v2148_v30 = vadd.f32 %v2124_v61, %v2107_v1  ;;  %v2149_v29 = vadd.f32 %v2123_v5, %v2108_v22  ;;  %v2150_v31 = vadd.f32 %v2124_v61, %v2109_v33 }
 0x325   :  { %v2151_v34 = vadd.f32 %v2123_v5, %v2110_v32  ;;  %v2152_v55 = vadd.f32 %v2124_v61, %v2111_v47  ;;  %v2153_v14 = vadd.f32 %v2123_v5, %v2112_v12  ;;  %v2154_v53 = vadd.f32 %v2124_v61, %v2113_v23 }
 0x326   :  { %v2155_v62 = vadd.f32 %v2123_v5, %v2114_v6  ;;  %v2156_v48 = vadd.f32 %v2124_v61, %v2115_v19  ;;  %v2157_v15 = vadd.f32 %v2123_v5, %v2116_v63  ;;  %v2158_v36 = vadd.f32 %v2124_v61, %v2117_v25 }
 0x327   :  { %v2159_v52 = vadd.f32 %v2123_v5, %v2118_v9  ;;  %v2160_v58 = vadd.f32 %v2124_v61, %v2119_v20  ;;  %v2161_v56 = vadd.f32 %v2123_v5, %v2120_v18  ;;  %v2162_v8 = vadd.f32 %v2124_v61, %v2121_v17 }
 0x328   :  { %v11205_v50 = vmax.f32 %v2127_v35, 0.0  ;;  %v11207_v45 = vmax.f32 %v2128_v44, 0.0  ;;  %v11209_v41 = vmax.f32 %v2129_v40, 0.0  ;;  %v11211_v3 = vmax.f32 %v2130_v2, 0.0 }
 0x329   :  { %v11213_v37 = vmax.f32 %v2131_v24, 0.0  ;;  %v11215_v1 = vmax.f32 %v2132_v11, 0.0  ;;  %v11217_v32 = vmax.f32 %v2133_v0, 0.0  ;;  %v11219_v12 = vmax.f32 %v2134_v16, 0.0 }
 0x32a   :  { %15119 = vst [vmem:[#allocation8_spill] sm:$0xff] %v11205_v50  ;;  %v11221_v22 = vmax.f32 %v2135_v51, 0.0  ;;  %v11223_v5 = vmax.f32 %v2136_v57, 0.0  ;;  %v11225_v6 = vmax.f32 %v2137_v4, 0.0  ;;  %v11227_v19 = vmax.f32 %v2138_v43, 0.0 }
 0x32b   :  { %15120 = vst [vmem:[#allocation10_spill] sm:$0xff] %v11207_v45  ;;  %v11229_v63 = vmax.f32 %v2139_v54, 0.0  ;;  %v11231_v25 = vmax.f32 %v2140_v26, 0.0  ;;  %v11233_v9 = vmax.f32 %v2141_v39, 0.0  ;;  %v11235_v11 = vmax.f32 %v2142_v7, 0.0 }
 0x32c   :  { %15121 = vst [vmem:[#allocation11_spill] sm:$0xff] %v11209_v41  ;;  %v11237_v20 = vmax.f32 %v2143_v60, 0.0  ;;  %v11239_v16 = vmax.f32 %v2144_v42, 0.0  ;;  %v11241_v18 = vmax.f32 %v2145_v59, 0.0  ;;  %v11243_v57 = vmax.f32 %v2146_v10, 0.0 }
 0x32d   :  { %15122 = vst [vmem:[#allocation12_spill] sm:$0xff] %v11211_v3  ;;  %v11245_v33 = vmax.f32 %v2147_v21, 0.0  ;;  %v11247_v43 = vmax.f32 %v2148_v30, 0.0  ;;  %v11249_v17 = vmax.f32 %v2149_v29, 0.0  ;;  %v11251_v61 = vmax.f32 %v2150_v31, 0.0 }
 0x32e   :  { %15123 = vst [vmem:[#allocation13_spill] sm:$0xff] %v11213_v37  ;;  %v11253_v39 = vmax.f32 %v2151_v34, 0.0  ;;  %v11255_v47 = vmax.f32 %v2152_v55, 0.0  ;;  %v11257_v60 = vmax.f32 %v2153_v14, 0.0  ;;  %v11259_v42 = vmax.f32 %v2154_v53, 0.0  ;;  %v15156_v14 = vld [vmem:[#allocation34_spill] sm:$0xff] }
 0x32f   :  { %15124 = vst [vmem:[#allocation14_spill] sm:$0xff] %v11217_v32  ;;  %v11261_v59 = vmax.f32 %v2155_v62, 0.0  ;;  %v11263_v23 = vmax.f32 %v2156_v48, 0.0  ;;  %v11265_v10 = vmax.f32 %v2157_v15, 0.0  ;;  %v11267_v35 = vmax.f32 %v2158_v36, 0.0  ;;  %v15159_v36 = vld [vmem:[#allocation42_spill] sm:$0xff] }
 0x330   :  { %15125 = vst [vmem:[#allocation15_spill] sm:$0xff] %v11221_v22  ;;  %v11269_v44 = vmax.f32 %v2159_v52, 0.0  ;;  %v11271_v40 = vmax.f32 %v2160_v58, 0.0  ;;  %v11273_v2 = vmax.f32 %v2161_v56, 0.0  ;;  %v11275_v24 = vmax.f32 %v2162_v8, 0.0 }
 0x331   :  { %15126 = vst [vmem:[#allocation16_spill] sm:$0xff] %v11223_v5  ;;  %v2326_v0 = vadd.s32 %v11202_v13, %v11152_v46  ;;  %v15152_v51 = vand.u32 65535, %v11046_v27  ;;  %v15154_v7 = vshrl.u32 %v11046_v27, 16  ;;  %v15155_v30 = vshrl.u32 %v11126_v38, 3 }
 0x332   :  { %15127 = vst [vmem:[#allocation17_spill] sm:$0xff] %v11225_v6  ;;  %v2318_v31 = vshrl.u32 %v11110_v28, 16  ;;  %v2366_v34 = vand.u32 65535, %v11049_v49  ;;  %v2367_v55 = vshrl.u32 %v11049_v49, 16  ;;  %v15157_v46 = vshrl.u32 %v15156_v14, 16 }
 0x333   :  { %15128 = vst [vmem:[#allocation19_spill] sm:$0xff] %v11227_v19  ;;  %v2340_v4 = vmul.u32 43691, %v15152_v51  ;;  %v15153_v54 = vmov %v15152_v51  ;;  %v2342_v21 = vmul.u32 43691, %v15154_v7  ;;  %v2272_v29 = vmul.u32 12, %v15155_v30  ;;  %v15160_v51 = vld [vmem:[#allocation26_spill] sm:$0xff] }
 0x334   :  { %15129 = vst [vmem:[#allocation20_spill] sm:$0xff] %v11229_v63  ;;  %v2341_v26 = vmul.u32 43690, %v15153_v54  ;;  %v2327_v13 = vadd.s32 %v2326_v0, %v15157_v46  ;;  %v15158_v53 = vmov %v15154_v7  ;;  %v2300_v52 = vshrl.u32 %v15159_v36, 3 }
 0x335   :  { %15130 = vst [vmem:[#allocation18_spill] sm:$0xff] %v11233_v9  ;;  %v2343_v62 = vmul.u32 43690, %v15158_v53  ;;  %v2346_v15 = vshll.u32 %v2342_v21, 16  ;;  %v2369_v58 = vmul.u32 43691, %v2366_v34  ;;  %v2370_v56 = vmul.u32 43690, %v2366_v34  ;;  %v15174_v9 = vld [vmem:[#allocation37_spill] sm:$0xff] }
 0x336   :  { %15131 = vst [vmem:[#allocation21_spill] sm:$0xff] %v11235_v11  ;;  %v2344_v48 = vshll.u32 %v2341_v26, 16  ;;  %v2371_v38 = vmul.u32 43691, %v2367_v55  ;;  %v2345_v8 = vshrl.u32 %v2341_v26, 16  ;;  %v2395_v54 = vand.u32 65535, %v15160_v51 }
 0x337   :  { %15132 = vst [vmem:[#allocation22_spill] sm:$0xff] %v11237_v20  ;;  %v15161_v7 = vmov 0   ;;  %v2373_v14 = vshll.u32 %v2370_v56, 16  ;;  %v2328_v46 = vadd.s32 %v2327_v13, %v2318_v31  ;;  %v2396_v34 = vshrl.u32 %v15160_v51, 16  ;;  %v15170_v20 = vld [vmem:[#allocation32_spill] sm:$0xff] }
 0x338   :  { %15133 = vst [vmem:[#allocation6_spill] sm:$0xff] %v11239_v16  ;;  %vm2348_vm1 = vc.u32 %v2340_v4, %v2344_v48  ;;  %v2350_v28 = vadd.s32 %v2344_v48, %v2340_v4  ;;  %v2375_v0 = vshll.u32 %v2371_v38, 16  ;;  %v2398_v48 = vmul.u32 43691, %v2395_v54 }
 0x339   :  { %15134 = vst [vmem:[#allocation7_spill] sm:$0xff] %v11241_v18  ;;  %v2349_v30 = vsel %vm2348_vm1, 1, %v15161_v7  ;;  %vm2377_vm3 = vc.u32 %v2369_v58, %v2373_v14  ;;  %v2379_v36 = vadd.s32 %v2373_v14, %v2369_v58  ;;  %v2376_v13 = vshrl.u32 %v2371_v38, 16  ;;  %v15163_v14 = vld [vmem:[#allocation27_spill] sm:$0xff] }
 0x33a   :  { %15135 = vst [vmem:[#allocation43_spill] sm:$0xff] %v11243_v57  ;;  %v2351_v53 = vadd.s32 %v2349_v30, %v2343_v62  ;;  %vm2352_vm2 = vc.u32 %v2350_v28, %v2346_v15  ;;  %v2378_v4 = vsel %vm2377_vm3, 1, %v15161_v7  ;;  %v2401_v58 = vmul.u32 43690, %v2396_v34 }
 0x33b   :  { %15136 = vst [vmem:[#allocation44_spill] sm:$0xff] %v11245_v33  ;;  %vm2381_vm4 = vc.u32 %v2379_v36, %v2375_v0  ;;  %v2685_v63 = vand.u32 65535, %v15174_v9 }
 0x33c   :  { %15137 = vst [vmem:[#allocation45_spill] sm:$0xff] %v11247_v43  ;;  %v2382_v62 = vsel %vm2381_vm4, 1, %v15161_v7 }
 0x33d   :  { %15138 = vst [vmem:[#allocation46_spill] sm:$0xff] %v11249_v17 }
 0x33e   :  { %15139 = vst [vmem:[#allocation47_spill] sm:$0xff] %v11251_v61 }
 0x33f   :  { %15140 = vst [vmem:[#allocation48_spill] sm:$0xff] %v11253_v39  ;;  %v2400_v39 = vmul.u32 43691, %v2396_v34 }
 0x340   :  { %15141 = vst [vmem:[#allocation49_spill] sm:$0xff] %v11255_v47 }
 0x341   :  { %15142 = vst [vmem:[#allocation50_spill] sm:$0xff] %v11257_v60  ;;  %v2404_v30 = vshll.u32 %v2400_v39, 16 }
 0x342   :  { %15143 = vst [vmem:[#allocation51_spill] sm:$0xff] %v11259_v42 }
 0x343   :  { %15144 = vst [vmem:[#allocation52_spill] sm:$0xff] %v11261_v59  ;;  %v2353_v59 = vsel %vm2352_vm2, 1, %v15161_v7 }
 0x344   :  { %15145 = vst [vmem:[#allocation53_spill] sm:$0xff] %v11263_v23  ;;  %v2355_v26 = vadd.s32 %v2353_v59, %v2351_v53  ;;  %v2301_v59 = vmul.u32 12, %v2300_v52  ;;  %v2424_v53 = vand.u32 65535, %v15163_v14 }
 0x345   :  { %15146 = vst [vmem:[#allocation54_spill] sm:$0xff] %v11265_v10  ;;  %v2347_v10 = vshrl.u32 %v2342_v21, 16 }
 0x346   :  { %15147 = vst [vmem:[#allocation55_spill] sm:$0xff] %v11267_v35  ;;  %v15162_v35 = vld [vmem:[#allocation23_spill] sm:$0xff]  ;;  %v2356_v21 = vadd.s32 %v2355_v26, %v2345_v8  ;;  %v2427_v38 = vmul.u32 43691, %v2424_v53  ;;  %v2428_v8 = vmul.u32 43690, %v2424_v53 }
 0x347   :  { %15148 = vst [vmem:[#allocation56_spill] sm:$0xff] %v11269_v44  ;;  %v2372_v44 = vmul.u32 43690, %v2367_v55  ;;  %v2399_v55 = vmul.u32 43690, %v2395_v54  ;;  %v11301_v31 = vsub.s32 %v15162_v35, %v2272_v29 }
 0x348   :  { %15149 = vst [vmem:[#allocation57_spill] sm:$0xff] %v11271_v40  ;;  %v2374_v40 = vshrl.u32 %v2370_v56, 16  ;;  %v2329_v56 = vshrl.u32 %v2328_v46, 3  ;;  %v2357_v0 = vadd.s32 %v2356_v21, %v2347_v10 }
 0x349   :  { %15150 = vst [vmem:[#allocation58_spill] sm:$0xff] %v11273_v2  ;;  %v2380_v60 = vadd.s32 %v2378_v4, %v2372_v44  ;;  %v2402_v28 = vshll.u32 %v2399_v55, 16  ;;  %v2425_v44 = vshrl.u32 %v15163_v14, 16  ;;  %v2403_v35 = vshrl.u32 %v2399_v55, 16 }
 0x34a   :  { %15151 = vst [vmem:[#allocation59_spill] sm:$0xff] %v11275_v24  ;;  %v2431_v4 = vshll.u32 %v2428_v8, 16  ;;  %v2330_v17 = vmul.u32 12, %v2329_v56  ;;  %v2358_v10 = vshrl.u32 %v2357_v0, 3  ;;  %v15166_v56 = vld [vmem:[#allocation25_spill] sm:$0xff] }
 0x34b   :  { %v2384_v15 = vadd.s32 %v2382_v62, %v2380_v60  ;;  %vm2406_vm5 = vc.u32 %v2398_v48, %v2402_v28  ;;  %v2408_v36 = vadd.s32 %v2402_v28, %v2398_v48  ;;  %v2429_v34 = vmul.u32 43691, %v2425_v44  ;;  %v15164_v62 = vld [vmem:[#allocation28_spill] sm:$0xff] }
 0x34c   :  { %v2407_v29 = vsel %vm2406_vm5, 1, %v15161_v7  ;;  %v2430_v46 = vmul.u32 43690, %v2425_v44  ;;  %v2453_v23 = vand.u32 65535, %v15164_v62  ;;  %v15165_v48 = vld [vmem:[#allocation24_spill] sm:$0xff]  ;;  %vm2435_vm7 = vc.u32 %v2427_v38, %v2431_v4 }
 0x34d   :  { %v2385_v54 = vadd.s32 %v2384_v15, %v2374_v40  ;;  %v2409_v60 = vadd.s32 %v2407_v29, %v2401_v58  ;;  %vm2410_vm6 = vc.u32 %v2408_v36, %v2404_v30  ;;  %v2433_v21 = vshll.u32 %v2429_v34, 16 }
 0x34e   :  { %v2411_v52 = vsel %vm2410_vm6, 1, %v15161_v7  ;;  %v11310_v55 = vsub.s32 %v15165_v48, %v2301_v59  ;;  %v2405_v15 = vshrl.u32 %v2400_v39, 16  ;;  %v2437_v28 = vadd.s32 %v2431_v4, %v2427_v38  ;;  %v15167_v48 = vld [vmem:[#allocation29_spill] sm:$0xff] }
 0x34f   :  { %v2386_v26 = vadd.s32 %v2385_v54, %v2376_v13  ;;  %v2413_v40 = vadd.s32 %v2411_v52, %v2409_v60  ;;  %v2436_v30 = vsel %vm2435_vm7, 1, %v15161_v7  ;;  %v2454_v53 = vshrl.u32 %v15164_v62, 16 }
 0x350   :  { %v2438_v44 = vadd.s32 %v2436_v30, %v2430_v46  ;;  %vm2439_vm9 = vc.u32 %v2437_v28, %v2433_v21  ;;  %v2456_v54 = vmul.u32 43691, %v2453_v23  ;;  %v2457_v36 = vmul.u32 43690, %v2453_v23 }
 0x351   :  { %v2387_v13 = vshrl.u32 %v2386_v26, 3  ;;  %v2414_v58 = vadd.s32 %v2413_v40, %v2403_v35  ;;  %v11315_v0 = vsub.s32 %v15166_v56, %v2330_v17  ;;  %v2359_v29 = vmul.u32 12, %v2358_v10 }
 0x352   :  { %v2440_v59 = vsel %vm2439_vm9, 1, %v15161_v7  ;;  %v2458_v60 = vmul.u32 43691, %v2454_v53  ;;  %v2432_v39 = vshrl.u32 %v2428_v8, 16  ;;  %v2459_v38 = vmul.u32 43690, %v2454_v53 }
 0x353   :  { %v2442_v52 = vadd.s32 %v2440_v59, %v2438_v44  ;;  %v2460_v26 = vshll.u32 %v2457_v36, 16  ;;  %v2388_v35 = vmul.u32 12, %v2387_v13  ;;  %v2434_v4 = vshrl.u32 %v2429_v34, 16 }
 0x354   :  { %v2462_v40 = vshll.u32 %v2458_v60, 16  ;;  %v2482_v33 = vand.u32 65535, %v15167_v48  ;;  %v2415_v46 = vadd.s32 %v2414_v58, %v2405_v15  ;;  %v2483_v23 = vshrl.u32 %v15167_v48, 16 }
 0x355   :  { %vm2464_vm10 = vc.u32 %v2456_v54, %v2460_v26  ;;  %v2466_v21 = vadd.s32 %v2460_v26, %v2456_v54  ;;  %v2461_v17 = vshrl.u32 %v2457_v36, 16  ;;  %v2443_v56 = vadd.s32 %v2442_v52, %v2432_v39  ;;  %v15168_v39 = vld [vmem:[#allocation30_spill] sm:$0xff] }
 0x356   :  { %v2465_v10 = vsel %vm2464_vm10, 1, %v15161_v7  ;;  %v2485_v28 = vmul.u32 43691, %v2482_v33  ;;  %v2486_v30 = vmul.u32 43690, %v2482_v33  ;;  %v2487_v53 = vmul.u32 43691, %v2483_v23 }
 0x357   :  { %v2467_v8 = vadd.s32 %v2465_v10, %v2459_v38  ;;  %vm2468_vm11 = vc.u32 %v2466_v21, %v2462_v40  ;;  %v11322_v13 = vsub.s32 %v11046_v27, %v2359_v29  ;;  %v2488_v44 = vmul.u32 43690, %v2483_v23 }
 0x358   :  { %v2469_v34 = vsel %vm2468_vm11, 1, %v15161_v7  ;;  %v2489_v15 = vshll.u32 %v2486_v30, 16  ;;  %v2416_v58 = vshrl.u32 %v2415_v46, 3  ;;  %v2463_v54 = vshrl.u32 %v2458_v60, 16 }
 0x359   :  { %v2471_v59 = vadd.s32 %v2469_v34, %v2467_v8  ;;  %v2491_v26 = vshll.u32 %v2487_v53, 16  ;;  %v11326_v36 = vsub.s32 %v11049_v49, %v2388_v35  ;;  %v2511_v52 = vand.u32 65535, %v15168_v39 }
 0x35a   :  { %vm2493_vm12 = vc.u32 %v2485_v28, %v2489_v15  ;;  %v2495_v33 = vadd.s32 %v2489_v15, %v2485_v28  ;;  %v2444_v38 = vadd.s32 %v2443_v56, %v2434_v4  ;;  %v2512_v29 = vshrl.u32 %v15168_v39, 16  ;;  %v15169_v56 = vld [vmem:[#allocation31_spill] sm:$0xff] }
 0x35b   :  { %v2472_v40 = vadd.s32 %v2471_v59, %v2461_v17  ;;  %v2494_v27 = vsel %vm2493_vm12, 1, %v15161_v7  ;;  %v2514_v23 = vmul.u32 43691, %v2511_v52  ;;  %v2515_v46 = vmul.u32 43690, %v2511_v52 }
 0x35c   :  { %v2496_v21 = vadd.s32 %v2494_v27, %v2488_v44  ;;  %vm2497_vm13 = vc.u32 %v2495_v33, %v2491_v26  ;;  %v2417_v60 = vmul.u32 12, %v2416_v58  ;;  %v2516_v49 = vmul.u32 43691, %v2512_v29 }
 0x35d   :  { %v2473_v10 = vadd.s32 %v2472_v40, %v2463_v54  ;;  %v2498_v8 = vsel %vm2497_vm13, 1, %v15161_v7  ;;  %v2490_v35 = vshrl.u32 %v2486_v30, 16  ;;  %v2517_v28 = vmul.u32 43690, %v2512_v29 }
 0x35e   :  { %v2500_v34 = vadd.s32 %v2498_v8, %v2496_v21  ;;  %v2518_v15 = vshll.u32 %v2515_v46, 16  ;;  %v2445_v42 = vshrl.u32 %v2444_v38, 3  ;;  %v2492_v4 = vshrl.u32 %v2487_v53, 16 }
 0x35f   :  { %v2520_v17 = vshll.u32 %v2516_v49, 16  ;;  %v2540_v59 = vand.u32 65535, %v15169_v56  ;;  %v2519_v47 = vshrl.u32 %v2515_v46, 16  ;;  %v2541_v26 = vshrl.u32 %v15169_v56, 16 }
 0x360   :  { %vm2522_vm14 = vc.u32 %v2514_v23, %v2518_v15  ;;  %v2524_v44 = vadd.s32 %v2518_v15, %v2514_v23  ;;  %v2474_v33 = vshrl.u32 %v2473_v10, 3  ;;  %v2501_v40 = vadd.s32 %v2500_v34, %v2490_v35 }
 0x361   :  { %v2523_v58 = vsel %vm2522_vm14, 1, %v15161_v7  ;;  %v2543_v54 = vmul.u32 43691, %v2540_v59  ;;  %v2544_v52 = vmul.u32 43690, %v2540_v59  ;;  %v2545_v27 = vmul.u32 43691, %v2541_v26 }
 0x362   :  { %v2525_v30 = vadd.s32 %v2523_v58, %v2517_v28  ;;  %vm2526_vm15 = vc.u32 %v2524_v44, %v2520_v17  ;;  %v11336_v38 = vsub.s32 %v15160_v51, %v2417_v60  ;;  %v2546_v29 = vmul.u32 43690, %v2541_v26 }
 0x363   :  { %v2527_v53 = vsel %vm2526_vm15, 1, %v15161_v7  ;;  %v2547_v21 = vshll.u32 %v2544_v52, 16  ;;  %v2446_v46 = vmul.u32 12, %v2445_v42  ;;  %v2521_v23 = vshrl.u32 %v2516_v49, 16 }
 0x364   :  { %v2529_v8 = vadd.s32 %v2527_v53, %v2525_v30  ;;  %v2549_v15 = vshll.u32 %v2545_v27, 16  ;;  %v2475_v10 = vmul.u32 12, %v2474_v33  ;;  %v2569_v59 = vand.u32 65535, %v15170_v20 }
 0x365   :  { %vm2551_vm1 = vc.u32 %v2543_v54, %v2547_v21  ;;  %v2553_v18 = vadd.s32 %v2547_v21, %v2543_v54  ;;  %v2502_v35 = vadd.s32 %v2501_v40, %v2492_v4  ;;  %v2570_v51 = vshrl.u32 %v15170_v20, 16 }
 0x366   :  { %v2530_v34 = vadd.s32 %v2529_v8, %v2519_v47  ;;  %v2552_v28 = vsel %vm2551_vm1, 1, %v15161_v7  ;;  %v2572_v17 = vmul.u32 43691, %v2569_v59  ;;  %v2573_v44 = vmul.u32 43690, %v2569_v59 }
 0x367   :  { %v2554_v60 = vadd.s32 %v2552_v28, %v2546_v29  ;;  %vm2555_vm2 = vc.u32 %v2553_v18, %v2549_v15  ;;  %v11343_v42 = vsub.s32 %v15163_v14, %v2446_v46  ;;  %v2548_v49 = vshrl.u32 %v2544_v52, 16  ;;  %v15171_v29 = vld [vmem:[#allocation33_spill] sm:$0xff] }
 0x368   :  { %v2556_v26 = vsel %vm2555_vm2, 1, %v15161_v7  ;;  %v2574_v33 = vmul.u32 43691, %v2570_v51  ;;  %v11347_v58 = vsub.s32 %v15164_v62, %v2475_v10  ;;  %v2575_v47 = vmul.u32 43690, %v2570_v51 }
 0x369   :  { %v2558_v4 = vadd.s32 %v2556_v26, %v2554_v60  ;;  %v2576_v54 = vshll.u32 %v2573_v44, 16  ;;  %v2503_v40 = vshrl.u32 %v2502_v35, 3  ;;  %v2550_v30 = vshrl.u32 %v2545_v27, 16 }
 0x36a   :  { %v2578_v53 = vshll.u32 %v2574_v33, 16  ;;  %v2598_v18 = vand.u32 65535, %v15171_v29  ;;  %v2531_v21 = vadd.s32 %v2530_v34, %v2521_v23  ;;  %v2599_v14 = vshrl.u32 %v15171_v29, 16 }
 0x36b   :  { %vm2580_vm3 = vc.u32 %v2572_v17, %v2576_v54  ;;  %v2582_v8 = vadd.s32 %v2576_v54, %v2572_v17  ;;  %v2559_v52 = vadd.s32 %v2558_v4, %v2548_v49  ;;  %v2577_v62 = vshrl.u32 %v2573_v44, 16  ;;  %v15172_v4 = vld [vmem:[#allocation35_spill] sm:$0xff] }
 0x36c   :  { %v2581_v46 = vsel %vm2580_vm3, 1, %v15161_v7  ;;  %v2601_v15 = vmul.u32 43691, %v2598_v18  ;;  %v2602_v59 = vmul.u32 43690, %v2598_v18  ;;  %v2603_v28 = vmul.u32 43691, %v2599_v14 }
 0x36d   :  { %v2583_v10 = vadd.s32 %v2581_v46, %v2575_v47  ;;  %vm2584_vm4 = vc.u32 %v2582_v8, %v2578_v53  ;;  %v2504_v51 = vmul.u32 12, %v2503_v40  ;;  %v2604_v35 = vmul.u32 43690, %v2599_v14 }
 0x36e   :  { %v2585_v27 = vsel %vm2584_vm4, 1, %v15161_v7  ;;  %v2605_v60 = vshll.u32 %v2602_v59, 16  ;;  %v2532_v26 = vshrl.u32 %v2531_v21, 3  ;;  %v2579_v23 = vshrl.u32 %v2574_v33, 16 }
 0x36f   :  { %v2587_v34 = vadd.s32 %v2585_v27, %v2583_v10  ;;  %v2607_v17 = vshll.u32 %v2603_v28, 16  ;;  %v2560_v54 = vadd.s32 %v2559_v52, %v2550_v30  ;;  %v2627_v61 = vand.u32 65535, %v15172_v4 }
 0x370   :  { %vm2609_vm5 = vc.u32 %v2601_v15, %v2605_v60  ;;  %v2611_v49 = vadd.s32 %v2605_v60, %v2601_v15  ;;  %v2606_v18 = vshrl.u32 %v2602_v59, 16  ;;  %v2628_v47 = vshrl.u32 %v15172_v4, 16  ;;  %v15173_v60 = vld [vmem:[#allocation36_spill] sm:$0xff] }
 0x371   :  { %v2588_v43 = vadd.s32 %v2587_v34, %v2577_v62  ;;  %v2610_v44 = vsel %vm2609_vm5, 1, %v15161_v7  ;;  %v2630_v53 = vmul.u32 43691, %v2627_v61  ;;  %v2631_v8 = vmul.u32 43690, %v2627_v61 }
 0x372   :  { %v2612_v40 = vadd.s32 %v2610_v44, %v2604_v35  ;;  %vm2613_vm6 = vc.u32 %v2611_v49, %v2607_v17  ;;  %v11357_v21 = vsub.s32 %v15167_v48, %v2504_v51  ;;  %v11359_v33 = vmul.u32 12, %v2532_v26 }
 0x373   :  { %v2614_v30 = vsel %vm2613_vm6, 1, %v15161_v7  ;;  %v2632_v14 = vmul.u32 43691, %v2628_v47  ;;  %v2608_v52 = vshrl.u32 %v2603_v28, 16  ;;  %v2633_v15 = vmul.u32 43690, %v2628_v47 }
 0x374   :  { %v2616_v46 = vadd.s32 %v2614_v30, %v2612_v40  ;;  %v2634_v59 = vshll.u32 %v2631_v8, 16  ;;  %v2561_v62 = vshrl.u32 %v2560_v54, 3  ;;  %v2589_v10 = vadd.s32 %v2588_v43, %v2579_v23 }
 0x375   :  { %v2636_v27 = vshll.u32 %v2632_v14, 16  ;;  %v2656_v35 = vand.u32 65535, %v15173_v60  ;;  %v2657_v48 = vshrl.u32 %v15173_v60, 16  ;;  %v2635_v51 = vshrl.u32 %v2631_v8, 16 }
 0x376   :  { %v2617_v34 = vadd.s32 %v2616_v46, %v2606_v18  ;;  %vm2638_vm7 = vc.u32 %v2630_v53, %v2634_v59  ;;  %v2640_v61 = vadd.s32 %v2634_v59, %v2630_v53  ;;  %v2562_v40 = vmul.u32 12, %v2561_v62 }
 0x377   :  { %v2639_v26 = vsel %vm2638_vm7, 1, %v15161_v7  ;;  %v2659_v17 = vmul.u32 43691, %v2656_v35  ;;  %v2660_v49 = vmul.u32 43690, %v2656_v35  ;;  %v2661_v47 = vmul.u32 43691, %v2657_v48 }
 0x378   :  { %v2618_v44 = vadd.s32 %v2617_v34, %v2608_v52  ;;  %v2641_v28 = vadd.s32 %v2639_v26, %v2633_v15  ;;  %vm2642_vm9 = vc.u32 %v2640_v61, %v2636_v27  ;;  %v2662_v23 = vmul.u32 43690, %v2657_v48 }
 0x379   :  { %v2643_v43 = vsel %vm2642_vm9, 1, %v15161_v7  ;;  %v2663_v54 = vshll.u32 %v2660_v49, 16  ;;  %v2590_v30 = vshrl.u32 %v2589_v10, 3  ;;  %v2637_v18 = vshrl.u32 %v2632_v14, 16 }
 0x37a   :  { %v2645_v46 = vadd.s32 %v2643_v43, %v2641_v28  ;;  %v2665_v53 = vshll.u32 %v2661_v47, 16  ;;  %v2619_v59 = vshrl.u32 %v2618_v44, 3  ;;  %v2664_v35 = vshrl.u32 %v2660_v49, 16 }
 0x37b   :  { %vm2667_vm10 = vc.u32 %v2659_v17, %v2663_v54  ;;  %v2669_v8 = vadd.s32 %v2663_v54, %v2659_v17  ;;  %v2686_v15 = vshrl.u32 %v15174_v9, 16  ;;  %v2688_v27 = vmul.u32 43691, %v2685_v63  ;;  %v15175_v54 = vld [vmem:[#allocation40_spill] sm:$0xff] }
 0x37c   :  { %v2646_v57 = vadd.s32 %v2645_v46, %v2635_v51  ;;  %v2668_v52 = vsel %vm2667_vm10, 1, %v15161_v7  ;;  %v2689_v34 = vmul.u32 43690, %v2685_v63  ;;  %v2591_v61 = vmul.u32 12, %v2590_v30 }
 0x37d   :  { %v2670_v62 = vadd.s32 %v2668_v52, %v2662_v23  ;;  %vm2671_vm11 = vc.u32 %v2669_v8, %v2665_v53  ;;  %v2690_v48 = vmul.u32 43691, %v2686_v15  ;;  %v2666_v26 = vshrl.u32 %v2661_v47, 16 }
 0x37e   :  { %v2647_v10 = vadd.s32 %v2646_v57, %v2637_v18  ;;  %v2672_v14 = vsel %vm2671_vm11, 1, %v15161_v7  ;;  %v2691_v17 = vmul.u32 43690, %v2686_v15  ;;  %v2692_v28 = vshll.u32 %v2689_v34, 16 }
 0x37f   :  { %v2674_v44 = vadd.s32 %v2672_v14, %v2670_v62  ;;  %v2620_v43 = vmul.u32 12, %v2619_v59  ;;  %v2694_v49 = vshll.u32 %v2690_v48, 16  ;;  %v2714_v46 = vand.u32 65535, %v15175_v54 }
 0x380   :  { %v2648_v51 = vshrl.u32 %v2647_v10, 3  ;;  %vm2696_vm12 = vc.u32 %v2688_v27, %v2692_v28  ;;  %v2698_v23 = vadd.s32 %v2692_v28, %v2688_v27  ;;  %v2715_v53 = vshrl.u32 %v15175_v54, 16 }
 0x381   :  { %v2675_v16 = vadd.s32 %v2674_v44, %v2664_v35  ;;  %v2693_v63 = vshrl.u32 %v2689_v34, 16  ;;  %v2697_v57 = vsel %vm2696_vm12, 1, %v15161_v7  ;;  %v2717_v30 = vmul.u32 43691, %v2714_v46 }
 0x382   :  { %v2718_v18 = vmul.u32 43690, %v2714_v46  ;;  %v2699_v47 = vadd.s32 %v2697_v57, %v2691_v17  ;;  %vm2700_vm13 = vc.u32 %v2698_v23, %v2694_v49  ;;  %v2719_v52 = vmul.u32 43691, %v2715_v53 }
 0x383   :  { %v2676_v8 = vadd.s32 %v2675_v16, %v2666_v26  ;;  %v2695_v15 = vshrl.u32 %v2690_v48, 16  ;;  %v2701_v59 = vsel %vm2700_vm13, 1, %v15161_v7  ;;  %v2720_v62 = vmul.u32 43690, %v2715_v53 }
 0x384   :  { %v2721_v10 = vshll.u32 %v2718_v18, 16  ;;  %v2649_v14 = vmul.u32 12, %v2648_v51  ;;  %v2703_v44 = vadd.s32 %v2701_v59, %v2699_v47  ;;  %v2723_v27 = vshll.u32 %v2719_v52, 16 }
 0x385   :  { %v2677_v35 = vshrl.u32 %v2676_v8, 3  ;;  %v11376_v34 = vsub.s32 %v15168_v39, %v11359_v33  ;;  %v11379_v28 = vsub.s32 %v15169_v56, %v2562_v40  ;;  %v11382_v26 = vsub.s32 %v15170_v20, %v2591_v61  ;;  %v15176_v20 = vld [vmem:[#allocation41_spill] sm:$0xff] }
 0x386   :  { %vm2725_vm14 = vc.u32 %v2717_v30, %v2721_v10  ;;  %v2727_v16 = vadd.s32 %v2721_v10, %v2717_v30  ;;  %v2704_v17 = vadd.s32 %v2703_v44, %v2693_v63  ;;  %v11386_v51 = vsub.s32 %v15171_v29, %v2620_v43 }
 0x387   :  { %v2678_v48 = vmul.u32 12, %v2677_v35  ;;  %v2726_v49 = vsel %vm2725_vm14, 1, %v15161_v7  ;;  %v2722_v46 = vshrl.u32 %v2718_v18, 16  ;;  %v11389_v39 = vsub.s32 %v15172_v4, %v2649_v14 }
 0x388   :  { %v2728_v23 = vadd.s32 %v2726_v49, %v2720_v62  ;;  %vm2729_vm15 = vc.u32 %v2727_v16, %v2723_v27  ;;  %v2705_v56 = vadd.s32 %v2704_v17, %v2695_v15  ;;  %v2724_v33 = vshrl.u32 %v2719_v52, 16 }
 0x389   :  { %v2730_v40 = vsel %vm2729_vm15, 1, %v15161_v7  ;;  %vm2740_vm1 = vcmp.ne.s32.totalorder %v15176_v20, 0  ;;  %vm2741_vm2 = vcmp.ne.s32.totalorder %v11301_v31, 0  ;;  %vm2742_vm3 = vcmp.ne.s32.totalorder %v11310_v55, 0 }
 0x38a   :  { %v2732_v53 = vadd.s32 %v2730_v40, %v2728_v23  ;;  %v11396_v29 = vsub.s32 %v15173_v60, %v2678_v48  ;;  %v2706_v61 = vshrl.u32 %v2705_v56, 3  ;;  %vm2743_vm4 = vcmp.ne.s32.totalorder %v11315_v0, 0 }
 0x38b   :  { %vm2744_vm5 = vcmp.ne.s32.totalorder %v11322_v13, 0  ;;  %vm2758_vm12 = vcmp.lt.s32.totalorder %v15176_v20, 0  ;;  %vm2759_vm13 = vcmp.lt.s32.totalorder %v11301_v31, 0  ;;  %vm2760_vm14 = vcmp.lt.s32.totalorder %v11310_v55, 0 }
 0x38c   :  { %v2733_v4 = vadd.s32 %v2732_v53, %v2722_v46  ;;  %v2707_v7 = vmul.u32 12, %v2706_v61  ;;  %vm2761_vm15 = vcmp.lt.s32.totalorder %v11315_v0, 0  ;;  %vm11411_vm8 = vmand %vm2758_vm12, %vm2740_vm1  ;;  %vm2762_vm10 = vcmp.lt.s32.totalorder %v11322_v13, 0 }
 0x38d   :  { %vm11423_vm9 = vmand %vm2759_vm13, %vm2741_vm2  ;;  %vm2763_vm7 = vcmp.lt.s32.totalorder %v11326_v36, 0  ;;  %vm2764_vm2 = vcmp.lt.s32.totalorder %v11336_v38, 0  ;;  %vm15187_vm1 = vcmp.ne.s32.totalorder %v11326_v36, 0  ;;  %v2794_v59 = vadd.s32 12, %v15176_v20 }
 0x38e   :  { %v2734_v60 = vadd.s32 %v2733_v4, %v2724_v33  ;;  %v11416_v63 = vsub.s32 %v15174_v9, %v2707_v7  ;;  %vm11432_vm0 = vmand %vm2760_vm14, %vm2742_vm3  ;;  %v2795_v62 = vadd.s32 12, %v11301_v31  ;;  %v2796_v10 = vadd.s32 12, %v11310_v55 }
 0x38f   :  { %vm11444_vm12 = vmand %vm2761_vm15, %vm2743_vm4  ;;  %vm2770_vm15 = vcmp.lt.s32.totalorder %v11382_v26, 0  ;;  %v2797_v44 = vadd.s32 12, %v11315_v0  ;;  %v2798_v27 = vadd.s32 12, %v11322_v13  ;;  %v2799_v16 = vadd.s32 12, %v11326_v36 }
 0x390   :  { %v2735_v30 = vshrl.u32 %v2734_v60, 3  ;;  %vm11456_vm6 = vmand %vm2762_vm10, %vm2744_vm5  ;;  %vm15190_vm10 = vcmp.ne.s32.totalorder %v11336_v38, 0  ;;  %v2800_v48 = vadd.s32 12, %v11336_v38  ;;  %v2801_v17 = vadd.s32 12, %v11343_v42 }
 0x391   :  { %vm11469_vm13 = vmand %vm2763_vm7, %vm15187_vm1  ;;  %vm15193_vm7 = vcmp.ne.s32.totalorder %v11343_v42, 0  ;;  %vm15194_vm1 = vcmp.lt.s32.totalorder %v11343_v42, 0  ;;  %v2802_v49 = vadd.s32 12, %v11347_v58  ;;  %v2803_v46 = vadd.s32 12, %v11357_v21 }
 0x392   :  { %v2736_v8 = vmul.u32 12, %v2735_v30  ;;  %vm11478_vm4 = vmand %vm2764_vm2, %vm15190_vm10  ;;  %vm15197_vm2 = vcmp.ne.s32.totalorder %v11347_v58, 0  ;;  %vm15198_vm10 = vcmp.lt.s32.totalorder %v11347_v58, 0  ;;  %v2804_v56 = vadd.s32 12, %v11376_v34 }
 0x393   :  { %vm11490_vm5 = vmand %vm15194_vm1, %vm15193_vm7  ;;  %vm15201_vm7 = vcmp.ne.s32.totalorder %v11357_v21, 0  ;;  %vm15202_vm1 = vcmp.lt.s32.totalorder %v11357_v21, 0  ;;  %v2805_v33 = vadd.s32 12, %v11379_v28  ;;  %v2806_v40 = vadd.s32 12, %v11382_v26 }
 0x394   :  { %v2737_v14 = vsub.s32 %v15175_v54, %v2736_v8  ;;  %vm11501_vm11 = vmand %vm15198_vm10, %vm15197_vm2  ;;  %v2807_v53 = vadd.s32 12, %v11386_v51  ;;  %vm15205_vm2 = vcmp.ne.s32.totalorder %v11376_v34, 0  ;;  %vm15206_vm10 = vcmp.lt.s32.totalorder %v11376_v34, 0 }
 0x395   :  { %vm11513_vm14 = vmand %vm15202_vm1, %vm15201_vm7  ;;  %v2808_v4 = vadd.s32 12, %v11389_v39  ;;  %v2809_v7 = vadd.s32 12, %v11396_v29  ;;  %v11534_v60 = vsel %vm11411_vm8, %v2794_v59, %v15176_v20  ;;  %v11539_v30 = vsel %vm11423_vm9, %v2795_v62, %v11301_v31 }
 0x396   :  { %vm11525_vm3 = vmand %vm15206_vm10, %vm15205_vm2  ;;  %15209 = vst [vmem:[#allocation34_spill] sm:$0xff] %v11534_v60  ;;  %vm15211_vm7 = vcmp.ne.s32.totalorder %v11379_v28, 0  ;;  %vm15212_vm1 = vcmp.lt.s32.totalorder %v11379_v28, 0  ;;  %v11548_v8 = vsel %vm11432_vm0, %v2796_v10, %v11310_v55  ;;  %v11553_v20 = vsel %vm11444_vm12, %v2797_v44, %v11315_v0 }
 0x397   :  { %15210 = vst [vmem:[#allocation42_spill] sm:$0xff] %v11539_v30  ;;  %vm2787_vm2 = vmand %vm15212_vm1, %vm15211_vm7  ;;  %v11558_v31 = vsel %vm11456_vm6, %v2798_v27, %v11322_v13  ;;  %v11563_v43 = vsel %vm11469_vm13, %v2799_v16, %v11326_v36  ;;  %vm15217_vm8 = vcmp.ne.s32.totalorder %v11382_v26, 0  ;;  %v11572_v55 = vsel %vm11478_vm4, %v2800_v48, %v11336_v38 }
 0x398   :  { %15213 = vst [vmem:[#allocation26_spill] sm:$0xff] %v11548_v8  ;;  %vm2788_vm0 = vmand %vm2770_vm15, %vm15217_vm8  ;;  %v11577_v0 = vsel %vm11490_vm5, %v2801_v17, %v11343_v42  ;;  %v11582_v13 = vsel %vm11501_vm11, %v2802_v49, %v11347_v58  ;;  %v11587_v36 = vsel %vm11513_vm14, %v2803_v46, %v11357_v21  ;;  %vm15222_vm6 = vcmp.ne.s32.totalorder %v11386_v51, 0 }
 0x399   :  { %15214 = vst [vmem:[#allocation23_spill] sm:$0xff] %v11553_v20  ;;  %vm15223_vm9 = vcmp.lt.s32.totalorder %v11386_v51, 0  ;;  %v2810_v38 = vadd.s32 12, %v11416_v63  ;;  %v11597_v42 = vsel %vm11525_vm3, %v2804_v56, %v11376_v34  ;;  %v11600_v58 = vsel %vm2787_vm2, %v2805_v33, %v11379_v28 }
 0x39a   :  { %15215 = vst [vmem:[#allocation27_spill] sm:$0xff] %v11558_v31  ;;  %vm2789_vm12 = vmand %vm15223_vm9, %vm15222_vm6  ;;  %v11603_v57 = vsel %vm2788_vm0, %v2806_v40, %v11382_v26  ;;  %vm2757_vm11 = vcmp.ne.s32.totalorder %v2737_v14, 0  ;;  %vm2775_vm13 = vcmp.lt.s32.totalorder %v2737_v14, 0  ;;  %vm15227_vm14 = vcmp.ne.s32.totalorder %v11389_v39, 0 }
 0x39b   :  { %15216 = vst [vmem:[#allocation28_spill] sm:$0xff] %v11563_v43  ;;  %vm15228_vm4 = vcmp.lt.s32.totalorder %v11389_v39, 0  ;;  %v2811_v21 = vadd.s32 12, %v2737_v14  ;;  %v11610_v9 = vsel %vm2789_vm12, %v2807_v53, %v11386_v51  ;;  %vm15230_vm3 = vcmp.ne.s32.totalorder %v11396_v29, 0  ;;  %vm2793_vm8 = vmand %vm2775_vm13, %vm2757_vm11 }
 0x39c   :  { %15218 = vst [vmem:[#allocation24_spill] sm:$0xff] %v11572_v55  ;;  %vm2790_vm15 = vmand %vm15228_vm4, %vm15227_vm14  ;;  %vm15231_vm5 = vcmp.lt.s32.totalorder %v11396_v29, 0  ;;  %vm15233_vm7 = vcmp.ne.s32.totalorder %v11416_v63, 0  ;;  %vm15234_vm1 = vcmp.lt.s32.totalorder %v11416_v63, 0 }
 0x39d   :  { %15219 = vst [vmem:[#allocation25_spill] sm:$0xff] %v11577_v0  ;;  %vm2791_vm10 = vmand %vm15231_vm5, %vm15230_vm3  ;;  %v11617_v34 = vsel %vm2790_vm15, %v2808_v4, %v11389_v39  ;;  %v11629_v51 = vsel %vm2793_vm8, %v2811_v21, %v2737_v14 }
 0x39e   :  { %15220 = vst [vmem:[#allocation29_spill] sm:$0xff] %v11582_v13  ;;  %vm2792_vm2 = vmand %vm15234_vm1, %vm15233_vm7  ;;  %v11624_v28 = vsel %vm2791_vm10, %v2809_v7, %v11396_v29 }
 0x39f   :  { %15221 = vst [vmem:[#allocation30_spill] sm:$0xff] %v11587_v36  ;;  %v11627_v26 = vsel %vm2792_vm2, %v2810_v38, %v11416_v63 }
 0x3a0   :  { %15224 = vst [vmem:[#allocation31_spill] sm:$0xff] %v11597_v42 }
 0x3a1   :  { %15225 = vst [vmem:[#allocation32_spill] sm:$0xff] %v11600_v58 }
 0x3a2   :  { %15226 = vst [vmem:[#allocation33_spill] sm:$0xff] %v11603_v57 }
 0x3a3   :  { %15229 = vst [vmem:[#allocation35_spill] sm:$0xff] %v11610_v9 }
 0x3a4   :  { %15232 = vst [vmem:[#allocation36_spill] sm:$0xff] %v11617_v34 }
 0x3a5   :  { %15235 = vst [vmem:[#allocation37_spill] sm:$0xff] %v11624_v28 }
 0x3a6   :  { %15236 = vst [vmem:[#allocation40_spill] sm:$0xff] %v11627_v26 }
 0x3a7   :  { %15237 = vst [vmem:[#allocation41_spill] sm:$0xff] %v11629_v51 }
 0x3a8   :  { %9100 = dma.done.wait [#allocation3], 17920 }
 0x3a9   :  { %9101 = vsyncadd [#allocation3], 4294949376  ;;  %v3073_v18 = vrot.slane %v11207_v45, 6  ;;  %v7848_v39 = vld [vmem:[#allocation2 + $0x110] sm:$0xf]  ;;  %v3075_v27 = vrot.slane %v11211_v3, 6 }
 0x3aa   :  { %v8986_v47 = vld [vmem:[#allocation2 + $0x114] sm:$0xf0]  ;;  %v8985_v52 = vld [vmem:[#allocation2 + $0x114] sm:$0xf]  ;;  %v7850_v59 = vld [vmem:[#allocation2 + $0x118] sm:$0xf0] }
 0x3ab   :  { %v7849_v15 = vor.u32 %v8986_v47, %v7848_v39  ;;  %v7840_v62 = vld [vmem:[#allocation2 + $0x100] sm:$0xf]  ;;  %v8984_v10 = vld [vmem:[#allocation2 + $0x104] sm:$0xf0]  ;;  %v7853_v35 = vor.u32 %v8985_v52, %v7850_v59  ;;  %v8983_v29 = vld [vmem:[#allocation2 + $0x104] sm:$0xf] }
 0x3ac   :  { %v7842_v44 = vld [vmem:[#allocation2 + $0x108] sm:$0xf0]  ;;  %v14893_v63 = vrot.slane %v11275_v24, 6  ;;  %v7841_v14 = vor.u32 %v8984_v10, %v7840_v62  ;;  %v15238_v16 = vld [vmem:[#allocation9_spill] sm:$0xff]  ;;  %vm3145_vm6 = vcmp.ge.s32.totalorder %v11534_v60, 2  ;;  %vm3163_vm9 = vcmp.lt.s32.totalorder %v11534_v60, 14 }
 0x3ad   :  { %3437 = vmatpush.bf16.msrb.mxu0 %v7849_v15  ;;  %vm3108_vm0 = vcmp.lt.s32.totalorder %v15238_v16, 2  ;;  %3545 = vmatpush.bf16.msrb.mxu2 %v7853_v35  ;;  %v7845_v54 = vor.u32 %v8983_v29, %v7842_v44  ;;  %v7832_v48 = vld [vmem:[#allocation2 + $0xf0] sm:$0xf]  ;;  %v8982_v17 = vld [vmem:[#allocation2 + $0xf4] sm:$0xf0]  ;;  %vm3146_vm12 = vcmp.ge.s32.totalorder %v11539_v30, 2  ;;  %vm11639_vm13 = vmand %vm3145_vm6, %vm3163_vm9 }
 0x3ae   :  { %vm3164_vm11 = vcmp.lt.s32.totalorder %v11539_v30, 14  ;;  %v8981_v49 = vld [vmem:[#allocation2 + $0xf4] sm:$0xf]  ;;  %v7834_v46 = vld [vmem:[#allocation2 + $0xf8] sm:$0xf0]  ;;  %v7833_v33 = vor.u32 %v8982_v17, %v7832_v48  ;;  %v3142_v53 = vsel %vm3108_vm0, %v3073_v18, %v3075_v27  ;;  %v3144_v61 = vsel %vm3108_vm0, %v14893_v63, %v3073_v18 }
 0x3af   :  { %v8989_v23 = vld [vmem:[#allocation2 + $0x134] sm:$0xf]  ;;  %v7866_v40 = vld [vmem:[#allocation2 + $0x138] sm:$0xf0]  ;;  %vm11651_vm14 = vmand %vm3146_vm12, %vm3164_vm11  ;;  %v7837_v7 = vor.u32 %v8981_v49, %v7834_v46  ;;  %v3236_v10 = vsel %vm11639_vm13, %v3144_v61, 0.0  ;;  %vm15243_vm4 = vcmask 261120  }
 0x3b0   :  { %v7824_v38 = vld [vmem:[#allocation2 + $0xe0] sm:$0xf]  ;;  %v8980_v21 = vld [vmem:[#allocation2 + $0xe4] sm:$0xf0]  ;;  %v7869_v39 = vor.u32 %v8989_v23, %v7866_v40  ;;  %v8987_v47 = vld [vmem:[#allocation2 + $0x124] sm:$0xf] }
 0x3b1   :  { %3438 = vmatpush.bf16.msrb.mxu0 %v7841_v14  ;;  %3546 = vmatpush.bf16.msrb.mxu2 %v7845_v54  ;;  %v8979_v52 = vld [vmem:[#allocation2 + $0xe4] sm:$0xf]  ;;  %v7826_v15 = vld [vmem:[#allocation2 + $0xe8] sm:$0xf0]  ;;  %v3238_v18 = vsel %vm11651_vm14, %v3142_v53, 0.0  ;;  %v7825_v44 = vor.u32 %v8980_v21, %v7824_v38  ;;  %vm3147_vm15 = vcmp.ge.s32.totalorder %v11548_v8, 2  ;;  %vm15244_vm5 = vmmov %vm15243_vm4 }
 0x3b2   :  { %v7858_v59 = vld [vmem:[#allocation2 + $0x128] sm:$0xf0]  ;;  %3605 = vmatpush.bf16.msrb.mxu3 %v7869_v39  ;;  %v7864_v35 = vld [vmem:[#allocation2 + $0x130] sm:$0xf]  ;;  %v8990_v29 = vld [vmem:[#allocation2 + $0x134] sm:$0xf0]  ;;  %v7829_v48 = vor.u32 %v8979_v52, %v7826_v15  ;;  %v3272_v39 = vpack.c.bf16 %v3238_v18, %v3236_v10 }
 0x3b3   :  { %v7861_v62 = vor.u32 %v8987_v47, %v7858_v59  ;;  %v7816_v14 = vld [vmem:[#allocation2 + $0xd0] sm:$0xf]  ;;  %v7865_v54 = vor.u32 %v8990_v29, %v7864_v35  ;;  %v8978_v17 = vld [vmem:[#allocation2 + $0xd4] sm:$0xf0]  ;;  %v7856_v49 = vld [vmem:[#allocation2 + $0x120] sm:$0xf] }
 0x3b4   :  { %v8988_v46 = vld [vmem:[#allocation2 + $0x124] sm:$0xf0]  ;;  %v8977_v23 = vld [vmem:[#allocation2 + $0xd4] sm:$0xf]  ;;  %v7818_v40 = vld [vmem:[#allocation2 + $0xd8] sm:$0xf0]  ;;  %v7817_v53 = vor.u32 %v8978_v17, %v7816_v14 }
 0x3b5   :  { %3439 = vmatpush.bf16.msrb.mxu0 %v7833_v33  ;;  %3547 = vmatpush.bf16.msrb.mxu2 %v7837_v7  ;;  %v7857_v47 = vor.u32 %v8988_v46, %v7856_v49  ;;  %v8969_v61 = vld [vmem:[#allocation2 + $0x94] sm:$0xf]  ;;  %v8018_v59 = vld [vmem:[#allocation2 + $0x98] sm:$0xf0]  ;;  %v7808_v63 = vld [vmem:[#allocation2 + $0xc0] sm:$0xf]  ;;  %v7821_v7 = vor.u32 %v8977_v23, %v7818_v40 }
 0x3b6   :  { %3497 = vmatpush.bf16.msrb.mxu1 %v7865_v54  ;;  %3606 = vmatpush.bf16.msrb.mxu3 %v7861_v62  ;;  %v8976_v33 = vld [vmem:[#allocation2 + $0xc4] sm:$0xf0]  ;;  %v8021_v38 = vor.u32 %v8969_v61, %v8018_v59  ;;  %v8016_v21 = vld [vmem:[#allocation2 + $0x90] sm:$0xf]  ;;  %v8970_v52 = vld [vmem:[#allocation2 + $0x94] sm:$0xf0] }
 0x3b7   :  { %v8975_v15 = vld [vmem:[#allocation2 + $0xc4] sm:$0xf]  ;;  %v7810_v35 = vld [vmem:[#allocation2 + $0xc8] sm:$0xf0]  ;;  %v8017_v10 = vor.u32 %v8970_v52, %v8016_v21  ;;  %v7809_v18 = vor.u32 %v8976_v33, %v7808_v63  ;;  %v3077_v62 = vrot.slane %v11215_v1, 6  ;;  %v14894_v29 = vrot.slane %v11219_v12, 6  ;;  %vm7870_vm8 = vmpackc.low %vm11651_vm14, %vm11639_vm13 }
 0x3b8   :  { %vm3165_vm3 = vcmp.lt.s32.totalorder %v11548_v8, 14  ;;  %v7800_v14 = vld [vmem:[#allocation2 + $0xb0] sm:$0xf]  ;;  %v8974_v54 = vld [vmem:[#allocation2 + $0xb4] sm:$0xf0]  ;;  %vm3148_vm10 = vcmp.ge.s32.totalorder %v11553_v20, 2  ;;  %vm15249_vm6 = vmmov %vm15243_vm4 }
 0x3b9   :  { %3440 = vmatpush.bf16.msrb.mxu0 %v7825_v44  ;;  %3548 = vmatpush.bf16.msrb.mxu2 %v7829_v48  ;;  %v7813_v44 = vor.u32 %v8975_v15, %v7810_v35  ;;  %vm3166_vm7 = vcmp.lt.s32.totalorder %v11553_v20, 14  ;;  %v8973_v63 = vld [vmem:[#allocation2 + $0xb4] sm:$0xf]  ;;  %v7802_v48 = vld [vmem:[#allocation2 + $0xb8] sm:$0xf0]  ;;  %v3072_v17 = vrot.slane %v11205_v50, 6  ;;  %vm11669_vm1 = vmand %vm3147_vm15, %vm3165_vm3  ;;  %v7801_v23 = vor.u32 %v8974_v54, %v7800_v14 }
 0x3ba   :  { %7933 = vmatmul.msk.bf16.vlgmr.msrb.gmra.mxu3 %vm15243_vm4, %v3272_v39  ;;  %3498 = vmatpush.bf16.msrb.mxu1 %v7857_v47  ;;  %v3074_v49 = vrot.slane %v11209_v41, 6  ;;  %v14895_v40 = vrot.slane %v11273_v2, 6  ;;  %v3140_v47 = vsel %vm3108_vm0, %v3075_v27, %v3077_v62  ;;  %vm11682_vm2 = vmand %vm3148_vm10, %vm3166_vm7  ;;  %v7805_v59 = vor.u32 %v8973_v63, %v7802_v48  ;;  %v8972_v33 = vld [vmem:[#allocation2 + $0xa4] sm:$0xf0]  ;;  %v7794_v21 = vld [vmem:[#allocation2 + $0xa8] sm:$0xf0] }
 0x3bb   :  { %3948 = vmatpush.bf16.msra.mxu3 %v8021_v38  ;;  %v8971_v38 = vld [vmem:[#allocation2 + $0xa4] sm:$0xf]  ;;  %v8966_v52 = vld [vmem:[#allocation2 + $0x74] sm:$0xf0]  ;;  %v8965_v15 = vld [vmem:[#allocation2 + $0x74] sm:$0xf] }
 0x3bc   :  { %v8002_v35 = vld [vmem:[#allocation2 + $0x78] sm:$0xf0]  ;;  %v7797_v14 = vor.u32 %v8971_v38, %v7794_v21  ;;  %v3083_v38 = vrot.slane %v11227_v19, 6  ;;  %vm3149_vm9 = vcmp.ge.s32.totalorder %v11558_v31, 2  ;;  %vm3167_vm12 = vcmp.lt.s32.totalorder %v11558_v31, 14  ;;  %vm15250_vm11 = vmmov %vm15243_vm4 }
 0x3bd   :  { %3441 = vmatpush.bf16.msrb.mxu0 %v7817_v53  ;;  %3549 = vmatpush.bf16.msrb.mxu2 %v7821_v7  ;;  %v7792_v53 = vld [vmem:[#allocation2 + $0xa0] sm:$0xf]  ;;  %v8000_v7 = vld [vmem:[#allocation2 + $0x70] sm:$0xf]  ;;  %v8005_v63 = vor.u32 %v8965_v15, %v8002_v35  ;;  %v8961_v56 = vld [vmem:[#allocation2 + $0x54] sm:$0xf] }
 0x3be   :  { %3840 = vmatpush.bf16.msra.mxu1 %v8017_v10  ;;  %v3240_v10 = vsel %vm11669_vm1, %v3140_v47, 0.0  ;;  %v8001_v54 = vor.u32 %v8966_v52, %v8000_v7  ;;  %v7992_v47 = vld [vmem:[#allocation2 + $0x60] sm:$0xf]  ;;  %v7986_v4 = vld [vmem:[#allocation2 + $0x58] sm:$0xf0]  ;;  %vm3150_vm13 = vcmp.ge.s32.totalorder %v11563_v43, 2  ;;  %vm11710_vm4 = vmand %vm3149_vm9, %vm3167_vm12 }
 0x3bf   :  { %7897 = vmatmul.msk.bf16.vlgmr.msrb.gmra.mxu1 %vm15244_vm5, %v3272_v39  ;;  %v3138_v39 = vsel %vm3108_vm0, %v3077_v62, %v14894_v29  ;;  %v3141_v62 = vsel %vm3108_vm0, %v3072_v17, %v3074_v49  ;;  %v8964_v29 = vld [vmem:[#allocation2 + $0x64] sm:$0xf0]  ;;  %vm3168_vm14 = vcmp.lt.s32.totalorder %v11563_v43, 14  ;;  %v7989_v21 = vor.u32 %v8961_v56, %v7986_v4  ;;  %v8962_v7 = vld [vmem:[#allocation2 + $0x54] sm:$0xf0]  ;;  %vm7873_vm3 = vmpackc.low %vm11682_vm2, %vm11669_vm1 }
 0x3c0   :  { %v3242_v27 = vsel %vm11682_vm2, %v3138_v39, 0.0  ;;  %v3076_v35 = vrot.slane %v11213_v37, 6  ;;  %vm11722_vm15 = vmand %vm3150_vm13, %vm3168_vm14  ;;  %vm3151_vm10 = vcmp.ge.s32.totalorder %v11572_v55, 2  ;;  %vm3169_vm7 = vcmp.lt.s32.totalorder %v11572_v55, 14  ;;  %v7976_v61 = vld [vmem:[#allocation2 + $0x40] sm:$0xf] }
 0x3c1   :  { %3442 = vmatpush.bf16.msrb.mxu0 %v7809_v18  ;;  %3550 = vmatpush.bf16.msrb.mxu2 %v7813_v44  ;;  %v7793_v18 = vor.u32 %v8972_v33, %v7792_v53  ;;  %v3143_v44 = vsel %vm3108_vm0, %v14895_v40, %v3072_v17  ;;  %v3274_v48 = vpack.c.bf16 %v3242_v27, %v3240_v10  ;;  %v7994_v53 = vld [vmem:[#allocation2 + $0x68] sm:$0xf0]  ;;  %v3078_v10 = vrot.slane %v11217_v32, 6  ;;  %vm11748_vm2 = vmand %vm3151_vm10, %vm3169_vm7  ;;  %v7970_v52 = vld [vmem:[#allocation2 + $0x38] sm:$0xf0] }
 0x3c2   :  { %v7871_v39 = vpack.c.bf16 %v3141_v62, %v3143_v44  ;;  %v7993_v33 = vor.u32 %v8964_v29, %v7992_v47  ;;  %v7984_v29 = vld [vmem:[#allocation2 + $0x50] sm:$0xf]  ;;  %vm3170_vm1 = vcmp.lt.s32.totalorder %v11577_v0, 14  ;;  %v3080_v4 = vrot.slane %v11221_v22, 6  ;;  %vm7876_vm12 = vmpackc.low %vm11722_vm15, %vm11710_vm4  ;;  %v8967_v44 = vld [vmem:[#allocation2 + $0x84] sm:$0xf] }
 0x3c3   :  { %v7985_v15 = vor.u32 %v8962_v7, %v7984_v29  ;;  %v3082_v29 = vrot.slane %v11225_v6, 6  ;;  %vm3153_vm13 = vcmp.ge.s32.totalorder %v11582_v13, 2  ;;  %vm3171_vm14 = vcmp.lt.s32.totalorder %v11582_v13, 14 }
 0x3c4   :  { %vm3172_vm10 = vcmp.lt.s32.totalorder %v11587_v36, 14 }
 0x3c5   :  { %3443 = vmatpush.bf16.msrb.mxu0 %v7801_v23  ;;  %3551 = vmatpush.bf16.msrb.mxu2 %v7805_v59  ;;  %v8963_v23 = vld [vmem:[#allocation2 + $0x64] sm:$0xf]  ;;  %v3081_v59 = vrot.slane %v11223_v5, 6 }
 0x3c6   :  { %v7997_v17 = vor.u32 %v8963_v23, %v7994_v53  ;;  %v3085_v23 = vrot.slane %v11231_v25, 6  ;;  %v3087_v53 = vrot.slane %v11235_v11, 6 }
 0x3c7   :  { %v3134_v27 = vsel %vm3108_vm0, %v3081_v59, %v3083_v38 }
 0x3c8   :  { %v3132_v7 = vsel %vm3108_vm0, %v3083_v38, %v3085_v23  ;;  %v15262_v38 = vld [vmem:[#allocation6_spill] sm:$0xff] }
 0x3c9   :  { %3444 = vmatpush.bf16.msrb.mxu0 %v7793_v18  ;;  %3552 = vmatpush.bf16.msrb.mxu2 %v7797_v14  ;;  %v15253_v18 = vrot.slane %v11219_v12, 6 }
 0x3ca   :  { %7934 = vmatmul.msk.bf16.gmra.mxu3 %vm15249_vm6, %v3274_v48  ;;  %vm3152_vm6 = vcmp.ge.s32.totalorder %v11577_v0, 2 }
 0x3cb   :  { %v3136_v62 = vsel %vm3108_vm0, %v15253_v18, %v3081_v59  ;;  %vm11758_vm9 = vmand %vm3152_vm6, %vm3170_vm1  ;;  %v3133_v18 = vsel %vm3108_vm0, %v3080_v4, %v3082_v29  ;;  %vm3155_vm6 = vcmp.ge.s32.totalorder %v11597_v42, 2  ;;  %vm3173_vm1 = vcmp.lt.s32.totalorder %v11597_v42, 14 }
 0x3cc   :  { %7872 = vmatmul.msk.bf16.vlgmr.msrb.gmra.mxu0 %vm7870_vm8, %v7871_v39  ;;  %7908 = vmatmul.msk.bf16.vlgmr.msrb.gmra.mxu2 %vm7870_vm8, %v7871_v39  ;;  %v3244_v14 = vsel %vm11710_vm4, %v3136_v62, 0.0  ;;  %vm15256_vm8 = vmmov %vm15244_vm5  ;;  %v3135_v62 = vsel %vm3108_vm0, %v3078_v10, %v3080_v4 }
 0x3cd   :  { %3780 = vmatpush.bf16.msra.mxu0 %v8001_v54  ;;  %3888 = vmatpush.bf16.msra.mxu2 %v8005_v63  ;;  %v3246_v54 = vsel %vm11722_vm15, %v3134_v27, 0.0  ;;  %v3137_v63 = vsel %vm3108_vm0, %v3076_v35, %v3078_v10  ;;  %v8957_v10 = vld [vmem:[#allocation2 + $0x34] sm:$0xf]  ;;  %vm11782_vm4 = vmand %vm3153_vm13, %vm3171_vm14 }
 0x3ce   :  { %v3276_v47 = vpack.c.bf16 %v3246_v54, %v3244_v14  ;;  %v7877_v54 = vpack.c.bf16 %v3133_v18, %v3135_v62  ;;  %vm7879_vm7 = vmpackc.low %vm11758_vm9, %vm11748_vm2 }
 0x3cf   :  { %7898 = vmatmul.msk.bf16.gmra.mxu1 %vm15250_vm11, %v3274_v48  ;;  %v3139_v48 = vsel %vm3108_vm0, %v3074_v49, %v3076_v35  ;;  %v8959_v49 = vld [vmem:[#allocation2 + $0x44] sm:$0xf]  ;;  %v3248_v35 = vsel %vm11748_vm2, %v3132_v7, 0.0  ;;  %vm15261_vm11 = vmmov %vm15244_vm5  ;;  %vm3174_vm2 = vcmp.lt.s32.totalorder %v11600_v58, 14  ;;  %v8953_v7 = vld [vmem:[#allocation2 + $0x14] sm:$0xf] }
 0x3d0   :  { %v7874_v39 = vpack.c.bf16 %v3137_v63, %v3139_v48  ;;  %v3089_v63 = vrot.slane %v15262_v38, 6  ;;  %v15263_v48 = vld [vmem:[#allocation43_spill] sm:$0xff] }
 0x3d1   :  { %3781 = vmatpush.bf16.msra.mxu0 %v7993_v33  ;;  %3889 = vmatpush.bf16.msra.mxu2 %v7997_v17  ;;  %v7978_v33 = vld [vmem:[#allocation2 + $0x48] sm:$0xf0]  ;;  %v8960_v17 = vld [vmem:[#allocation2 + $0x44] sm:$0xf0] }
 0x3d2   :  { %v7981_v46 = vor.u32 %v8959_v49, %v7978_v33  ;;  %v7977_v56 = vor.u32 %v8960_v17, %v7976_v61  ;;  %v15268_v17 = vld [vmem:[#allocation18_spill] sm:$0xff] }
 0x3d5   :  { %3782 = vmatpush.bf16.msra.mxu0 %v7985_v15  ;;  %3890 = vmatpush.bf16.msra.mxu2 %v7989_v21  ;;  %v3130_v21 = vsel %vm3108_vm0, %v3085_v23, %v3087_v53  ;;  %v8010_v23 = vld [vmem:[#allocation2 + $0x88] sm:$0xf0]  ;;  %v8968_v15 = vld [vmem:[#allocation2 + $0x84] sm:$0xf0] }
 0x3d6   :  { %v3250_v27 = vsel %vm11758_vm9, %v3130_v21, 0.0  ;;  %v8013_v33 = vor.u32 %v8967_v44, %v8010_v23  ;;  %v3128_v21 = vsel %vm3108_vm0, %v3087_v53, %v3089_v63  ;;  %v8958_v44 = vld [vmem:[#allocation2 + $0x34] sm:$0xf0]  ;;  %vm11817_vm9 = vmand %vm3155_vm6, %vm3173_vm1 }
 0x3d7   :  { %v3278_v14 = vpack.c.bf16 %v3250_v27, %v3248_v35  ;;  %v3252_v35 = vsel %vm11782_vm4, %v3128_v21, 0.0 }
 0x3d8   :  { %3949 = vmatpush.bf16.msra.mxu3 %v8013_v33  ;;  %v8955_v33 = vld [vmem:[#allocation2 + $0x24] sm:$0xf] }
 0x3d9   :  { %3891 = vmatpush.bf16.msra.mxu2 %v7981_v46  ;;  %3783 = vmatpush.bf16.msra.mxu0 %v7977_v56  ;;  %v15267_v46 = vld [vmem:[#allocation20_spill] sm:$0xff]  ;;  %v3086_v56 = vrot.slane %v15268_v17, 6 }
 0x3da   :  { %7935 = vmatmul.msk.bf16.gmra.mxu3 %vm15244_vm5, %v3276_v47  ;;  %v3084_v61 = vrot.slane %v15267_v46, 6 }
 0x3dc   :  { %7875 = vmatmul.msk.bf16.gmra.mxu0 %vm7873_vm3, %v7874_v39  ;;  %7911 = vmatmul.msk.bf16.gmra.mxu2 %vm7873_vm3, %v7874_v39  ;;  %vm15264_vm3 = vmmov %vm15244_vm5  ;;  %vm3154_vm5 = vcmp.ge.s32.totalorder %v11587_v36, 2  ;;  %v7973_v39 = vor.u32 %v8957_v10, %v7970_v52  ;;  %v3129_v18 = vsel %vm3108_vm0, %v3084_v61, %v3086_v56  ;;  %v3131_v62 = vsel %vm3108_vm0, %v3082_v29, %v3084_v61  ;;  %v15273_v10 = vld [vmem:[#allocation47_spill] sm:$0xff]  ;;  %v7968_v29 = vld [vmem:[#allocation2 + $0x30] sm:$0xf] }
 0x3dd   :  { %vm11792_vm15 = vmand %vm3154_vm5, %vm3172_vm10  ;;  %v7880_v53 = vpack.c.bf16 %v3129_v18, %v3131_v62  ;;  %v3095_v52 = vrot.slane %v15273_v10, 6  ;;  %v7969_v59 = vor.u32 %v8958_v44, %v7968_v29  ;;  %v15275_v61 = vld [vmem:[#allocation22_spill] sm:$0xff]  ;;  %vm3157_vm5 = vcmp.ge.s32.totalorder %v11603_v57, 2 }
 0x3de   :  { %3892 = vmatpush.bf16.msra.mxu2 %v7973_v39  ;;  %v8008_v39 = vld [vmem:[#allocation2 + $0x80] sm:$0xf]  ;;  %vm7882_vm14 = vmpackc.low %vm11792_vm15, %vm11782_vm4  ;;  %vm3175_vm10 = vcmp.lt.s32.totalorder %v11603_v57, 14  ;;  %vm3176_vm4 = vcmp.lt.s32.totalorder %v11610_v9, 14 }
 0x3df   :  { %7899 = vmatmul.msk.bf16.gmra.mxu1 %vm15256_vm8, %v3276_v47  ;;  %v3091_v47 = vrot.slane %v15263_v48, 6  ;;  %vm15271_vm8 = vmmov %vm15264_vm3  ;;  %v8009_v23 = vor.u32 %v8968_v15, %v8008_v39  ;;  %3784 = vmatpush.bf16.msra.mxu0 %v7969_v59 }
 0x3e1   :  { %v3126_v4 = vsel %vm3108_vm0, %v3089_v63, %v3091_v47  ;;  %3841 = vmatpush.bf16.msra.mxu1 %v8009_v23  ;;  %v15281_v23 = vld [vmem:[#allocation49_spill] sm:$0xff] }
 0x3e2   :  { %v3254_v27 = vsel %vm11792_vm15, %v3126_v4, 0.0  ;;  %v3088_v4 = vrot.slane %v15275_v61, 6  ;;  %vm11850_vm15 = vmand %vm3157_vm5, %vm3175_vm10 }
 0x3e4   :  { %v3127_v15 = vsel %vm3108_vm0, %v3086_v56, %v3088_v4  ;;  %v7960_v56 = vld [vmem:[#allocation2 + $0x20] sm:$0xf] }
 0x3ea   :  { %7936 = vmatmul.msk.bf16.gmra.mxu3 %vm15261_vm11, %v3278_v14  ;;  %vm3156_vm11 = vcmp.ge.s32.totalorder %v11600_v58, 2 }
 0x3eb   :  { %vm11826_vm13 = vmand %vm3156_vm11, %vm3174_vm2  ;;  %vm3159_vm11 = vcmp.ge.s32.totalorder %v11617_v34, 2  ;;  %vm3177_vm2 = vcmp.lt.s32.totalorder %v11617_v34, 14 }
 0x3ec   :  { %7878 = vmatmul.msk.bf16.gmra.mxu0 %vm7876_vm12, %v7877_v54  ;;  %7914 = vmatmul.msk.bf16.gmra.mxu2 %vm7876_vm12, %v7877_v54  ;;  %v15272_v54 = vld [vmem:[#allocation45_spill] sm:$0xff]  ;;  %vm15274_vm12 = vmmov %vm15264_vm3 }
 0x3ed   :  { %v3093_v63 = vrot.slane %v15272_v54, 6  ;;  %vm7885_vm1 = vmpackc.low %vm11826_vm13, %vm11817_vm9 }
 0x3ef   :  { %7900 = vmatmul.msk.bf16.gmra.mxu1 %vm15264_vm3, %v3278_v14  ;;  %v3280_v14 = vpack.c.bf16 %v3254_v27, %v3252_v35  ;;  %v7962_v35 = vld [vmem:[#allocation2 + $0x28] sm:$0xf0]  ;;  %v3122_v62 = vsel %vm3108_vm0, %v3093_v63, %v3095_v52 }
 0x3f0   :  { %v15278_v27 = vld [vmem:[#allocation7_spill] sm:$0xff]  ;;  %v7965_v29 = vor.u32 %v8955_v33, %v7962_v35  ;;  %v3258_v39 = vsel %vm11826_vm13, %v3122_v62, 0.0  ;;  %v3097_v33 = vrot.slane %v15281_v23, 6  ;;  %vm11884_vm13 = vmand %vm3159_vm11, %vm3177_vm2  ;;  %vm3180_vm11 = vcmp.lt.s32.totalorder %v11629_v51, 14 }
 0x3f1   :  { %v3090_v18 = vrot.slane %v15278_v27, 6  ;;  %v15282_v35 = vld [vmem:[#allocation51_spill] sm:$0xff] }
 0x3f2   :  { %3893 = vmatpush.bf16.msra.mxu2 %v7965_v29  ;;  %v3099_v62 = vrot.slane %v15282_v35, 6  ;;  %v3120_v40 = vsel %vm3108_vm0, %v3095_v52, %v3097_v33 }
 0x3f3   :  { %v3125_v59 = vsel %vm3108_vm0, %v3088_v4, %v3090_v18  ;;  %v8956_v4 = vld [vmem:[#allocation2 + $0x24] sm:$0xf0] }
 0x3f4   :  { %v7961_v49 = vor.u32 %v8956_v4, %v7960_v56  ;;  %v3260_v4 = vsel %vm11850_vm15, %v3120_v40, 0.0  ;;  %v15291_v40 = vld [vmem:[#allocation53_spill] sm:$0xff] }
 0x3f5   :  { %v3101_v52 = vrot.slane %v15291_v40, 6 }
 0x3f6   :  { %3785 = vmatpush.bf16.msra.mxu0 %v7961_v49 }
 0x3fa   :  { %7937 = vmatmul.msk.bf16.gmra.mxu3 %vm15271_vm8, %v3280_v14  ;;  %vm3158_vm8 = vcmp.ge.s32.totalorder %v11610_v9, 2 }
 0x3fb   :  { %vm11860_vm6 = vmand %vm3158_vm8, %vm3176_vm4  ;;  %vm3161_vm8 = vcmp.ge.s32.totalorder %v11627_v26, 2  ;;  %vm3179_vm4 = vcmp.lt.s32.totalorder %v11627_v26, 14 }
 0x3fc   :  { %7881 = vmatmul.msk.bf16.gmra.mxu0 %vm7879_vm7, %v7880_v53  ;;  %7917 = vmatmul.msk.bf16.gmra.mxu2 %vm7879_vm7, %v7880_v53  ;;  %vm15283_vm7 = vmmov %vm15264_vm3  ;;  %v8154_v53 = vld [vmem:[#allocation2 + $0x1b8] sm:$0xf0] }
 0x3fd   :  { %vm7888_vm10 = vmpackc.low %vm11860_vm6, %vm11850_vm15 }
 0x3fe   :  { %vm11917_vm15 = vmand %vm3161_vm8, %vm3179_vm4 }
 0x3ff   :  { %7901 = vmatmul.msk.bf16.gmra.mxu1 %vm15274_vm12, %v3280_v14  ;;  %v3124_v14 = vsel %vm3108_vm0, %v3091_v47, %v3093_v63  ;;  %v7883_v63 = vpack.c.bf16 %v3125_v59, %v3127_v15  ;;  %v15287_v15 = vld [vmem:[#allocation46_spill] sm:$0xff]  ;;  %vm15290_vm12 = vmmov %vm15264_vm3 }
 0x400   :  { %v3256_v44 = vsel %vm11817_vm9, %v3124_v14, 0.0  ;;  %v7954_v14 = vld [vmem:[#allocation2 + $0x18] sm:$0xf0]  ;;  %vm3178_vm9 = vcmp.lt.s32.totalorder %v11624_v28, 14 }
 0x401   :  { %v3282_v47 = vpack.c.bf16 %v3258_v39, %v3256_v44  ;;  %v7957_v44 = vor.u32 %v8953_v7, %v7954_v14  ;;  %v15286_v39 = vld [vmem:[#allocation44_spill] sm:$0xff] }
 0x402   :  { %v3092_v59 = vrot.slane %v15286_v39, 6 }
 0x403   :  { %3894 = vmatpush.bf16.msra.mxu2 %v7957_v44 }
 0x404   :  { %v3123_v14 = vsel %vm3108_vm0, %v3090_v18, %v3092_v59  ;;  %v7952_v18 = vld [vmem:[#allocation2 + $0x10] sm:$0xf] }
 0x40a   :  { %7938 = vmatmul.msk.bf16.gmra.mxu3 %vm15264_vm3, %v3282_v47 }
 0x40c   :  { %7884 = vmatmul.msk.bf16.gmra.mxu0 %vm7882_vm14, %v7883_v63  ;;  %7920 = vmatmul.msk.bf16.gmra.mxu2 %vm7882_vm14, %v7883_v63  ;;  %v3094_v63 = vrot.slane %v15287_v15, 6  ;;  %vm15293_vm14 = vmmov %vm15264_vm3  ;;  %vm3160_vm3 = vcmp.ge.s32.totalorder %v11624_v28, 2 }
 0x40d   :  { %vm11894_vm5 = vmand %vm3160_vm3, %vm3178_vm9  ;;  %vm2908_vm3 = vcmp.ge.s32.totalorder %v11534_v60, 3  ;;  %vm2926_vm9 = vcmp.lt.s32.totalorder %v11534_v60, 15  ;;  %v9010_v60 = vld [vmem:[#allocation2 + $0x1d4] sm:$0xf0] }
 0x40e   :  { %v3121_v7 = vsel %vm3108_vm0, %v3092_v59, %v3094_v63  ;;  %v8954_v59 = vld [vmem:[#allocation2 + $0x14] sm:$0xf0]  ;;  %vm7891_vm2 = vmpackc.low %vm11894_vm5, %vm11884_vm13 }
 0x40f   :  { %7902 = vmatmul.msk.bf16.gmra.mxu1 %vm15283_vm7, %v3282_v47  ;;  %v3118_v47 = vsel %vm3108_vm0, %v3097_v33, %v3099_v62  ;;  %v7886_v39 = vpack.c.bf16 %v3121_v7, %v3123_v14  ;;  %v15292_v33 = vld [vmem:[#allocation55_spill] sm:$0xff]  ;;  %v7953_v21 = vor.u32 %v8954_v59, %v7952_v18  ;;  %vm11955_vm8 = vmand %vm2908_vm3, %vm2926_vm9 }
 0x410   :  { %v3262_v49 = vsel %vm11860_vm6, %v3118_v47, 0.0  ;;  %v3103_v44 = vrot.slane %v15292_v33, 6  ;;  %v15296_v47 = vld [vmem:[#allocation48_spill] sm:$0xff] }
 0x411   :  { %v3284_v15 = vpack.c.bf16 %v3262_v49, %v3260_v4  ;;  %3786 = vmatpush.bf16.msra.mxu0 %v7953_v21  ;;  %v15297_v4 = vld [vmem:[#allocation50_spill] sm:$0xff] }
 0x412   :  { %v3098_v49 = vrot.slane %v15297_v4, 6  ;;  %v3114_v7 = vsel %vm3108_vm0, %v3101_v52, %v3103_v44 }
 0x413   :  { %v3266_v59 = vsel %vm11894_vm5, %v3114_v7, 0.0  ;;  %v15300_v7 = vld [vmem:[#allocation57_spill] sm:$0xff]  ;;  %vm2871_vm5 = vcmp.lt.s32.totalorder %v15238_v16, 3 }
 0x414   :  { %v3105_v34 = vrot.slane %v15300_v7, 6 }
 0x41a   :  { %7939 = vmatmul.msk.bf16.gmra.mxu3 %vm15290_vm12, %v3284_v15  ;;  %vm3162_vm12 = vcmp.ge.s32.totalorder %v11629_v51, 2 }
 0x41b   :  { %vm11929_vm6 = vmand %vm3162_vm12, %vm3180_vm11  ;;  %vm2928_vm11 = vcmp.lt.s32.totalorder %v11548_v8, 15 }
 0x41c   :  { %7887 = vmatmul.msk.bf16.gmra.mxu0 %vm7885_vm1, %v7886_v39  ;;  %7923 = vmatmul.msk.bf16.gmra.mxu2 %vm7885_vm1, %v7886_v39  ;;  %v3096_v39 = vrot.slane %v15296_v47, 6  ;;  %vm15301_vm1 = vmmov %vm15283_vm7 }
 0x41e   :  { %v3117_v21 = vsel %vm3108_vm0, %v3096_v39, %v3098_v49  ;;  %v3119_v4 = vsel %vm3108_vm0, %v3094_v63, %v3096_v39  ;;  %v15304_v63 = vld [vmem:[#allocation52_spill] sm:$0xff] }
 0x41f   :  { %7903 = vmatmul.msk.bf16.gmra.mxu1 %vm15293_vm14, %v3284_v15  ;;  %v3116_v15 = vsel %vm3108_vm0, %v3099_v62, %v3101_v52  ;;  %v7889_v28 = vpack.c.bf16 %v3117_v21, %v3119_v4  ;;  %v8951_v62 = vld [vmem:[#allocation2 + $0x4] sm:$0xf]  ;;  %v7946_v52 = vld [vmem:[#allocation2 + $0x8] sm:$0xf0]  ;;  %v3100_v56 = vrot.slane %v15304_v63, 6  ;;  %v15306_v4 = vrot.slane %v11275_v24, 6  ;;  %vm15309_vm14 = vmmov %vm15301_vm1 }
 0x420   :  { %v3264_v18 = vsel %vm11884_vm13, %v3116_v15, 0.0  ;;  %v7949_v15 = vor.u32 %v8951_v62, %v7946_v52  ;;  %v7944_v21 = vld [vmem:[#allocation2] sm:$0xf]  ;;  %v8952_v62 = vld [vmem:[#allocation2 + $0x4] sm:$0xf0]  ;;  %vm15310_vm13 = vmmov %vm15301_vm1 }
 0x421   :  { %v3286_v47 = vpack.c.bf16 %v3266_v59, %v3264_v18  ;;  %v3110_v18 = vsel %vm3108_vm0, %v3105_v34, %v15306_v4  ;;  %v7945_v52 = vor.u32 %v8952_v62, %v7944_v21  ;;  %v3115_v4 = vsel %vm3108_vm0, %v3098_v49, %v3100_v56  ;;  %v9005_v49 = vld [vmem:[#allocation2 + $0x1b4] sm:$0xf]  ;;  %vm15317_vm12 = vmmov %vm15310_vm13 }
 0x422   :  { %3895 = vmatpush.bf16.msra.mxu2 %v7949_v15  ;;  %v2836_v21 = vrot.slane %v11207_v45, 5  ;;  %v14909_v62 = vrot.slane %v11275_v24, 5 }
 0x423   :  { %3787 = vmatpush.bf16.msra.mxu0 %v7945_v52 }
 0x42a   :  { %7940 = vmatmul.msk.bf16.gmra.mxu3 %vm15283_vm7, %v3286_v47  ;;  %vm2927_vm7 = vcmp.lt.s32.totalorder %v11539_v30, 15 }
 0x42c   :  { %7890 = vmatmul.msk.bf16.gmra.mxu0 %vm7888_vm10, %v7889_v28  ;;  %7926 = vmatmul.msk.bf16.gmra.mxu2 %vm7888_vm10, %v7889_v28  ;;  %v15305_v28 = vld [vmem:[#allocation54_spill] sm:$0xff]  ;;  %vm2909_vm10 = vcmp.ge.s32.totalorder %v11539_v30, 3  ;;  %v2907_v30 = vsel %vm2871_vm5, %v14909_v62, %v2836_v21 }
 0x42d   :  { %v3102_v39 = vrot.slane %v15305_v28, 6  ;;  %v3270_v28 = vsel %vm11929_vm6, %v3110_v18, 0.0  ;;  %v14906_v18 = vrot.slane %v11211_v3, 5  ;;  %vm11968_vm4 = vmand %vm2909_vm10, %vm2927_vm7  ;;  %v2999_v45 = vsel %vm11955_vm8, %v2907_v30, 0.0 }
 0x42e   :  { %vm8022_vm9 = vmpackc.low %vm11968_vm4, %vm11955_vm8  ;;  %vm2912_vm10 = vcmp.ge.s32.totalorder %v11558_v31, 3  ;;  %vm2930_vm7 = vcmp.lt.s32.totalorder %v11558_v31, 15  ;;  %vm2913_vm8 = vcmp.ge.s32.totalorder %v11563_v43, 3 }
 0x42f   :  { %7904 = vmatmul.msk.bf16.gmra.mxu1 %vm15301_vm1, %v3286_v47  ;;  %v3112_v47 = vsel %vm3108_vm0, %v3103_v44, %v3105_v34  ;;  %v3113_v63 = vsel %vm3108_vm0, %v3100_v56, %v3102_v39  ;;  %v8157_v56 = vor.u32 %v9005_v49, %v8154_v53  ;;  %v8152_v53 = vld [vmem:[#allocation2 + $0x1b0] sm:$0xf]  ;;  %vm7894_vm1 = vmpackc.low %vm11929_vm6, %vm11917_vm15  ;;  %vm2929_vm6 = vcmp.lt.s32.totalorder %v11553_v20, 15 }
 0x430   :  { %v3268_v15 = vsel %vm11917_vm15, %v3112_v47, 0.0  ;;  %v7892_v44 = vpack.c.bf16 %v3113_v63, %v3115_v4  ;;  %v9009_v63 = vld [vmem:[#allocation2 + $0x1d4] sm:$0xf]  ;;  %vm2911_vm15 = vcmp.ge.s32.totalorder %v11553_v20, 3 }
 0x431   :  { %v3288_v34 = vpack.c.bf16 %v3270_v28, %v3268_v15  ;;  %v8170_v28 = vld [vmem:[#allocation2 + $0x1d8] sm:$0xf0]  ;;  %4469 = vmatpush.bf16.msrb.mxu2 %v8157_v56  ;;  %v15313_v4 = vld [vmem:[#allocation56_spill] sm:$0xff]  ;;  %vm12011_vm3 = vmand %vm2911_vm15, %vm2929_vm6  ;;  %v2839_v15 = vrot.slane %v11213_v37, 5  ;;  %vm2914_vm15 = vcmp.ge.s32.totalorder %v11572_v55, 3  ;;  %vm2932_vm6 = vcmp.lt.s32.totalorder %v11572_v55, 15 }
 0x432   :  { %v8173_v52 = vor.u32 %v9009_v63, %v8170_v28  ;;  %v9006_v63 = vld [vmem:[#allocation2 + $0x1b4] sm:$0xf0] }
 0x433   :  { %v8153_v28 = vor.u32 %v9006_v63, %v8152_v53 }
 0x434   :  { %4529 = vmatpush.bf16.msrb.mxu3 %v8173_v52 }
 0x435   :  { %4361 = vmatpush.bf16.msrb.mxu0 %v8153_v28 }
 0x43a   :  { %7941 = vmatmul.msk.bf16.gmra.mxu3 %vm15309_vm14, %v3288_v34 }
 0x43c   :  { %v3500_v47 = vpop.f32.mrf.mxu1  ;;  %7893 = vmatmul.msk.bf16.gmra.mxu0 %vm7891_vm2, %v7892_v44  ;;  %7929 = vmatmul.msk.bf16.gmra.mxu2 %vm7891_vm2, %v7892_v44  ;;  %v3104_v44 = vrot.slane %v15313_v4, 6  ;;  %v8168_v4 = vld [vmem:[#allocation2 + $0x1d0] sm:$0xf]  ;;  %vm15318_vm2 = vmmov %vm15317_vm12 }
 0x43d   :  { %v3608_v14 = vpop.f32.mrf.mxu3  ;;  %v8169_v24 = vor.u32 %v9010_v60, %v8168_v4  ;;  %v2840_v4 = vrot.slane %v11215_v1, 5 }
 0x43e   :  { %v3111_v52 = vsel %vm3108_vm0, %v3102_v39, %v3104_v44  ;;  %v2842_v39 = vrot.slane %v11219_v12, 5 }
 0x43f   :  { %7905 = vmatmul.msk.bf16.gmra.mxu1 %vm15310_vm13, %v3288_v34  ;;  %v2905_v34 = vsel %vm2871_vm5, %v2836_v21, %v14906_v18  ;;  %v15316_v21 = vrot.slane %v11273_v2, 6  ;;  %vm15327_vm13 = vmmov %vm15318_vm2 }
 0x440   :  { %v3001_v18 = vsel %vm11968_vm4, %v2905_v34, 0.0  ;;  %4421 = vmatpush.bf16.msrb.mxu1 %v8169_v24  ;;  %v8146_v24 = vld [vmem:[#allocation2 + $0x1a8] sm:$0xf0]  ;;  %vm2931_vm4 = vcmp.lt.s32.totalorder %v11563_v43, 15 }
 0x441   :  { %v3109_v62 = vsel %vm3108_vm0, %v3104_v44, %v15316_v21  ;;  %v3035_v53 = vpack.c.bf16 %v3001_v18, %v2999_v45  ;;  %vm2910_vm0 = vcmp.ge.s32.totalorder %v11548_v8, 3  ;;  %v9003_v45 = vld [vmem:[#allocation2 + $0x1a4] sm:$0xf]  ;;  %v2837_v18 = vrot.slane %v11209_v41, 5 }
 0x442   :  { %v7895_v63 = vpack.c.bf16 %v3109_v62, %v3111_v52  ;;  %vm11998_vm14 = vmand %vm2910_vm0, %vm2928_vm11  ;;  %v2901_v21 = vsel %vm2871_vm5, %v2840_v4, %v2842_v39  ;;  %v15322_v52 = vrot.slane %v11211_v3, 5 }
 0x443   :  { %vm12055_vm0 = vmand %vm2913_vm8, %vm2931_vm4  ;;  %vm2916_vm8 = vcmp.ge.s32.totalorder %v11582_v13, 3  ;;  %vm2934_vm4 = vcmp.lt.s32.totalorder %v11582_v13, 15 }
 0x444   :  { %v3502_v56 = vpop.f32.mrf.mxu1  ;;  %vm8025_vm11 = vmpackc.low %vm12011_vm3, %vm11998_vm14 }
 0x445   :  { %v3610_v51 = vpop.f32.mrf.mxu3 }
 0x449   :  { %v3446_v26 = vpop.f32.mrf.mxu0 }
 0x44a   :  { %v11986_v60 = vadd.f32 %v3500_v47, %v3446_v26  ;;  %8085 = vmatmul.msk.bf16.vlgmr.msra.gmra.mxu3 %vm15317_vm12, %v3035_v53  ;;  %v8149_v26 = vor.u32 %v9003_v45, %v8146_v24  ;;  %v2835_v47 = vrot.slane %v11205_v50, 5  ;;  %v8144_v24 = vld [vmem:[#allocation2 + $0x1a0] sm:$0xf]  ;;  %vm12044_vm12 = vmand %vm2912_vm10, %vm2930_vm7 }
 0x44b   :  { %vm8028_vm7 = vmpackc.low %vm12055_vm0, %vm12044_vm12 }
 0x44c   :  { %v3505_v30 = vpop.f32.mrf.mxu1  ;;  %7896 = vmatmul.msk.bf16.gmra.mxu0 %vm7894_vm1, %v7895_v63  ;;  %7932 = vmatmul.msk.bf16.gmra.mxu2 %vm7894_vm1, %v7895_v63  ;;  %v2904_v41 = vsel %vm2871_vm5, %v2835_v47, %v2837_v18  ;;  %vm15328_vm1 = vmmov %vm15318_vm2 }
 0x44d   :  { %v3613_v29 = vpop.f32.mrf.mxu3  ;;  %4470 = vmatpush.bf16.msrb.mxu2 %v8149_v26 }
 0x44f   :  { %8049 = vmatmul.msk.bf16.vlgmr.msra.gmra.mxu1 %vm15318_vm2, %v3035_v53  ;;  %v3554_v59 = vpop.f32.mrf.mxu2  ;;  %v2903_v53 = vsel %vm2871_vm5, %v15322_v52, %v2840_v4  ;;  %v15326_v4 = vrot.slane %v11273_v2, 5  ;;  %vm15334_vm2 = vmmov %vm15328_vm1 }
 0x450   :  { %v12002_v44 = vadd.f32 %v3608_v14, %v3554_v59  ;;  %v9004_v14 = vld [vmem:[#allocation2 + $0x1a4] sm:$0xf0]  ;;  %v3003_v28 = vsel %vm11998_vm14, %v2903_v53, 0.0  ;;  %vm15335_vm14 = vmmov %vm15328_vm1 }
 0x451   :  { %v3448_v34 = vpop.f32.mrf.mxu0  ;;  %v8145_v59 = vor.u32 %v9004_v14, %v8144_v24  ;;  %v2906_v52 = vsel %vm2871_vm5, %v15326_v4, %v2835_v47  ;;  %v2844_v47 = vrot.slane %v11223_v5, 5 }
 0x452   :  { %15321 = vst [vmem:[#allocation9_spill] sm:$0xff] %v12002_v44  ;;  %v12015_v45 = vadd.f32 %v3502_v56, %v3448_v34  ;;  %v3005_v44 = vsel %vm12011_vm3, %v2901_v21, 0.0  ;;  %v8023_v50 = vpack.c.bf16 %v2904_v41, %v2906_v52  ;;  %v9001_v52 = vld [vmem:[#allocation2 + $0x194] sm:$0xf]  ;;  %vm2915_vm3 = vcmp.ge.s32.totalorder %v11577_v0, 3 }
 0x453   :  { %4362 = vmatpush.bf16.msrb.mxu0 %v8145_v59  ;;  %v3037_v34 = vpack.c.bf16 %v3005_v44, %v3003_v28  ;;  %v2846_v44 = vrot.slane %v11227_v19, 5  ;;  %v2841_v28 = vrot.slane %v11217_v32, 5  ;;  %v2899_v59 = vsel %vm2871_vm5, %v2842_v39, %v2844_v47 }
 0x454   :  { %15325 = vst [vmem:[#allocation45_spill] sm:$0xff] %v12015_v45  ;;  %v3507_v26 = vpop.f32.mrf.mxu1 }
 0x455   :  { %v3615_v56 = vpop.f32.mrf.mxu3  ;;  %v2900_v39 = vsel %vm2871_vm5, %v2839_v15, %v2841_v28 }
 0x457   :  { %v3556_v45 = vpop.f32.mrf.mxu2 }
 0x458   :  { %v12027_v24 = vadd.f32 %v3610_v51, %v3556_v45  ;;  %v2897_v45 = vsel %vm2871_vm5, %v2844_v47, %v2846_v44  ;;  %v2902_v47 = vsel %vm2871_vm5, %v2837_v18, %v2839_v15 }
 0x459   :  { %v3451_v14 = vpop.f32.mrf.mxu0  ;;  %v3009_v32 = vsel %vm12055_vm0, %v2897_v45, 0.0  ;;  %v8136_v45 = vld [vmem:[#allocation2 + $0x190] sm:$0xf]  ;;  %vm2917_vm0 = vcmp.ge.s32.totalorder %v11587_v36, 3 }
 0x45a   :  { %v12033_v21 = vadd.f32 %v3505_v30, %v3451_v14  ;;  %8086 = vmatmul.msk.bf16.gmra.mxu3 %vm15327_vm13, %v3037_v34  ;;  %vm12086_vm13 = vmand %vm2914_vm15, %vm2932_vm6 }
 0x45c   :  { %v3510_v53 = vpop.f32.mrf.mxu1  ;;  %8024 = vmatmul.msk.bf16.vlgmr.msra.gmra.mxu0 %vm8022_vm9, %v8023_v50  ;;  %8060 = vmatmul.msk.bf16.vlgmr.msra.gmra.mxu2 %vm8022_vm9, %v8023_v50  ;;  %vm2933_vm9 = vcmp.lt.s32.totalorder %v11577_v0, 15 }
 0x45d   :  { %v3618_v41 = vpop.f32.mrf.mxu3  ;;  %vm12097_vm10 = vmand %vm2915_vm3, %vm2933_vm9  ;;  %vm2918_vm3 = vcmp.ge.s32.totalorder %v11597_v42, 3  ;;  %vm2936_vm9 = vcmp.lt.s32.totalorder %v11597_v42, 15 }
 0x45e   :  { %vm8031_vm6 = vmpackc.low %vm12097_vm10, %vm12086_vm13 }
 0x45f   :  { %8050 = vmatmul.msk.bf16.gmra.mxu1 %vm15328_vm1, %v3037_v34  ;;  %v3559_v51 = vpop.f32.mrf.mxu2  ;;  %v8138_v34 = vld [vmem:[#allocation2 + $0x198] sm:$0xf0] }
 0x460   :  { %v12048_v49 = vadd.f32 %v3613_v29, %v3559_v51  ;;  %v8141_v37 = vor.u32 %v9001_v52, %v8138_v34  ;;  %v3007_v51 = vsel %vm12044_vm12, %v2899_v59, 0.0  ;;  %vm15342_vm12 = vmmov %vm15328_vm1 }
 0x461   :  { %v3453_v30 = vpop.f32.mrf.mxu0  ;;  %v3039_v43 = vpack.c.bf16 %v3009_v32, %v3007_v51  ;;  %v2848_v32 = vrot.slane %v11231_v25, 5 }
 0x462   :  { %15331 = vst [vmem:[#allocation47_spill] sm:$0xff] %v12048_v49  ;;  %v12059_v14 = vadd.f32 %v3507_v26, %v3453_v30  ;;  %4471 = vmatpush.bf16.msrb.mxu2 %v8141_v37  ;;  %v8026_v26 = vpack.c.bf16 %v2900_v39, %v2902_v47  ;;  %v9002_v37 = vld [vmem:[#allocation2 + $0x194] sm:$0xf0]  ;;  %v2845_v39 = vrot.slane %v11225_v6, 5 }
 0x463   :  { %v8137_v34 = vor.u32 %v9002_v37, %v8136_v45  ;;  %v8999_v45 = vld [vmem:[#allocation2 + $0x184] sm:$0xf]  ;;  %v8130_v37 = vld [vmem:[#allocation2 + $0x188] sm:$0xf0] }
 0x464   :  { %v3512_v29 = vpop.f32.mrf.mxu1 }
 0x465   :  { %v3620_v49 = vpop.f32.mrf.mxu3  ;;  %4363 = vmatpush.bf16.msrb.mxu0 %v8137_v34 }
 0x467   :  { %v3561_v31 = vpop.f32.mrf.mxu2 }
 0x468   :  { %v12069_v30 = vadd.f32 %v3615_v56, %v3561_v31  ;;  %v2850_v31 = vrot.slane %v11235_v11, 5  ;;  %v2843_v56 = vrot.slane %v11221_v22, 5 }
 0x469   :  { %v3456_v52 = vpop.f32.mrf.mxu0 }
 0x46a   :  { %v12075_v59 = vadd.f32 %v3510_v53, %v3456_v52  ;;  %8087 = vmatmul.msk.bf16.gmra.mxu3 %vm15334_vm2, %v3039_v43  ;;  %v2893_v47 = vsel %vm2871_vm5, %v2848_v32, %v2850_v31  ;;  %vm12128_vm2 = vmand %vm2916_vm8, %vm2934_vm4  ;;  %v8998_v53 = vld [vmem:[#allocation2 + $0x174] sm:$0xf0] }
 0x46b   :  { %v3013_v6 = vsel %vm12097_vm10, %v2893_v47, 0.0  ;;  %vm2919_vm10 = vcmp.ge.s32.totalorder %v11600_v58, 3 }
 0x46c   :  { %v3515_v18 = vpop.f32.mrf.mxu1  ;;  %8027 = vmatmul.msk.bf16.gmra.mxu0 %vm8025_vm11, %v8026_v26  ;;  %8063 = vmatmul.msk.bf16.gmra.mxu2 %vm8025_vm11, %v8026_v26  ;;  %vm2935_vm11 = vcmp.lt.s32.totalorder %v11587_v36, 15 }
 0x46d   :  { %v3623_v62 = vpop.f32.mrf.mxu3  ;;  %vm12141_vm15 = vmand %vm2917_vm0, %vm2935_vm11  ;;  %vm2920_vm0 = vcmp.ge.s32.totalorder %v11603_v57, 3  ;;  %vm2938_vm11 = vcmp.lt.s32.totalorder %v11603_v57, 15  ;;  %v15365_v57 = vrot.slane %v15273_v10, 5 }
 0x46e   :  { %vm8034_vm4 = vmpackc.low %vm12141_vm15, %vm12128_vm2 }
 0x46f   :  { %8051 = vmatmul.msk.bf16.gmra.mxu1 %vm15335_vm14, %v3039_v43  ;;  %v3564_v63 = vpop.f32.mrf.mxu2  ;;  %v2895_v43 = vsel %vm2871_vm5, %v2846_v44, %v2848_v32  ;;  %v2898_v44 = vsel %vm2871_vm5, %v2841_v28, %v2843_v56  ;;  %vm15350_vm14 = vmmov %vm15328_vm1 }
 0x470   :  { %v12090_v15 = vadd.f32 %v3618_v41, %v3564_v63  ;;  %v8133_v41 = vor.u32 %v8999_v45, %v8130_v37  ;;  %v3011_v63 = vsel %vm12086_vm13, %v2895_v43, 0.0  ;;  %v8128_v43 = vld [vmem:[#allocation2 + $0x180] sm:$0xf]  ;;  %v9000_v37 = vld [vmem:[#allocation2 + $0x184] sm:$0xf0]  ;;  %vm15351_vm13 = vmmov %vm15328_vm1 }
 0x471   :  { %v3458_v51 = vpop.f32.mrf.mxu0 }
 0x472   :  { %15338 = vst [vmem:[#allocation22_spill] sm:$0xff] %v12090_v15  ;;  %v12101_v52 = vadd.f32 %v3512_v29, %v3458_v51  ;;  %v2896_v15 = vsel %vm2871_vm5, %v2843_v56, %v2845_v39  ;;  %4472 = vmatpush.bf16.msrb.mxu2 %v8133_v41  ;;  %v3041_v29 = vpack.c.bf16 %v3013_v6, %v3011_v63  ;;  %v2852_v6 = vrot.slane %v15262_v38, 5  ;;  %v8162_v63 = vld [vmem:[#allocation2 + $0x1c8] sm:$0xf0] }
 0x473   :  { %v8129_v56 = vor.u32 %v9000_v37, %v8128_v43  ;;  %v8997_v43 = vld [vmem:[#allocation2 + $0x174] sm:$0xf] }
 0x474   :  { %15341 = vst [vmem:[#allocation60_spill] sm:$0xff] %v12101_v52  ;;  %v3517_v34 = vpop.f32.mrf.mxu1  ;;  %v8029_v52 = vpack.c.bf16 %v2896_v15, %v2898_v44  ;;  %v8996_v15 = vld [vmem:[#allocation2 + $0x164] sm:$0xf0] }
 0x475   :  { %v3625_v32 = vpop.f32.mrf.mxu3  ;;  %4364 = vmatpush.bf16.msrb.mxu0 %v8129_v56 }
 0x477   :  { %v3566_v51 = vpop.f32.mrf.mxu2 }
 0x478   :  { %v12111_v22 = vadd.f32 %v3620_v49, %v3566_v51  ;;  %v14931_v49 = vrot.slane %v15263_v48, 5 }
 0x479   :  { %v3461_v45 = vpop.f32.mrf.mxu0 }
 0x47a   :  { %v12117_v47 = vadd.f32 %v3515_v18, %v3461_v45  ;;  %8088 = vmatmul.msk.bf16.gmra.mxu3 %vm15328_vm1, %v3041_v29  ;;  %v2847_v18 = vrot.slane %v15267_v46, 5  ;;  %v2889_v44 = vsel %vm2871_vm5, %v2852_v6, %v14931_v49  ;;  %vm12176_vm1 = vmand %vm2918_vm3, %vm2936_vm9 }
 0x47b   :  { %v3017_v49 = vsel %vm12141_vm15, %v2889_v44, 0.0  ;;  %vm2939_vm15 = vcmp.lt.s32.totalorder %v11610_v9, 15 }
 0x47c   :  { %v3520_v28 = vpop.f32.mrf.mxu1  ;;  %8030 = vmatmul.msk.bf16.gmra.mxu0 %vm8028_vm7, %v8029_v52  ;;  %8066 = vmatmul.msk.bf16.gmra.mxu2 %vm8028_vm7, %v8029_v52  ;;  %vm2937_vm7 = vcmp.lt.s32.totalorder %v11600_v58, 15 }
 0x47d   :  { %v3628_v50 = vpop.f32.mrf.mxu3  ;;  %vm12191_vm8 = vmand %vm2919_vm10, %vm2937_vm7 }
 0x47e   :  { %vm8037_vm9 = vmpackc.low %vm12191_vm8, %vm12176_vm1 }
 0x47f   :  { %8052 = vmatmul.msk.bf16.gmra.mxu1 %vm15342_vm12, %v3041_v29  ;;  %v3569_v4 = vpop.f32.mrf.mxu2  ;;  %v2891_v29 = vsel %vm2871_vm5, %v2850_v31, %v2852_v6  ;;  %v15349_v31 = vrot.slane %v15268_v17, 5 }
 0x480   :  { %v12132_v52 = vadd.f32 %v3623_v62, %v3569_v4  ;;  %v8122_v62 = vld [vmem:[#allocation2 + $0x178] sm:$0xf0]  ;;  %v9007_v4 = vld [vmem:[#allocation2 + $0x1c4] sm:$0xf]  ;;  %v3015_v46 = vsel %vm12128_vm2, %v2891_v29, 0.0  ;;  %vm2921_vm2 = vcmp.ge.s32.totalorder %v11610_v9, 3 }
 0x481   :  { %v3463_v41 = vpop.f32.mrf.mxu0  ;;  %v8125_v56 = vor.u32 %v8997_v43, %v8122_v62  ;;  %v2892_v6 = vsel %vm2871_vm5, %v2847_v18, %v15349_v31  ;;  %v3043_v43 = vpack.c.bf16 %v3017_v49, %v3015_v46  ;;  %v14934_v46 = vrot.slane %v15273_v10, 5  ;;  %v8160_v49 = vld [vmem:[#allocation2 + $0x1c0] sm:$0xf]  ;;  %vm12237_vm3 = vmand %vm2921_vm2, %vm2939_vm15 }
 0x482   :  { %15345 = vst [vmem:[#allocation61_spill] sm:$0xff] %v12132_v52  ;;  %v12145_v45 = vadd.f32 %v3517_v34, %v3463_v41  ;;  %v8165_v52 = vor.u32 %v9007_v4, %v8162_v63  ;;  %v2894_v34 = vsel %vm2871_vm5, %v2845_v39, %v2847_v18  ;;  %v2856_v39 = vrot.slane %v15272_v54, 5  ;;  %v9008_v18 = vld [vmem:[#allocation2 + $0x1c4] sm:$0xf0] }
 0x483   :  { %4473 = vmatpush.bf16.msrb.mxu2 %v8125_v56  ;;  %v2851_v4 = vrot.slane %v15275_v61, 5 }
 0x484   :  { %15348 = vst [vmem:[#allocation62_spill] sm:$0xff] %v12145_v45  ;;  %v3522_v37 = vpop.f32.mrf.mxu1  ;;  %4530 = vmatpush.bf16.msrb.mxu3 %v8165_v52  ;;  %v8032_v45 = vpack.c.bf16 %v2892_v6, %v2894_v34  ;;  %v8161_v52 = vor.u32 %v9008_v18, %v8160_v49  ;;  %v2853_v34 = vrot.slane %v15278_v27, 5  ;;  %v8114_v49 = vld [vmem:[#allocation2 + $0x168] sm:$0xf0] }
 0x485   :  { %v3630_v41 = vpop.f32.mrf.mxu3 }
 0x486   :  { %4422 = vmatpush.bf16.msrb.mxu1 %v8161_v52 }
 0x487   :  { %v3571_v62 = vpop.f32.mrf.mxu2 }
 0x488   :  { %v12157_v36 = vadd.f32 %v3625_v32, %v3571_v62  ;;  %v8120_v32 = vld [vmem:[#allocation2 + $0x170] sm:$0xf]  ;;  %v15354_v62 = vrot.slane %v15263_v48, 5 }
 0x489   :  { %v3466_v29 = vpop.f32.mrf.mxu0 }
 0x48a   :  { %v12163_v63 = vadd.f32 %v3520_v28, %v3466_v29  ;;  %8089 = vmatmul.msk.bf16.gmra.mxu3 %vm15350_vm14, %v3043_v43  ;;  %v8121_v28 = vor.u32 %v8998_v53, %v8120_v32  ;;  %v2887_v29 = vsel %vm2871_vm5, %v15354_v62, %v2856_v39  ;;  %v8995_v53 = vld [vmem:[#allocation2 + $0x164] sm:$0xf]  ;;  %v15358_v62 = vrot.slane %v15268_v17, 5  ;;  %vm12224_vm14 = vmand %vm2920_vm0, %vm2938_vm11  ;;  %v15373_v32 = vld [vmem:[#allocation37_spill] sm:$0xff] }
 0x48b   :  { %v8117_v18 = vor.u32 %v8995_v53, %v8114_v49  ;;  %vm8040_vm11 = vmpackc.low %vm12237_vm3, %vm12224_vm14 }
 0x48c   :  { %v3525_v44 = vpop.f32.mrf.mxu1  ;;  %8033 = vmatmul.msk.bf16.gmra.mxu0 %vm8031_vm6, %v8032_v45  ;;  %8069 = vmatmul.msk.bf16.gmra.mxu2 %vm8031_vm6, %v8032_v45  ;;  %v2890_v52 = vsel %vm2871_vm5, %v15358_v62, %v2851_v4  ;;  %vm15359_vm6 = vmmov %vm15342_vm12 }
 0x48d   :  { %v3633_v26 = vpop.f32.mrf.mxu3  ;;  %4365 = vmatpush.bf16.msrb.mxu0 %v8121_v28  ;;  %4474 = vmatpush.bf16.msrb.mxu2 %v8117_v18  ;;  %v15360_v18 = vld [vmem:[#allocation44_spill] sm:$0xff] }
 0x48f   :  { %8053 = vmatmul.msk.bf16.gmra.mxu1 %vm15351_vm13, %v3043_v43  ;;  %v3574_v56 = vpop.f32.mrf.mxu2  ;;  %v2885_v43 = vsel %vm2871_vm5, %v2856_v39, %v14934_v46  ;;  %v2888_v39 = vsel %vm2871_vm5, %v2851_v4, %v2853_v34  ;;  %v2860_v4 = vrot.slane %v15281_v23, 5  ;;  %vm15370_vm13 = vmmov %vm15359_vm6 }
 0x490   :  { %v12180_v31 = vadd.f32 %v3628_v50, %v3574_v56  ;;  %v3019_v56 = vsel %vm12176_vm1, %v2887_v29, 0.0  ;;  %v3021_v46 = vsel %vm12191_vm8, %v2885_v43, 0.0  ;;  %v8035_v27 = vpack.c.bf16 %v2888_v39, %v2890_v52  ;;  %v15364_v52 = vld [vmem:[#allocation46_spill] sm:$0xff]  ;;  %vm15372_vm1 = vmmov %vm15359_vm6 }
 0x491   :  { %v3468_v6 = vpop.f32.mrf.mxu0  ;;  %vm2923_vm8 = vcmp.ge.s32.totalorder %v15373_v32, 3 }
 0x492   :  { %v12195_v50 = vadd.f32 %v3522_v37, %v3468_v6  ;;  %v3045_v6 = vpack.c.bf16 %v3021_v46, %v3019_v56  ;;  %v2862_v46 = vrot.slane %v15282_v35, 5  ;;  %v2855_v56 = vrot.slane %v15360_v18, 5 }
 0x494   :  { %15357 = vst [vmem:[#allocation63_spill] sm:$0xff] %v12195_v50  ;;  %v3527_v28 = vpop.f32.mrf.mxu1 }
 0x495   :  { %v3635_v37 = vpop.f32.mrf.mxu3 }
 0x497   :  { %v3576_v50 = vpop.f32.mrf.mxu2 }
 0x498   :  { %v12207_v53 = vadd.f32 %v3630_v41, %v3576_v50  ;;  %v8112_v41 = vld [vmem:[#allocation2 + $0x160] sm:$0xf] }
 0x499   :  { %v3471_v49 = vpop.f32.mrf.mxu0  ;;  %v8113_v51 = vor.u32 %v8996_v15, %v8112_v41  ;;  %v2883_v41 = vsel %vm2871_vm5, %v15365_v57, %v2860_v4  ;;  %v15386_v15 = vld [vmem:[#allocation41_spill] sm:$0xff] }
 0x49a   :  { %v12213_v43 = vadd.f32 %v3525_v44, %v3471_v49  ;;  %8090 = vmatmul.msk.bf16.gmra.mxu3 %vm15342_vm12, %v3045_v6  ;;  %v2857_v49 = vrot.slane %v15364_v52, 5 }
 0x49b   :  { %4366 = vmatpush.bf16.msrb.mxu0 %v8113_v51 }
 0x49c   :  { %v3530_v29 = vpop.f32.mrf.mxu1  ;;  %8036 = vmatmul.msk.bf16.gmra.mxu0 %vm8034_vm4, %v8035_v27  ;;  %8072 = vmatmul.msk.bf16.gmra.mxu2 %vm8034_vm4, %v8035_v27  ;;  %v2884_v52 = vsel %vm2871_vm5, %v2855_v56, %v2857_v49  ;;  %vm2941_vm4 = vcmp.lt.s32.totalorder %v15373_v32, 15  ;;  %v8994_v32 = vld [vmem:[#allocation2 + $0x154] sm:$0xf0] }
 0x49d   :  { %v3638_v50 = vpop.f32.mrf.mxu3  ;;  %vm12279_vm0 = vmand %vm2923_vm8, %vm2941_vm4  ;;  %vm4032_vm8 = vcmp.lt.s32.totalorder %v15238_v16, 1 }
 0x49f   :  { %8054 = vmatmul.msk.bf16.gmra.mxu1 %vm15359_vm6, %v3045_v6  ;;  %v3579_v44 = vpop.f32.mrf.mxu2  ;;  %v2881_v6 = vsel %vm2871_vm5, %v2860_v4, %v2862_v46  ;;  %vm15383_vm6 = vmmov %vm15372_vm1 }
 0x4a0   :  { %v12228_v27 = vadd.f32 %v3633_v26, %v3579_v44  ;;  %v3023_v26 = vsel %vm12224_vm14, %v2883_v41, 0.0  ;;  %v3025_v44 = vsel %vm12237_vm3, %v2881_v6, 0.0  ;;  %v8106_v6 = vld [vmem:[#allocation2 + $0x158] sm:$0xf0]  ;;  %vm2925_vm14 = vcmp.ge.s32.totalorder %v15386_v15, 3 }
 0x4a1   :  { %v3473_v62 = vpop.f32.mrf.mxu0  ;;  %v3047_v4 = vpack.c.bf16 %v3025_v44, %v3023_v26  ;;  %v15378_v44 = vld [vmem:[#allocation50_spill] sm:$0xff]  ;;  %vm2943_vm3 = vcmp.lt.s32.totalorder %v15386_v15, 15  ;;  %v8298_v15 = vld [vmem:[#allocation2 + $0x248] sm:$0xf0] }
 0x4a2   :  { %15363 = vst [vmem:[#allocation64_spill] sm:$0xff] %v12228_v27  ;;  %v12241_v18 = vadd.f32 %v3527_v28, %v3473_v62  ;;  %v2886_v27 = vsel %vm2871_vm5, %v2853_v34, %v2855_v56  ;;  %v8993_v62 = vld [vmem:[#allocation2 + $0x154] sm:$0xf] }
 0x4a3   :  { %v8038_v35 = vpack.c.bf16 %v2884_v52, %v2886_v27  ;;  %v15371_v56 = vld [vmem:[#allocation36_spill] sm:$0xff] }
 0x4a4   :  { %15368 = vst [vmem:[#allocation65_spill] sm:$0xff] %v12241_v18  ;;  %v3532_v51 = vpop.f32.mrf.mxu1  ;;  %v8109_v18 = vor.u32 %v8993_v62, %v8106_v6  ;;  %vm2922_vm10 = vcmp.ge.s32.totalorder %v15371_v56, 3  ;;  %vm2940_vm7 = vcmp.lt.s32.totalorder %v15371_v56, 15  ;;  %v15374_v27 = vld [vmem:[#allocation48_spill] sm:$0xff] }
 0x4a5   :  { %v3640_v57 = vpop.f32.mrf.mxu3  ;;  %v2859_v52 = vrot.slane %v15374_v27, 5  ;;  %vm12268_vm12 = vmand %vm2922_vm10, %vm2940_vm7  ;;  %v8104_v27 = vld [vmem:[#allocation2 + $0x150] sm:$0xf]  ;;  %v9025_v6 = vld [vmem:[#allocation2 + $0x254] sm:$0xf] }
 0x4a6   :  { %4475 = vmatpush.bf16.msrb.mxu2 %v8109_v18  ;;  %vm12322_vm10 = vmand %vm2925_vm14, %vm2943_vm3  ;;  %vm4071_vm14 = vcmp.ge.s32.totalorder %v11548_v8, 1  ;;  %vm4089_vm3 = vcmp.lt.s32.totalorder %v11548_v8, 13 }
 0x4a7   :  { %v3581_v9 = vpop.f32.mrf.mxu2  ;;  %vm8043_vm7 = vmpackc.low %vm12279_vm0, %vm12268_vm12 }
 0x4a8   :  { %v12251_v23 = vadd.f32 %v3635_v37, %v3581_v9  ;;  %v2864_v9 = vrot.slane %v15291_v40, 5  ;;  %v2866_v37 = vrot.slane %v15292_v33, 5  ;;  %v8105_v33 = vor.u32 %v8994_v32, %v8104_v27 }
 0x4a9   :  { %v3476_v28 = vpop.f32.mrf.mxu0 }
 0x4aa   :  { %v12257_v41 = vadd.f32 %v3530_v29, %v3476_v28  ;;  %8091 = vmatmul.msk.bf16.gmra.mxu3 %vm15370_vm13, %v3047_v4  ;;  %v2861_v28 = vrot.slane %v15378_v44, 5  ;;  %v2877_v62 = vsel %vm2871_vm5, %v2864_v9, %v2866_v37  ;;  %4367 = vmatpush.bf16.msrb.mxu0 %v8105_v33 }
 0x4ab   :  { %v3029_v44 = vsel %vm12279_vm0, %v2877_v62, 0.0  ;;  %v8991_v62 = vld [vmem:[#allocation2 + $0x144] sm:$0xf] }
 0x4ac   :  { %15369 = vst [vmem:[#allocation66_spill] sm:$0xff] %v12257_v41  ;;  %v3535_v34 = vpop.f32.mrf.mxu1  ;;  %8039 = vmatmul.msk.bf16.gmra.mxu0 %vm8037_vm9, %v8038_v35  ;;  %8075 = vmatmul.msk.bf16.gmra.mxu2 %vm8037_vm9, %v8038_v35  ;;  %vm15385_vm9 = vmmov %vm15372_vm1  ;;  %v15401_v35 = vld [vmem:[#allocation42_spill] sm:$0xff] }
 0x4ad   :  { %v3643_v45 = vpop.f32.mrf.mxu3  ;;  %vm4088_vm0 = vcmp.lt.s32.totalorder %v15401_v35, 13 }
 0x4af   :  { %8055 = vmatmul.msk.bf16.gmra.mxu1 %vm15372_vm1, %v3047_v4  ;;  %v3584_v29 = vpop.f32.mrf.mxu2  ;;  %v2879_v4 = vsel %vm2871_vm5, %v2862_v46, %v2864_v9  ;;  %v2880_v46 = vsel %vm2871_vm5, %v2859_v52, %v2861_v28  ;;  %v2882_v9 = vsel %vm2871_vm5, %v2857_v49, %v2859_v52  ;;  %v8098_v49 = vld [vmem:[#allocation2 + $0x148] sm:$0xf0]  ;;  %v2868_v52 = vrot.slane %v15300_v7, 5 }
 0x4b0   :  { %v12272_v18 = vadd.f32 %v3638_v50, %v3584_v29  ;;  %v3027_v29 = vsel %vm12268_vm12, %v2879_v4, 0.0 }
 0x4b1   :  { %v3478_v26 = vpop.f32.mrf.mxu0  ;;  %v3049_v40 = vpack.c.bf16 %v3029_v44, %v3027_v29  ;;  %v15384_v44 = vld [vmem:[#allocation40_spill] sm:$0xff] }
 0x4b2   :  { %15377 = vst [vmem:[#allocation67_spill] sm:$0xff] %v12272_v18  ;;  %v12283_v56 = vadd.f32 %v3532_v51, %v3478_v26  ;;  %v8041_v51 = vpack.c.bf16 %v2880_v46, %v2882_v9  ;;  %vm2924_vm2 = vcmp.ge.s32.totalorder %v15384_v44, 3  ;;  %vm2942_vm15 = vcmp.lt.s32.totalorder %v15384_v44, 15 }
 0x4b3   :  { %vm12309_vm13 = vmand %vm2924_vm2, %vm2942_vm15 }
 0x4b4   :  { %v3537_v50 = vpop.f32.mrf.mxu1 }
 0x4b5   :  { %v3645_v18 = vpop.f32.mrf.mxu3 }
 0x4b7   :  { %v3586_v41 = vpop.f32.mrf.mxu2 }
 0x4b8   :  { %v12293_v26 = vadd.f32 %v3640_v57, %v3586_v41  ;;  %v8101_v57 = vor.u32 %v8991_v62, %v8098_v49  ;;  %v15392_v62 = vld [vmem:[#allocation59_spill] sm:$0xff] }
 0x4b9   :  { %v3481_v32 = vpop.f32.mrf.mxu0  ;;  %v15393_v49 = vrot.slane %v15392_v62, 5 }
 0x4ba   :  { %15381 = vst [vmem:[#allocation68_spill] sm:$0xff] %v12293_v26  ;;  %v12299_v27 = vadd.f32 %v3535_v34, %v3481_v32  ;;  %8092 = vmatmul.msk.bf16.gmra.mxu3 %vm15383_vm6, %v3049_v40  ;;  %4476 = vmatpush.bf16.msrb.mxu2 %v8101_v57  ;;  %v15387_v34 = vld [vmem:[#allocation52_spill] sm:$0xff]  ;;  %v2875_v57 = vsel %vm2871_vm5, %v2866_v37, %v2868_v52  ;;  %vm15402_vm6 = vmmov %vm15372_vm1 }
 0x4bb   :  { %v2863_v4 = vrot.slane %v15387_v34, 5 }
 0x4bc   :  { %15382 = vst [vmem:[#allocation69_spill] sm:$0xff] %v12299_v27  ;;  %v3540_v33 = vpop.f32.mrf.mxu1  ;;  %8042 = vmatmul.msk.bf16.gmra.mxu0 %vm8040_vm11, %v8041_v51  ;;  %8078 = vmatmul.msk.bf16.gmra.mxu2 %vm8040_vm11, %v8041_v51  ;;  %v15391_v51 = vld [vmem:[#allocation54_spill] sm:$0xff]  ;;  %vm4070_vm11 = vcmp.ge.s32.totalorder %v15401_v35, 1  ;;  %v9026_v35 = vld [vmem:[#allocation2 + $0x254] sm:$0xf0] }
 0x4bd   :  { %v3648_v39 = vpop.f32.mrf.mxu3  ;;  %v2865_v32 = vrot.slane %v15391_v51, 5  ;;  %v8096_v51 = vld [vmem:[#allocation2 + $0x140] sm:$0xf]  ;;  %v2878_v37 = vsel %vm2871_vm5, %v2861_v28, %v2863_v4  ;;  %vm12370_vm15 = vmand %vm4070_vm11, %vm4088_vm0 }
 0x4be   :  { %v15399_v28 = vld [vmem:[#allocation10_spill] sm:$0xff] }
 0x4bf   :  { %8056 = vmatmul.msk.bf16.gmra.mxu1 %vm15385_vm9, %v3049_v40  ;;  %v3589_v41 = vpop.f32.mrf.mxu2  ;;  %v2873_v40 = vsel %vm2871_vm5, %v2868_v52, %v15393_v49  ;;  %v2876_v49 = vsel %vm2871_vm5, %v2863_v4, %v2865_v32  ;;  %v3997_v4 = vrot.slane %v15399_v28, 7  ;;  %vm8046_vm9 = vmpackc.low %vm12322_vm10, %vm12309_vm13 }
 0x4c0   :  { %v12313_v46 = vadd.f32 %v3643_v45, %v3589_v41  ;;  %v3031_v45 = vsel %vm12309_vm13, %v2875_v57, 0.0  ;;  %v3033_v41 = vsel %vm12322_vm10, %v2873_v40, 0.0  ;;  %vm15412_vm13 = vmmov %vm15372_vm1  ;;  %vm4072_vm10 = vcmp.ge.s32.totalorder %v11553_v20, 1 }
 0x4c1   :  { %v3483_v9 = vpop.f32.mrf.mxu0  ;;  %v3051_v27 = vpack.c.bf16 %v3033_v41, %v3031_v45  ;;  %v9029_v45 = vld [vmem:[#allocation2 + $0x274] sm:$0xf] }
 0x4c2   :  { %15390 = vst [vmem:[#allocation70_spill] sm:$0xff] %v12313_v46  ;;  %v12326_v34 = vadd.f32 %v3537_v50, %v3483_v9  ;;  %v8992_v46 = vld [vmem:[#allocation2 + $0x144] sm:$0xf0]  ;;  %v8044_v9 = vpack.c.bf16 %v2876_v49, %v2878_v37  ;;  %v8322_v37 = vld [vmem:[#allocation2 + $0x278] sm:$0xf0] }
 0x4c3   :  { %v8097_v52 = vor.u32 %v8992_v46, %v8096_v51  ;;  %v14950_v46 = vrot.slane %v11211_v3, 7  ;;  %v14951_v51 = vrot.slane %v15392_v62, 7 }
 0x4c4   :  { %15396 = vst [vmem:[#allocation71_spill] sm:$0xff] %v12326_v34  ;;  %v3542_v44 = vpop.f32.mrf.mxu1 }
 0x4c5   :  { %v3650_v7 = vpop.f32.mrf.mxu3  ;;  %4368 = vmatpush.bf16.msrb.mxu0 %v8097_v52 }
 0x4c7   :  { %v3591_v50 = vpop.f32.mrf.mxu2 }
 0x4c8   :  { %v12336_v34 = vadd.f32 %v3645_v18, %v3591_v50  ;;  %v15400_v18 = vld [vmem:[#allocation34_spill] sm:$0xff]  ;;  %v8325_v50 = vor.u32 %v9029_v45, %v8322_v37  ;;  %v15408_v45 = vld [vmem:[#allocation56_spill] sm:$0xff] }
 0x4c9   :  { %v3486_v57 = vpop.f32.mrf.mxu0  ;;  %vm4069_vm4 = vcmp.ge.s32.totalorder %v15400_v18, 1  ;;  %vm4087_vm12 = vcmp.lt.s32.totalorder %v15400_v18, 13  ;;  %v4068_v18 = vsel %vm4032_vm8, %v14951_v51, %v3997_v4  ;;  %v2867_v37 = vrot.slane %v15408_v45, 5  ;;  %v8304_v51 = vld [vmem:[#allocation2 + $0x250] sm:$0xf] }
 0x4ca   :  { %15397 = vst [vmem:[#allocation72_spill] sm:$0xff] %v12336_v34  ;;  %v12342_v40 = vadd.f32 %v3540_v33, %v3486_v57  ;;  %8093 = vmatmul.msk.bf16.gmra.mxu3 %vm15372_vm1, %v3051_v27  ;;  %v8306_v33 = vld [vmem:[#allocation2 + $0x258] sm:$0xf0]  ;;  %vm12356_vm2 = vmand %vm4069_vm4, %vm4087_vm12  ;;  %v8320_v34 = vld [vmem:[#allocation2 + $0x270] sm:$0xf] }
 0x4cb   :  { %v8309_v49 = vor.u32 %v9025_v6, %v8306_v33  ;;  %4947 = vmatpush.bf16.msra.mxu3 %v8325_v50  ;;  %v2874_v50 = vsel %vm2871_vm5, %v2865_v32, %v2867_v37  ;;  %vm8174_vm11 = vmpackc.low %vm12370_vm15, %vm12356_vm2 }
 0x4cc   :  { %15398 = vst [vmem:[#allocation73_spill] sm:$0xff] %v12342_v40  ;;  %v3843_v26 = vpop.f32.mrf.mxu1  ;;  %8045 = vmatmul.msk.bf16.gmra.mxu0 %vm8043_vm7, %v8044_v9  ;;  %8081 = vmatmul.msk.bf16.gmra.mxu2 %vm8043_vm7, %v8044_v9  ;;  %v4066_v9 = vsel %vm4032_vm8, %v3997_v4, %v14950_v46  ;;  %v4160_v40 = vsel %vm12356_vm2, %v4068_v18, 0.0  ;;  %vm4090_vm7 = vcmp.lt.s32.totalorder %v11553_v20, 13 }
 0x4cd   :  { %v12353_v41 = vpop.f32.mrf.mxu3  ;;  %4887 = vmatpush.bf16.msra.mxu2 %v8309_v49  ;;  %v4162_v4 = vsel %vm12370_vm15, %v4066_v9, 0.0  ;;  %v15410_v49 = vrot.slane %v11273_v2, 5  ;;  %vm12422_vm4 = vmand %vm4072_vm10, %vm4090_vm7  ;;  %vm4075_vm10 = vcmp.ge.s32.totalorder %v11572_v55, 1  ;;  %vm4093_vm7 = vcmp.lt.s32.totalorder %v11572_v55, 13 }
 0x4ce   :  { %v4196_v45 = vpack.c.bf16 %v4162_v4, %v4160_v40  ;;  %v14954_v40 = vrot.slane %v11219_v12, 7  ;;  %v15417_v4 = vld [vmem:[#allocation9_spill] sm:$0xff] }
 0x4cf   :  { %8057 = vmatmul.msk.bf16.gmra.mxu1 %vm15402_vm6, %v3051_v27  ;;  %v3594_v57 = vpop.f32.mrf.mxu2  ;;  %v15428_v27 = vld [vmem:[#allocation13_spill] sm:$0xff] }
 0x4d0   :  { %v12374_v6 = vadd.f32 %v3648_v39, %v3594_v57  ;;  %v2872_v39 = vsel %vm2871_vm5, %v2867_v37, %v15410_v49  ;;  %v9030_v57 = vld [vmem:[#allocation2 + $0x274] sm:$0xf0]  ;;  %vm15411_vm5 = vmmov %vm15372_vm1  ;;  %v8296_v37 = vld [vmem:[#allocation2 + $0x240] sm:$0xf] }
 0x4d1   :  { %v3488_v33 = vpop.f32.mrf.mxu0  ;;  %vm12408_vm1 = vmand %vm4071_vm14, %vm4089_vm3 }
 0x4d2   :  { %15407 = vst [vmem:[#allocation74_spill] sm:$0xff] %v12374_v6  ;;  %v12377_v28 = vadd.f32 %v3542_v44, %v3488_v33  ;;  %v8305_v44 = vor.u32 %v9026_v35, %v8304_v51  ;;  %v8047_v6 = vpack.c.bf16 %v2872_v39, %v2874_v50  ;;  %v15414_v35 = vld [vmem:[#allocation11_spill] sm:$0xff]  ;;  %vm15424_vm12 = vmmov %vm15411_vm5 }
 0x4d3   :  { %vm15426_vm2 = vmmov %vm15411_vm5 }
 0x4d4   :  { %15409 = vst [vmem:[#allocation75_spill] sm:$0xff] %v12377_v28  ;;  %v3845_v46 = vpop.f32.mrf.mxu1  ;;  %v8321_v28 = vor.u32 %v9030_v57, %v8320_v34  ;;  %4779 = vmatpush.bf16.msra.mxu0 %v8305_v44  ;;  %v4001_v34 = vrot.slane %v11215_v1, 7  ;;  %v15418_v57 = vrot.slane %v11211_v3, 7  ;;  %vm8177_vm3 = vmpackc.low %vm12422_vm4, %vm12408_vm1 }
 0x4d5   :  { %v3953_v33 = vpop.f32.mrf.mxu3 }
 0x4d6   :  { %4839 = vmatpush.bf16.msra.mxu1 %v8321_v28  ;;  %v4062_v44 = vsel %vm4032_vm8, %v4001_v34, %v14954_v40 }
 0x4d7   :  { %v3596_v18 = vpop.f32.mrf.mxu2 }
 0x4d8   :  { %v12389_v9 = vadd.f32 %v3650_v7, %v3596_v18  ;;  %v9023_v7 = vld [vmem:[#allocation2 + $0x244] sm:$0xf]  ;;  %v4064_v18 = vsel %vm4032_vm8, %v15418_v57, %v4001_v34  ;;  %v9024_v34 = vld [vmem:[#allocation2 + $0x244] sm:$0xf0]  ;;  %v15422_v57 = vrot.slane %v15414_v35, 7 }
 0x4d9   :  { %v3789_v62 = vpop.f32.mrf.mxu0  ;;  %v4164_v40 = vsel %vm12408_vm1, %v4064_v18, 0.0  ;;  %vm15438_vm1 = vmmov %vm15426_vm2 }
 0x4da   :  { %v3790_v49 = vadd.f32 %v3789_v62, %v11986_v60  ;;  %8237 = vmatmul.msk.bf16.vlgmr.msrb.gmra.mxu3 %vm15411_vm5, %v4196_v45  ;;  %v8301_v60 = vor.u32 %v9023_v7, %v8298_v15  ;;  %v15413_v62 = vld [vmem:[#allocation8_spill] sm:$0xff]  ;;  %v15421_v7 = vld [vmem:[#allocation45_spill] sm:$0xff] }
 0x4db   :  { %v3996_v28 = vrot.slane %v15413_v62, 7 }
 0x4dc   :  { %v3848_v32 = vpop.f32.mrf.mxu1  ;;  %v12397_v51 = vadd.f32 %v3843_v26, %v3790_v49  ;;  %8048 = vmatmul.msk.bf16.gmra.mxu0 %vm8046_vm9, %v8047_v6  ;;  %8084 = vmatmul.msk.bf16.gmra.mxu2 %vm8046_vm9, %v8047_v6  ;;  %v4011_v6 = vrot.slane %v11235_v11, 7 }
 0x4dd   :  { %v3956_v29 = vpop.f32.mrf.mxu3  ;;  %4888 = vmatpush.bf16.msra.mxu2 %v8301_v60  ;;  %v4065_v20 = vsel %vm4032_vm8, %v3996_v28, %v15422_v57 }
 0x4df   :  { %8201 = vmatmul.msk.bf16.vlgmr.msrb.gmra.mxu1 %vm15412_vm13, %v4196_v45  ;;  %v3897_v26 = vpop.f32.mrf.mxu2  ;;  %v4166_v45 = vsel %vm12422_vm4, %v4062_v44, 0.0  ;;  %vm15437_vm13 = vmmov %vm15426_vm2  ;;  %vm4076_vm4 = vcmp.ge.s32.totalorder %v11577_v0, 1 }
 0x4e0   :  { %v3898_v39 = vadd.f32 %v3897_v26, %v15417_v4 }
 0x4e1   :  { %v3791_v50 = vpop.f32.mrf.mxu0 }
 0x4e2   :  { %v3792_v15 = vadd.f32 %v3791_v50, %v15421_v7  ;;  %v12428_v60 = vadd.f32 %v12353_v41, %v3898_v39  ;;  %v15423_v50 = vrot.slane %v11273_v2, 7  ;;  %v4198_v7 = vpack.c.bf16 %v4166_v45, %v4164_v40  ;;  %v15425_v40 = vld [vmem:[#allocation27_spill] sm:$0xff] }
 0x4e3   :  { %vm4073_vm0 = vcmp.ge.s32.totalorder %v15425_v40, 1  ;;  %vm4091_vm6 = vcmp.lt.s32.totalorder %v15425_v40, 13  ;;  %v15431_v45 = vld [vmem:[#allocation47_spill] sm:$0xff]  ;;  %v8290_v40 = vld [vmem:[#allocation2 + $0x238] sm:$0xf0] }
 0x4e4   :  { %v3850_v26 = vpop.f32.mrf.mxu1  ;;  %v12430_v4 = vadd.f32 %v3845_v46, %v3792_v15  ;;  %v4067_v41 = vsel %vm4032_vm8, %v15423_v50, %v3996_v28  ;;  %v8297_v46 = vor.u32 %v9024_v34, %v8296_v37  ;;  %vm12463_vm5 = vmand %vm4073_vm0, %vm4091_vm6 }
 0x4e5   :  { %v3958_v39 = vpop.f32.mrf.mxu3  ;;  %v8175_v15 = vpack.c.bf16 %v4065_v20, %v4067_v41  ;;  %v4005_v20 = vrot.slane %v11223_v5, 7  ;;  %v15432_v41 = vld [vmem:[#allocation14_spill] sm:$0xff]  ;;  %v15436_v5 = vrot.slane %v15414_v35, 7 }
 0x4e6   :  { %4780 = vmatpush.bf16.msra.mxu0 %v8297_v46  ;;  %v4002_v46 = vrot.slane %v15432_v41, 7 }
 0x4e7   :  { %v3899_v18 = vpop.f32.mrf.mxu2 }
 0x4e8   :  { %v3900_v44 = vadd.f32 %v3899_v18, %v12027_v24  ;;  %v4007_v24 = vrot.slane %v11227_v19, 7 }
 0x4e9   :  { %v3794_v8 = vpop.f32.mrf.mxu0 }
 0x4ea   :  { %v3795_v57 = vadd.f32 %v3794_v8, %v12033_v21  ;;  %v12450_v62 = vadd.f32 %v3953_v33, %v3900_v44  ;;  %8238 = vmatmul.msk.bf16.gmra.mxu3 %vm15424_vm12, %v4198_v7  ;;  %v15427_v8 = vld [vmem:[#allocation28_spill] sm:$0xff]  ;;  %v4000_v33 = vrot.slane %v15428_v27, 7  ;;  %v4058_v18 = vsel %vm4032_vm8, %v4005_v20, %v4007_v24  ;;  %vm12513_vm12 = vmand %vm4075_vm10, %vm4093_vm7 }
 0x4eb   :  { %vm4074_vm15 = vcmp.ge.s32.totalorder %v15427_v8, 1  ;;  %vm4092_vm9 = vcmp.lt.s32.totalorder %v15427_v8, 13 }
 0x4ec   :  { %v3853_v28 = vpop.f32.mrf.mxu1  ;;  %v12453_v37 = vadd.f32 %v3848_v32, %v3795_v57  ;;  %8176 = vmatmul.msk.bf16.vlgmr.msrb.gmra.mxu0 %vm8174_vm11, %v8175_v15  ;;  %8212 = vmatmul.msk.bf16.vlgmr.msrb.gmra.mxu2 %vm8174_vm11, %v8175_v15  ;;  %vm12475_vm14 = vmand %vm4074_vm15, %vm4092_vm9  ;;  %vm4094_vm11 = vcmp.lt.s32.totalorder %v11577_v0, 13  ;;  %vm4077_vm15 = vcmp.ge.s32.totalorder %v11582_v13, 1  ;;  %vm4095_vm9 = vcmp.lt.s32.totalorder %v11582_v13, 13  ;;  %v9020_v32 = vld [vmem:[#allocation2 + $0x224] sm:$0xf0] }
 0x4ed   :  { %v3961_v52 = vpop.f32.mrf.mxu3  ;;  %v4170_v19 = vsel %vm12475_vm14, %v4058_v18, 0.0  ;;  %vm12523_vm0 = vmand %vm4076_vm4, %vm4094_vm11  ;;  %vm4079_vm4 = vcmp.ge.s32.totalorder %v11597_v42, 1  ;;  %vm4097_vm11 = vcmp.lt.s32.totalorder %v11597_v42, 13 }
 0x4ee   :  { %vm8180_vm6 = vmpackc.low %vm12475_vm14, %vm12463_vm5 }
 0x4ef   :  { %8202 = vmatmul.msk.bf16.gmra.mxu1 %vm15426_vm2, %v4198_v7  ;;  %v3902_v21 = vpop.f32.mrf.mxu2  ;;  %v15433_v7 = vrot.slane %v11219_v12, 7  ;;  %vm15447_vm2 = vmmov %vm15438_vm1 }
 0x4f0   :  { %v3903_v34 = vadd.f32 %v3902_v21, %v15431_v45  ;;  %v9021_v45 = vld [vmem:[#allocation2 + $0x234] sm:$0xf]  ;;  %vm8183_vm7 = vmpackc.low %vm12523_vm0, %vm12513_vm12 }
 0x4f1   :  { %v3796_v50 = vpop.f32.mrf.mxu0  ;;  %v4060_v15 = vsel %vm4032_vm8, %v15433_v7, %v4005_v20  ;;  %v8293_v20 = vor.u32 %v9021_v45, %v8290_v40  ;;  %v4061_v7 = vsel %vm4032_vm8, %v4000_v33, %v4002_v46  ;;  %v9022_v45 = vld [vmem:[#allocation2 + $0x234] sm:$0xf0] }
 0x4f2   :  { %v3797_v57 = vadd.f32 %v3796_v50, %v12059_v14  ;;  %v12480_v8 = vadd.f32 %v3956_v29, %v3903_v34  ;;  %v4168_v27 = vsel %vm12463_vm5, %v4060_v15, 0.0  ;;  %v4063_v14 = vsel %vm4032_vm8, %v15436_v5, %v4000_v33  ;;  %v8288_v33 = vld [vmem:[#allocation2 + $0x230] sm:$0xf] }
 0x4f3   :  { %4889 = vmatpush.bf16.msra.mxu2 %v8293_v20  ;;  %v4200_v34 = vpack.c.bf16 %v4170_v19, %v4168_v27  ;;  %v8178_v50 = vpack.c.bf16 %v4061_v7, %v4063_v14  ;;  %v8289_v27 = vor.u32 %v9022_v45, %v8288_v33  ;;  %v15442_v7 = vld [vmem:[#allocation22_spill] sm:$0xff]  ;;  %v15446_v33 = vld [vmem:[#allocation60_spill] sm:$0xff]  ;;  %v9018_v20 = vld [vmem:[#allocation2 + $0x214] sm:$0xf0] }
 0x4f4   :  { %v3855_v21 = vpop.f32.mrf.mxu1  ;;  %v12482_v41 = vadd.f32 %v3850_v26, %v3797_v57 }
 0x4f5   :  { %v3963_v29 = vpop.f32.mrf.mxu3  ;;  %4781 = vmatpush.bf16.msra.mxu0 %v8289_v27 }
 0x4f7   :  { %v3904_v26 = vpop.f32.mrf.mxu2 }
 0x4f8   :  { %v3905_v57 = vadd.f32 %v3904_v26, %v12069_v30  ;;  %v4009_v30 = vrot.slane %v11231_v25, 7 }
 0x4f9   :  { %v3799_v15 = vpop.f32.mrf.mxu0 }
 0x4fa   :  { %v3800_v40 = vadd.f32 %v3799_v15, %v12075_v59  ;;  %v12500_v18 = vadd.f32 %v3958_v39, %v3905_v57  ;;  %8239 = vmatmul.msk.bf16.gmra.mxu3 %vm15437_vm13, %v4200_v34  ;;  %v15439_v39 = vld [vmem:[#allocation15_spill] sm:$0xff]  ;;  %v4056_v15 = vsel %vm4032_vm8, %v4007_v24, %v4009_v30  ;;  %vm12560_vm13 = vmand %vm4077_vm15, %vm4095_vm9 }
 0x4fc   :  { %v3858_v5 = vpop.f32.mrf.mxu1  ;;  %v12503_v19 = vadd.f32 %v3853_v28, %v3800_v40  ;;  %8179 = vmatmul.msk.bf16.gmra.mxu0 %vm8177_vm3, %v8178_v50  ;;  %8215 = vmatmul.msk.bf16.gmra.mxu2 %vm8177_vm3, %v8178_v50  ;;  %v4004_v28 = vrot.slane %v15439_v39, 7  ;;  %v15443_v50 = vld [vmem:[#allocation17_spill] sm:$0xff]  ;;  %v8282_v39 = vld [vmem:[#allocation2 + $0x228] sm:$0xf0]  ;;  %vm15449_vm3 = vmmov %vm15438_vm1 }
 0x4fd   :  { %v3966_v59 = vpop.f32.mrf.mxu3  ;;  %v4006_v57 = vrot.slane %v15443_v50, 7  ;;  %v9019_v50 = vld [vmem:[#allocation2 + $0x224] sm:$0xf] }
 0x4ff   :  { %8203 = vmatmul.msk.bf16.gmra.mxu1 %vm15438_vm1, %v4200_v34  ;;  %v3907_v49 = vpop.f32.mrf.mxu2  ;;  %v4054_v34 = vsel %vm4032_vm8, %v4009_v30, %v4011_v6  ;;  %v4057_v24 = vsel %vm4032_vm8, %v4004_v28, %v4006_v57  ;;  %v4059_v30 = vsel %vm4032_vm8, %v4002_v46, %v4004_v28  ;;  %v14971_v28 = vrot.slane %v15263_v48, 7 }
 0x500   :  { %v3908_v14 = vadd.f32 %v3907_v49, %v15442_v7  ;;  %v4172_v49 = vsel %vm12513_vm12, %v4056_v15, 0.0  ;;  %v4174_v7 = vsel %vm12523_vm0, %v4054_v34, 0.0  ;;  %vm15457_vm12 = vmmov %vm15438_vm1  ;;  %vm4080_vm0 = vcmp.ge.s32.totalorder %v11600_v58, 1 }
 0x501   :  { %v3801_v26 = vpop.f32.mrf.mxu0 }
 0x502   :  { %v3802_v45 = vadd.f32 %v3801_v26, %v15446_v33  ;;  %v12528_v27 = vadd.f32 %v3961_v52, %v3908_v14  ;;  %v8285_v26 = vor.u32 %v9019_v50, %v8282_v39  ;;  %v4202_v14 = vpack.c.bf16 %v4174_v7, %v4172_v49 }
 0x503   :  { %v8181_v33 = vpack.c.bf16 %v4057_v24, %v4059_v30  ;;  %v4013_v39 = vrot.slane %v15262_v38, 7  ;;  %v9016_v30 = vld [vmem:[#allocation2 + $0x204] sm:$0xf0] }
 0x504   :  { %v3860_v0 = vpop.f32.mrf.mxu1  ;;  %v12530_v55 = vadd.f32 %v3855_v21, %v3802_v45  ;;  %4890 = vmatpush.bf16.msra.mxu2 %v8285_v26  ;;  %v15454_v26 = vld [vmem:[#allocation61_spill] sm:$0xff] }
 0x505   :  { %v3968_v52 = vpop.f32.mrf.mxu3  ;;  %v4050_v7 = vsel %vm4032_vm8, %v4013_v39, %v14971_v28  ;;  %v4052_v24 = vsel %vm4032_vm8, %v4011_v6, %v4013_v39 }
 0x506   :  { %v4176_v28 = vsel %vm12560_vm13, %v4052_v24, 0.0 }
 0x507   :  { %v3909_v21 = vpop.f32.mrf.mxu2 }
 0x508   :  { %v3910_v45 = vadd.f32 %v3909_v21, %v12111_v22  ;;  %v8280_v22 = vld [vmem:[#allocation2 + $0x220] sm:$0xf] }
 0x509   :  { %v3804_v15 = vpop.f32.mrf.mxu0  ;;  %v8281_v44 = vor.u32 %v9020_v32, %v8280_v22 }
 0x50a   :  { %v3805_v34 = vadd.f32 %v3804_v15, %v12117_v47  ;;  %v12546_v11 = vadd.f32 %v3963_v29, %v3910_v45  ;;  %8240 = vmatmul.msk.bf16.gmra.mxu3 %vm15447_vm2, %v4202_v14  ;;  %v15448_v47 = vld [vmem:[#allocation30_spill] sm:$0xff]  ;;  %v14976_v15 = vrot.slane %v15268_v17, 7  ;;  %vm12615_vm2 = vmand %vm4079_vm4, %vm4097_vm11 }
 0x50b   :  { %vm4078_vm5 = vcmp.ge.s32.totalorder %v15448_v47, 1  ;;  %vm4096_vm14 = vcmp.lt.s32.totalorder %v15448_v47, 13  ;;  %4782 = vmatpush.bf16.msra.mxu0 %v8281_v44  ;;  %v9017_v47 = vld [vmem:[#allocation2 + $0x214] sm:$0xf] }
 0x50c   :  { %v3863_v46 = vpop.f32.mrf.mxu1  ;;  %v12551_v50 = vadd.f32 %v3858_v5, %v3805_v34  ;;  %8182 = vmatmul.msk.bf16.gmra.mxu0 %vm8180_vm6, %v8181_v33  ;;  %8218 = vmatmul.msk.bf16.gmra.mxu2 %vm8180_vm6, %v8181_v33  ;;  %vm12570_vm10 = vmand %vm4078_vm5, %vm4096_vm14  ;;  %v15455_v33 = vld [vmem:[#allocation20_spill] sm:$0xff]  ;;  %v15456_v34 = vld [vmem:[#allocation62_spill] sm:$0xff]  ;;  %vm4098_vm6 = vcmp.lt.s32.totalorder %v11600_v58, 13 }
 0x50d   :  { %v12557_v29 = vpop.f32.mrf.mxu3  ;;  %v4008_v45 = vrot.slane %v15455_v33, 7  ;;  %v4178_v6 = vsel %vm12570_vm10, %v4050_v7, 0.0  ;;  %vm12629_vm15 = vmand %vm4080_vm0, %vm4098_vm6  ;;  %v8264_v5 = vld [vmem:[#allocation2 + $0x200] sm:$0xf] }
 0x50e   :  { %v4204_v33 = vpack.c.bf16 %v4178_v6, %v4176_v28  ;;  %v4017_v28 = vrot.slane %v15272_v54, 7  ;;  %v4012_v6 = vrot.slane %v15275_v61, 7  ;;  %vm8186_vm9 = vmpackc.low %vm12570_vm10, %vm12560_vm13 }
 0x50f   :  { %8204 = vmatmul.msk.bf16.gmra.mxu1 %vm15449_vm3, %v4202_v14  ;;  %v3912_v49 = vpop.f32.mrf.mxu2  ;;  %v4053_v13 = vsel %vm4032_vm8, %v4008_v45, %v14976_v15  ;;  %vm15466_vm5 = vmmov %vm15438_vm1 }
 0x510   :  { %v3913_v14 = vadd.f32 %v3912_v49, %v15454_v26  ;;  %v8274_v49 = vld [vmem:[#allocation2 + $0x218] sm:$0xf0]  ;;  %v9027_v26 = vld [vmem:[#allocation2 + $0x264] sm:$0xf]  ;;  %vm15470_vm13 = vmmov %vm15438_vm1 }
 0x511   :  { %v3806_v21 = vpop.f32.mrf.mxu0  ;;  %vm8189_vm11 = vmpackc.low %vm12629_vm15, %vm12615_vm2 }
 0x512   :  { %v3807_v22 = vadd.f32 %v3806_v21, %v15456_v34  ;;  %v12578_v32 = vadd.f32 %v3966_v59, %v3913_v14  ;;  %v4055_v59 = vsel %vm4032_vm8, %v4006_v57, %v4008_v45  ;;  %v8277_v14 = vor.u32 %v9017_v47, %v8274_v49  ;;  %v8314_v21 = vld [vmem:[#allocation2 + $0x268] sm:$0xf0] }
 0x513   :  { %v8317_v24 = vor.u32 %v9027_v26, %v8314_v21  ;;  %v15488_v49 = vld [vmem:[#allocation55_spill] sm:$0xff] }
 0x514   :  { %v3865_v44 = vpop.f32.mrf.mxu1  ;;  %v12584_v39 = vadd.f32 %v3860_v0, %v3807_v22  ;;  %4891 = vmatpush.bf16.msra.mxu2 %v8277_v14  ;;  %v8184_v0 = vpack.c.bf16 %v4053_v13, %v4055_v59  ;;  %v14977_v13 = vrot.slane %v15273_v10, 7  ;;  %v15460_v59 = vld [vmem:[#allocation7_spill] sm:$0xff] }
 0x515   :  { %v3973_v34 = vpop.f32.mrf.mxu3  ;;  %4948 = vmatpush.bf16.msra.mxu3 %v8317_v24  ;;  %v4014_v14 = vrot.slane %v15460_v59, 7  ;;  %v15461_v24 = vrot.slane %v15263_v48, 7 }
 0x516   :  { %v4046_v21 = vsel %vm4032_vm8, %v4017_v28, %v14977_v13 }
 0x517   :  { %v3914_v7 = vpop.f32.mrf.mxu2 }
 0x518   :  { %v3915_v22 = vadd.f32 %v3914_v7, %v12157_v36  ;;  %v8272_v36 = vld [vmem:[#allocation2 + $0x210] sm:$0xf]  ;;  %v4048_v7 = vsel %vm4032_vm8, %v15461_v24, %v4017_v28  ;;  %v9015_v28 = vld [vmem:[#allocation2 + $0x204] sm:$0xf]  ;;  %v4049_v24 = vsel %vm4032_vm8, %v4012_v6, %v4014_v14 }
 0x519   :  { %v3809_v38 = vpop.f32.mrf.mxu0  ;;  %v8273_v40 = vor.u32 %v9018_v20, %v8272_v36 }
 0x51a   :  { %v3810_v15 = vadd.f32 %v3809_v38, %v12163_v63  ;;  %v12598_v57 = vadd.f32 %v3968_v52, %v3915_v22  ;;  %8241 = vmatmul.msk.bf16.gmra.mxu3 %vm15438_vm1, %v4204_v33  ;;  %v8312_v38 = vld [vmem:[#allocation2 + $0x260] sm:$0xf]  ;;  %v9028_v52 = vld [vmem:[#allocation2 + $0x264] sm:$0xf0] }
 0x51b   :  { %4783 = vmatpush.bf16.msra.mxu0 %v8273_v40  ;;  %v15464_v22 = vld [vmem:[#allocation63_spill] sm:$0xff]  ;;  %v4180_v40 = vsel %vm12615_vm2, %v4048_v7, 0.0  ;;  %vm15490_vm2 = vmmov %vm15466_vm5 }
 0x51c   :  { %v3868_v47 = vpop.f32.mrf.mxu1  ;;  %v12602_v45 = vadd.f32 %v3863_v46, %v3810_v15  ;;  %8185 = vmatmul.msk.bf16.gmra.mxu0 %vm8183_vm7, %v8184_v0  ;;  %8221 = vmatmul.msk.bf16.gmra.mxu2 %vm8183_vm7, %v8184_v0  ;;  %v8313_v46 = vor.u32 %v9028_v52, %v8312_v38  ;;  %v4182_v52 = vsel %vm12629_vm15, %v4046_v21, 0.0  ;;  %v15489_v0 = vld [vmem:[#allocation36_spill] sm:$0xff] }
 0x51d   :  { %v12607_v63 = vpop.f32.mrf.mxu3  ;;  %vm4083_vm0 = vcmp.ge.s32.totalorder %v15489_v0, 1  ;;  %vm4101_vm6 = vcmp.lt.s32.totalorder %v15489_v0, 13 }
 0x51e   :  { %4840 = vmatpush.bf16.msra.mxu1 %v8313_v46  ;;  %v15465_v46 = vrot.slane %v15268_v17, 7 }
 0x51f   :  { %8205 = vmatmul.msk.bf16.gmra.mxu1 %vm15457_vm12, %v4204_v33  ;;  %v3917_v15 = vpop.f32.mrf.mxu2  ;;  %vm15485_vm12 = vmmov %vm15466_vm5 }
 0x520   :  { %v3918_v26 = vadd.f32 %v3917_v15, %v12180_v31  ;;  %v8266_v15 = vld [vmem:[#allocation2 + $0x208] sm:$0xf0] }
 0x521   :  { %v3811_v33 = vpop.f32.mrf.mxu0 }
 0x522   :  { %v3812_v31 = vadd.f32 %v3811_v33, %v15464_v22  ;;  %v12635_v36 = vadd.f32 %v12557_v29, %v3918_v26  ;;  %v4051_v29 = vsel %vm4032_vm8, %v15465_v46, %v4012_v6  ;;  %v8269_v26 = vor.u32 %v9015_v28, %v8266_v15  ;;  %v15468_v15 = vld [vmem:[#allocation51_spill] sm:$0xff]  ;;  %v15472_v46 = vld [vmem:[#allocation44_spill] sm:$0xff] }
 0x524   :  { %v3870_v20 = vpop.f32.mrf.mxu1  ;;  %v12637_v38 = vadd.f32 %v3865_v44, %v3812_v31  ;;  %v4206_v44 = vpack.c.bf16 %v4182_v52, %v4180_v40  ;;  %4892 = vmatpush.bf16.msra.mxu2 %v8269_v26  ;;  %v8187_v31 = vpack.c.bf16 %v4049_v24, %v4051_v29  ;;  %v15467_v40 = vld [vmem:[#allocation49_spill] sm:$0xff]  ;;  %v4016_v29 = vrot.slane %v15472_v46, 7 }
 0x525   :  { %v3978_v33 = vpop.f32.mrf.mxu3  ;;  %v4021_v52 = vrot.slane %v15467_v40, 7  ;;  %v15469_v24 = vld [vmem:[#allocation33_spill] sm:$0xff] }
 0x526   :  { %vm4081_vm14 = vcmp.ge.s32.totalorder %v15469_v24, 1  ;;  %vm4099_vm3 = vcmp.lt.s32.totalorder %v15469_v24, 13 }
 0x527   :  { %v3919_v22 = vpop.f32.mrf.mxu2  ;;  %vm12668_vm1 = vmand %vm4081_vm14, %vm4099_vm3 }
 0x528   :  { %v3920_v7 = vadd.f32 %v3919_v22, %v12207_v53  ;;  %v15475_v22 = vld [vmem:[#allocation64_spill] sm:$0xff] }
 0x529   :  { %v3814_v13 = vpop.f32.mrf.mxu0 }
 0x52a   :  { %v3815_v21 = vadd.f32 %v3814_v13, %v12213_v43  ;;  %v12655_v58 = vadd.f32 %v3973_v34, %v3920_v7  ;;  %8242 = vmatmul.msk.bf16.gmra.mxu3 %vm15466_vm5, %v4206_v44  ;;  %v15471_v34 = vld [vmem:[#allocation35_spill] sm:$0xff]  ;;  %vm12719_vm5 = vmand %vm4083_vm0, %vm4101_vm6 }
 0x52b   :  { %vm4082_vm10 = vcmp.ge.s32.totalorder %v15471_v34, 1  ;;  %vm4100_vm7 = vcmp.lt.s32.totalorder %v15471_v34, 13 }
 0x52c   :  { %v3873_v6 = vpop.f32.mrf.mxu1  ;;  %v12658_v28 = vadd.f32 %v3868_v47, %v3815_v21  ;;  %8188 = vmatmul.msk.bf16.gmra.mxu0 %vm8186_vm9, %v8187_v31  ;;  %8224 = vmatmul.msk.bf16.gmra.mxu2 %vm8186_vm9, %v8187_v31  ;;  %v8265_v47 = vor.u32 %v9016_v30, %v8264_v5  ;;  %v15476_v21 = vld [vmem:[#allocation46_spill] sm:$0xff]  ;;  %v15478_v5 = vrot.slane %v15273_v10, 7  ;;  %vm12682_vm4 = vmand %vm4082_vm10, %vm4100_vm7 }
 0x52d   :  { %v3981_v43 = vpop.f32.mrf.mxu3  ;;  %v4018_v53 = vrot.slane %v15476_v21, 7  ;;  %vm8192_vm3 = vmpackc.low %vm12682_vm4, %vm12668_vm1 }
 0x52e   :  { %4784 = vmatpush.bf16.msra.mxu0 %v8265_v47  ;;  %v4044_v30 = vsel %vm4032_vm8, %v15478_v5, %v4021_v52  ;;  %v15481_v47 = vld [vmem:[#allocation65_spill] sm:$0xff]  ;;  %v4047_v5 = vsel %vm4032_vm8, %v4014_v14, %v4016_v29  ;;  %v9013_v14 = vld [vmem:[#allocation2 + $0x1f4] sm:$0xf] }
 0x52f   :  { %8206 = vmatmul.msk.bf16.gmra.mxu1 %vm15470_vm13, %v4206_v44  ;;  %v3922_v13 = vpop.f32.mrf.mxu2  ;;  %v15477_v44 = vrot.slane %v15468_v15, 7  ;;  %vm15505_vm13 = vmmov %vm15490_vm2 }
 0x530   :  { %v3923_v31 = vadd.f32 %v3922_v13, %v15475_v22 }
 0x531   :  { %v3816_v7 = vpop.f32.mrf.mxu0  ;;  %v4042_v24 = vsel %vm4032_vm8, %v4021_v52, %v15477_v44  ;;  %v4184_v44 = vsel %vm12668_vm1, %v4044_v30, 0.0  ;;  %v4045_v52 = vsel %vm4032_vm8, %v4016_v29, %v4018_v53  ;;  %v8258_v29 = vld [vmem:[#allocation2 + $0x1f8] sm:$0xf0]  ;;  %vm15509_vm1 = vmmov %vm15490_vm2 }
 0x532   :  { %v3817_v42 = vadd.f32 %v3816_v7, %v15481_v47  ;;  %v12688_v13 = vadd.f32 %v12607_v63, %v3923_v31  ;;  %v4186_v46 = vsel %vm12682_vm4, %v4042_v24, 0.0  ;;  %v8190_v63 = vpack.c.bf16 %v4045_v52, %v4047_v5 }
 0x533   :  { %v4208_v7 = vpack.c.bf16 %v4186_v46, %v4184_v44  ;;  %v8261_v44 = vor.u32 %v9013_v14, %v8258_v29  ;;  %v4027_v5 = vrot.slane %v15488_v49, 7  ;;  %v15496_v29 = vld [vmem:[#allocation50_spill] sm:$0xff]  ;;  %v15497_v49 = vrot.slane %v15468_v15, 7 }
 0x534   :  { %v3875_v22 = vpop.f32.mrf.mxu1  ;;  %v12690_v21 = vadd.f32 %v3870_v20, %v3817_v42  ;;  %v15483_v20 = vld [vmem:[#allocation66_spill] sm:$0xff]  ;;  %v4022_v0 = vrot.slane %v15496_v29, 7 }
 0x535   :  { %v3983_v40 = vpop.f32.mrf.mxu3  ;;  %4893 = vmatpush.bf16.msra.mxu2 %v8261_v44 }
 0x536   :  { %15482 = vst [vmem:[#allocation9_spill] sm:$0xff] %v12690_v21 }
 0x537   :  { %v3924_v47 = vpop.f32.mrf.mxu2 }
 0x538   :  { %v3925_v31 = vadd.f32 %v3924_v47, %v12251_v23  ;;  %v15487_v23 = vld [vmem:[#allocation53_spill] sm:$0xff] }
 0x539   :  { %v3819_v42 = vpop.f32.mrf.mxu0  ;;  %v4025_v52 = vrot.slane %v15487_v23, 7  ;;  %v15491_v47 = vld [vmem:[#allocation37_spill] sm:$0xff] }
 0x53a   :  { %v3820_v24 = vadd.f32 %v3819_v42, %v15483_v20  ;;  %v12706_v30 = vadd.f32 %v3978_v33, %v3925_v31  ;;  %8243 = vmatmul.msk.bf16.gmra.mxu3 %vm15485_vm12, %v4208_v7  ;;  %vm4084_vm15 = vcmp.ge.s32.totalorder %v15491_v47, 1  ;;  %vm4102_vm9 = vcmp.lt.s32.totalorder %v15491_v47, 13  ;;  %v15492_v31 = vld [vmem:[#allocation48_spill] sm:$0xff]  ;;  %v15495_v20 = vld [vmem:[#allocation67_spill] sm:$0xff]  ;;  %v8420_v47 = vld [vmem:[#allocation2 + $0x318] sm:$0xf0] }
 0x53b   :  { %v4020_v42 = vrot.slane %v15492_v31, 7  ;;  %v4040_v44 = vsel %vm4032_vm8, %v15497_v49, %v4025_v52  ;;  %vm12731_vm14 = vmand %vm4084_vm15, %vm4102_vm9 }
 0x53c   :  { %15484 = vst [vmem:[#allocation45_spill] sm:$0xff] %v12706_v30  ;;  %v3878_v21 = vpop.f32.mrf.mxu1  ;;  %v12709_v46 = vadd.f32 %v3873_v6, %v3820_v24  ;;  %8191 = vmatmul.msk.bf16.gmra.mxu0 %vm8189_vm11, %v8190_v63  ;;  %8227 = vmatmul.msk.bf16.gmra.mxu2 %vm8189_vm11, %v8190_v63  ;;  %v4188_v30 = vsel %vm12719_vm5, %v4040_v44, 0.0  ;;  %vm8195_vm6 = vmpackc.low %vm12731_vm14, %vm12719_vm5 }
 0x53d   :  { %v3986_v33 = vpop.f32.mrf.mxu3  ;;  %v4041_v49 = vsel %vm4032_vm8, %v4020_v42, %v4022_v0  ;;  %vm15527_vm15 = vmmov %vm15509_vm1 }
 0x53e   :  { %15486 = vst [vmem:[#allocation47_spill] sm:$0xff] %v12709_v46  ;;  %v9014_v46 = vld [vmem:[#allocation2 + $0x1f4] sm:$0xf0]  ;;  %vm15534_vm5 = vmmov %vm15509_vm1 }
 0x53f   :  { %8207 = vmatmul.msk.bf16.gmra.mxu1 %vm15490_vm2, %v4208_v7  ;;  %v3927_v6 = vpop.f32.mrf.mxu2  ;;  %v4038_v7 = vsel %vm4032_vm8, %v4025_v52, %v4027_v5  ;;  %vm15525_vm2 = vmmov %vm15509_vm1 }
 0x540   :  { %v3928_v24 = vadd.f32 %v3927_v6, %v15495_v20  ;;  %v8256_v20 = vld [vmem:[#allocation2 + $0x1f0] sm:$0xf]  ;;  %v4190_v15 = vsel %vm12731_vm14, %v4038_v7, 0.0  ;;  %vm15536_vm14 = vmmov %vm15509_vm1 }
 0x541   :  { %v3821_v14 = vpop.f32.mrf.mxu0  ;;  %v8257_v52 = vor.u32 %v9014_v46, %v8256_v20  ;;  %v15503_v46 = vld [vmem:[#allocation69_spill] sm:$0xff] }
 0x542   :  { %v3822_v31 = vadd.f32 %v3821_v14, %v12283_v56  ;;  %v12736_v23 = vadd.f32 %v3981_v43, %v3928_v24  ;;  %v4043_v56 = vsel %vm4032_vm8, %v4018_v53, %v4020_v42  ;;  %v4210_v24 = vpack.c.bf16 %v4190_v15, %v4188_v30  ;;  %v9011_v15 = vld [vmem:[#allocation2 + $0x1e4] sm:$0xf]  ;;  %v8250_v30 = vld [vmem:[#allocation2 + $0x1e8] sm:$0xf0]  ;;  %v15507_v20 = vld [vmem:[#allocation57_spill] sm:$0xff] }
 0x543   :  { %4785 = vmatpush.bf16.msra.mxu0 %v8257_v52  ;;  %v4029_v52 = vrot.slane %v15507_v20, 7  ;;  %v8253_v34 = vor.u32 %v9011_v15, %v8250_v30  ;;  %v15516_v15 = vld [vmem:[#allocation59_spill] sm:$0xff] }
 0x544   :  { %15500 = vst [vmem:[#allocation22_spill] sm:$0xff] %v12736_v23  ;;  %v3880_v6 = vpop.f32.mrf.mxu1  ;;  %v12738_v29 = vadd.f32 %v3875_v22, %v3822_v31  ;;  %v8193_v23 = vpack.c.bf16 %v4041_v49, %v4043_v56  ;;  %v15502_v22 = vld [vmem:[#allocation68_spill] sm:$0xff]  ;;  %v15517_v30 = vrot.slane %v15516_v15, 7  ;;  %v8248_v15 = vld [vmem:[#allocation2 + $0x1e0] sm:$0xf] }
 0x545   :  { %v3988_v43 = vpop.f32.mrf.mxu3  ;;  %v15508_v49 = vld [vmem:[#allocation40_spill] sm:$0xff]  ;;  %4894 = vmatpush.bf16.msra.mxu2 %v8253_v34  ;;  %v4036_v34 = vsel %vm4032_vm8, %v4027_v5, %v4029_v52 }
 0x546   :  { %15501 = vst [vmem:[#allocation60_spill] sm:$0xff] %v12738_v29  ;;  %vm4085_vm10 = vcmp.ge.s32.totalorder %v15508_v49, 1  ;;  %vm4103_vm7 = vcmp.lt.s32.totalorder %v15508_v49, 13  ;;  %v15520_v49 = vld [vmem:[#allocation71_spill] sm:$0xff] }
 0x547   :  { %v3929_v14 = vpop.f32.mrf.mxu2  ;;  %vm12766_vm12 = vmand %vm4085_vm10, %vm4103_vm7 }
 0x548   :  { %v3930_v31 = vadd.f32 %v3929_v14, %v15502_v22  ;;  %v15514_v14 = vld [vmem:[#allocation70_spill] sm:$0xff]  ;;  %vm15545_vm10 = vmmov %vm15509_vm1 }
 0x549   :  { %v3824_v29 = vpop.f32.mrf.mxu0  ;;  %vm15552_vm7 = vmmov %vm15509_vm1 }
 0x54a   :  { %v3825_v7 = vadd.f32 %v3824_v29, %v15503_v46  ;;  %v12754_v44 = vadd.f32 %v3983_v40, %v3930_v31  ;;  %8244 = vmatmul.msk.bf16.gmra.mxu3 %vm15505_vm13, %v4210_v24  ;;  %v15510_v40 = vld [vmem:[#allocation41_spill] sm:$0xff]  ;;  %v15511_v29 = vld [vmem:[#allocation52_spill] sm:$0xff]  ;;  %v15515_v46 = vld [vmem:[#allocation54_spill] sm:$0xff] }
 0x54b   :  { %vm4086_vm4 = vcmp.ge.s32.totalorder %v15510_v40, 1  ;;  %vm4104_vm11 = vcmp.lt.s32.totalorder %v15510_v40, 13  ;;  %v4024_v56 = vrot.slane %v15511_v29, 7  ;;  %vm15543_vm13 = vmmov %vm15509_vm1 }
 0x54c   :  { %15504 = vst [vmem:[#allocation61_spill] sm:$0xff] %v12754_v44  ;;  %v3883_v53 = vpop.f32.mrf.mxu1  ;;  %v12757_v42 = vadd.f32 %v3878_v21, %v3825_v7  ;;  %8194 = vmatmul.msk.bf16.gmra.mxu0 %vm8192_vm3, %v8193_v23  ;;  %8230 = vmatmul.msk.bf16.gmra.mxu2 %vm8192_vm3, %v8193_v23  ;;  %v4026_v7 = vrot.slane %v15515_v46, 7  ;;  %vm12778_vm0 = vmand %vm4086_vm4, %vm4104_vm11  ;;  %v4192_v46 = vsel %vm12766_vm12, %v4036_v34, 0.0 }
 0x54d   :  { %v3991_v26 = vpop.f32.mrf.mxu3  ;;  %vm8198_vm9 = vmpackc.low %vm12778_vm0, %vm12766_vm12 }
 0x54e   :  { %15506 = vst [vmem:[#allocation62_spill] sm:$0xff] %v12757_v42  ;;  %v9012_v42 = vld [vmem:[#allocation2 + $0x1e4] sm:$0xf0]  ;;  %v4037_v5 = vsel %vm4032_vm8, %v4024_v56, %v4026_v7  ;;  %vm15537_vm3 = vmmov %vm15509_vm1 }
 0x54f   :  { %8208 = vmatmul.msk.bf16.gmra.mxu1 %vm15509_vm1, %v4210_v24  ;;  %v3932_v21 = vpop.f32.mrf.mxu2  ;;  %v4034_v24 = vsel %vm4032_vm8, %v4029_v52, %v15517_v30  ;;  %v4039_v52 = vsel %vm4032_vm8, %v4022_v0, %v4024_v56  ;;  %v9045_v56 = vld [vmem:[#allocation2 + $0x2f4] sm:$0xf]  ;;  %vm15558_vm4 = vmmov %vm15509_vm1 }
 0x550   :  { %v3933_v22 = vadd.f32 %v3932_v21, %v15514_v14  ;;  %v4194_v30 = vsel %vm12778_vm0, %v4034_v24, 0.0  ;;  %v15524_v24 = vld [vmem:[#allocation73_spill] sm:$0xff]  ;;  %vm15560_vm11 = vmmov %vm15509_vm1 }
 0x551   :  { %v3826_v31 = vpop.f32.mrf.mxu0  ;;  %vm15562_vm12 = vmmov %vm15509_vm1 }
 0x552   :  { %v3827_v29 = vadd.f32 %v3826_v31, %v15520_v49  ;;  %v12783_v20 = vadd.f32 %v3986_v33, %v3933_v22  ;;  %v8249_v49 = vor.u32 %v9012_v42, %v8248_v15  ;;  %v4212_v22 = vpack.c.bf16 %v4194_v30, %v4192_v46  ;;  %v15523_v31 = vld [vmem:[#allocation72_spill] sm:$0xff]  ;;  %v8404_v46 = vld [vmem:[#allocation2 + $0x2f8] sm:$0xf0]  ;;  %vm15564_vm0 = vmmov %vm15509_vm1 }
 0x553   :  { %v9049_v15 = vld [vmem:[#allocation2 + $0x314] sm:$0xf]  ;;  %v8407_v63 = vor.u32 %v9045_v56, %v8404_v46  ;;  %v8418_v56 = vld [vmem:[#allocation2 + $0x310] sm:$0xf]  ;;  %v15531_v46 = vrot.slane %v11273_v2, 7 }
 0x554   :  { %15521 = vst [vmem:[#allocation7_spill] sm:$0xff] %v12783_v20  ;;  %v3885_v21 = vpop.f32.mrf.mxu1  ;;  %v12785_v14 = vadd.f32 %v3880_v6, %v3827_v29  ;;  %4786 = vmatpush.bf16.msra.mxu0 %v8249_v49  ;;  %v8196_v29 = vpack.c.bf16 %v4037_v5, %v4039_v52  ;;  %v8423_v5 = vor.u32 %v9049_v15, %v8420_v47 }
 0x555   :  { %v3993_v33 = vpop.f32.mrf.mxu3  ;;  %5504 = vmatpush.bf16.msrb.mxu2 %v8407_v63 }
 0x556   :  { %15522 = vst [vmem:[#allocation63_spill] sm:$0xff] %v12785_v14  ;;  %5564 = vmatpush.bf16.msrb.mxu3 %v8423_v5  ;;  %v9050_v5 = vld [vmem:[#allocation2 + $0x314] sm:$0xf0] }
 0x557   :  { %v3934_v6 = vpop.f32.mrf.mxu2 }
 0x558   :  { %v3935_v14 = vadd.f32 %v3934_v6, %v15523_v31  ;;  %v15529_v6 = vld [vmem:[#allocation56_spill] sm:$0xff] }
 0x559   :  { %v3829_v34 = vpop.f32.mrf.mxu0  ;;  %v4028_v31 = vrot.slane %v15529_v6, 7 }
 0x55a   :  { %v3830_v20 = vadd.f32 %v3829_v34, %v15524_v24  ;;  %v12801_v44 = vadd.f32 %v3988_v43, %v3935_v14  ;;  %8245 = vmatmul.msk.bf16.gmra.mxu3 %vm15525_vm2, %v4212_v22  ;;  %v15528_v43 = vld [vmem:[#allocation74_spill] sm:$0xff]  ;;  %vm15577_vm2 = vmmov %vm15564_vm0 }
 0x55b   :  { %v4033_v15 = vsel %vm4032_vm8, %v4028_v31, %v15531_v46  ;;  %v4035_v63 = vsel %vm4032_vm8, %v4026_v7, %v4028_v31  ;;  %vm15533_vm8 = vmmov %vm15509_vm1  ;;  %v8396_v46 = vld [vmem:[#allocation2 + $0x2e8] sm:$0xf0] }
 0x55c   :  { %v4424_v0 = vpop.f32.mrf.mxu1  ;;  %v12804_v42 = vadd.f32 %v3883_v53, %v3830_v20  ;;  %8197 = vmatmul.msk.bf16.gmra.mxu0 %vm8195_vm6, %v8196_v29  ;;  %8233 = vmatmul.msk.bf16.gmra.mxu2 %vm8195_vm6, %v8196_v29  ;;  %v15530_v53 = vld [vmem:[#allocation75_spill] sm:$0xff]  ;;  %vm15574_vm6 = vmmov %vm15564_vm0 }
 0x55d   :  { %v4532_v30 = vpop.f32.mrf.mxu3 }
 0x55e   :  { %15526 = vst [vmem:[#allocation64_spill] sm:$0xff] %v12804_v42  ;;  %v8402_v42 = vld [vmem:[#allocation2 + $0x2f0] sm:$0xf] }
 0x55f   :  { %8209 = vmatmul.msk.bf16.gmra.mxu1 %vm15527_vm15, %v4212_v22  ;;  %v3937_v52 = vpop.f32.mrf.mxu2  ;;  %v9046_v22 = vld [vmem:[#allocation2 + $0x2f4] sm:$0xf0]  ;;  %vm15588_vm15 = vmmov %vm15564_vm0 }
 0x560   :  { %v3938_v14 = vadd.f32 %v3937_v52, %v15528_v43  ;;  %v8403_v47 = vor.u32 %v9046_v22, %v8402_v42  ;;  %v8419_v43 = vor.u32 %v9050_v5, %v8418_v56  ;;  %v9043_v56 = vld [vmem:[#allocation2 + $0x2e4] sm:$0xf]  ;;  %v8394_v5 = vld [vmem:[#allocation2 + $0x2e0] sm:$0xf] }
 0x561   :  { %v3831_v49 = vpop.f32.mrf.mxu0  ;;  %v8399_v23 = vor.u32 %v9043_v56, %v8396_v46 }
 0x562   :  { %v3832_v20 = vadd.f32 %v3831_v49, %v15530_v53  ;;  %v12810_v29 = vadd.f32 %v3991_v26, %v3938_v14  ;;  %v15532_v26 = vld [vmem:[#allocation10_spill] sm:$0xff]  ;;  %5396 = vmatpush.bf16.msrb.mxu0 %v8403_v47  ;;  %v8199_v49 = vpack.c.bf16 %v4033_v15, %v4035_v63  ;;  %5456 = vmatpush.bf16.msrb.mxu1 %v8419_v43  ;;  %v9044_v43 = vld [vmem:[#allocation2 + $0x2e4] sm:$0xf0] }
 0x563   :  { %v4614_v14 = vpack.c.bf16 %v11211_v3, %v15532_v26  ;;  %5505 = vmatpush.bf16.msrb.mxu2 %v8399_v23 }
 0x564   :  { %v4426_v34 = vpop.f32.mrf.mxu1  ;;  %v12812_v24 = vadd.f32 %v3885_v21, %v3832_v20 }
 0x565   :  { %v4534_v52 = vpop.f32.mrf.mxu3 }
 0x567   :  { %v3939_v21 = vpop.f32.mrf.mxu2 }
 0x568   :  { %v3940_v53 = vadd.f32 %v3939_v21, %v12389_v9  ;;  %v8395_v21 = vor.u32 %v9044_v43, %v8394_v5  ;;  %v8388_v5 = vld [vmem:[#allocation2 + $0x2d8] sm:$0xf0] }
 0x569   :  { %v4370_v20 = vpop.f32.mrf.mxu0 }
 0x56a   :  { %v4425_v7 = vadd.f32 %v4424_v0, %v4370_v20  ;;  %v12827_v42 = vadd.f32 %v3993_v33, %v3940_v53  ;;  %8335 = vmatmul.msk.bf16.vlgmr.msra.gmra.mxu3 %vm15533_vm8, %v4614_v14  ;;  %5397 = vmatpush.bf16.msrb.mxu0 %v8395_v21  ;;  %v15535_v20 = vld [vmem:[#allocation8_spill] sm:$0xff]  ;;  %vm15601_vm8 = vmmov %vm15564_vm0 }
 0x56c   :  { %v4429_v31 = vpop.f32.mrf.mxu1  ;;  %v12831_v22 = vadd.f32 %v4425_v7, %v12397_v51  ;;  %8200 = vmatmul.msk.bf16.gmra.mxu0 %vm8198_vm9, %v8199_v49  ;;  %8236 = vmatmul.msk.bf16.gmra.mxu2 %vm8198_vm9, %v8199_v49  ;;  %vm15591_vm9 = vmmov %vm15564_vm0 }
 0x56d   :  { %v4537_v9 = vpop.f32.mrf.mxu3 }
 0x56f   :  { %8326 = vmatmul.msk.bf16.vlgmr.msra.gmra.mxu1 %vm15534_vm5, %v4614_v14  ;;  %v4478_v15 = vpop.f32.mrf.mxu2  ;;  %v4616_v14 = vpack.c.bf16 %v11219_v12, %v11215_v1  ;;  %vm5067_vm5 = vcmp.lt.s32.totalorder %v15238_v16, 7 }
 0x570   :  { %v4533_v40 = vadd.f32 %v4532_v30, %v4478_v15  ;;  %v4613_v30 = vpack.c.bf16 %v15414_v35, %v15535_v20 }
 0x571   :  { %v4372_v0 = vpop.f32.mrf.mxu0 }
 0x572   :  { %v4427_v33 = vadd.f32 %v4426_v34, %v4372_v0  ;;  %v12835_v63 = vadd.f32 %v4533_v40, %v12428_v60 }
 0x574   :  { %v4431_v47 = vpop.f32.mrf.mxu1  ;;  %v12838_v51 = vadd.f32 %v4427_v33, %v12430_v4  ;;  %v9041_v33 = vld [vmem:[#allocation2 + $0x2d4] sm:$0xf] }
 0x575   :  { %v4539_v49 = vpop.f32.mrf.mxu3 }
 0x577   :  { %v4480_v53 = vpop.f32.mrf.mxu2 }
 0x578   :  { %v4535_v34 = vadd.f32 %v4534_v52, %v4480_v53  ;;  %v15538_v53 = vld [vmem:[#allocation16_spill] sm:$0xff] }
 0x579   :  { %v4375_v7 = vpop.f32.mrf.mxu0 }
 0x57a   :  { %v4430_v60 = vadd.f32 %v4429_v31, %v4375_v7  ;;  %v12845_v56 = vadd.f32 %v4535_v34, %v12450_v62  ;;  %8336 = vmatmul.msk.bf16.gmra.mxu3 %vm15536_vm14, %v4616_v14  ;;  %v15540_v7 = vld [vmem:[#allocation13_spill] sm:$0xff] }
 0x57c   :  { %v4434_v4 = vpop.f32.mrf.mxu1  ;;  %v12849_v46 = vadd.f32 %v4430_v60, %v12453_v37  ;;  %4787 = vmatmul.bf16.vlgmr.msra.gmra.mxu0 %v4613_v30  ;;  %4895 = vmatmul.bf16.vlgmr.msra.gmra.mxu2 %v4613_v30  ;;  %v8391_v37 = vor.u32 %v9041_v33, %v8388_v5  ;;  %v15539_v30 = vld [vmem:[#allocation19_spill] sm:$0xff] }
 0x57d   :  { %v4542_v23 = vpop.f32.mrf.mxu3  ;;  %v4618_v34 = vpack.c.bf16 %v15539_v30, %v15538_v53 }
 0x57e   :  { %5506 = vmatpush.bf16.msrb.mxu2 %v8391_v37 }
 0x57f   :  { %8327 = vmatmul.msk.bf16.gmra.mxu1 %vm15537_vm3, %v4616_v14  ;;  %v4483_v15 = vpop.f32.mrf.mxu2 }
 0x580   :  { %v4538_v40 = vadd.f32 %v4537_v9, %v4483_v15  ;;  %v15541_v9 = vld [vmem:[#allocation14_spill] sm:$0xff] }
 0x581   :  { %v4377_v0 = vpop.f32.mrf.mxu0  ;;  %v4615_v60 = vpack.c.bf16 %v15541_v9, %v15540_v7 }
 0x582   :  { %v4432_v52 = vadd.f32 %v4431_v47, %v4377_v0  ;;  %v12853_v31 = vadd.f32 %v4538_v40, %v12480_v8  ;;  %v8386_v0 = vld [vmem:[#allocation2 + $0x2d0] sm:$0xf] }
 0x584   :  { %v4436_v62 = vpop.f32.mrf.mxu1  ;;  %v12856_v43 = vadd.f32 %v4432_v52, %v12482_v41  ;;  %v9042_v52 = vld [vmem:[#allocation2 + $0x2d4] sm:$0xf0] }
 0x585   :  { %v4544_v21 = vpop.f32.mrf.mxu3  ;;  %v8387_v5 = vor.u32 %v9042_v52, %v8386_v0 }
 0x587   :  { %v4485_v14 = vpop.f32.mrf.mxu2  ;;  %5398 = vmatpush.bf16.msrb.mxu0 %v8387_v5  ;;  %v15549_v5 = vld [vmem:[#allocation15_spill] sm:$0xff] }
 0x588   :  { %v4540_v47 = vadd.f32 %v4539_v49, %v4485_v14 }
 0x589   :  { %v4380_v15 = vpop.f32.mrf.mxu0 }
 0x58a   :  { %v4435_v8 = vadd.f32 %v4434_v4, %v4380_v15  ;;  %v12863_v40 = vadd.f32 %v4540_v47, %v12500_v18  ;;  %8337 = vmatmul.msk.bf16.gmra.mxu3 %vm15543_vm13, %v4618_v34 }
 0x58c   :  { %15542 = vst [vmem:[#allocation65_spill] sm:$0xff] %v12863_v40  ;;  %v4439_v41 = vpop.f32.mrf.mxu1  ;;  %v12867_v33 = vadd.f32 %v4435_v8, %v12503_v19  ;;  %4792 = vmatmul.bf16.gmra.mxu0 %v4615_v60  ;;  %4900 = vmatmul.bf16.gmra.mxu2 %v4615_v60  ;;  %v9039_v19 = vld [vmem:[#allocation2 + $0x2c4] sm:$0xf]  ;;  %v8380_v8 = vld [vmem:[#allocation2 + $0x2c8] sm:$0xf0]  ;;  %v15548_v60 = vld [vmem:[#allocation21_spill] sm:$0xff] }
 0x58d   :  { %v4547_v37 = vpop.f32.mrf.mxu3  ;;  %v4620_v52 = vpack.c.bf16 %v15548_v60, %v11231_v25 }
 0x58e   :  { %15544 = vst [vmem:[#allocation66_spill] sm:$0xff] %v12867_v33  ;;  %v8383_v33 = vor.u32 %v9039_v19, %v8380_v8  ;;  %v8378_v19 = vld [vmem:[#allocation2 + $0x2c0] sm:$0xf]  ;;  %v9040_v8 = vld [vmem:[#allocation2 + $0x2c4] sm:$0xf0] }
 0x58f   :  { %8328 = vmatmul.msk.bf16.gmra.mxu1 %vm15545_vm10, %v4618_v34  ;;  %v4488_v49 = vpop.f32.mrf.mxu2 }
 0x590   :  { %v4543_v4 = vadd.f32 %v4542_v23, %v4488_v49  ;;  %5507 = vmatpush.bf16.msrb.mxu2 %v8383_v33  ;;  %v15550_v23 = vld [vmem:[#allocation17_spill] sm:$0xff]  ;;  %v8379_v33 = vor.u32 %v9040_v8, %v8378_v19  ;;  %v8412_v19 = vld [vmem:[#allocation2 + $0x308] sm:$0xf0] }
 0x591   :  { %v4382_v14 = vpop.f32.mrf.mxu0  ;;  %v4617_v49 = vpack.c.bf16 %v15550_v23, %v15549_v5 }
 0x592   :  { %v4437_v18 = vadd.f32 %v4436_v62, %v4382_v14  ;;  %v12871_v47 = vadd.f32 %v4543_v4, %v12528_v27  ;;  %5399 = vmatpush.bf16.msrb.mxu0 %v8379_v33 }
 0x594   :  { %15546 = vst [vmem:[#allocation67_spill] sm:$0xff] %v12871_v47  ;;  %v4441_v15 = vpop.f32.mrf.mxu1  ;;  %v12874_v40 = vadd.f32 %v4437_v18, %v12530_v55 }
 0x595   :  { %v4549_v0 = vpop.f32.mrf.mxu3 }
 0x596   :  { %15547 = vst [vmem:[#allocation68_spill] sm:$0xff] %v12874_v40 }
 0x597   :  { %v4490_v34 = vpop.f32.mrf.mxu2 }
 0x598   :  { %v4545_v62 = vadd.f32 %v4544_v21, %v4490_v34 }
 0x599   :  { %v4385_v14 = vpop.f32.mrf.mxu0 }
 0x59a   :  { %v4440_v27 = vadd.f32 %v4439_v41, %v4385_v14  ;;  %v12881_v4 = vadd.f32 %v4545_v62, %v12546_v11  ;;  %8338 = vmatmul.msk.bf16.gmra.mxu3 %vm15552_vm7, %v4620_v52  ;;  %vm15606_vm7 = vmmov %vm15564_vm0 }
 0x59c   :  { %15551 = vst [vmem:[#allocation69_spill] sm:$0xff] %v12881_v4  ;;  %v4444_v55 = vpop.f32.mrf.mxu1  ;;  %v12885_v18 = vadd.f32 %v4440_v27, %v12551_v50  ;;  %4797 = vmatmul.bf16.gmra.mxu0 %v4617_v49  ;;  %4905 = vmatmul.bf16.gmra.mxu2 %v4617_v49  ;;  %v9037_v27 = vld [vmem:[#allocation2 + $0x2b4] sm:$0xf]  ;;  %v9047_v4 = vld [vmem:[#allocation2 + $0x304] sm:$0xf] }
 0x59d   :  { %v4552_v40 = vpop.f32.mrf.mxu3  ;;  %v8415_v47 = vor.u32 %v9047_v4, %v8412_v19 }
 0x59e   :  { %15553 = vst [vmem:[#allocation70_spill] sm:$0xff] %v12885_v18  ;;  %v8372_v18 = vld [vmem:[#allocation2 + $0x2b8] sm:$0xf0] }
 0x59f   :  { %8329 = vmatmul.msk.bf16.gmra.mxu1 %vm15509_vm1, %v4620_v52  ;;  %v4493_v21 = vpop.f32.mrf.mxu2  ;;  %v8375_v49 = vor.u32 %v9037_v27, %v8372_v18  ;;  %v15555_v52 = vld [vmem:[#allocation6_spill] sm:$0xff]  ;;  %5565 = vmatpush.bf16.msrb.mxu3 %v8415_v47  ;;  %v9038_v27 = vld [vmem:[#allocation2 + $0x2b4] sm:$0xf0] }
 0x5a0   :  { %v4548_v41 = vadd.f32 %v4547_v37, %v4493_v21  ;;  %v4622_v33 = vpack.c.bf16 %v15263_v48, %v15555_v52 }
 0x5a1   :  { %v4387_v34 = vpop.f32.mrf.mxu0  ;;  %5508 = vmatpush.bf16.msrb.mxu2 %v8375_v49  ;;  %v8410_v49 = vld [vmem:[#allocation2 + $0x300] sm:$0xf] }
 0x5a2   :  { %v4442_v11 = vadd.f32 %v4441_v15, %v4387_v34  ;;  %v12889_v62 = vadd.f32 %v4548_v41, %v12578_v32  ;;  %v15556_v15 = vld [vmem:[#allocation20_spill] sm:$0xff] }
 0x5a3   :  { %v4619_v32 = vpack.c.bf16 %v15268_v17, %v15556_v15 }
 0x5a4   :  { %v4446_v14 = vpop.f32.mrf.mxu1  ;;  %v12892_v50 = vadd.f32 %v4442_v11, %v12584_v39  ;;  %v8370_v11 = vld [vmem:[#allocation2 + $0x2b0] sm:$0xf] }
 0x5a5   :  { %v4554_v8 = vpop.f32.mrf.mxu3  ;;  %v8371_v47 = vor.u32 %v9038_v27, %v8370_v11  ;;  %v4624_v11 = vpack.c.bf16 %v15273_v10, %v15272_v54 }
 0x5a6   :  { %15554 = vst [vmem:[#allocation71_spill] sm:$0xff] %v12892_v50 }
 0x5a7   :  { %v4495_v37 = vpop.f32.mrf.mxu2  ;;  %5400 = vmatpush.bf16.msrb.mxu0 %v8371_v47 }
 0x5a8   :  { %v4550_v21 = vadd.f32 %v4549_v0, %v4495_v37  ;;  %v9048_v0 = vld [vmem:[#allocation2 + $0x304] sm:$0xf0] }
 0x5a9   :  { %v4390_v41 = vpop.f32.mrf.mxu0 }
 0x5aa   :  { %v4445_v39 = vadd.f32 %v4444_v55, %v4390_v41  ;;  %v12899_v34 = vadd.f32 %v4550_v21, %v12598_v57  ;;  %8339 = vmatmul.msk.bf16.gmra.mxu3 %vm15558_vm4, %v4622_v33  ;;  %v8411_v55 = vor.u32 %v9048_v0, %v8410_v49 }
 0x5ac   :  { %15557 = vst [vmem:[#allocation72_spill] sm:$0xff] %v12899_v34  ;;  %v4449_v18 = vpop.f32.mrf.mxu1  ;;  %v12903_v4 = vadd.f32 %v4445_v39, %v12602_v45  ;;  %4802 = vmatmul.bf16.gmra.mxu0 %v4619_v32  ;;  %4910 = vmatmul.bf16.gmra.mxu2 %v4619_v32  ;;  %v8364_v34 = vld [vmem:[#allocation2 + $0x2a8] sm:$0xf0] }
 0x5ad   :  { %v4557_v19 = vpop.f32.mrf.mxu3  ;;  %5457 = vmatpush.bf16.msrb.mxu1 %v8411_v55 }
 0x5ae   :  { %15559 = vst [vmem:[#allocation73_spill] sm:$0xff] %v12903_v4  ;;  %v9035_v4 = vld [vmem:[#allocation2 + $0x2a4] sm:$0xf] }
 0x5af   :  { %8330 = vmatmul.msk.bf16.gmra.mxu1 %vm15560_vm11, %v4622_v33  ;;  %v4498_v37 = vpop.f32.mrf.mxu2  ;;  %v8367_v50 = vor.u32 %v9035_v4, %v8364_v34  ;;  %v8362_v4 = vld [vmem:[#allocation2 + $0x2a0] sm:$0xf]  ;;  %vm15614_vm11 = vmmov %vm15564_vm0 }
 0x5b0   :  { %v4553_v57 = vadd.f32 %v4552_v40, %v4498_v37  ;;  %v4621_v40 = vpack.c.bf16 %v15460_v59, %v15275_v61 }
 0x5b1   :  { %v4392_v21 = vpop.f32.mrf.mxu0  ;;  %5509 = vmatpush.bf16.msrb.mxu2 %v8367_v50  ;;  %v9036_v50 = vld [vmem:[#allocation2 + $0x2a4] sm:$0xf0] }
 0x5b2   :  { %v4447_v41 = vadd.f32 %v4446_v14, %v4392_v21  ;;  %v12907_v45 = vadd.f32 %v4553_v57, %v12635_v36  ;;  %v8363_v55 = vor.u32 %v9036_v50, %v8362_v4 }
 0x5b4   :  { %v4451_v39 = vpop.f32.mrf.mxu1  ;;  %v12910_v32 = vadd.f32 %v4447_v41, %v12637_v38  ;;  %5401 = vmatpush.bf16.msrb.mxu0 %v8363_v55  ;;  %v15566_v41 = vld [vmem:[#allocation9_spill] sm:$0xff] }
 0x5b5   :  { %v4559_v33 = vpop.f32.mrf.mxu3 }
 0x5b7   :  { %v4500_v27 = vpop.f32.mrf.mxu2 }
 0x5b8   :  { %v4555_v14 = vadd.f32 %v4554_v8, %v4500_v27 }
 0x5b9   :  { %v4395_v49 = vpop.f32.mrf.mxu0 }
 0x5ba   :  { %v4450_v36 = vadd.f32 %v4449_v18, %v4395_v49  ;;  %v12917_v47 = vadd.f32 %v4555_v14, %v12655_v58  ;;  %8340 = vmatmul.msk.bf16.gmra.mxu3 %vm15562_vm12, %v4624_v11  ;;  %v15569_v14 = vld [vmem:[#allocation51_spill] sm:$0xff] }
 0x5bc   :  { %15561 = vst [vmem:[#allocation74_spill] sm:$0xff] %v12917_v47  ;;  %v4454_v38 = vpop.f32.mrf.mxu1  ;;  %v12921_v34 = vadd.f32 %v4450_v36, %v12658_v28  ;;  %4807 = vmatmul.bf16.gmra.mxu0 %v4621_v40  ;;  %4915 = vmatmul.bf16.gmra.mxu2 %v4621_v40  ;;  %v15568_v40 = vld [vmem:[#allocation49_spill] sm:$0xff]  ;;  %v15580_v47 = vld [vmem:[#allocation60_spill] sm:$0xff] }
 0x5bd   :  { %v4562_v0 = vpop.f32.mrf.mxu3  ;;  %v4626_v49 = vpack.c.bf16 %v15569_v14, %v15568_v40  ;;  %v9034_v14 = vld [vmem:[#allocation2 + $0x294] sm:$0xf0] }
 0x5be   :  { %15563 = vst [vmem:[#allocation75_spill] sm:$0xff] %v12921_v34  ;;  %v15570_v34 = vld [vmem:[#allocation44_spill] sm:$0xff] }
 0x5bf   :  { %8331 = vmatmul.msk.bf16.gmra.mxu1 %vm15564_vm0, %v4624_v11  ;;  %v4503_v8 = vpop.f32.mrf.mxu2  ;;  %v15571_v11 = vld [vmem:[#allocation46_spill] sm:$0xff] }
 0x5c0   :  { %v4558_v18 = vadd.f32 %v4557_v19, %v4503_v8  ;;  %v4623_v4 = vpack.c.bf16 %v15571_v11, %v15570_v34  ;;  %v15572_v8 = vld [vmem:[#allocation45_spill] sm:$0xff]  ;;  %v8354_v11 = vld [vmem:[#allocation2 + $0x290] sm:$0xf] }
 0x5c1   :  { %v4397_v37 = vpop.f32.mrf.mxu0 }
 0x5c2   :  { %v4452_v58 = vadd.f32 %v4451_v39, %v4397_v37  ;;  %v12925_v57 = vadd.f32 %v4558_v18, %v12688_v13  ;;  %v9033_v18 = vld [vmem:[#allocation2 + $0x294] sm:$0xf]  ;;  %v8356_v37 = vld [vmem:[#allocation2 + $0x298] sm:$0xf0] }
 0x5c4   :  { %15565 = vst [vmem:[#allocation8_spill] sm:$0xff] %v12925_v57  ;;  %v4456_v21 = vpop.f32.mrf.mxu1  ;;  %v12928_v28 = vadd.f32 %v4452_v58, %v15566_v41  ;;  %v15575_v58 = vld [vmem:[#allocation47_spill] sm:$0xff] }
 0x5c5   :  { %v4564_v27 = vpop.f32.mrf.mxu3 }
 0x5c6   :  { %15567 = vst [vmem:[#allocation16_spill] sm:$0xff] %v12928_v28  ;;  %v8359_v28 = vor.u32 %v9033_v18, %v8356_v37  ;;  %v15583_v37 = vld [vmem:[#allocation55_spill] sm:$0xff] }
 0x5c7   :  { %v4505_v36 = vpop.f32.mrf.mxu2 }
 0x5c8   :  { %v4560_v50 = vadd.f32 %v4559_v33, %v4505_v36  ;;  %5510 = vmatpush.bf16.msrb.mxu2 %v8359_v28 }
 0x5c9   :  { %v4400_v55 = vpop.f32.mrf.mxu0 }
 0x5ca   :  { %v4455_v19 = vadd.f32 %v4454_v38, %v4400_v55  ;;  %v12935_v39 = vadd.f32 %v4560_v50, %v15572_v8  ;;  %8341 = vmatmul.msk.bf16.gmra.mxu3 %vm15574_vm6, %v4626_v49  ;;  %v15578_v55 = vld [vmem:[#allocation22_spill] sm:$0xff]  ;;  %vm15616_vm6 = vmmov %vm15577_vm2 }
 0x5cc   :  { %15573 = vst [vmem:[#allocation19_spill] sm:$0xff] %v12935_v39  ;;  %v4459_v13 = vpop.f32.mrf.mxu1  ;;  %v12939_v41 = vadd.f32 %v4455_v19, %v15575_v58  ;;  %4812 = vmatmul.bf16.gmra.mxu0 %v4623_v4  ;;  %4920 = vmatmul.bf16.gmra.mxu2 %v4623_v4  ;;  %v8355_v58 = vor.u32 %v9034_v14, %v8354_v11  ;;  %v15582_v4 = vld [vmem:[#allocation53_spill] sm:$0xff]  ;;  %v9031_v11 = vld [vmem:[#allocation2 + $0x284] sm:$0xf] }
 0x5cd   :  { %v4567_v57 = vpop.f32.mrf.mxu3 }
 0x5ce   :  { %15576 = vst [vmem:[#allocation21_spill] sm:$0xff] %v12939_v41  ;;  %5402 = vmatpush.bf16.msrb.mxu0 %v8355_v58  ;;  %v15584_v41 = vld [vmem:[#allocation48_spill] sm:$0xff]  ;;  %v8348_v58 = vld [vmem:[#allocation2 + $0x288] sm:$0xf0] }
 0x5cf   :  { %8332 = vmatmul.msk.bf16.gmra.mxu1 %vm15577_vm2, %v4626_v49  ;;  %v4508_v33 = vpop.f32.mrf.mxu2  ;;  %v4628_v49 = vpack.c.bf16 %v15583_v37, %v15582_v4 }
 0x5d0   :  { %v4563_v38 = vadd.f32 %v4562_v0, %v4508_v33  ;;  %v15585_v0 = vld [vmem:[#allocation50_spill] sm:$0xff] }
 0x5d1   :  { %v4402_v36 = vpop.f32.mrf.mxu0  ;;  %v4625_v33 = vpack.c.bf16 %v15585_v0, %v15584_v41  ;;  %v15594_v0 = vld [vmem:[#allocation63_spill] sm:$0xff] }
 0x5d2   :  { %v4457_v50 = vadd.f32 %v4456_v21, %v4402_v36  ;;  %v12943_v8 = vadd.f32 %v4563_v38, %v15578_v55  ;;  %v15586_v55 = vld [vmem:[#allocation61_spill] sm:$0xff] }
 0x5d4   :  { %15579 = vst [vmem:[#allocation9_spill] sm:$0xff] %v12943_v8  ;;  %v4461_v39 = vpop.f32.mrf.mxu1  ;;  %v12946_v19 = vadd.f32 %v4457_v50, %v15580_v47  ;;  %v15589_v50 = vld [vmem:[#allocation62_spill] sm:$0xff] }
 0x5d5   :  { %v4569_v18 = vpop.f32.mrf.mxu3 }
 0x5d6   :  { %15581 = vst [vmem:[#allocation49_spill] sm:$0xff] %v12946_v19  ;;  %v8351_v19 = vor.u32 %v9031_v11, %v8348_v58  ;;  %v15596_v11 = vld [vmem:[#allocation57_spill] sm:$0xff]  ;;  %v15597_v58 = vld [vmem:[#allocation59_spill] sm:$0xff] }
 0x5d7   :  { %v4510_v28 = vpop.f32.mrf.mxu2  ;;  %v4630_v4 = vpack.c.bf16 %v15597_v58, %v15596_v11 }
 0x5d8   :  { %v4565_v21 = vadd.f32 %v4564_v27, %v4510_v28  ;;  %5511 = vmatpush.bf16.msrb.mxu2 %v8351_v19 }
 0x5d9   :  { %v4405_v36 = vpop.f32.mrf.mxu0 }
 0x5da   :  { %v4460_v38 = vadd.f32 %v4459_v13, %v4405_v36  ;;  %v12953_v8 = vadd.f32 %v4565_v21, %v15586_v55  ;;  %8342 = vmatmul.msk.bf16.gmra.mxu3 %vm15588_vm15, %v4628_v49  ;;  %v15592_v36 = vld [vmem:[#allocation7_spill] sm:$0xff] }
 0x5dc   :  { %15587 = vst [vmem:[#allocation44_spill] sm:$0xff] %v12953_v8  ;;  %v4464_v47 = vpop.f32.mrf.mxu1  ;;  %v12957_v14 = vadd.f32 %v4460_v38, %v15589_v50  ;;  %4817 = vmatmul.bf16.gmra.mxu0 %v4625_v33  ;;  %4925 = vmatmul.bf16.gmra.mxu2 %v4625_v33  ;;  %v8346_v50 = vld [vmem:[#allocation2 + $0x280] sm:$0xf] }
 0x5dd   :  { %v4572_v37 = vpop.f32.mrf.mxu3 }
 0x5de   :  { %15590 = vst [vmem:[#allocation45_spill] sm:$0xff] %v12957_v14  ;;  %v9032_v14 = vld [vmem:[#allocation2 + $0x284] sm:$0xf0] }
 0x5df   :  { %8333 = vmatmul.msk.bf16.gmra.mxu1 %vm15591_vm9, %v4628_v49  ;;  %v4513_v27 = vpop.f32.mrf.mxu2  ;;  %v8347_v41 = vor.u32 %v9032_v14, %v8346_v50  ;;  %v15598_v49 = vld [vmem:[#allocation52_spill] sm:$0xff]  ;;  %v8572_v50 = vld [vmem:[#allocation2 + $0x3b8] sm:$0xf0] }
 0x5e0   :  { %v4568_v13 = vadd.f32 %v4567_v57, %v4513_v27  ;;  %v15599_v57 = vld [vmem:[#allocation54_spill] sm:$0xff] }
 0x5e1   :  { %v4407_v28 = vpop.f32.mrf.mxu0  ;;  %5403 = vmatpush.bf16.msrb.mxu0 %v8347_v41  ;;  %v4627_v27 = vpack.c.bf16 %v15599_v57, %v15598_v49  ;;  %v15602_v41 = vld [vmem:[#allocation34_spill] sm:$0xff] }
 0x5e2   :  { %v4462_v21 = vadd.f32 %v4461_v39, %v4407_v28  ;;  %v12961_v55 = vadd.f32 %v4568_v13, %v15592_v36  ;;  %vm5104_vm14 = vcmp.ge.s32.totalorder %v15602_v41, 4294967295  ;;  %vm5122_vm13 = vcmp.lt.s32.totalorder %v15602_v41, 11 }
 0x5e3   :  { %vm12986_vm1 = vmand %vm5104_vm14, %vm5122_vm13 }
 0x5e4   :  { %15593 = vst [vmem:[#allocation47_spill] sm:$0xff] %v12961_v55  ;;  %v4466_v8 = vpop.f32.mrf.mxu1  ;;  %v12964_v38 = vadd.f32 %v4462_v21, %v15594_v0  ;;  %v5034_v0 = vrot.slane %v11211_v3, 1 }
 0x5e5   :  { %v4574_v33 = vpop.f32.mrf.mxu3 }
 0x5e6   :  { %15595 = vst [vmem:[#allocation22_spill] sm:$0xff] %v12964_v38  ;;  %v15603_v38 = vld [vmem:[#allocation64_spill] sm:$0xff] }
 0x5e7   :  { %v4515_v19 = vpop.f32.mrf.mxu2 }
 0x5e8   :  { %v4570_v39 = vadd.f32 %v4569_v18, %v4515_v19  ;;  %v8556_v19 = vld [vmem:[#allocation2 + $0x398] sm:$0xf0] }
 0x5e9   :  { %v4410_v28 = vpop.f32.mrf.mxu0 }
 0x5ea   :  { %v4465_v13 = vadd.f32 %v4464_v47, %v4410_v28  ;;  %v12973_v21 = vadd.f32 %v4570_v39, %v12801_v44  ;;  %8343 = vmatmul.msk.bf16.gmra.mxu3 %vm15601_vm8, %v4630_v4  ;;  %v15605_v47 = vld [vmem:[#allocation42_spill] sm:$0xff]  ;;  %v9065_v44 = vld [vmem:[#allocation2 + $0x394] sm:$0xf] }
 0x5eb   :  { %vm5105_vm3 = vcmp.ge.s32.totalorder %v15605_v47, 4294967295  ;;  %vm5123_vm10 = vcmp.lt.s32.totalorder %v15605_v47, 11  ;;  %v9069_v39 = vld [vmem:[#allocation2 + $0x3b4] sm:$0xf]  ;;  %v8559_v36 = vor.u32 %v9065_v44, %v8556_v19  ;;  %v8554_v47 = vld [vmem:[#allocation2 + $0x390] sm:$0xf] }
 0x5ec   :  { %15600 = vst [vmem:[#allocation60_spill] sm:$0xff] %v12973_v21  ;;  %v4842_v14 = vpop.f32.mrf.mxu1  ;;  %v12980_v18 = vadd.f32 %v4465_v13, %v15603_v38  ;;  %4822 = vmatmul.bf16.gmra.mxu0 %v4627_v27  ;;  %4930 = vmatmul.bf16.gmra.mxu2 %v4627_v27  ;;  %v8575_v38 = vor.u32 %v9069_v39, %v8572_v50  ;;  %v15610_v27 = vrot.slane %v15532_v26, 1  ;;  %vm13000_vm4 = vmand %vm5105_vm3, %vm5123_vm10  ;;  %v9066_v26 = vld [vmem:[#allocation2 + $0x394] sm:$0xf0]  ;;  %v15627_v21 = vld [vmem:[#allocation27_spill] sm:$0xff] }
 0x5ed   :  { %v4950_v28 = vpop.f32.mrf.mxu3  ;;  %6121 = vmatpush.bf16.msra.mxu2 %v8559_v36  ;;  %v8570_v36 = vld [vmem:[#allocation2 + $0x3b0] sm:$0xf]  ;;  %vm8424_vm14 = vmpackc.low %vm13000_vm4, %vm12986_vm1  ;;  %vm5108_vm13 = vcmp.ge.s32.totalorder %v15627_v21, 4294967295  ;;  %vm5126_vm10 = vcmp.lt.s32.totalorder %v15627_v21, 11 }
 0x5ee   :  { %15604 = vst [vmem:[#allocation61_spill] sm:$0xff] %v12980_v18  ;;  %v15609_v18 = vrot.slane %v11215_v1, 1  ;;  %v5101_v3 = vsel %vm5067_vm5, %v15610_v27, %v5034_v0  ;;  %6181 = vmatpush.bf16.msra.mxu3 %v8575_v38  ;;  %vm15626_vm3 = vmmov %vm15616_vm6 }
 0x5ef   :  { %8334 = vmatmul.msk.bf16.gmra.mxu1 %vm15606_vm7, %v4630_v4  ;;  %v4518_v13 = vpop.f32.mrf.mxu2  ;;  %v5195_v55 = vsel %vm12986_vm1, %v5101_v3, 0.0  ;;  %vm15628_vm7 = vmmov %vm15626_vm3 }
 0x5f0   :  { %v5099_v41 = vsel %vm5067_vm5, %v5034_v0, %v15609_v18  ;;  %v4573_v44 = vadd.f32 %v4572_v37, %v4518_v13  ;;  %v8555_v37 = vor.u32 %v9066_v26, %v8554_v47  ;;  %v9070_v13 = vld [vmem:[#allocation2 + $0x3b4] sm:$0xf0]  ;;  %v14994_v47 = vrot.slane %v15538_v53, 1 }
 0x5f1   :  { %v4412_v50 = vpop.f32.mrf.mxu0  ;;  %v5197_v0 = vsel %vm13000_vm4, %v5099_v41, 0.0 }
 0x5f2   :  { %v4467_v19 = vadd.f32 %v4466_v8, %v4412_v50  ;;  %v13005_v39 = vadd.f32 %v4573_v44, %v12810_v29  ;;  %v8571_v8 = vor.u32 %v9070_v13, %v8570_v36  ;;  %v5231_v50 = vpack.c.bf16 %v5197_v0, %v5195_v55  ;;  %6013 = vmatpush.bf16.msra.mxu0 %v8555_v37  ;;  %v15615_v0 = vld [vmem:[#allocation26_spill] sm:$0xff] }
 0x5f3   :  { %v4629_v44 = vpack.c.bf16 %v11273_v2, %v15529_v6  ;;  %v5038_v55 = vrot.slane %v11219_v12, 1  ;;  %vm5106_vm12 = vcmp.ge.s32.totalorder %v15615_v0, 4294967295  ;;  %vm5124_vm0 = vcmp.lt.s32.totalorder %v15615_v0, 11 }
 0x5f4   :  { %15613 = vst [vmem:[#allocation62_spill] sm:$0xff] %v13005_v39  ;;  %v4844_v18 = vpop.f32.mrf.mxu1  ;;  %v13012_v27 = vadd.f32 %v4467_v19, %v12812_v24  ;;  %6073 = vmatpush.bf16.msra.mxu1 %v8571_v8  ;;  %v5033_v13 = vrot.slane %v15414_v35, 1  ;;  %vm13032_vm9 = vmand %vm5106_vm12, %vm5124_vm0  ;;  %v8546_v35 = vld [vmem:[#allocation2 + $0x380] sm:$0xf]  ;;  %v5046_v8 = vrot.slane %v15548_v60, 1 }
 0x5f5   :  { %v4952_v38 = vpop.f32.mrf.mxu3 }
 0x5f7   :  { %v4520_v29 = vpop.f32.mrf.mxu2 }
 0x5f8   :  { %v4575_v3 = vadd.f32 %v4574_v33, %v4520_v29  ;;  %v9063_v33 = vld [vmem:[#allocation2 + $0x384] sm:$0xf] }
 0x5f9   :  { %v4788_v39 = vpop.f32.mrf.mxu0 }
 0x5fa   :  { %v4843_v41 = vadd.f32 %v4842_v14, %v4788_v39  ;;  %v13017_v24 = vadd.f32 %v4575_v3, %v12827_v42  ;;  %8487 = vmatmul.msk.bf16.vlgmr.msrb.gmra.mxu3 %vm15614_vm11, %v5231_v50  ;;  %v8548_v14 = vld [vmem:[#allocation2 + $0x388] sm:$0xf0]  ;;  %v5035_v3 = vrot.slane %v15540_v7, 1  ;;  %vm13084_vm11 = vmand %vm5108_vm13, %vm5126_vm10 }
 0x5fb   :  { %v15617_v39 = vld [vmem:[#allocation23_spill] sm:$0xff] }
 0x5fc   :  { %v4847_v19 = vpop.f32.mrf.mxu1  ;;  %v13021_v26 = vadd.f32 %v4843_v41, %v12831_v22  ;;  %4827 = vmatmul.bf16.gmra.mxu0 %v4629_v44  ;;  %4935 = vmatmul.bf16.gmra.mxu2 %v4629_v44  ;;  %vm5107_vm2 = vcmp.ge.s32.totalorder %v15617_v39, 4294967295  ;;  %vm5125_vm15 = vcmp.lt.s32.totalorder %v15617_v39, 11  ;;  %v8551_v22 = vor.u32 %v9063_v33, %v8548_v14 }
 0x5fd   :  { %v4955_v42 = vpop.f32.mrf.mxu3  ;;  %v15620_v41 = vrot.slane %v11215_v1, 1  ;;  %vm13045_vm8 = vmand %vm5107_vm2, %vm5125_vm15  ;;  %v5048_v14 = vrot.slane %v15555_v52, 1 }
 0x5fe   :  { %6122 = vmatpush.bf16.msra.mxu2 %v8551_v22  ;;  %vm8427_vm0 = vmpackc.low %vm13045_vm8, %vm13032_vm9 }
 0x5ff   :  { %8451 = vmatmul.msk.bf16.vlgmr.msrb.gmra.mxu1 %vm15616_vm6, %v5231_v50  ;;  %v4896_v36 = vpop.f32.mrf.mxu2  ;;  %v5095_v50 = vsel %vm5067_vm5, %v5038_v55, %v14994_v47  ;;  %v5097_v33 = vsel %vm5067_vm5, %v15620_v41, %v5038_v55  ;;  %v9064_v55 = vld [vmem:[#allocation2 + $0x384] sm:$0xf0]  ;;  %v5098_v41 = vsel %vm5067_vm5, %v5033_v13, %v5035_v3  ;;  %vm15637_vm6 = vmmov %vm15626_vm3 }
 0x600   :  { %v4951_v29 = vadd.f32 %v4950_v28, %v4896_v36  ;;  %v5199_v47 = vsel %vm13032_vm9, %v5097_v33, 0.0  ;;  %v5201_v7 = vsel %vm13045_vm8, %v5095_v50, 0.0  ;;  %vm15640_vm9 = vmmov %vm15626_vm3 }
 0x601   :  { %v4790_v44 = vpop.f32.mrf.mxu0 }
 0x602   :  { %v4845_v37 = vadd.f32 %v4844_v18, %v4790_v44  ;;  %v13050_v28 = vadd.f32 %v4951_v29, %v12835_v63  ;;  %v15625_v18 = vrot.slane %v15535_v20, 1  ;;  %v8547_v29 = vor.u32 %v9064_v55, %v8546_v35 }
 0x603   :  { %v5039_v55 = vrot.slane %v15549_v5, 1 }
 0x604   :  { %15623 = vst [vmem:[#allocation7_spill] sm:$0xff] %v13050_v28  ;;  %v4849_v22 = vpop.f32.mrf.mxu1  ;;  %v13053_v36 = vadd.f32 %v4845_v37, %v12838_v51  ;;  %v5100_v63 = vsel %vm5067_vm5, %v15625_v18, %v5033_v13  ;;  %v5233_v51 = vpack.c.bf16 %v5201_v7, %v5199_v47  ;;  %6014 = vmatpush.bf16.msra.mxu0 %v8547_v29  ;;  %v5042_v7 = vrot.slane %v15539_v30, 1  ;;  %v8530_v47 = vld [vmem:[#allocation2 + $0x360] sm:$0xf]  ;;  %v9060_v29 = vld [vmem:[#allocation2 + $0x364] sm:$0xf0] }
 0x605   :  { %v4957_v44 = vpop.f32.mrf.mxu3  ;;  %v15632_v18 = vrot.slane %v15538_v53, 1 }
 0x606   :  { %15624 = vst [vmem:[#allocation63_spill] sm:$0xff] %v13053_v36  ;;  %v8425_v36 = vpack.c.bf16 %v5098_v41, %v5100_v63 }
 0x607   :  { %v4898_v37 = vpop.f32.mrf.mxu2  ;;  %v5093_v63 = vsel %vm5067_vm5, %v15632_v18, %v5042_v7 }
 0x608   :  { %v4953_v33 = vadd.f32 %v4952_v38, %v4898_v37  ;;  %v5044_v38 = vrot.slane %v11231_v25, 1  ;;  %v5203_v5 = vsel %vm13084_vm11, %v5093_v63, 0.0  ;;  %v15636_v63 = vld [vmem:[#allocation65_spill] sm:$0xff] }
 0x609   :  { %v4793_v28 = vpop.f32.mrf.mxu0 }
 0x60a   :  { %v4848_v50 = vadd.f32 %v4847_v19, %v4793_v28  ;;  %v13070_v39 = vadd.f32 %v4953_v33, %v12845_v56  ;;  %8488 = vmatmul.msk.bf16.gmra.mxu3 %vm15626_vm3, %v5233_v51  ;;  %v15629_v56 = vld [vmem:[#allocation28_spill] sm:$0xff]  ;;  %v5091_v41 = vsel %vm5067_vm5, %v5042_v7, %v5044_v38 }
 0x60b   :  { %vm5109_vm1 = vcmp.ge.s32.totalorder %v15629_v56, 4294967295  ;;  %vm5127_vm4 = vcmp.lt.s32.totalorder %v15629_v56, 11  ;;  %v9061_v33 = vld [vmem:[#allocation2 + $0x374] sm:$0xf] }
 0x60c   :  { %v4852_v13 = vpop.f32.mrf.mxu1  ;;  %v13074_v35 = vadd.f32 %v4848_v50, %v12849_v46  ;;  %8426 = vmatmul.msk.bf16.vlgmr.msrb.gmra.mxu0 %vm8424_vm14, %v8425_v36  ;;  %8462 = vmatmul.msk.bf16.vlgmr.msrb.gmra.mxu2 %vm8424_vm14, %v8425_v36  ;;  %v5037_v46 = vrot.slane %v15541_v9, 1  ;;  %vm13095_vm12 = vmand %vm5109_vm1, %vm5127_vm4  ;;  %v8540_v50 = vld [vmem:[#allocation2 + $0x378] sm:$0xf0] }
 0x60d   :  { %v4960_v4 = vpop.f32.mrf.mxu3  ;;  %v5205_v7 = vsel %vm13095_vm12, %v5091_v41, 0.0  ;;  %v8543_v18 = vor.u32 %v9061_v33, %v8540_v50  ;;  %vm8430_vm10 = vmpackc.low %vm13095_vm12, %vm13084_vm11 }
 0x60e   :  { %v5094_v9 = vsel %vm5067_vm5, %v5037_v46, %v5039_v55 }
 0x60f   :  { %8452 = vmatmul.msk.bf16.gmra.mxu1 %vm15628_vm7, %v5233_v51  ;;  %v4901_v19 = vpop.f32.mrf.mxu2  ;;  %6123 = vmatpush.bf16.msra.mxu2 %v8543_v18  ;;  %v15638_v18 = vld [vmem:[#allocation66_spill] sm:$0xff]  ;;  %vm15651_vm7 = vmmov %vm15637_vm6 }
 0x610   :  { %v4956_v28 = vadd.f32 %v4955_v42, %v4901_v19 }
 0x611   :  { %v4795_v36 = vpop.f32.mrf.mxu0 }
 0x612   :  { %v4850_v51 = vadd.f32 %v4849_v22, %v4795_v36  ;;  %v13100_v37 = vadd.f32 %v4956_v28, %v12853_v31  ;;  %v5096_v31 = vsel %vm5067_vm5, %v5035_v3, %v5037_v46  ;;  %v5235_v28 = vpack.c.bf16 %v5205_v7, %v5203_v5  ;;  %v8538_v3 = vld [vmem:[#allocation2 + $0x370] sm:$0xf]  ;;  %v9062_v46 = vld [vmem:[#allocation2 + $0x374] sm:$0xf0] }
 0x613   :  { %v15641_v7 = vld [vmem:[#allocation25_spill] sm:$0xff] }
 0x614   :  { %15635 = vst [vmem:[#allocation64_spill] sm:$0xff] %v13100_v37  ;;  %v4854_v42 = vpop.f32.mrf.mxu1  ;;  %v13103_v19 = vadd.f32 %v4850_v51, %v12856_v43  ;;  %v8428_v37 = vpack.c.bf16 %v5094_v9, %v5096_v31  ;;  %v8539_v9 = vor.u32 %v9062_v46, %v8538_v3  ;;  %vm5111_vm8 = vcmp.ge.s32.totalorder %v15641_v7, 4294967295  ;;  %v9058_v3 = vld [vmem:[#allocation2 + $0x354] sm:$0xf0] }
 0x615   :  { %v4962_v22 = vpop.f32.mrf.mxu3  ;;  %vm5129_vm14 = vcmp.lt.s32.totalorder %v15641_v7, 11  ;;  %v15648_v7 = vld [vmem:[#allocation68_spill] sm:$0xff] }
 0x616   :  { %6015 = vmatpush.bf16.msra.mxu0 %v8539_v9  ;;  %vm13141_vm13 = vmand %vm5111_vm8, %vm5129_vm14 }
 0x617   :  { %v4903_v36 = vpop.f32.mrf.mxu2 }
 0x618   :  { %v4958_v43 = vadd.f32 %v4957_v44, %v4903_v36  ;;  %v15639_v44 = vld [vmem:[#allocation24_spill] sm:$0xff]  ;;  %v5041_v36 = vrot.slane %v15550_v23, 1 }
 0x619   :  { %v4798_v51 = vpop.f32.mrf.mxu0  ;;  %vm5110_vm2 = vcmp.ge.s32.totalorder %v15639_v44, 4294967295  ;;  %vm5128_vm15 = vcmp.lt.s32.totalorder %v15639_v44, 11  ;;  %v9059_v44 = vld [vmem:[#allocation2 + $0x364] sm:$0xf] }
 0x61a   :  { %v4853_v41 = vadd.f32 %v4852_v13, %v4798_v51  ;;  %v13118_v33 = vadd.f32 %v4958_v43, %v15636_v63  ;;  %8489 = vmatmul.msk.bf16.gmra.mxu3 %vm15637_vm6, %v5235_v28  ;;  %vm13132_vm3 = vmand %vm5110_vm2, %vm5128_vm15  ;;  %v5087_v63 = vsel %vm5067_vm5, %v5046_v8, %v5048_v14 }
 0x61b   :  { %vm8433_vm15 = vmpackc.low %vm13141_vm13, %vm13132_vm3 }
 0x61c   :  { %v4857_v50 = vpop.f32.mrf.mxu1  ;;  %v13122_v5 = vadd.f32 %v4853_v41, %v15638_v18  ;;  %8429 = vmatmul.msk.bf16.gmra.mxu0 %vm8427_vm0, %v8428_v37  ;;  %8465 = vmatmul.msk.bf16.gmra.mxu2 %vm8427_vm0, %v8428_v37  ;;  %v5043_v41 = vrot.slane %v15556_v15, 1  ;;  %v15646_v18 = vld [vmem:[#allocation67_spill] sm:$0xff]  ;;  %v5209_v15 = vsel %vm13141_vm13, %v5087_v63, 0.0  ;;  %vm15656_vm0 = vmmov %vm15637_vm6  ;;  %v8522_v37 = vld [vmem:[#allocation2 + $0x350] sm:$0xf] }
 0x61d   :  { %v4965_v13 = vpop.f32.mrf.mxu3 }
 0x61f   :  { %8453 = vmatmul.msk.bf16.gmra.mxu1 %vm15640_vm9, %v5235_v28  ;;  %v4906_v31 = vpop.f32.mrf.mxu2  ;;  %v5089_v28 = vsel %vm5067_vm5, %v5044_v38, %v5046_v8  ;;  %v8532_v38 = vld [vmem:[#allocation2 + $0x368] sm:$0xf0]  ;;  %v5090_v8 = vsel %vm5067_vm5, %v5041_v36, %v5043_v41  ;;  %vm15665_vm9 = vmmov %vm15656_vm0 }
 0x620   :  { %v4961_v43 = vadd.f32 %v4960_v4, %v4906_v31  ;;  %v5207_v31 = vsel %vm13132_vm3, %v5089_v28, 0.0  ;;  %v15650_v28 = vld [vmem:[#allocation69_spill] sm:$0xff]  ;;  %vm15668_vm3 = vmmov %vm15656_vm0 }
 0x621   :  { %v4800_v51 = vpop.f32.mrf.mxu0 }
 0x622   :  { %v4855_v46 = vadd.f32 %v4854_v42, %v4800_v51  ;;  %v13146_v9 = vadd.f32 %v4961_v43, %v15646_v18  ;;  %v5092_v42 = vsel %vm5067_vm5, %v5039_v55, %v5041_v36  ;;  %v8535_v43 = vor.u32 %v9059_v44, %v8532_v38  ;;  %v15652_v36 = vld [vmem:[#allocation70_spill] sm:$0xff]  ;;  %v15685_v38 = vld [vmem:[#allocation33_spill] sm:$0xff] }
 0x623   :  { %v5237_v18 = vpack.c.bf16 %v5209_v15, %v5207_v31  ;;  %v5050_v44 = vrot.slane %v15263_v48, 1  ;;  %v15005_v15 = vrot.slane %v15272_v54, 1 }
 0x624   :  { %15647 = vst [vmem:[#allocation26_spill] sm:$0xff] %v13146_v9  ;;  %v4859_v23 = vpop.f32.mrf.mxu1  ;;  %v13149_v4 = vadd.f32 %v4855_v46, %v15648_v7  ;;  %6124 = vmatpush.bf16.msra.mxu2 %v8535_v43  ;;  %v8431_v46 = vpack.c.bf16 %v5090_v8, %v5092_v42 }
 0x625   :  { %v4967_v51 = vpop.f32.mrf.mxu3  ;;  %v5083_v42 = vsel %vm5067_vm5, %v5050_v44, %v15005_v15  ;;  %v5085_v43 = vsel %vm5067_vm5, %v5048_v14, %v5050_v44  ;;  %v15662_v44 = vld [vmem:[#allocation71_spill] sm:$0xff] }
 0x626   :  { %15649 = vst [vmem:[#allocation27_spill] sm:$0xff] %v13149_v4 }
 0x627   :  { %v4908_v7 = vpop.f32.mrf.mxu2 }
 0x628   :  { %v4963_v4 = vadd.f32 %v4962_v22, %v4908_v7  ;;  %v15654_v22 = vld [vmem:[#allocation29_spill] sm:$0xff]  ;;  %v8514_v7 = vld [vmem:[#allocation2 + $0x340] sm:$0xf] }
 0x629   :  { %v4803_v9 = vpop.f32.mrf.mxu0  ;;  %vm5112_vm1 = vcmp.ge.s32.totalorder %v15654_v22, 4294967295  ;;  %vm5130_vm4 = vcmp.lt.s32.totalorder %v15654_v22, 11  ;;  %v15664_v22 = vld [vmem:[#allocation72_spill] sm:$0xff] }
 0x62a   :  { %v4858_v63 = vadd.f32 %v4857_v50, %v4803_v9  ;;  %v13164_v52 = vadd.f32 %v4963_v4, %v15650_v28  ;;  %8490 = vmatmul.msk.bf16.gmra.mxu3 %vm15651_vm7, %v5237_v18  ;;  %v15655_v50 = vld [vmem:[#allocation30_spill] sm:$0xff]  ;;  %v8531_v9 = vor.u32 %v9060_v29, %v8530_v47  ;;  %vm13177_vm6 = vmand %vm5112_vm1, %vm5130_vm4  ;;  %v15008_v28 = vrot.slane %v15275_v61, 1 }
 0x62b   :  { %vm5113_vm11 = vcmp.ge.s32.totalorder %v15655_v50, 4294967295  ;;  %vm5131_vm12 = vcmp.lt.s32.totalorder %v15655_v50, 11  ;;  %v9067_v50 = vld [vmem:[#allocation2 + $0x3a4] sm:$0xf] }
 0x62c   :  { %v4862_v55 = vpop.f32.mrf.mxu1  ;;  %v13170_v31 = vadd.f32 %v4858_v63, %v15652_v36  ;;  %8432 = vmatmul.msk.bf16.gmra.mxu0 %vm8430_vm10, %v8431_v46  ;;  %8468 = vmatmul.msk.bf16.gmra.mxu2 %vm8430_vm10, %v8431_v46  ;;  %vm13187_vm2 = vmand %vm5113_vm11, %vm5131_vm12  ;;  %v5045_v63 = vrot.slane %v15268_v17, 1  ;;  %vm5116_vm12 = vcmp.ge.s32.totalorder %v15685_v38, 4294967295 }
 0x62d   :  { %v4970_v4 = vpop.f32.mrf.mxu3  ;;  %6016 = vmatpush.bf16.msra.mxu0 %v8531_v9  ;;  %v5211_v9 = vsel %vm13177_vm6, %v5085_v43, 0.0  ;;  %v5213_v14 = vsel %vm13187_vm2, %v5083_v42, 0.0  ;;  %vm8436_vm4 = vmpackc.low %vm13187_vm2, %vm13177_vm6 }
 0x62e   :  { %15653 = vst [vmem:[#allocation65_spill] sm:$0xff] %v13170_v31  ;;  %v5239_v17 = vpack.c.bf16 %v5213_v14, %v5211_v9  ;;  %v9068_v14 = vld [vmem:[#allocation2 + $0x3a4] sm:$0xf0]  ;;  %vm15680_vm11 = vmmov %vm15656_vm0 }
 0x62f   :  { %8454 = vmatmul.msk.bf16.gmra.mxu1 %vm15656_vm0, %v5237_v18  ;;  %v4911_v8 = vpop.f32.mrf.mxu2  ;;  %vm5134_vm0 = vcmp.lt.s32.totalorder %v15685_v38, 11  ;;  %vm15686_vm6 = vmmov %vm15668_vm3 }
 0x630   :  { %v4966_v46 = vadd.f32 %v4965_v13, %v4911_v8  ;;  %v9057_v13 = vld [vmem:[#allocation2 + $0x354] sm:$0xf]  ;;  %v8524_v8 = vld [vmem:[#allocation2 + $0x358] sm:$0xf0] }
 0x631   :  { %v4805_v18 = vpop.f32.mrf.mxu0 }
 0x632   :  { %v4860_v36 = vadd.f32 %v4859_v23, %v4805_v18  ;;  %v13194_v47 = vadd.f32 %v4966_v46, %v12889_v62  ;;  %v5086_v23 = vsel %vm5067_vm5, %v5045_v63, %v15008_v28  ;;  %v5088_v62 = vsel %vm5067_vm5, %v5043_v41, %v5045_v63  ;;  %v8564_v18 = vld [vmem:[#allocation2 + $0x3a8] sm:$0xf0]  ;;  %v15666_v63 = vld [vmem:[#allocation73_spill] sm:$0xff] }
 0x633   :  { %v8527_v46 = vor.u32 %v9057_v13, %v8524_v8 }
 0x634   :  { %15661 = vst [vmem:[#allocation66_spill] sm:$0xff] %v13194_v47  ;;  %v4864_v29 = vpop.f32.mrf.mxu1  ;;  %v13201_v15 = vadd.f32 %v4860_v36, %v15662_v44  ;;  %v8567_v47 = vor.u32 %v9067_v50, %v8564_v18  ;;  %v8434_v36 = vpack.c.bf16 %v5086_v23, %v5088_v62  ;;  %v5054_v50 = vrot.slane %v15273_v10, 1 }
 0x635   :  { %v4972_v43 = vpop.f32.mrf.mxu3  ;;  %6125 = vmatpush.bf16.msra.mxu2 %v8527_v46  ;;  %v5049_v23 = vrot.slane %v15460_v59, 1 }
 0x636   :  { %15663 = vst [vmem:[#allocation67_spill] sm:$0xff] %v13201_v15  ;;  %6182 = vmatpush.bf16.msra.mxu3 %v8567_v47  ;;  %v15667_v47 = vld [vmem:[#allocation31_spill] sm:$0xff] }
 0x637   :  { %v4913_v42 = vpop.f32.mrf.mxu2  ;;  %vm5114_vm8 = vcmp.ge.s32.totalorder %v15667_v47, 4294967295  ;;  %vm5132_vm14 = vcmp.lt.s32.totalorder %v15667_v47, 11 }
 0x638   :  { %v4968_v44 = vadd.f32 %v4967_v51, %v4913_v42  ;;  %v15010_v51 = vrot.slane %v15568_v40, 1  ;;  %vm13230_vm7 = vmand %vm5114_vm8, %vm5132_vm14 }
 0x639   :  { %v4808_v15 = vpop.f32.mrf.mxu0 }
 0x63a   :  { %v4863_v28 = vadd.f32 %v4862_v55, %v4808_v15  ;;  %v13214_v31 = vadd.f32 %v4968_v44, %v15664_v22  ;;  %8491 = vmatmul.msk.bf16.gmra.mxu3 %vm15665_vm9, %v5239_v17  ;;  %v8562_v55 = vld [vmem:[#allocation2 + $0x3a0] sm:$0xf]  ;;  %v15669_v22 = vld [vmem:[#allocation32_spill] sm:$0xff]  ;;  %v5079_v42 = vsel %vm5067_vm5, %v5054_v50, %v15010_v51  ;;  %vm13282_vm9 = vmand %vm5116_vm12, %vm5134_vm0 }
 0x63b   :  { %vm5115_vm13 = vcmp.ge.s32.totalorder %v15669_v22, 4294967295  ;;  %vm5133_vm10 = vcmp.lt.s32.totalorder %v15669_v22, 11  ;;  %v8563_v13 = vor.u32 %v9068_v14, %v8562_v55 }
 0x63c   :  { %v4867_v41 = vpop.f32.mrf.mxu1  ;;  %v13219_v9 = vadd.f32 %v4863_v28, %v15666_v63  ;;  %8435 = vmatmul.msk.bf16.gmra.mxu0 %vm8433_vm15, %v8434_v36  ;;  %8471 = vmatmul.msk.bf16.gmra.mxu2 %vm8433_vm15, %v8434_v36  ;;  %v8523_v28 = vor.u32 %v9058_v3, %v8522_v37  ;;  %v15672_v36 = vrot.slane %v15272_v54, 1  ;;  %vm13243_vm1 = vmand %vm5115_vm13, %vm5133_vm10  ;;  %v5064_v63 = vrot.slane %v15596_v11, 1  ;;  %v9054_v11 = vld [vmem:[#allocation2 + $0x334] sm:$0xf0] }
 0x63d   :  { %v4975_v15 = vpop.f32.mrf.mxu3  ;;  %6074 = vmatpush.bf16.msra.mxu1 %v8563_v13  ;;  %v5217_v14 = vsel %vm13243_vm1, %v5079_v42, 0.0  ;;  %vm8439_vm14 = vmpackc.low %vm13243_vm1, %vm13230_vm7 }
 0x63e   :  { %6017 = vmatpush.bf16.msra.mxu0 %v8523_v28  ;;  %v5081_v44 = vsel %vm5067_vm5, %v15672_v36, %v5054_v50  ;;  %v9055_v50 = vld [vmem:[#allocation2 + $0x344] sm:$0xf] }
 0x63f   :  { %8455 = vmatmul.msk.bf16.gmra.mxu1 %vm15668_vm3, %v5239_v17  ;;  %v4916_v8 = vpop.f32.mrf.mxu2  ;;  %v5051_v17 = vrot.slane %v15570_v34, 1  ;;  %v5215_v28 = vsel %vm13230_vm7, %v5081_v44, 0.0  ;;  %vm15706_vm7 = vmmov %vm15668_vm3 }
 0x640   :  { %v4971_v46 = vadd.f32 %v4970_v4, %v4916_v8  ;;  %v8516_v8 = vld [vmem:[#allocation2 + $0x348] sm:$0xf0] }
 0x641   :  { %v4810_v18 = vpop.f32.mrf.mxu0  ;;  %v5082_v36 = vsel %vm5067_vm5, %v5049_v23, %v5051_v17  ;;  %v8519_v13 = vor.u32 %v9055_v50, %v8516_v8  ;;  %v15681_v50 = vld [vmem:[#allocation75_spill] sm:$0xff] }
 0x642   :  { %v4865_v37 = vadd.f32 %v4864_v29, %v4810_v18  ;;  %v13248_v4 = vadd.f32 %v4971_v46, %v12907_v45  ;;  %v15677_v29 = vrot.slane %v15275_v61, 1 }
 0x643   :  { %6126 = vmatpush.bf16.msra.mxu2 %v8519_v13  ;;  %v15688_v13 = vld [vmem:[#allocation46_spill] sm:$0xff] }
 0x644   :  { %15675 = vst [vmem:[#allocation68_spill] sm:$0xff] %v13248_v4  ;;  %v4869_v3 = vpop.f32.mrf.mxu1  ;;  %v13251_v55 = vadd.f32 %v4865_v37, %v12910_v32  ;;  %v5084_v45 = vsel %vm5067_vm5, %v15677_v29, %v5049_v23  ;;  %v5241_v32 = vpack.c.bf16 %v5217_v14, %v5215_v28  ;;  %v15683_v28 = vld [vmem:[#allocation51_spill] sm:$0xff] }
 0x645   :  { %v4977_v46 = vpop.f32.mrf.mxu3  ;;  %v8437_v37 = vpack.c.bf16 %v5082_v36, %v5084_v45  ;;  %v5058_v14 = vrot.slane %v15683_v28, 1 }
 0x646   :  { %15676 = vst [vmem:[#allocation69_spill] sm:$0xff] %v13251_v55  ;;  %v15678_v55 = vld [vmem:[#allocation74_spill] sm:$0xff] }
 0x647   :  { %v4918_v18 = vpop.f32.mrf.mxu2 }
 0x648   :  { %v4973_v44 = vadd.f32 %v4972_v43, %v4918_v18  ;;  %v15684_v43 = vld [vmem:[#allocation53_spill] sm:$0xff]  ;;  %v5053_v18 = vrot.slane %v15688_v13, 1 }
 0x649   :  { %v4813_v51 = vpop.f32.mrf.mxu0  ;;  %v15692_v38 = vrot.slane %v15684_v43, 1 }
 0x64a   :  { %v4868_v42 = vadd.f32 %v4867_v41, %v4813_v51  ;;  %v13268_v4 = vadd.f32 %v4973_v44, %v15678_v55  ;;  %8492 = vmatmul.msk.bf16.gmra.mxu3 %vm15680_vm11, %v5241_v32  ;;  %v9056_v41 = vld [vmem:[#allocation2 + $0x344] sm:$0xf0]  ;;  %v15722_v44 = vld [vmem:[#allocation40_spill] sm:$0xff] }
 0x64b   :  { %v15687_v55 = vld [vmem:[#allocation35_spill] sm:$0xff]  ;;  %v8515_v29 = vor.u32 %v9056_v41, %v8514_v7 }
 0x64c   :  { %15679 = vst [vmem:[#allocation70_spill] sm:$0xff] %v13268_v4  ;;  %v4872_v23 = vpop.f32.mrf.mxu1  ;;  %v13272_v8 = vadd.f32 %v4868_v42, %v15681_v50  ;;  %8438 = vmatmul.msk.bf16.gmra.mxu0 %vm8436_vm4, %v8437_v37  ;;  %8474 = vmatmul.msk.bf16.gmra.mxu2 %vm8436_vm4, %v8437_v37  ;;  %vm5117_vm2 = vcmp.ge.s32.totalorder %v15687_v55, 4294967295  ;;  %vm5135_vm15 = vcmp.lt.s32.totalorder %v15687_v55, 11  ;;  %v15691_v50 = vld [vmem:[#allocation48_spill] sm:$0xff]  ;;  %v15693_v55 = vrot.slane %v15568_v40, 1 }
 0x64d   :  { %v4980_v51 = vpop.f32.mrf.mxu3  ;;  %6018 = vmatpush.bf16.msra.mxu0 %v8515_v29  ;;  %v5055_v36 = vrot.slane %v15691_v50, 1  ;;  %vm13295_vm8 = vmand %vm5117_vm2, %vm5135_vm15  ;;  %v15696_v29 = vld [vmem:[#allocation8_spill] sm:$0xff]  ;;  %vm5120_vm2 = vcmp.ge.s32.totalorder %v15722_v44, 4294967295  ;;  %vm5138_vm15 = vcmp.lt.s32.totalorder %v15722_v44, 11  ;;  %v8498_v44 = vld [vmem:[#allocation2 + $0x320] sm:$0xf] }
 0x64e   :  { %15682 = vst [vmem:[#allocation71_spill] sm:$0xff] %v13272_v8  ;;  %v5077_v7 = vsel %vm5067_vm5, %v15693_v55, %v5058_v14  ;;  %v15698_v50 = vld [vmem:[#allocation16_spill] sm:$0xff]  ;;  %v5080_v55 = vsel %vm5067_vm5, %v5051_v17, %v5053_v18  ;;  %v8508_v17 = vld [vmem:[#allocation2 + $0x338] sm:$0xf0]  ;;  %vm8442_vm0 = vmpackc.low %vm13295_vm8, %vm13282_vm9 }
 0x64f   :  { %8456 = vmatmul.msk.bf16.gmra.mxu1 %vm15686_vm6, %v5241_v32  ;;  %v4921_v45 = vpop.f32.mrf.mxu2  ;;  %v5075_v32 = vsel %vm5067_vm5, %v5058_v14, %v15692_v38  ;;  %v5219_v38 = vsel %vm13282_vm9, %v5077_v7, 0.0  ;;  %v5078_v14 = vsel %vm5067_vm5, %v5053_v18, %v5055_v36  ;;  %v15702_v18 = vld [vmem:[#allocation21_spill] sm:$0xff]  ;;  %vm15719_vm6 = vmmov %vm15668_vm3 }
 0x650   :  { %v4976_v37 = vadd.f32 %v4975_v15, %v4921_v45  ;;  %v5221_v8 = vsel %vm13295_vm8, %v5075_v32, 0.0  ;;  %vm15723_vm9 = vmmov %vm15668_vm3 }
 0x651   :  { %v4815_v42 = vpop.f32.mrf.mxu0 }
 0x652   :  { %v4870_v13 = vadd.f32 %v4869_v3, %v4815_v42  ;;  %v13300_v15 = vadd.f32 %v4976_v37, %v15696_v29  ;;  %v5243_v42 = vpack.c.bf16 %v5221_v8, %v5219_v38  ;;  %v8440_v29 = vpack.c.bf16 %v5078_v14, %v5080_v55  ;;  %v15704_v38 = vld [vmem:[#allocation55_spill] sm:$0xff]  ;;  %v15705_v14 = vld [vmem:[#allocation36_spill] sm:$0xff]  ;;  %v15708_v55 = vld [vmem:[#allocation50_spill] sm:$0xff] }
 0x653   :  { %v5062_v62 = vrot.slane %v15704_v38, 1  ;;  %vm5118_vm13 = vcmp.ge.s32.totalorder %v15705_v14, 4294967295  ;;  %vm5136_vm10 = vcmp.lt.s32.totalorder %v15705_v14, 11 }
 0x654   :  { %15697 = vst [vmem:[#allocation72_spill] sm:$0xff] %v13300_v15  ;;  %v4874_v45 = vpop.f32.mrf.mxu1  ;;  %v13303_v28 = vadd.f32 %v4870_v13, %v15698_v50  ;;  %v15700_v50 = vld [vmem:[#allocation19_spill] sm:$0xff]  ;;  %vm13332_vm11 = vmand %vm5118_vm13, %vm5136_vm10 }
 0x655   :  { %v4982_v3 = vpop.f32.mrf.mxu3 }
 0x656   :  { %15699 = vst [vmem:[#allocation73_spill] sm:$0xff] %v13303_v28  ;;  %v9053_v28 = vld [vmem:[#allocation2 + $0x334] sm:$0xf] }
 0x657   :  { %v4923_v37 = vpop.f32.mrf.mxu2 }
 0x658   :  { %v4978_v15 = vadd.f32 %v4977_v46, %v4923_v37  ;;  %v8511_v46 = vor.u32 %v9053_v28, %v8508_v17  ;;  %v5057_v28 = vrot.slane %v15708_v55, 1  ;;  %v5071_v17 = vsel %vm5067_vm5, %v5062_v62, %v5064_v63  ;;  %v15740_v37 = vld [vmem:[#allocation61_spill] sm:$0xff] }
 0x659   :  { %v4818_v4 = vpop.f32.mrf.mxu0 }
 0x65a   :  { %v4873_v13 = vadd.f32 %v4872_v23, %v4818_v4  ;;  %v13318_v32 = vadd.f32 %v4978_v15, %v15700_v50  ;;  %8493 = vmatmul.msk.bf16.gmra.mxu3 %vm15668_vm3, %v5243_v42  ;;  %v15707_v23 = vld [vmem:[#allocation37_spill] sm:$0xff]  ;;  %6127 = vmatpush.bf16.msra.mxu2 %v8511_v46  ;;  %v5059_v50 = vrot.slane %v15598_v49, 1  ;;  %vm13379_vm3 = vmand %vm5120_vm2, %vm5138_vm15 }
 0x65b   :  { %vm5119_vm1 = vcmp.ge.s32.totalorder %v15707_v23, 4294967295  ;;  %vm5137_vm4 = vcmp.lt.s32.totalorder %v15707_v23, 11  ;;  %v15714_v23 = vld [vmem:[#allocation9_spill] sm:$0xff] }
 0x65c   :  { %15701 = vst [vmem:[#allocation31_spill] sm:$0xff] %v13318_v32  ;;  %v4877_v7 = vpop.f32.mrf.mxu1  ;;  %v13322_v8 = vadd.f32 %v4873_v13, %v15702_v18  ;;  %8441 = vmatmul.msk.bf16.gmra.mxu0 %vm8439_vm14, %v8440_v29  ;;  %8477 = vmatmul.msk.bf16.gmra.mxu2 %vm8439_vm14, %v8440_v29  ;;  %vm13343_vm12 = vmand %vm5119_vm1, %vm5137_vm4  ;;  %v15716_v49 = vld [vmem:[#allocation49_spill] sm:$0xff]  ;;  %v5074_v32 = vsel %vm5067_vm5, %v5057_v28, %v5059_v50  ;;  %vm5684_vm1 = vcmp.lt.s32.totalorder %v15238_v16, 6 }
 0x65d   :  { %v4985_v4 = vpop.f32.mrf.mxu3  ;;  %vm8445_vm10 = vmpackc.low %vm13343_vm12, %vm13332_vm11 }
 0x65e   :  { %15703 = vst [vmem:[#allocation32_spill] sm:$0xff] %v13322_v8 }
 0x65f   :  { %8457 = vmatmul.msk.bf16.gmra.mxu1 %vm15706_vm7, %v5243_v42  ;;  %v4926_v15 = vpop.f32.mrf.mxu2  ;;  %v15711_v42 = vrot.slane %v15684_v43, 1  ;;  %vm15738_vm7 = vmmov %vm15719_vm6 }
 0x660   :  { %v4981_v29 = vadd.f32 %v4980_v51, %v4926_v15  ;;  %v8506_v15 = vld [vmem:[#allocation2 + $0x330] sm:$0xf] }
 0x661   :  { %v4820_v13 = vpop.f32.mrf.mxu0  ;;  %v5073_v18 = vsel %vm5067_vm5, %v15711_v42, %v5062_v62  ;;  %v5225_v62 = vsel %vm13343_vm12, %v5071_v17, 0.0  ;;  %v8507_v42 = vor.u32 %v9054_v11, %v8506_v15  ;;  %v15717_v11 = vld [vmem:[#allocation44_spill] sm:$0xff] }
 0x662   :  { %v4875_v55 = vadd.f32 %v4874_v45, %v4820_v13  ;;  %v13348_v14 = vadd.f32 %v4981_v29, %v15714_v23  ;;  %v5223_v8 = vsel %vm13332_vm11, %v5073_v18, 0.0  ;;  %v5076_v45 = vsel %vm5067_vm5, %v5055_v36, %v5057_v28  ;;  %v15720_v36 = vld [vmem:[#allocation45_spill] sm:$0xff] }
 0x663   :  { %6019 = vmatpush.bf16.msra.mxu0 %v8507_v42  ;;  %v5245_v29 = vpack.c.bf16 %v5225_v62, %v5223_v8  ;;  %v9051_v8 = vld [vmem:[#allocation2 + $0x324] sm:$0xf]  ;;  %v15724_v62 = vld [vmem:[#allocation41_spill] sm:$0xff] }
 0x664   :  { %15715 = vst [vmem:[#allocation74_spill] sm:$0xff] %v13348_v14  ;;  %v4879_v51 = vpop.f32.mrf.mxu1  ;;  %v13351_v38 = vadd.f32 %v4875_v55, %v15716_v49  ;;  %v8443_v14 = vpack.c.bf16 %v5074_v32, %v5076_v45  ;;  %v8500_v32 = vld [vmem:[#allocation2 + $0x328] sm:$0xf0]  ;;  %vm5121_vm8 = vcmp.ge.s32.totalorder %v15724_v62, 4294967295  ;;  %vm5139_vm14 = vcmp.lt.s32.totalorder %v15724_v62, 11 }
 0x665   :  { %v4987_v23 = vpop.f32.mrf.mxu3  ;;  %v8503_v41 = vor.u32 %v9051_v8, %v8500_v32  ;;  %v5061_v45 = vrot.slane %v15599_v57, 1  ;;  %vm13390_vm13 = vmand %vm5121_vm8, %vm5139_vm14  ;;  %vm5723_vm8 = vcmp.ge.s32.totalorder %v15615_v0, 4294967294  ;;  %vm5741_vm14 = vcmp.lt.s32.totalorder %v15615_v0, 10  ;;  %v8700_v8 = vld [vmem:[#allocation2 + $0x428] sm:$0xf0] }
 0x667   :  { %v4928_v13 = vpop.f32.mrf.mxu2  ;;  %6128 = vmatpush.bf16.msra.mxu2 %v8503_v41  ;;  %v15731_v41 = vld [vmem:[#allocation47_spill] sm:$0xff] }
 0x668   :  { %v4983_v49 = vadd.f32 %v4982_v3, %v4928_v13  ;;  %v5066_v3 = vrot.slane %v15597_v58, 1 }
 0x669   :  { %v4823_v55 = vpop.f32.mrf.mxu0 }
 0x66a   :  { %v4878_v17 = vadd.f32 %v4877_v7, %v4823_v55  ;;  %v13366_v18 = vadd.f32 %v4983_v49, %v15717_v11  ;;  %8494 = vmatmul.msk.bf16.gmra.mxu3 %vm15719_vm6, %v5245_v29 }
 0x66c   :  { %15718 = vst [vmem:[#allocation75_spill] sm:$0xff] %v13366_v18  ;;  %v4882_v15 = vpop.f32.mrf.mxu1  ;;  %v13370_v28 = vadd.f32 %v4878_v17, %v15720_v36  ;;  %8444 = vmatmul.msk.bf16.gmra.mxu0 %vm8442_vm0, %v8443_v14  ;;  %8480 = vmatmul.msk.bf16.gmra.mxu2 %vm8442_vm0, %v8443_v14  ;;  %v5069_v17 = vsel %vm5067_vm5, %v5064_v63, %v5066_v3  ;;  %v15737_v18 = vld [vmem:[#allocation60_spill] sm:$0xff]  ;;  %v9083_v14 = vld [vmem:[#allocation2 + $0x424] sm:$0xf] }
 0x66d   :  { %v4990_v7 = vpop.f32.mrf.mxu3  ;;  %v5227_v63 = vsel %vm13379_vm3, %v5069_v17, 0.0 }
 0x66e   :  { %15721 = vst [vmem:[#allocation8_spill] sm:$0xff] %v13370_v28 }
 0x66f   :  { %8458 = vmatmul.msk.bf16.gmra.mxu1 %vm15723_vm9, %v5245_v29  ;;  %v4931_v42 = vpop.f32.mrf.mxu2  ;;  %v15727_v29 = vld [vmem:[#allocation10_spill] sm:$0xff]  ;;  %vm8448_vm9 = vmpackc.low %vm13390_vm13, %vm13379_vm3 }
 0x670   :  { %v4986_v13 = vadd.f32 %v4985_v4, %v4931_v42  ;;  %v15728_v11 = vrot.slane %v15727_v29, 1  ;;  %v15733_v42 = vld [vmem:[#allocation22_spill] sm:$0xff]  ;;  %v15022_v58 = vrot.slane %v15727_v29, 2 }
 0x671   :  { %v4825_v49 = vpop.f32.mrf.mxu0 }
 0x672   :  { %v5103_v36 = vsel %vm5067_vm5, %v5066_v3, %v15728_v11  ;;  %v4880_v32 = vadd.f32 %v4879_v51, %v4825_v49  ;;  %v13395_v57 = vadd.f32 %v4986_v13, %v15731_v41  ;;  %v9052_v3 = vld [vmem:[#allocation2 + $0x324] sm:$0xf0]  ;;  %v15735_v11 = vrot.slane %v15529_v6, 1 }
 0x673   :  { %v5229_v55 = vsel %vm13390_vm13, %v5103_v36, 0.0  ;;  %v5072_v13 = vsel %vm5067_vm5, %v5059_v50, %v5061_v45  ;;  %v8499_v49 = vor.u32 %v9052_v3, %v8498_v44 }
 0x674   :  { %15732 = vst [vmem:[#allocation16_spill] sm:$0xff] %v13395_v57  ;;  %v4884_v4 = vpop.f32.mrf.mxu1  ;;  %v13398_v62 = vadd.f32 %v4880_v32, %v15733_v42  ;;  %v5070_v51 = vsel %vm5067_vm5, %v5061_v45, %v15735_v11  ;;  %v5247_v32 = vpack.c.bf16 %v5229_v55, %v5227_v63  ;;  %v15736_v11 = vld [vmem:[#allocation12_spill] sm:$0xff]  ;;  %v15021_v45 = vrot.slane %v11215_v1, 2 }
 0x675   :  { %v4992_v41 = vpop.f32.mrf.mxu3  ;;  %6020 = vmatpush.bf16.msra.mxu0 %v8499_v49  ;;  %v5651_v28 = vrot.slane %v15736_v11, 2  ;;  %v9089_v55 = vld [vmem:[#allocation2 + $0x454] sm:$0xf] }
 0x676   :  { %15734 = vst [vmem:[#allocation19_spill] sm:$0xff] %v13398_v62  ;;  %v8446_v62 = vpack.c.bf16 %v5070_v51, %v5072_v13  ;;  %v8724_v51 = vld [vmem:[#allocation2 + $0x458] sm:$0xf0] }
 0x677   :  { %v4933_v42 = vpop.f32.mrf.mxu2  ;;  %v8727_v49 = vor.u32 %v9089_v55, %v8724_v51  ;;  %v15746_v55 = vld [vmem:[#allocation62_spill] sm:$0xff] }
 0x678   :  { %v4988_v17 = vadd.f32 %v4987_v23, %v4933_v42  ;;  %v15739_v23 = vld [vmem:[#allocation34_spill] sm:$0xff] }
 0x679   :  { %v4828_v57 = vpop.f32.mrf.mxu0  ;;  %vm5721_vm4 = vcmp.ge.s32.totalorder %v15739_v23, 4294967294  ;;  %vm5739_vm12 = vcmp.lt.s32.totalorder %v15739_v23, 10  ;;  %6798 = vmatpush.bf16.msrb.mxu3 %v8727_v49  ;;  %v15750_v49 = vrot.slane %v15535_v20, 1 }
 0x67a   :  { %v4883_v36 = vadd.f32 %v4882_v15, %v4828_v57  ;;  %v13417_v50 = vadd.f32 %v4988_v17, %v15737_v18  ;;  %8495 = vmatmul.msk.bf16.gmra.mxu3 %vm15738_vm7, %v5247_v32  ;;  %v15741_v57 = vld [vmem:[#allocation42_spill] sm:$0xff]  ;;  %v9085_v18 = vld [vmem:[#allocation2 + $0x434] sm:$0xf]  ;;  %v8708_v15 = vld [vmem:[#allocation2 + $0x438] sm:$0xf0]  ;;  %v5716_v17 = vsel %vm5684_vm1, %v5651_v28, %v15021_v45 }
 0x67b   :  { %vm5722_vm11 = vcmp.ge.s32.totalorder %v15741_v57, 4294967294  ;;  %vm5740_vm0 = vcmp.lt.s32.totalorder %v15741_v57, 10  ;;  %v8711_v3 = vor.u32 %v9085_v18, %v8708_v15  ;;  %vm13430_vm2 = vmand %vm5721_vm4, %vm5739_vm12  ;;  %v5065_v18 = vrot.slane %v11273_v2, 1 }
 0x67c   :  { %v5459_v44 = vpop.f32.mrf.mxu1  ;;  %v13424_v46 = vadd.f32 %v4883_v36, %v15740_v37  ;;  %8447 = vmatmul.msk.bf16.gmra.mxu0 %vm8445_vm10, %v8446_v62  ;;  %8483 = vmatmul.msk.bf16.gmra.mxu2 %vm8445_vm10, %v8446_v62  ;;  %v5718_v62 = vsel %vm5684_vm1, %v15022_v58, %v5651_v28  ;;  %vm13444_vm15 = vmand %vm5722_vm11, %vm5740_vm0  ;;  %v15749_v2 = vrot.slane %v15529_v6, 1  ;;  %vm5725_vm0 = vcmp.ge.s32.totalorder %v15627_v21, 4294967294 }
 0x67d   :  { %v5567_v63 = vpop.f32.mrf.mxu3  ;;  %6738 = vmatpush.bf16.msrb.mxu2 %v8711_v3  ;;  %v5812_v28 = vsel %vm13430_vm2, %v5718_v62, 0.0  ;;  %v5814_v58 = vsel %vm13444_vm15, %v5716_v17, 0.0  ;;  %v8706_v3 = vld [vmem:[#allocation2 + $0x430] sm:$0xf]  ;;  %vm13487_vm7 = vmand %vm5723_vm8, %vm5741_vm14 }
 0x67e   :  { %vm8576_vm11 = vmpackc.low %vm13444_vm15, %vm13430_vm2  ;;  %vm5726_vm15 = vcmp.ge.s32.totalorder %v15629_v56, 4294967294 }
 0x67f   :  { %8459 = vmatmul.msk.bf16.gmra.mxu1 %vm15719_vm6, %v5247_v32  ;;  %v4936_v42 = vpop.f32.mrf.mxu2 }
 0x680   :  { %v4991_v36 = vadd.f32 %v4990_v7, %v4936_v42  ;;  %v9086_v7 = vld [vmem:[#allocation2 + $0x434] sm:$0xf0]  ;;  %v8722_v42 = vld [vmem:[#allocation2 + $0x450] sm:$0xf] }
 0x681   :  { %v4830_v37 = vpop.f32.mrf.mxu0  ;;  %v8707_v62 = vor.u32 %v9086_v7, %v8706_v3  ;;  %v15754_v3 = vld [vmem:[#allocation11_spill] sm:$0xff] }
 0x682   :  { %v4885_v15 = vadd.f32 %v4884_v4, %v4830_v37  ;;  %v13450_v51 = vadd.f32 %v4991_v36, %v15746_v55  ;;  %v5068_v4 = vsel %vm5067_vm5, %v15749_v2, %v5065_v18  ;;  %v5102_v36 = vsel %vm5067_vm5, %v5065_v18, %v15750_v49  ;;  %v9090_v37 = vld [vmem:[#allocation2 + $0x454] sm:$0xf0]  ;;  %vm15751_vm5 = vmmov %vm15719_vm6 }
 0x683   :  { %v8723_v17 = vor.u32 %v9090_v37, %v8722_v42  ;;  %6630 = vmatpush.bf16.msrb.mxu0 %v8707_v62  ;;  %vm15752_vm3 = vmmov %vm15751_vm5  ;;  %v5650_v7 = vrot.slane %v15754_v3, 2  ;;  %v15758_v37 = vrot.slane %v11215_v1, 2  ;;  %vm5743_vm6 = vcmp.lt.s32.totalorder %v15627_v21, 10 }
 0x684   :  { %15747 = vst [vmem:[#allocation21_spill] sm:$0xff] %v13450_v51  ;;  %v5461_v45 = vpop.f32.mrf.mxu1  ;;  %v13457_v57 = vadd.f32 %v4885_v15, %v13012_v27  ;;  %v5848_v51 = vpack.c.bf16 %v5814_v58, %v5812_v28  ;;  %v8449_v15 = vpack.c.bf16 %v5102_v36, %v5068_v4  ;;  %v5655_v28 = vrot.slane %v11219_v12, 2  ;;  %v15757_v36 = vld [vmem:[#allocation13_spill] sm:$0xff]  ;;  %vm15766_vm12 = vmmov %vm15752_vm3 }
 0x685   :  { %v5569_v55 = vpop.f32.mrf.mxu3  ;;  %6690 = vmatpush.bf16.msrb.mxu1 %v8723_v17  ;;  %v5652_v62 = vrot.slane %v15757_v36, 2  ;;  %vm15767_vm2 = vmmov %vm15752_vm3  ;;  %v5663_v42 = vrot.slane %v15548_v60, 2 }
 0x686   :  { %15748 = vst [vmem:[#allocation9_spill] sm:$0xff] %v13457_v57  ;;  %v5714_v17 = vsel %vm5684_vm1, %v15758_v37, %v5655_v28 }
 0x687   :  { %v4938_v27 = vpop.f32.mrf.mxu2  ;;  %v5715_v37 = vsel %vm5684_vm1, %v5650_v7, %v5652_v62 }
 0x688   :  { %v4993_v57 = vadd.f32 %v4992_v41, %v4938_v27  ;;  %v15027_v41 = vrot.slane %v15538_v53, 2 }
 0x689   :  { %v5405_v23 = vpop.f32.mrf.mxu0 }
 0x68a   :  { %v5460_v2 = vadd.f32 %v5459_v44, %v5405_v23  ;;  %v13472_v11 = vadd.f32 %v4993_v57, %v13017_v24  ;;  %8639 = vmatmul.msk.bf16.vlgmr.msra.gmra.mxu3 %vm15751_vm5, %v5848_v51  ;;  %v15753_v44 = vld [vmem:[#allocation23_spill] sm:$0xff]  ;;  %v8698_v57 = vld [vmem:[#allocation2 + $0x420] sm:$0xf]  ;;  %vm13539_vm5 = vmand %vm5725_vm0, %vm5743_vm6 }
 0x68b   :  { %vm5724_vm13 = vcmp.ge.s32.totalorder %v15753_v44, 4294967294  ;;  %vm5742_vm10 = vcmp.lt.s32.totalorder %v15753_v44, 10 }
 0x68c   :  { %v5464_v18 = vpop.f32.mrf.mxu1  ;;  %v13476_v58 = vadd.f32 %v5460_v2, %v13021_v26  ;;  %8450 = vmatmul.msk.bf16.gmra.mxu0 %vm8448_vm9, %v8449_v15  ;;  %8486 = vmatmul.msk.bf16.gmra.mxu2 %vm8448_vm9, %v8449_v15  ;;  %v8703_v26 = vor.u32 %v9083_v14, %v8700_v8  ;;  %vm13500_vm4 = vmand %vm5724_vm13, %vm5742_vm10  ;;  %v15761_v2 = vld [vmem:[#allocation7_spill] sm:$0xff]  ;;  %vm5744_vm9 = vcmp.lt.s32.totalorder %v15629_v56, 10 }
 0x68d   :  { %v5572_v24 = vpop.f32.mrf.mxu3  ;;  %v15763_v8 = vld [vmem:[#allocation63_spill] sm:$0xff]  ;;  %vm13550_vm8 = vmand %vm5726_vm15, %vm5744_vm9 }
 0x68e   :  { %6739 = vmatpush.bf16.msrb.mxu2 %v8703_v26  ;;  %vm8579_vm14 = vmpackc.low %vm13500_vm4, %vm13487_vm7 }
 0x68f   :  { %8603 = vmatmul.msk.bf16.vlgmr.msra.gmra.mxu1 %vm15752_vm3, %v5848_v51  ;;  %v5513_v23 = vpop.f32.mrf.mxu2  ;;  %v5712_v51 = vsel %vm5684_vm1, %v5655_v28, %v15027_v41  ;;  %v9084_v28 = vld [vmem:[#allocation2 + $0x424] sm:$0xf0]  ;;  %vm15777_vm3 = vmmov %vm15767_vm2 }
 0x690   :  { %v5568_v4 = vadd.f32 %v5567_v63, %v5513_v23  ;;  %v5816_v23 = vsel %vm13487_vm7, %v5714_v17, 0.0  ;;  %v5818_v41 = vsel %vm13500_vm4, %v5712_v51, 0.0  ;;  %vm15780_vm7 = vmmov %vm15767_vm2 }
 0x691   :  { %v5407_v49 = vpop.f32.mrf.mxu0  ;;  %vm8582_vm6 = vmpackc.low %vm13550_vm8, %vm13539_vm5 }
 0x692   :  { %v5462_v15 = vadd.f32 %v5461_v45, %v5407_v49  ;;  %v13505_v63 = vadd.f32 %v5568_v4, %v15761_v2  ;;  %v15765_v45 = vrot.slane %v15535_v20, 2  ;;  %v8699_v49 = vor.u32 %v9084_v28, %v8698_v57 }
 0x694   :  { %15762 = vst [vmem:[#allocation49_spill] sm:$0xff] %v13505_v63  ;;  %v5466_v14 = vpop.f32.mrf.mxu1  ;;  %v13508_v26 = vadd.f32 %v5462_v15, %v15763_v8  ;;  %v5717_v4 = vsel %vm5684_vm1, %v15765_v45, %v5650_v7  ;;  %v5850_v15 = vpack.c.bf16 %v5818_v41, %v5816_v23  ;;  %6631 = vmatpush.bf16.msrb.mxu0 %v8699_v49  ;;  %v5661_v41 = vrot.slane %v11231_v25, 2  ;;  %v15771_v23 = vld [vmem:[#allocation15_spill] sm:$0xff] }
 0x695   :  { %v5574_v2 = vpop.f32.mrf.mxu3  ;;  %v5656_v28 = vrot.slane %v15771_v23, 2  ;;  %v15772_v45 = vrot.slane %v15538_v53, 2  ;;  %v9080_v49 = vld [vmem:[#allocation2 + $0x404] sm:$0xf0] }
 0x696   :  { %15764 = vst [vmem:[#allocation44_spill] sm:$0xff] %v13508_v26  ;;  %v8577_v26 = vpack.c.bf16 %v5715_v37, %v5717_v4 }
 0x697   :  { %v5515_v8 = vpop.f32.mrf.mxu2 }
 0x698   :  { %v5570_v17 = vadd.f32 %v5569_v55, %v5515_v8  ;;  %v5659_v55 = vrot.slane %v15539_v30, 2  ;;  %v15775_v8 = vld [vmem:[#allocation64_spill] sm:$0xff] }
 0x699   :  { %v5410_v63 = vpop.f32.mrf.mxu0 }
 0x69a   :  { %v5465_v51 = vadd.f32 %v5464_v18, %v5410_v63  ;;  %v13525_v36 = vadd.f32 %v5570_v17, %v13070_v39  ;;  %8640 = vmatmul.msk.bf16.gmra.mxu3 %vm15766_vm12, %v5850_v15  ;;  %v5708_v37 = vsel %vm5684_vm1, %v5659_v55, %v5661_v41  ;;  %v5710_v4 = vsel %vm5684_vm1, %v15772_v45, %v5659_v55  ;;  %v8682_v18 = vld [vmem:[#allocation2 + $0x400] sm:$0xf] }
 0x69b   :  { %v5822_v55 = vsel %vm13550_vm8, %v5708_v37, 0.0 }
 0x69c   :  { %v5469_v7 = vpop.f32.mrf.mxu1  ;;  %v13529_v57 = vadd.f32 %v5465_v51, %v13074_v35  ;;  %8578 = vmatmul.msk.bf16.vlgmr.msra.gmra.mxu0 %vm8576_vm11, %v8577_v26  ;;  %8614 = vmatmul.msk.bf16.vlgmr.msra.gmra.mxu2 %vm8576_vm11, %v8577_v26  ;;  %v15768_v35 = vld [vmem:[#allocation14_spill] sm:$0xff]  ;;  %v9081_v51 = vld [vmem:[#allocation2 + $0x414] sm:$0xf] }
 0x69d   :  { %v5577_v13 = vpop.f32.mrf.mxu3  ;;  %v5654_v32 = vrot.slane %v15768_v35, 2  ;;  %v5820_v35 = vsel %vm13539_vm5, %v5710_v4, 0.0 }
 0x69f   :  { %8604 = vmatmul.msk.bf16.gmra.mxu1 %vm15767_vm2, %v5850_v15  ;;  %v5518_v39 = vpop.f32.mrf.mxu2  ;;  %v5711_v56 = vsel %vm5684_vm1, %v5654_v32, %v5656_v28 }
 0x6a0   :  { %v5573_v63 = vadd.f32 %v5572_v24, %v5518_v39  ;;  %v8692_v39 = vld [vmem:[#allocation2 + $0x418] sm:$0xf0] }
 0x6a1   :  { %v5412_v26 = vpop.f32.mrf.mxu0  ;;  %v8695_v45 = vor.u32 %v9081_v51, %v8692_v39  ;;  %v15779_v39 = vld [vmem:[#allocation24_spill] sm:$0xff] }
 0x6a2   :  { %v5467_v15 = vadd.f32 %v5466_v14, %v5412_v26  ;;  %v13555_v17 = vadd.f32 %v5573_v63, %v15775_v8  ;;  %v5713_v14 = vsel %vm5684_vm1, %v5652_v62, %v5654_v32  ;;  %v5852_v26 = vpack.c.bf16 %v5822_v55, %v5820_v35  ;;  %v8690_v62 = vld [vmem:[#allocation2 + $0x410] sm:$0xf]  ;;  %v9082_v32 = vld [vmem:[#allocation2 + $0x414] sm:$0xf0] }
 0x6a3   :  { %6740 = vmatpush.bf16.msrb.mxu2 %v8695_v45  ;;  %vm5727_vm13 = vcmp.ge.s32.totalorder %v15779_v39, 4294967294  ;;  %vm5745_vm10 = vcmp.lt.s32.totalorder %v15779_v39, 10  ;;  %v15782_v55 = vld [vmem:[#allocation17_spill] sm:$0xff]  ;;  %v15790_v39 = vld [vmem:[#allocation27_spill] sm:$0xff] }
 0x6a4   :  { %15776 = vst [vmem:[#allocation45_spill] sm:$0xff] %v13555_v17  ;;  %v5471_v24 = vpop.f32.mrf.mxu1  ;;  %v13558_v23 = vadd.f32 %v5467_v15, %v13103_v19  ;;  %v8580_v17 = vpack.c.bf16 %v5711_v56, %v5713_v14  ;;  %v8691_v56 = vor.u32 %v9082_v32, %v8690_v62  ;;  %v5658_v45 = vrot.slane %v15782_v55, 2  ;;  %vm13587_vm12 = vmand %vm5727_vm13, %vm5745_vm10  ;;  %v9078_v62 = vld [vmem:[#allocation2 + $0x3f4] sm:$0xf0] }
 0x6a5   :  { %v5579_v63 = vpop.f32.mrf.mxu3 }
 0x6a6   :  { %6632 = vmatpush.bf16.msrb.mxu0 %v8691_v56  ;;  %v15788_v56 = vld [vmem:[#allocation26_spill] sm:$0xff] }
 0x6a7   :  { %v5520_v8 = vpop.f32.mrf.mxu2 }
 0x6a8   :  { %v5575_v19 = vadd.f32 %v5574_v2, %v5520_v8  ;;  %v15778_v2 = vld [vmem:[#allocation6_spill] sm:$0xff] }
 0x6a9   :  { %v5415_v15 = vpop.f32.mrf.mxu0  ;;  %v5665_v27 = vrot.slane %v15778_v2, 2  ;;  %v9079_v2 = vld [vmem:[#allocation2 + $0x404] sm:$0xf] }
 0x6aa   :  { %v5470_v37 = vadd.f32 %v5469_v7, %v5415_v15  ;;  %v13573_v4 = vadd.f32 %v5575_v19, %v13118_v33  ;;  %8641 = vmatmul.msk.bf16.gmra.mxu3 %vm15777_vm3, %v5852_v26  ;;  %v15781_v7 = vld [vmem:[#allocation25_spill] sm:$0xff]  ;;  %v15785_v19 = vld [vmem:[#allocation20_spill] sm:$0xff] }
 0x6ab   :  { %vm5728_vm4 = vcmp.ge.s32.totalorder %v15781_v7, 4294967294  ;;  %vm5746_vm11 = vcmp.lt.s32.totalorder %v15781_v7, 10  ;;  %v5660_v15 = vrot.slane %v15785_v19, 2 }
 0x6ac   :  { %v5474_v51 = vpop.f32.mrf.mxu1  ;;  %v13577_v35 = vadd.f32 %v5470_v37, %v13122_v5  ;;  %8581 = vmatmul.msk.bf16.gmra.mxu0 %vm8579_vm14, %v8580_v17  ;;  %8617 = vmatmul.msk.bf16.gmra.mxu2 %vm8579_vm14, %v8580_v17  ;;  %v5704_v37 = vsel %vm5684_vm1, %v5663_v42, %v5665_v27  ;;  %vm13596_vm0 = vmand %vm5728_vm4, %vm5746_vm11  ;;  %vm5731_vm4 = vcmp.ge.s32.totalorder %v15667_v47, 4294967294  ;;  %vm5749_vm11 = vcmp.lt.s32.totalorder %v15667_v47, 10  ;;  %v8674_v17 = vld [vmem:[#allocation2 + $0x3f0] sm:$0xf] }
 0x6ad   :  { %v5582_v33 = vpop.f32.mrf.mxu3  ;;  %v5826_v19 = vsel %vm13596_vm0, %v5704_v37, 0.0  ;;  %vm15796_vm14 = vmmov %vm15767_vm2 }
 0x6ae   :  { %vm8585_vm10 = vmpackc.low %vm13596_vm0, %vm13587_vm12  ;;  %vm5732_vm0 = vcmp.ge.s32.totalorder %v15669_v22, 4294967294 }
 0x6af   :  { %8605 = vmatmul.msk.bf16.gmra.mxu1 %vm15780_vm7, %v5852_v26  ;;  %v5523_v5 = vpop.f32.mrf.mxu2  ;;  %v5706_v26 = vsel %vm5684_vm1, %v5661_v41, %v5663_v42  ;;  %v8684_v41 = vld [vmem:[#allocation2 + $0x408] sm:$0xf0]  ;;  %v5707_v42 = vsel %vm5684_vm1, %v5658_v45, %v5660_v15  ;;  %vm15806_vm7 = vmmov %vm15767_vm2 }
 0x6b0   :  { %v5578_v14 = vadd.f32 %v5577_v13, %v5523_v5  ;;  %v5824_v5 = vsel %vm13587_vm12, %v5706_v26, 0.0  ;;  %vm15807_vm12 = vmmov %vm15767_vm2 }
 0x6b1   :  { %v5417_v8 = vpop.f32.mrf.mxu0 }
 0x6b2   :  { %v5472_v32 = vadd.f32 %v5471_v24, %v5417_v8  ;;  %v13601_v55 = vadd.f32 %v5578_v14, %v15788_v56  ;;  %v5709_v24 = vsel %vm5684_vm1, %v5656_v28, %v5658_v45  ;;  %v8687_v14 = vor.u32 %v9079_v2, %v8684_v41 }
 0x6b3   :  { %v5854_v56 = vpack.c.bf16 %v5826_v19, %v5824_v5  ;;  %v5667_v2 = vrot.slane %v15263_v48, 2  ;;  %v15032_v45 = vrot.slane %v15272_v54, 2  ;;  %v15792_v19 = vld [vmem:[#allocation65_spill] sm:$0xff]  ;;  %v9087_v48 = vld [vmem:[#allocation2 + $0x444] sm:$0xf] }
 0x6b4   :  { %15789 = vst [vmem:[#allocation10_spill] sm:$0xff] %v13601_v55  ;;  %v5476_v7 = vpop.f32.mrf.mxu1  ;;  %v13604_v13 = vadd.f32 %v5472_v32, %v15790_v39  ;;  %6741 = vmatpush.bf16.msrb.mxu2 %v8687_v14  ;;  %v8583_v32 = vpack.c.bf16 %v5707_v42, %v5709_v24  ;;  %v8666_v14 = vld [vmem:[#allocation2 + $0x3e0] sm:$0xf] }
 0x6b5   :  { %v5584_v8 = vpop.f32.mrf.mxu3  ;;  %v5700_v42 = vsel %vm5684_vm1, %v5667_v2, %v15032_v45  ;;  %v5702_v24 = vsel %vm5684_vm1, %v5665_v27, %v5667_v2  ;;  %v15804_v2 = vld [vmem:[#allocation67_spill] sm:$0xff] }
 0x6b6   :  { %15791 = vst [vmem:[#allocation47_spill] sm:$0xff] %v13604_v13 }
 0x6b7   :  { %v5525_v39 = vpop.f32.mrf.mxu2 }
 0x6b8   :  { %v5580_v13 = vadd.f32 %v5579_v63, %v5525_v39  ;;  %v15794_v63 = vld [vmem:[#allocation29_spill] sm:$0xff] }
 0x6b9   :  { %v5420_v55 = vpop.f32.mrf.mxu0  ;;  %vm5729_vm15 = vcmp.ge.s32.totalorder %v15794_v63, 4294967294  ;;  %vm5747_vm9 = vcmp.lt.s32.totalorder %v15794_v63, 10 }
 0x6ba   :  { %v5475_v37 = vadd.f32 %v5474_v51, %v5420_v55  ;;  %v13619_v26 = vadd.f32 %v5580_v13, %v13164_v52  ;;  %8642 = vmatmul.msk.bf16.gmra.mxu3 %vm15767_vm2, %v5854_v56  ;;  %v15795_v52 = vld [vmem:[#allocation30_spill] sm:$0xff]  ;;  %v8683_v51 = vor.u32 %v9080_v49, %v8682_v18  ;;  %vm13632_vm3 = vmand %vm5729_vm15, %vm5747_vm9  ;;  %v15822_v13 = vld [vmem:[#allocation33_spill] sm:$0xff] }
 0x6bb   :  { %vm5730_vm5 = vcmp.ge.s32.totalorder %v15795_v52, 4294967294  ;;  %vm5748_vm8 = vcmp.lt.s32.totalorder %v15795_v52, 10  ;;  %v15802_v49 = vld [vmem:[#allocation66_spill] sm:$0xff]  ;;  %v5828_v45 = vsel %vm13632_vm3, %v5702_v24, 0.0  ;;  %vm13685_vm2 = vmand %vm5731_vm4, %vm5749_vm11 }
 0x6bc   :  { %v5479_v28 = vpop.f32.mrf.mxu1  ;;  %v13625_v5 = vadd.f32 %v5475_v37, %v15792_v19  ;;  %8584 = vmatmul.msk.bf16.gmra.mxu0 %vm8582_vm6, %v8583_v32  ;;  %8620 = vmatmul.msk.bf16.gmra.mxu2 %vm8582_vm6, %v8583_v32  ;;  %vm13642_vm13 = vmand %vm5730_vm5, %vm5748_vm8  ;;  %v15801_v32 = vld [vmem:[#allocation18_spill] sm:$0xff]  ;;  %v15035_v19 = vrot.slane %v15275_v61, 2  ;;  %vm5750_vm6 = vcmp.lt.s32.totalorder %v15669_v22, 10  ;;  %vm5733_vm8 = vcmp.ge.s32.totalorder %v15822_v13, 4294967294 }
 0x6bd   :  { %v5587_v55 = vpop.f32.mrf.mxu3  ;;  %6633 = vmatpush.bf16.msrb.mxu0 %v8683_v51  ;;  %v5662_v37 = vrot.slane %v15801_v32, 2  ;;  %v5830_v27 = vsel %vm13642_vm13, %v5700_v42, 0.0  ;;  %vm13698_vm15 = vmand %vm5732_vm0, %vm5750_vm6 }
 0x6be   :  { %15793 = vst [vmem:[#allocation22_spill] sm:$0xff] %v13625_v5  ;;  %v5856_v32 = vpack.c.bf16 %v5830_v27, %v5828_v45  ;;  %vm8588_vm9 = vmpackc.low %vm13642_vm13, %vm13632_vm3 }
 0x6bf   :  { %8606 = vmatmul.msk.bf16.gmra.mxu1 %vm15796_vm14, %v5854_v56  ;;  %v5528_v41 = vpop.f32.mrf.mxu2  ;;  %vm15818_vm5 = vmmov %vm15806_vm7  ;;  %vm5751_vm14 = vcmp.lt.s32.totalorder %v15822_v13, 10 }
 0x6c0   :  { %v5583_v39 = vadd.f32 %v5582_v33, %v5528_v41  ;;  %v9077_v33 = vld [vmem:[#allocation2 + $0x3f4] sm:$0xf]  ;;  %v8676_v41 = vld [vmem:[#allocation2 + $0x3f8] sm:$0xf0]  ;;  %vm15823_vm3 = vmmov %vm15818_vm5 }
 0x6c1   :  { %v5422_v56 = vpop.f32.mrf.mxu0  ;;  %vm8591_vm11 = vmpackc.low %vm13698_vm15, %vm13685_vm2 }
 0x6c2   :  { %v5477_v18 = vadd.f32 %v5476_v7, %v5422_v56  ;;  %v13649_v51 = vadd.f32 %v5583_v39, %v15802_v49  ;;  %v5703_v7 = vsel %vm5684_vm1, %v5662_v37, %v15035_v19  ;;  %v5705_v39 = vsel %vm5684_vm1, %v5660_v15, %v5662_v37  ;;  %v8716_v49 = vld [vmem:[#allocation2 + $0x448] sm:$0xf0] }
 0x6c3   :  { %v8679_v56 = vor.u32 %v9077_v33, %v8676_v41 }
 0x6c4   :  { %15803 = vst [vmem:[#allocation60_spill] sm:$0xff] %v13649_v51  ;;  %v5481_v52 = vpop.f32.mrf.mxu1  ;;  %v13656_v63 = vadd.f32 %v5477_v18, %v15804_v2  ;;  %v8719_v51 = vor.u32 %v9087_v48, %v8716_v49  ;;  %v8586_v18 = vpack.c.bf16 %v5703_v7, %v5705_v39  ;;  %v5671_v48 = vrot.slane %v15273_v10, 2 }
 0x6c5   :  { %v5589_v24 = vpop.f32.mrf.mxu3  ;;  %6742 = vmatpush.bf16.msrb.mxu2 %v8679_v56  ;;  %v15810_v39 = vrot.slane %v15272_v54, 2 }
 0x6c6   :  { %15805 = vst [vmem:[#allocation61_spill] sm:$0xff] %v13656_v63  ;;  %6799 = vmatpush.bf16.msrb.mxu3 %v8719_v51  ;;  %v5666_v51 = vrot.slane %v15460_v59, 2 }
 0x6c7   :  { %v5530_v42 = vpop.f32.mrf.mxu2  ;;  %v5698_v56 = vsel %vm5684_vm1, %v15810_v39, %v5671_v48 }
 0x6c8   :  { %v5585_v2 = vadd.f32 %v5584_v8, %v5530_v42  ;;  %v15036_v8 = vrot.slane %v15568_v40, 2 }
 0x6c9   :  { %v5425_v63 = vpop.f32.mrf.mxu0 }
 0x6ca   :  { %v5480_v19 = vadd.f32 %v5479_v28, %v5425_v63  ;;  %v13669_v5 = vadd.f32 %v5585_v2, %v13214_v31  ;;  %8643 = vmatmul.msk.bf16.gmra.mxu3 %vm15806_vm7, %v5856_v32  ;;  %v8714_v31 = vld [vmem:[#allocation2 + $0x440] sm:$0xf]  ;;  %v9088_v63 = vld [vmem:[#allocation2 + $0x444] sm:$0xf0]  ;;  %v5696_v7 = vsel %vm5684_vm1, %v5671_v48, %v15036_v8  ;;  %v9075_v48 = vld [vmem:[#allocation2 + $0x3e4] sm:$0xf] }
 0x6cb   :  { %v8715_v37 = vor.u32 %v9088_v63, %v8714_v31  ;;  %v5832_v31 = vsel %vm13685_vm2, %v5698_v56, 0.0  ;;  %v8668_v63 = vld [vmem:[#allocation2 + $0x3e8] sm:$0xf0]  ;;  %v15817_v8 = vld [vmem:[#allocation70_spill] sm:$0xff]  ;;  %vm13737_vm7 = vmand %vm5733_vm8, %vm5751_vm14 }
 0x6cc   :  { %v5484_v15 = vpop.f32.mrf.mxu1  ;;  %v13674_v45 = vadd.f32 %v5480_v19, %v13219_v9  ;;  %8587 = vmatmul.msk.bf16.gmra.mxu0 %vm8585_vm10, %v8586_v18  ;;  %8623 = vmatmul.msk.bf16.gmra.mxu2 %vm8585_vm10, %v8586_v18  ;;  %v8675_v9 = vor.u32 %v9078_v62, %v8674_v17  ;;  %v15814_v17 = vld [vmem:[#allocation69_spill] sm:$0xff]  ;;  %vm15844_vm2 = vmmov %vm15823_vm3 }
 0x6cd   :  { %v5592_v28 = vpop.f32.mrf.mxu3  ;;  %6691 = vmatpush.bf16.msrb.mxu1 %v8715_v37 }
 0x6ce   :  { %6634 = vmatpush.bf16.msrb.mxu0 %v8675_v9  ;;  %v5834_v9 = vsel %vm13698_vm15, %v5696_v7, 0.0 }
 0x6cf   :  { %8607 = vmatmul.msk.bf16.gmra.mxu1 %vm15807_vm12, %v5856_v32  ;;  %v5533_v19 = vpop.f32.mrf.mxu2  ;;  %v5668_v32 = vrot.slane %v15570_v34, 2  ;;  %v5858_v39 = vpack.c.bf16 %v5834_v9, %v5832_v31  ;;  %v15821_v31 = vld [vmem:[#allocation51_spill] sm:$0xff]  ;;  %vm15838_vm12 = vmmov %vm15823_vm3 }
 0x6d0   :  { %v5588_v33 = vadd.f32 %v5587_v55, %v5533_v19  ;;  %v15813_v55 = vld [vmem:[#allocation68_spill] sm:$0xff]  ;;  %v5675_v9 = vrot.slane %v15821_v31, 2 }
 0x6d1   :  { %v5427_v41 = vpop.f32.mrf.mxu0  ;;  %v5699_v19 = vsel %vm5684_vm1, %v5666_v51, %v5668_v32 }
 0x6d2   :  { %v5482_v42 = vadd.f32 %v5481_v52, %v5427_v41  ;;  %v13703_v18 = vadd.f32 %v5588_v33, %v15813_v55  ;;  %v15816_v52 = vrot.slane %v15275_v61, 2  ;;  %v8671_v33 = vor.u32 %v9075_v48, %v8668_v63  ;;  %v15819_v48 = vld [vmem:[#allocation71_spill] sm:$0xff] }
 0x6d4   :  { %v5486_v2 = vpop.f32.mrf.mxu1  ;;  %v13706_v62 = vadd.f32 %v5482_v42, %v15814_v17  ;;  %v5701_v37 = vsel %vm5684_vm1, %v15816_v52, %v5666_v51  ;;  %6743 = vmatpush.bf16.msrb.mxu2 %v8671_v33  ;;  %v15825_v33 = vld [vmem:[#allocation46_spill] sm:$0xff] }
 0x6d5   :  { %v5594_v41 = vpop.f32.mrf.mxu3  ;;  %v8589_v55 = vpack.c.bf16 %v5699_v19, %v5701_v37  ;;  %v15824_v19 = vld [vmem:[#allocation35_spill] sm:$0xff] }
 0x6d6   :  { %15815 = vst [vmem:[#allocation62_spill] sm:$0xff] %v13706_v62  ;;  %vm5734_vm13 = vcmp.ge.s32.totalorder %v15824_v19, 4294967294  ;;  %vm5752_vm10 = vcmp.lt.s32.totalorder %v15824_v19, 10  ;;  %v15829_v19 = vrot.slane %v15568_v40, 2 }
 0x6d7   :  { %v5535_v42 = vpop.f32.mrf.mxu2  ;;  %vm13750_vm4 = vmand %vm5734_vm13, %vm5752_vm10 }
 0x6d8   :  { %v5590_v56 = vadd.f32 %v5589_v24, %v5535_v42  ;;  %v15039_v24 = vrot.slane %v15684_v43, 2  ;;  %v5670_v42 = vrot.slane %v15825_v33, 2  ;;  %vm8594_vm14 = vmpackc.low %vm13750_vm4, %vm13737_vm7 }
 0x6d9   :  { %v5430_v17 = vpop.f32.mrf.mxu0 }
 0x6da   :  { %v5485_v7 = vadd.f32 %v5484_v15, %v5430_v17  ;;  %v13723_v62 = vadd.f32 %v5590_v56, %v15817_v8  ;;  %8644 = vmatmul.msk.bf16.gmra.mxu3 %vm15818_vm5, %v5858_v39  ;;  %v9076_v15 = vld [vmem:[#allocation2 + $0x3e4] sm:$0xf0]  ;;  %v15859_v56 = vld [vmem:[#allocation40_spill] sm:$0xff] }
 0x6db   :  { %v8667_v52 = vor.u32 %v9076_v15, %v8666_v14  ;;  %v5694_v14 = vsel %vm5684_vm1, %v15829_v19, %v5675_v9  ;;  %v5697_v19 = vsel %vm5684_vm1, %v5668_v32, %v5670_v42  ;;  %v8660_v32 = vld [vmem:[#allocation2 + $0x3d8] sm:$0xf0]  ;;  %vm5737_vm13 = vcmp.ge.s32.totalorder %v15859_v56, 4294967294 }
 0x6dc   :  { %v5489_v51 = vpop.f32.mrf.mxu1  ;;  %v13727_v63 = vadd.f32 %v5485_v7, %v15819_v48  ;;  %8590 = vmatmul.msk.bf16.gmra.mxu0 %vm8588_vm9, %v8589_v55  ;;  %8626 = vmatmul.msk.bf16.gmra.mxu2 %vm8588_vm9, %v8589_v55  ;;  %v15828_v7 = vld [vmem:[#allocation48_spill] sm:$0xff]  ;;  %vm5755_vm10 = vcmp.lt.s32.totalorder %v15859_v56, 10 }
 0x6dd   :  { %v5597_v8 = vpop.f32.mrf.mxu3  ;;  %6635 = vmatpush.bf16.msrb.mxu0 %v8667_v52  ;;  %v5672_v48 = vrot.slane %v15828_v7, 2  ;;  %v15832_v52 = vld [vmem:[#allocation72_spill] sm:$0xff]  ;;  %v15834_v7 = vld [vmem:[#allocation73_spill] sm:$0xff] }
 0x6de   :  { %15820 = vst [vmem:[#allocation23_spill] sm:$0xff] %v13727_v63 }
 0x6df   :  { %8608 = vmatmul.msk.bf16.gmra.mxu1 %vm15823_vm3, %v5858_v39  ;;  %v5538_v37 = vpop.f32.mrf.mxu2  ;;  %v5692_v39 = vsel %vm5684_vm1, %v5675_v9, %v15039_v24  ;;  %v5836_v24 = vsel %vm13737_vm7, %v5694_v14, 0.0  ;;  %v5695_v9 = vsel %vm5684_vm1, %v5670_v42, %v5672_v48  ;;  %v15839_v42 = vld [vmem:[#allocation32_spill] sm:$0xff]  ;;  %vm15856_vm3 = vmmov %vm15844_vm2 }
 0x6e0   :  { %v5593_v55 = vadd.f32 %v5592_v28, %v5538_v37  ;;  %v5838_v31 = vsel %vm13750_vm4, %v5692_v39, 0.0  ;;  %vm15860_vm7 = vmmov %vm15844_vm2 }
 0x6e1   :  { %v5432_v17 = vpop.f32.mrf.mxu0 }
 0x6e2   :  { %v5487_v33 = vadd.f32 %v5486_v2, %v5432_v17  ;;  %v13755_v28 = vadd.f32 %v5593_v55, %v15832_v52  ;;  %v5860_v17 = vpack.c.bf16 %v5838_v31, %v5836_v24  ;;  %v8592_v52 = vpack.c.bf16 %v5695_v9, %v5697_v19  ;;  %v15841_v24 = vld [vmem:[#allocation55_spill] sm:$0xff]  ;;  %v15842_v9 = vld [vmem:[#allocation57_spill] sm:$0xff]  ;;  %v15843_v19 = vld [vmem:[#allocation36_spill] sm:$0xff] }
 0x6e3   :  { %v5679_v27 = vrot.slane %v15841_v24, 2  ;;  %v5681_v49 = vrot.slane %v15842_v9, 2  ;;  %vm5735_vm0 = vcmp.ge.s32.totalorder %v15843_v19, 4294967294  ;;  %vm5753_vm6 = vcmp.lt.s32.totalorder %v15843_v19, 10  ;;  %v15853_v9 = vld [vmem:[#allocation74_spill] sm:$0xff] }
 0x6e4   :  { %15833 = vst [vmem:[#allocation11_spill] sm:$0xff] %v13755_v28  ;;  %v5491_v37 = vpop.f32.mrf.mxu1  ;;  %v13758_v13 = vadd.f32 %v5487_v33, %v15834_v7  ;;  %v15836_v7 = vld [vmem:[#allocation31_spill] sm:$0xff]  ;;  %vm13787_vm5 = vmand %vm5735_vm0, %vm5753_vm6 }
 0x6e5   :  { %v5599_v2 = vpop.f32.mrf.mxu3  ;;  %v5688_v19 = vsel %vm5684_vm1, %v5679_v27, %v5681_v49 }
 0x6e6   :  { %15835 = vst [vmem:[#allocation7_spill] sm:$0xff] %v13758_v13  ;;  %v9073_v13 = vld [vmem:[#allocation2 + $0x3d4] sm:$0xf] }
 0x6e7   :  { %v5540_v55 = vpop.f32.mrf.mxu2 }
 0x6e8   :  { %v5595_v28 = vadd.f32 %v5594_v41, %v5540_v55  ;;  %v8663_v41 = vor.u32 %v9073_v13, %v8660_v32  ;;  %v15846_v55 = vld [vmem:[#allocation50_spill] sm:$0xff]  ;;  %v15849_v32 = vld [vmem:[#allocation52_spill] sm:$0xff] }
 0x6e9   :  { %v5435_v63 = vpop.f32.mrf.mxu0  ;;  %v5674_v13 = vrot.slane %v15846_v55, 2 }
 0x6ea   :  { %v5490_v33 = vadd.f32 %v5489_v51, %v5435_v63  ;;  %v13773_v39 = vadd.f32 %v5595_v28, %v15836_v7  ;;  %8645 = vmatmul.msk.bf16.gmra.mxu3 %vm15838_vm12, %v5860_v17  ;;  %v15845_v63 = vld [vmem:[#allocation37_spill] sm:$0xff]  ;;  %6744 = vmatpush.bf16.msrb.mxu2 %v8663_v41  ;;  %vm13834_vm12 = vmand %vm5737_vm13, %vm5755_vm10  ;;  %v15873_v41 = vld [vmem:[#allocation34_spill] sm:$0xff] }
 0x6eb   :  { %vm5736_vm15 = vcmp.ge.s32.totalorder %v15845_v63, 4294967294  ;;  %vm5754_vm9 = vcmp.lt.s32.totalorder %v15845_v63, 10 }
 0x6ec   :  { %15837 = vst [vmem:[#allocation63_spill] sm:$0xff] %v13773_v39  ;;  %v5494_v14 = vpop.f32.mrf.mxu1  ;;  %v13777_v31 = vadd.f32 %v5490_v33, %v15839_v42  ;;  %8593 = vmatmul.msk.bf16.gmra.mxu0 %vm8591_vm11, %v8592_v52  ;;  %8629 = vmatmul.msk.bf16.gmra.mxu2 %vm8591_vm11, %v8592_v52  ;;  %v5676_v42 = vrot.slane %v15849_v32, 2  ;;  %vm13798_vm8 = vmand %vm5736_vm15, %vm5754_vm9  ;;  %v6270_v52 = vrot.slane %v11215_v1, 3  ;;  %vm6338_vm15 = vcmp.ge.s32.totalorder %v15873_v41, 4294967293 }
 0x6ed   :  { %v5602_v51 = vpop.f32.mrf.mxu3  ;;  %vm8597_vm6 = vmpackc.low %vm13798_vm8, %vm13787_vm5  ;;  %vm6356_vm9 = vcmp.lt.s32.totalorder %v15873_v41, 9 }
 0x6ee   :  { %15840 = vst [vmem:[#allocation64_spill] sm:$0xff] %v13777_v31  ;;  %v9074_v31 = vld [vmem:[#allocation2 + $0x3d4] sm:$0xf0]  ;;  %vm13883_vm13 = vmand %vm6338_vm15, %vm6356_vm9 }
 0x6ef   :  { %8609 = vmatmul.msk.bf16.gmra.mxu1 %vm15844_vm2, %v5860_v17  ;;  %v5543_v28 = vpop.f32.mrf.mxu2  ;;  %v15850_v17 = vrot.slane %v15684_v43, 2  ;;  %v5691_v43 = vsel %vm5684_vm1, %v5674_v13, %v5676_v42 }
 0x6f0   :  { %v5598_v33 = vadd.f32 %v5597_v8, %v5543_v28  ;;  %v8658_v28 = vld [vmem:[#allocation2 + $0x3d0] sm:$0xf] }
 0x6f1   :  { %v5437_v7 = vpop.f32.mrf.mxu0  ;;  %v5690_v63 = vsel %vm5684_vm1, %v15850_v17, %v5679_v27  ;;  %v5842_v27 = vsel %vm13798_vm8, %v5688_v19, 0.0  ;;  %v8659_v17 = vor.u32 %v9074_v31, %v8658_v28  ;;  %v15855_v31 = vld [vmem:[#allocation75_spill] sm:$0xff]  ;;  %vm6301_vm8 = vcmp.lt.s32.totalorder %v15238_v16, 5 }
 0x6f2   :  { %v5492_v55 = vadd.f32 %v5491_v37, %v5437_v7  ;;  %v13803_v24 = vadd.f32 %v5598_v33, %v15853_v9  ;;  %v5840_v39 = vsel %vm13787_vm5, %v5690_v63, 0.0  ;;  %v5693_v37 = vsel %vm5684_vm1, %v5672_v48, %v5674_v13  ;;  %v15857_v48 = vld [vmem:[#allocation8_spill] sm:$0xff]  ;;  %vm15874_vm5 = vmmov %vm15844_vm2 }
 0x6f3   :  { %6636 = vmatpush.bf16.msrb.mxu0 %v8659_v17  ;;  %v5862_v33 = vpack.c.bf16 %v5842_v27, %v5840_v39  ;;  %v9071_v39 = vld [vmem:[#allocation2 + $0x3c4] sm:$0xf]  ;;  %v15861_v17 = vld [vmem:[#allocation41_spill] sm:$0xff] }
 0x6f4   :  { %15854 = vst [vmem:[#allocation26_spill] sm:$0xff] %v13803_v24  ;;  %v5496_v8 = vpop.f32.mrf.mxu1  ;;  %v13806_v32 = vadd.f32 %v5492_v55, %v13351_v38  ;;  %v8595_v24 = vpack.c.bf16 %v5691_v43, %v5693_v37  ;;  %v8652_v43 = vld [vmem:[#allocation2 + $0x3c8] sm:$0xf0]  ;;  %vm5738_vm4 = vcmp.ge.s32.totalorder %v15861_v17, 4294967294  ;;  %vm5756_vm11 = vcmp.lt.s32.totalorder %v15861_v17, 10 }
 0x6f5   :  { %v5604_v9 = vpop.f32.mrf.mxu3  ;;  %v8655_v15 = vor.u32 %v9071_v39, %v8652_v43  ;;  %vm13845_vm0 = vmand %vm5738_vm4, %vm5756_vm11  ;;  %vm6358_vm11 = vcmp.lt.s32.totalorder %v15615_v0, 9  ;;  %v6267_v43 = vrot.slane %v15754_v3, 3  ;;  %v15891_v3 = vld [vmem:[#allocation49_spill] sm:$0xff] }
 0x6f6   :  { %vm15884_vm4 = vmmov %vm15844_vm2 }
 0x6f7   :  { %v5545_v7 = vpop.f32.mrf.mxu2  ;;  %6745 = vmatpush.bf16.msrb.mxu2 %v8655_v15 }
 0x6f8   :  { %v5600_v38 = vadd.f32 %v5599_v2, %v5545_v7  ;;  %v15858_v2 = vld [vmem:[#allocation59_spill] sm:$0xff]  ;;  %v15862_v7 = vld [vmem:[#allocation54_spill] sm:$0xff] }
 0x6f9   :  { %v5440_v55 = vpop.f32.mrf.mxu0  ;;  %v5683_v27 = vrot.slane %v15858_v2, 2  ;;  %v8650_v2 = vld [vmem:[#allocation2 + $0x3c0] sm:$0xf] }
 0x6fa   :  { %v5495_v19 = vadd.f32 %v5494_v14, %v5440_v55  ;;  %v13821_v63 = vadd.f32 %v5600_v38, %v15855_v31  ;;  %8646 = vmatmul.msk.bf16.gmra.mxu3 %vm15856_vm3, %v5862_v33  ;;  %v5678_v38 = vrot.slane %v15862_v7, 2  ;;  %v5680_v31 = vrot.slane %v15529_v6, 2  ;;  %v15868_v7 = vld [vmem:[#allocation16_spill] sm:$0xff] }
 0x6fc   :  { %v5499_v28 = vpop.f32.mrf.mxu1  ;;  %v13825_v13 = vadd.f32 %v5495_v19, %v15857_v48  ;;  %8596 = vmatmul.msk.bf16.gmra.mxu0 %vm8594_vm14, %v8595_v24  ;;  %8632 = vmatmul.msk.bf16.gmra.mxu2 %vm8594_vm14, %v8595_v24  ;;  %v5686_v48 = vsel %vm5684_vm1, %v5681_v49, %v5683_v27 }
 0x6fd   :  { %v5607_v14 = vpop.f32.mrf.mxu3  ;;  %v5844_v49 = vsel %vm13834_vm12, %v5686_v48, 0.0 }
 0x6ff   :  { %8610 = vmatmul.msk.bf16.gmra.mxu1 %vm15860_vm7, %v5862_v33  ;;  %v5548_v37 = vpop.f32.mrf.mxu2  ;;  %v15865_v33 = vrot.slane %v15727_v29, 2  ;;  %vm8600_vm7 = vmpackc.low %vm13845_vm0, %vm13834_vm12 }
 0x700   :  { %v5603_v55 = vadd.f32 %v5602_v51, %v5548_v37  ;;  %v15870_v37 = vld [vmem:[#allocation19_spill] sm:$0xff]  ;;  %vm15885_vm12 = vmmov %vm15844_vm2 }
 0x701   :  { %v5442_v19 = vpop.f32.mrf.mxu0  ;;  %v5720_v39 = vsel %vm5684_vm1, %v5683_v27, %v15865_v33  ;;  %v9072_v27 = vld [vmem:[#allocation2 + $0x3c4] sm:$0xf0]  ;;  %v5687_v33 = vsel %vm5684_vm1, %v5678_v38, %v5680_v31 }
 0x702   :  { %v5497_v15 = vadd.f32 %v5496_v8, %v5442_v19  ;;  %v13850_v17 = vadd.f32 %v5603_v55, %v15868_v7  ;;  %v5846_v6 = vsel %vm13845_vm0, %v5720_v39, 0.0  ;;  %v5689_v8 = vsel %vm5684_vm1, %v5676_v42, %v5678_v38 }
 0x703   :  { %v8651_v7 = vor.u32 %v9072_v27, %v8650_v2  ;;  %v5864_v19 = vpack.c.bf16 %v5846_v6, %v5844_v49  ;;  %v15046_v6 = vrot.slane %v15727_v29, 3  ;;  %v15878_v49 = vld [vmem:[#allocation58_spill] sm:$0xff]  ;;  %vm6341_vm0 = vcmp.ge.s32.totalorder %v15753_v44, 4294967293 }
 0x704   :  { %15869 = vst [vmem:[#allocation27_spill] sm:$0xff] %v13850_v17  ;;  %v5501_v51 = vpop.f32.mrf.mxu1  ;;  %v13853_v56 = vadd.f32 %v5497_v15, %v15870_v37  ;;  %v8598_v37 = vpack.c.bf16 %v5687_v33, %v5689_v8  ;;  %v5682_v27 = vrot.slane %v15878_v49, 2 }
 0x705   :  { %v5609_v55 = vpop.f32.mrf.mxu3  ;;  %6637 = vmatpush.bf16.msrb.mxu0 %v8651_v7 }
 0x706   :  { %15871 = vst [vmem:[#allocation65_spill] sm:$0xff] %v13853_v56 }
 0x707   :  { %v5550_v15 = vpop.f32.mrf.mxu2 }
 0x708   :  { %v5605_v56 = vadd.f32 %v5604_v9, %v5550_v15  ;;  %v15872_v9 = vld [vmem:[#allocation12_spill] sm:$0xff]  ;;  %v15881_v15 = vld [vmem:[#allocation21_spill] sm:$0xff] }
 0x709   :  { %v5445_v17 = vpop.f32.mrf.mxu0  ;;  %v6268_v38 = vrot.slane %v15872_v9, 3 }
 0x70a   :  { %v5500_v48 = vadd.f32 %v5499_v28, %v5445_v17  ;;  %v13868_v39 = vadd.f32 %v5605_v56, %v13417_v50  ;;  %8647 = vmatmul.msk.bf16.gmra.mxu3 %vm15844_vm2, %v5864_v19  ;;  %v15875_v28 = vld [vmem:[#allocation42_spill] sm:$0xff] }
 0x70b   :  { %vm6339_vm14 = vcmp.ge.s32.totalorder %v15875_v28, 4294967293  ;;  %vm6357_vm3 = vcmp.lt.s32.totalorder %v15875_v28, 9  ;;  %v6333_v33 = vsel %vm6301_vm8, %v6268_v38, %v6270_v52  ;;  %v6335_v8 = vsel %vm6301_vm8, %v15046_v6, %v6268_v38 }
 0x70c   :  { %v6076_v42 = vpop.f32.mrf.mxu1  ;;  %v13872_v2 = vadd.f32 %v5500_v48, %v13424_v46  ;;  %8599 = vmatmul.msk.bf16.gmra.mxu0 %vm8597_vm6, %v8598_v37  ;;  %8635 = vmatmul.msk.bf16.gmra.mxu2 %vm8597_vm6, %v8598_v37  ;;  %vm13894_vm10 = vmand %vm6339_vm14, %vm6357_vm3  ;;  %v15882_v48 = vld [vmem:[#allocation9_spill] sm:$0xff]  ;;  %v6429_v41 = vsel %vm13883_vm13, %v6335_v8, 0.0  ;;  %v5685_v38 = vsel %vm5684_vm1, %v5680_v31, %v5682_v27  ;;  %vm6359_vm6 = vcmp.lt.s32.totalorder %v15753_v44, 9 }
 0x70d   :  { %v6184_v50 = vpop.f32.mrf.mxu3  ;;  %v6431_v28 = vsel %vm13894_vm10, %v6333_v33, 0.0  ;;  %vm13943_vm15 = vmand %vm6341_vm0, %vm6359_vm6  ;;  %vm6342_vm14 = vcmp.ge.s32.totalorder %v15627_v21, 4294967293  ;;  %vm6360_vm3 = vcmp.lt.s32.totalorder %v15627_v21, 9 }
 0x70e   :  { %vm8728_vm9 = vmpackc.low %vm13894_vm10, %vm13883_vm13 }
 0x70f   :  { %8611 = vmatmul.msk.bf16.gmra.mxu1 %vm15874_vm5, %v5864_v19  ;;  %v5553_v46 = vpop.f32.mrf.mxu2  ;;  %vm15893_vm5 = vmmov %vm15884_vm4 }
 0x710   :  { %v5608_v17 = vadd.f32 %v5607_v14, %v5553_v46  ;;  %v15883_v46 = vrot.slane %v15535_v20, 2  ;;  %vm15894_vm13 = vmmov %vm15884_vm4 }
 0x711   :  { %v5447_v1 = vpop.f32.mrf.mxu0 }
 0x712   :  { %v5502_v19 = vadd.f32 %v5501_v51, %v5447_v1  ;;  %v13899_v37 = vadd.f32 %v5608_v17, %v15881_v15  ;;  %v5719_v51 = vsel %vm5684_vm1, %v5682_v27, %v15883_v46  ;;  %v6465_v1 = vpack.c.bf16 %v6431_v28, %v6429_v41 }
 0x713   :  { %v8601_v6 = vpack.c.bf16 %v5719_v51, %v5685_v38  ;;  %v6274_v41 = vrot.slane %v15538_v53, 3  ;;  %vm6340_vm1 = vcmp.ge.s32.totalorder %v15615_v0, 4294967293 }
 0x714   :  { %v6078_v14 = vpop.f32.mrf.mxu1  ;;  %v13902_v9 = vadd.f32 %v5502_v19, %v15882_v48  ;;  %vm13934_vm2 = vmand %vm6340_vm1, %vm6358_vm11 }
 0x715   :  { %v6186_v17 = vpop.f32.mrf.mxu3  ;;  %vm8731_vm11 = vmpackc.low %vm13943_vm15, %vm13934_vm2 }
 0x717   :  { %v5555_v15 = vpop.f32.mrf.mxu2 }
 0x718   :  { %v5610_v19 = vadd.f32 %v5609_v55, %v5555_v15  ;;  %v6272_v55 = vrot.slane %v11219_v12, 3  ;;  %v15892_v15 = vld [vmem:[#allocation44_spill] sm:$0xff] }
 0x719   :  { %v6022_v48 = vpop.f32.mrf.mxu0  ;;  %v15905_v12 = vld [vmem:[#allocation24_spill] sm:$0xff] }
 0x71a   :  { %v6077_v33 = vadd.f32 %v6076_v42, %v6022_v48  ;;  %v13919_v8 = vadd.f32 %v5610_v19, %v13472_v11  ;;  %8791 = vmatmul.msk.bf16.vlgmr.msrb.gmra.mxu3 %vm15884_vm4, %v6465_v1  ;;  %v6329_v28 = vsel %vm6301_vm8, %v6272_v55, %v6274_v41  ;;  %v6331_v38 = vsel %vm6301_vm8, %v6270_v52, %v6272_v55  ;;  %vm13982_vm4 = vmand %vm6342_vm14, %vm6360_vm3 }
 0x71b   :  { %v6433_v19 = vsel %vm13934_vm2, %v6331_v38, 0.0  ;;  %v6435_v48 = vsel %vm13943_vm15, %v6329_v28, 0.0  ;;  %vm6344_vm0 = vcmp.ge.s32.totalorder %v15905_v12, 4294967293  ;;  %vm6362_vm6 = vcmp.lt.s32.totalorder %v15905_v12, 9  ;;  %vm15906_vm2 = vmmov %vm15893_vm5 }
 0x71c   :  { %v6081_v31 = vpop.f32.mrf.mxu1  ;;  %v13923_v27 = vadd.f32 %v6077_v33, %v13476_v58  ;;  %8602 = vmatmul.msk.bf16.gmra.mxu0 %vm8600_vm7, %v8601_v6  ;;  %8638 = vmatmul.msk.bf16.gmra.mxu2 %vm8600_vm7, %v8601_v6  ;;  %v15047_v58 = vrot.slane %v15535_v20, 3  ;;  %v15888_v6 = vld [vmem:[#allocation13_spill] sm:$0xff]  ;;  %v6467_v55 = vpack.c.bf16 %v6435_v48, %v6433_v19  ;;  %v15899_v19 = vld [vmem:[#allocation15_spill] sm:$0xff] }
 0x71d   :  { %v6189_v24 = vpop.f32.mrf.mxu3  ;;  %v6269_v0 = vrot.slane %v15888_v6, 3  ;;  %v6273_v48 = vrot.slane %v15899_v19, 3 }
 0x71f   :  { %8755 = vmatmul.msk.bf16.vlgmr.msrb.gmra.mxu1 %vm15885_vm12, %v6465_v1  ;;  %v6130_v11 = vpop.f32.mrf.mxu2  ;;  %v6332_v52 = vsel %vm6301_vm8, %v6267_v43, %v6269_v0  ;;  %vm15903_vm12 = vmmov %vm15893_vm5 }
 0x720   :  { %v6185_v53 = vadd.f32 %v6184_v50, %v6130_v11 }
 0x721   :  { %v6024_v42 = vpop.f32.mrf.mxu0 }
 0x722   :  { %v6079_v46 = vadd.f32 %v6078_v14, %v6024_v42  ;;  %v13948_v51 = vadd.f32 %v6185_v53, %v15891_v3  ;;  %v6334_v14 = vsel %vm6301_vm8, %v15047_v58, %v6267_v43  ;;  %v6278_v3 = vrot.slane %v11231_v25, 3 }
 0x723   :  { %v8729_v53 = vpack.c.bf16 %v6332_v52, %v6334_v14 }
 0x724   :  { %v6083_v1 = vpop.f32.mrf.mxu1  ;;  %v13951_v50 = vadd.f32 %v6079_v46, %v15892_v15  ;;  %v15919_v15 = vld [vmem:[#allocation29_spill] sm:$0xff] }
 0x725   :  { %v6191_v33 = vpop.f32.mrf.mxu3 }
 0x727   :  { %v6132_v11 = vpop.f32.mrf.mxu2 }
 0x728   :  { %v6187_v42 = vadd.f32 %v6186_v17, %v6132_v11  ;;  %v6276_v17 = vrot.slane %v15539_v30, 3  ;;  %v15902_v11 = vld [vmem:[#allocation45_spill] sm:$0xff] }
 0x729   :  { %v6027_v6 = vpop.f32.mrf.mxu0 }
 0x72a   :  { %v6082_v28 = vadd.f32 %v6081_v31, %v6027_v6  ;;  %v13968_v38 = vadd.f32 %v6187_v42, %v13525_v36  ;;  %8792 = vmatmul.msk.bf16.gmra.mxu3 %vm15893_vm5, %v6467_v55  ;;  %v15895_v36 = vld [vmem:[#allocation28_spill] sm:$0xff]  ;;  %v6325_v21 = vsel %vm6301_vm8, %v6276_v17, %v6278_v3  ;;  %v6327_v52 = vsel %vm6301_vm8, %v6274_v41, %v6276_v17  ;;  %vm14028_vm5 = vmand %vm6344_vm0, %vm6362_vm6 }
 0x72b   :  { %vm6343_vm10 = vcmp.ge.s32.totalorder %v15895_v36, 4294967293  ;;  %vm6361_vm7 = vcmp.lt.s32.totalorder %v15895_v36, 9  ;;  %v6437_v6 = vsel %vm13982_vm4, %v6327_v52, 0.0 }
 0x72c   :  { %v6086_v46 = vpop.f32.mrf.mxu1  ;;  %v13972_v43 = vadd.f32 %v6082_v28, %v13529_v57  ;;  %8730 = vmatmul.msk.bf16.vlgmr.msrb.gmra.mxu0 %vm8728_vm9, %v8729_v53  ;;  %8766 = vmatmul.msk.bf16.vlgmr.msrb.gmra.mxu2 %vm8728_vm9, %v8729_v53  ;;  %v15896_v57 = vld [vmem:[#allocation14_spill] sm:$0xff]  ;;  %vm13991_vm1 = vmand %vm6343_vm10, %vm6361_vm7  ;;  %vm6346_vm10 = vcmp.ge.s32.totalorder %v15919_v15, 4294967293  ;;  %vm6364_vm7 = vcmp.lt.s32.totalorder %v15919_v15, 9  ;;  %v15928_v15 = vld [vmem:[#allocation61_spill] sm:$0xff] }
 0x72d   :  { %v6194_v56 = vpop.f32.mrf.mxu3  ;;  %v6271_v31 = vrot.slane %v15896_v57, 3  ;;  %v6439_v28 = vsel %vm13991_vm1, %v6325_v21, 0.0  ;;  %vm8734_vm3 = vmpackc.low %vm13991_vm1, %vm13982_vm4 }
 0x72e   :  { %v6469_v36 = vpack.c.bf16 %v6439_v28, %v6437_v6  ;;  %v15911_v28 = vld [vmem:[#allocation20_spill] sm:$0xff]  ;;  %vm15920_vm4 = vmmov %vm15906_vm2 }
 0x72f   :  { %8756 = vmatmul.msk.bf16.gmra.mxu1 %vm15894_vm13, %v6467_v55  ;;  %v6135_v7 = vpop.f32.mrf.mxu2  ;;  %v6328_v41 = vsel %vm6301_vm8, %v6271_v31, %v6273_v48  ;;  %v6330_v17 = vsel %vm6301_vm8, %v6269_v0, %v6271_v31  ;;  %v15904_v31 = vld [vmem:[#allocation6_spill] sm:$0xff]  ;;  %vm15916_vm13 = vmmov %vm15906_vm2 }
 0x730   :  { %v6190_v30 = vadd.f32 %v6189_v24, %v6135_v7  ;;  %v8732_v57 = vpack.c.bf16 %v6328_v41, %v6330_v17  ;;  %v6282_v52 = vrot.slane %v15904_v31, 3  ;;  %v6277_v41 = vrot.slane %v15911_v28, 3  ;;  %v15915_v31 = vld [vmem:[#allocation47_spill] sm:$0xff] }
 0x731   :  { %v6029_v25 = vpop.f32.mrf.mxu0 }
 0x732   :  { %v6084_v55 = vadd.f32 %v6083_v1, %v6029_v25  ;;  %v13996_v53 = vadd.f32 %v6190_v30, %v15902_v11 }
 0x734   :  { %v6088_v42 = vpop.f32.mrf.mxu1  ;;  %v13999_v24 = vadd.f32 %v6084_v55, %v13558_v23 }
 0x735   :  { %v6196_v1 = vpop.f32.mrf.mxu3 }
 0x737   :  { %v6137_v7 = vpop.f32.mrf.mxu2 }
 0x738   :  { %v6192_v30 = vadd.f32 %v6191_v33, %v6137_v7  ;;  %v6280_v33 = vrot.slane %v15548_v60, 3  ;;  %v15956_v7 = vld [vmem:[#allocation36_spill] sm:$0xff] }
 0x739   :  { %v6032_v25 = vpop.f32.mrf.mxu0 }
 0x73a   :  { %v6087_v23 = vadd.f32 %v6086_v46, %v6032_v25  ;;  %v14014_v19 = vadd.f32 %v6192_v30, %v13573_v4  ;;  %8793 = vmatmul.msk.bf16.gmra.mxu3 %vm15903_vm12, %v6469_v36  ;;  %v15907_v4 = vld [vmem:[#allocation25_spill] sm:$0xff]  ;;  %v6321_v17 = vsel %vm6301_vm8, %v6280_v33, %v6282_v52  ;;  %v15914_v30 = vld [vmem:[#allocation10_spill] sm:$0xff]  ;;  %vm14074_vm12 = vmand %vm6346_vm10, %vm6364_vm7 }
 0x73b   :  { %vm6345_vm15 = vcmp.ge.s32.totalorder %v15907_v4, 4294967293  ;;  %vm6363_vm9 = vcmp.lt.s32.totalorder %v15907_v4, 9 }
 0x73c   :  { %v6091_v21 = vpop.f32.mrf.mxu1  ;;  %v14018_v0 = vadd.f32 %v6087_v23, %v13577_v35  ;;  %8733 = vmatmul.msk.bf16.gmra.mxu0 %vm8731_vm11, %v8732_v57  ;;  %8769 = vmatmul.msk.bf16.gmra.mxu2 %vm8731_vm11, %v8732_v57  ;;  %v15908_v35 = vld [vmem:[#allocation17_spill] sm:$0xff]  ;;  %vm14037_vm14 = vmand %vm6345_vm15, %vm6363_vm9  ;;  %vm6348_vm15 = vcmp.ge.s32.totalorder %v15667_v47, 4294967293  ;;  %vm6366_vm9 = vcmp.lt.s32.totalorder %v15667_v47, 9 }
 0x73d   :  { %v6199_v44 = vpop.f32.mrf.mxu3  ;;  %v6275_v55 = vrot.slane %v15908_v35, 3  ;;  %v6443_v4 = vsel %vm14037_vm14, %v6321_v17, 0.0  ;;  %vm8737_vm6 = vmpackc.low %vm14037_vm14, %vm14028_vm5  ;;  %vm6349_vm14 = vcmp.ge.s32.totalorder %v15669_v22, 4294967293 }
 0x73f   :  { %8757 = vmatmul.msk.bf16.gmra.mxu1 %vm15906_vm2, %v6469_v36  ;;  %v6140_v46 = vpop.f32.mrf.mxu2  ;;  %v6323_v36 = vsel %vm6301_vm8, %v6278_v3, %v6280_v33  ;;  %v6324_v3 = vsel %vm6301_vm8, %v6275_v55, %v6277_v41  ;;  %v6326_v33 = vsel %vm6301_vm8, %v6273_v48, %v6275_v55  ;;  %v15918_v55 = vld [vmem:[#allocation43_spill] sm:$0xff] }
 0x740   :  { %v6195_v60 = vadd.f32 %v6194_v56, %v6140_v46  ;;  %v6441_v12 = vsel %vm14028_vm5, %v6323_v36, 0.0  ;;  %vm15929_vm5 = vmmov %vm15906_vm2 }
 0x741   :  { %v6034_v6 = vpop.f32.mrf.mxu0  ;;  %v6471_v46 = vpack.c.bf16 %v6443_v4, %v6441_v12  ;;  %v15922_v12 = vld [vmem:[#allocation18_spill] sm:$0xff] }
 0x742   :  { %v6089_v57 = vadd.f32 %v6088_v42, %v6034_v6  ;;  %v14042_v25 = vadd.f32 %v6195_v60, %v15914_v30  ;;  %v8735_v60 = vpack.c.bf16 %v6324_v3, %v6326_v33  ;;  %v15917_v30 = vld [vmem:[#allocation22_spill] sm:$0xff]  ;;  %v6279_v4 = vrot.slane %v15922_v12, 3  ;;  %v15939_v3 = vld [vmem:[#allocation33_spill] sm:$0xff] }
 0x744   :  { %v6093_v23 = vpop.f32.mrf.mxu1  ;;  %v14045_v56 = vadd.f32 %v6089_v57, %v15915_v31  ;;  %v6286_v31 = vrot.slane %v15272_v54, 3 }
 0x745   :  { %v6201_v42 = vpop.f32.mrf.mxu3 }
 0x747   :  { %v6142_v35 = vpop.f32.mrf.mxu2 }
 0x748   :  { %v6197_v6 = vadd.f32 %v6196_v1, %v6142_v35  ;;  %v6284_v1 = vrot.slane %v15918_v55, 3  ;;  %v6281_v35 = vrot.slane %v15275_v61, 3 }
 0x749   :  { %v6037_v28 = vpop.f32.mrf.mxu0 }
 0x74a   :  { %v6092_v36 = vadd.f32 %v6091_v21, %v6037_v28  ;;  %v14060_v17 = vadd.f32 %v6197_v6, %v13619_v26  ;;  %8794 = vmatmul.msk.bf16.gmra.mxu3 %vm15916_vm13, %v6471_v46  ;;  %v15921_v26 = vld [vmem:[#allocation30_spill] sm:$0xff]  ;;  %vm14120_vm13 = vmand %vm6348_vm15, %vm6366_vm9 }
 0x74b   :  { %vm6347_vm1 = vcmp.ge.s32.totalorder %v15921_v26, 4294967293  ;;  %vm6365_vm11 = vcmp.lt.s32.totalorder %v15921_v26, 9 }
 0x74c   :  { %v6096_v57 = vpop.f32.mrf.mxu1  ;;  %v14064_v48 = vadd.f32 %v6092_v36, %v15917_v30  ;;  %8736 = vmatmul.msk.bf16.gmra.mxu0 %vm8734_vm3, %v8735_v60  ;;  %8772 = vmatmul.msk.bf16.gmra.mxu2 %vm8734_vm3, %v8735_v60  ;;  %v6317_v60 = vsel %vm6301_vm8, %v6284_v1, %v6286_v31  ;;  %vm14083_vm0 = vmand %vm6347_vm1, %vm6365_vm11  ;;  %v15927_v36 = vld [vmem:[#allocation60_spill] sm:$0xff]  ;;  %vm6367_vm3 = vcmp.lt.s32.totalorder %v15669_v22, 9  ;;  %vm6350_vm1 = vcmp.ge.s32.totalorder %v15939_v3, 4294967293 }
 0x74d   :  { %v6204_v14 = vpop.f32.mrf.mxu3  ;;  %v6447_v26 = vsel %vm14083_vm0, %v6317_v60, 0.0  ;;  %vm14129_vm10 = vmand %vm6349_vm14, %vm6367_vm3  ;;  %vm6368_vm11 = vcmp.lt.s32.totalorder %v15939_v3, 9  ;;  %vm6352_vm14 = vcmp.ge.s32.totalorder %v15956_v7, 4294967293  ;;  %vm6370_vm3 = vcmp.lt.s32.totalorder %v15956_v7, 9 }
 0x74e   :  { %vm8740_vm7 = vmpackc.low %vm14083_vm0, %vm14074_vm12 }
 0x74f   :  { %8758 = vmatmul.msk.bf16.gmra.mxu1 %vm15920_vm4, %v6471_v46  ;;  %v6145_v21 = vpop.f32.mrf.mxu2  ;;  %v6319_v46 = vsel %vm6301_vm8, %v6282_v52, %v6284_v1  ;;  %v6320_v52 = vsel %vm6301_vm8, %v6279_v4, %v6281_v35  ;;  %v6322_v1 = vsel %vm6301_vm8, %v6277_v41, %v6279_v4  ;;  %v6290_v4 = vrot.slane %v15568_v40, 3  ;;  %vm15935_vm4 = vmmov %vm15906_vm2 }
 0x750   :  { %v6200_v33 = vadd.f32 %v6199_v44, %v6145_v21  ;;  %v6445_v61 = vsel %vm14074_vm12, %v6319_v46, 0.0  ;;  %vm15940_vm12 = vmmov %vm15906_vm2 }
 0x751   :  { %v6039_v54 = vpop.f32.mrf.mxu0  ;;  %v6473_v21 = vpack.c.bf16 %v6447_v26, %v6445_v61  ;;  %vm8743_vm9 = vmpackc.low %vm14129_vm10, %vm14120_vm13 }
 0x752   :  { %v6094_v28 = vadd.f32 %v6093_v23, %v6039_v54  ;;  %v14088_v30 = vadd.f32 %v6200_v33, %v15927_v36  ;;  %v8738_v33 = vpack.c.bf16 %v6320_v52, %v6322_v1  ;;  %v15934_v52 = vld [vmem:[#allocation62_spill] sm:$0xff] }
 0x754   :  { %v6098_v55 = vpop.f32.mrf.mxu1  ;;  %v14091_v44 = vadd.f32 %v6094_v28, %v15928_v15 }
 0x755   :  { %v6206_v23 = vpop.f32.mrf.mxu3 }
 0x757   :  { %v6147_v12 = vpop.f32.mrf.mxu2 }
 0x758   :  { %v6202_v54 = vadd.f32 %v6201_v42, %v6147_v12  ;;  %v6288_v42 = vrot.slane %v15273_v10, 3 }
 0x759   :  { %v6042_v36 = vpop.f32.mrf.mxu0 }
 0x75a   :  { %v6097_v46 = vadd.f32 %v6096_v57, %v6042_v36  ;;  %v14106_v60 = vadd.f32 %v6202_v54, %v13669_v5  ;;  %8795 = vmatmul.msk.bf16.gmra.mxu3 %vm15906_vm2, %v6473_v21  ;;  %v6285_v57 = vrot.slane %v15570_v34, 3  ;;  %v6313_v47 = vsel %vm6301_vm8, %v6288_v42, %v6290_v4  ;;  %vm14166_vm2 = vmand %vm6350_vm1, %vm6368_vm11 }
 0x75b   :  { %v6315_v15 = vsel %vm6301_vm8, %v6286_v31, %v6288_v42  ;;  %v6451_v1 = vsel %vm14129_vm10, %v6313_v47, 0.0 }
 0x75c   :  { %v6101_v28 = vpop.f32.mrf.mxu1  ;;  %v14110_v41 = vadd.f32 %v6097_v46, %v13674_v45  ;;  %8739 = vmatmul.msk.bf16.gmra.mxu0 %vm8737_vm6, %v8738_v33  ;;  %8775 = vmatmul.msk.bf16.gmra.mxu2 %vm8737_vm6, %v8738_v33  ;;  %v6283_v45 = vrot.slane %v15460_v59, 3  ;;  %v6449_v34 = vsel %vm14120_vm13, %v6315_v15, 0.0  ;;  %v15942_v15 = vld [vmem:[#allocation46_spill] sm:$0xff]  ;;  %vm15957_vm13 = vmmov %vm15935_vm4 }
 0x75d   :  { %v6209_v11 = vpop.f32.mrf.mxu3  ;;  %v6475_v12 = vpack.c.bf16 %v6451_v1, %v6449_v34 }
 0x75e   :  { %v6316_v31 = vsel %vm6301_vm8, %v6283_v45, %v6285_v57 }
 0x75f   :  { %8759 = vmatmul.msk.bf16.gmra.mxu1 %vm15929_vm5, %v6473_v21  ;;  %v6150_v5 = vpop.f32.mrf.mxu2  ;;  %v6318_v21 = vsel %vm6301_vm8, %v6281_v35, %v6283_v45  ;;  %v15937_v45 = vld [vmem:[#allocation51_spill] sm:$0xff]  ;;  %vm15952_vm5 = vmmov %vm15935_vm4 }
 0x760   :  { %v6205_v10 = vadd.f32 %v6204_v14, %v6150_v5  ;;  %v8741_v33 = vpack.c.bf16 %v6316_v31, %v6318_v21  ;;  %v15945_v31 = vld [vmem:[#allocation48_spill] sm:$0xff] }
 0x761   :  { %v6044_v40 = vpop.f32.mrf.mxu0  ;;  %v6289_v21 = vrot.slane %v15945_v31, 3 }
 0x762   :  { %v6099_v22 = vadd.f32 %v6098_v55, %v6044_v40  ;;  %v14134_v59 = vadd.f32 %v6205_v10, %v13703_v18  ;;  %v15936_v10 = vld [vmem:[#allocation23_spill] sm:$0xff]  ;;  %v15938_v40 = vld [vmem:[#allocation53_spill] sm:$0xff] }
 0x763   :  { %v6294_v47 = vrot.slane %v15938_v40, 3 }
 0x764   :  { %v6103_v26 = vpop.f32.mrf.mxu1  ;;  %v14137_v14 = vadd.f32 %v6099_v22, %v15934_v52  ;;  %v6287_v22 = vrot.slane %v15942_v15, 3 }
 0x765   :  { %v6211_v55 = vpop.f32.mrf.mxu3 }
 0x767   :  { %v6152_v18 = vpop.f32.mrf.mxu2 }
 0x768   :  { %v6207_v54 = vadd.f32 %v6206_v23, %v6152_v18  ;;  %v6292_v23 = vrot.slane %v15937_v45, 3  ;;  %v15949_v45 = vld [vmem:[#allocation7_spill] sm:$0xff] }
 0x769   :  { %v6047_v36 = vpop.f32.mrf.mxu0 }
 0x76a   :  { %v6102_v46 = vadd.f32 %v6101_v28, %v6047_v36  ;;  %v14152_v42 = vadd.f32 %v6207_v54, %v13723_v62  ;;  %8796 = vmatmul.msk.bf16.gmra.mxu3 %vm15935_vm4, %v6475_v12  ;;  %v15941_v62 = vld [vmem:[#allocation35_spill] sm:$0xff]  ;;  %v6309_v18 = vsel %vm6301_vm8, %v6292_v23, %v6294_v47  ;;  %vm14212_vm4 = vmand %vm6352_vm14, %vm6370_vm3 }
 0x76b   :  { %vm6351_vm0 = vcmp.ge.s32.totalorder %v15941_v62, 4294967293  ;;  %vm6369_vm6 = vcmp.lt.s32.totalorder %v15941_v62, 9  ;;  %v15948_v36 = vld [vmem:[#allocation11_spill] sm:$0xff] }
 0x76c   :  { %v6106_v5 = vpop.f32.mrf.mxu1  ;;  %v14156_v35 = vadd.f32 %v6102_v46, %v15936_v10  ;;  %8742 = vmatmul.msk.bf16.gmra.mxu0 %vm8740_vm7, %v8741_v33  ;;  %8778 = vmatmul.msk.bf16.gmra.mxu2 %vm8740_vm7, %v8741_v33  ;;  %vm14175_vm15 = vmand %vm6351_vm0, %vm6369_vm6  ;;  %v15975_v33 = vld [vmem:[#allocation54_spill] sm:$0xff] }
 0x76d   :  { %v6214_v6 = vpop.f32.mrf.mxu3  ;;  %v6455_v3 = vsel %vm14175_vm15, %v6309_v18, 0.0  ;;  %vm8746_vm11 = vmpackc.low %vm14175_vm15, %vm14166_vm2 }
 0x76f   :  { %8760 = vmatmul.msk.bf16.gmra.mxu1 %vm15940_vm12, %v6475_v12  ;;  %v6155_v28 = vpop.f32.mrf.mxu2  ;;  %v6311_v12 = vsel %vm6301_vm8, %v6290_v4, %v6292_v23  ;;  %v6312_v4 = vsel %vm6301_vm8, %v6287_v22, %v6289_v21  ;;  %v6314_v23 = vsel %vm6301_vm8, %v6285_v57, %v6287_v22  ;;  %v15954_v22 = vld [vmem:[#allocation55_spill] sm:$0xff]  ;;  %vm15969_vm12 = vmmov %vm15952_vm5 }
 0x770   :  { %v6210_v34 = vadd.f32 %v6209_v11, %v6155_v28  ;;  %v6453_v40 = vsel %vm14166_vm2, %v6311_v12, 0.0  ;;  %v8744_v15 = vpack.c.bf16 %v6312_v4, %v6314_v23  ;;  %v15950_v12 = vld [vmem:[#allocation63_spill] sm:$0xff]  ;;  %v15959_v4 = vld [vmem:[#allocation50_spill] sm:$0xff]  ;;  %vm15973_vm2 = vmmov %vm15952_vm5 }
 0x771   :  { %v6049_v1 = vpop.f32.mrf.mxu0  ;;  %v6477_v62 = vpack.c.bf16 %v6455_v3, %v6453_v40  ;;  %v6291_v23 = vrot.slane %v15959_v4, 3 }
 0x772   :  { %v6104_v54 = vadd.f32 %v6103_v26, %v6049_v1  ;;  %v14180_v46 = vadd.f32 %v6210_v34, %v15948_v36  ;;  %v15953_v36 = vld [vmem:[#allocation64_spill] sm:$0xff] }
 0x774   :  { %v6108_v10 = vpop.f32.mrf.mxu1  ;;  %v14183_v11 = vadd.f32 %v6104_v54, %v15949_v45  ;;  %v15955_v45 = vld [vmem:[#allocation57_spill] sm:$0xff] }
 0x775   :  { %v6216_v26 = vpop.f32.mrf.mxu3  ;;  %v6298_v40 = vrot.slane %v15955_v45, 3  ;;  %v15965_v45 = vld [vmem:[#allocation26_spill] sm:$0xff] }
 0x777   :  { %v6157_v28 = vpop.f32.mrf.mxu2 }
 0x778   :  { %v6212_v34 = vadd.f32 %v6211_v55, %v6157_v28  ;;  %v6296_v55 = vrot.slane %v15954_v22, 3 }
 0x779   :  { %v6052_v1 = vpop.f32.mrf.mxu0 }
 0x77a   :  { %v6107_v31 = vadd.f32 %v6106_v5, %v6052_v1  ;;  %v14198_v18 = vadd.f32 %v6212_v34, %v15950_v12  ;;  %8797 = vmatmul.msk.bf16.gmra.mxu3 %vm15952_vm5, %v6477_v62  ;;  %v15958_v5 = vld [vmem:[#allocation37_spill] sm:$0xff]  ;;  %v15962_v1 = vld [vmem:[#allocation52_spill] sm:$0xff]  ;;  %v6305_v12 = vsel %vm6301_vm8, %v6296_v55, %v6298_v40 }
 0x77b   :  { %vm6353_vm10 = vcmp.ge.s32.totalorder %v15958_v5, 4294967293  ;;  %vm6371_vm7 = vcmp.lt.s32.totalorder %v15958_v5, 9 }
 0x77c   :  { %15951 = vst [vmem:[#allocation66_spill] sm:$0xff] %v14198_v18  ;;  %v6111_v54 = vpop.f32.mrf.mxu1  ;;  %v14202_v57 = vadd.f32 %v6107_v31, %v15953_v36  ;;  %8745 = vmatmul.msk.bf16.gmra.mxu0 %vm8743_vm9, %v8744_v15  ;;  %8781 = vmatmul.msk.bf16.gmra.mxu2 %vm8743_vm9, %v8744_v15  ;;  %v6293_v31 = vrot.slane %v15962_v1, 3  ;;  %vm14221_vm1 = vmand %vm6353_vm10, %vm6371_vm7  ;;  %v6299_v36 = vrot.slane %v15878_v49, 3 }
 0x77d   :  { %v6219_v61 = vpop.f32.mrf.mxu3  ;;  %v6459_v4 = vsel %vm14221_vm1, %v6305_v12, 0.0  ;;  %vm8749_vm3 = vmpackc.low %vm14221_vm1, %vm14212_vm4 }
 0x77e   :  { %vm15989_vm10 = vmmov %vm15973_vm2 }
 0x77f   :  { %8761 = vmatmul.msk.bf16.gmra.mxu1 %vm15957_vm13, %v6477_v62  ;;  %v6160_v3 = vpop.f32.mrf.mxu2  ;;  %v6307_v62 = vsel %vm6301_vm8, %v6294_v47, %v6296_v55  ;;  %v6308_v47 = vsel %vm6301_vm8, %v6291_v23, %v6293_v31  ;;  %v6310_v55 = vsel %vm6301_vm8, %v6289_v21, %v6291_v23  ;;  %v15971_v23 = vld [vmem:[#allocation59_spill] sm:$0xff]  ;;  %vm15987_vm13 = vmmov %vm15973_vm2 }
 0x780   :  { %v6215_v15 = vadd.f32 %v6214_v6, %v6160_v3  ;;  %v6457_v3 = vsel %vm14212_vm4, %v6307_v62, 0.0  ;;  %v8747_v1 = vpack.c.bf16 %v6308_v47, %v6310_v55  ;;  %v15978_v47 = vld [vmem:[#allocation56_spill] sm:$0xff] }
 0x781   :  { %v6054_v34 = vpop.f32.mrf.mxu0  ;;  %v6297_v55 = vrot.slane %v15978_v47, 3 }
 0x782   :  { %v6109_v22 = vadd.f32 %v6108_v10, %v6054_v34  ;;  %v14226_v7 = vadd.f32 %v6215_v15, %v15965_v45  ;;  %v6479_v34 = vpack.c.bf16 %v6459_v4, %v6457_v3 }
 0x784   :  { %15966 = vst [vmem:[#allocation67_spill] sm:$0xff] %v14226_v7  ;;  %v6113_v5 = vpop.f32.mrf.mxu1  ;;  %v14229_v6 = vadd.f32 %v6109_v22, %v13806_v32  ;;  %v15972_v22 = vld [vmem:[#allocation40_spill] sm:$0xff] }
 0x785   :  { %v6221_v10 = vpop.f32.mrf.mxu3  ;;  %vm6354_vm0 = vcmp.ge.s32.totalorder %v15972_v22, 4294967293  ;;  %vm6372_vm6 = vcmp.lt.s32.totalorder %v15972_v22, 9 }
 0x786   :  { %15967 = vst [vmem:[#allocation68_spill] sm:$0xff] %v14229_v6  ;;  %vm14257_vm5 = vmand %vm6354_vm0, %vm6372_vm6  ;;  %vm16019_vm6 = vcmask 1040384  }
 0x787   :  { %v6162_v15 = vpop.f32.mrf.mxu2 }
 0x788   :  { %v6217_v45 = vadd.f32 %v6216_v26, %v6162_v15  ;;  %v6300_v26 = vrot.slane %v15971_v23, 3  ;;  %v15982_v23 = vld [vmem:[#allocation27_spill] sm:$0xff] }
 0x789   :  { %v6057_v58 = vpop.f32.mrf.mxu0 }
 0x78a   :  { %v6112_v32 = vadd.f32 %v6111_v54, %v6057_v58  ;;  %v14244_v12 = vadd.f32 %v6217_v45, %v13821_v63  ;;  %8798 = vmatmul.msk.bf16.gmra.mxu3 %vm15969_vm12, %v6479_v34  ;;  %v15974_v58 = vld [vmem:[#allocation41_spill] sm:$0xff]  ;;  %v6295_v54 = vrot.slane %v15975_v33, 3  ;;  %v6303_v15 = vsel %vm6301_vm8, %v6298_v40, %v6300_v26 }
 0x78b   :  { %vm6355_vm15 = vcmp.ge.s32.totalorder %v15974_v58, 4294967293  ;;  %vm6373_vm9 = vcmp.lt.s32.totalorder %v15974_v58, 9  ;;  %v15984_v58 = vld [vmem:[#allocation65_spill] sm:$0xff]  ;;  %v6461_v40 = vsel %vm14257_vm5, %v6303_v15, 0.0 }
 0x78c   :  { %15968 = vst [vmem:[#allocation69_spill] sm:$0xff] %v14244_v12  ;;  %v6116_v62 = vpop.f32.mrf.mxu1  ;;  %v14248_v21 = vadd.f32 %v6112_v32, %v13825_v13  ;;  %8748 = vmatmul.msk.bf16.gmra.mxu0 %vm8746_vm11, %v8747_v1  ;;  %8784 = vmatmul.msk.bf16.gmra.mxu2 %vm8746_vm11, %v8747_v1  ;;  %vm14268_vm14 = vmand %vm6355_vm15, %vm6373_vm9  ;;  %v6306_v33 = vsel %vm6301_vm8, %v6293_v31, %v6295_v54 }
 0x78d   :  { %v6224_v52 = vpop.f32.mrf.mxu3  ;;  %vm8752_vm7 = vmpackc.low %vm14268_vm14, %vm14257_vm5 }
 0x78e   :  { %15970 = vst [vmem:[#allocation70_spill] sm:$0xff] %v14248_v21 }
 0x78f   :  { %8762 = vmatmul.msk.bf16.gmra.mxu1 %vm15973_vm2, %v6479_v34  ;;  %v6165_v63 = vpop.f32.mrf.mxu2  ;;  %v15979_v34 = vrot.slane %v15727_v29, 3  ;;  %vm16021_vm2 = vmmov %vm16019_vm6 }
 0x790   :  { %v6220_v3 = vadd.f32 %v6219_v61, %v6165_v63 }
 0x791   :  { %v6059_v4 = vpop.f32.mrf.mxu0  ;;  %v6337_v1 = vsel %vm6301_vm8, %v6300_v26, %v15979_v34  ;;  %v6304_v26 = vsel %vm6301_vm8, %v6295_v54, %v6297_v55 }
 0x792   :  { %v6114_v32 = vadd.f32 %v6113_v5, %v6059_v4  ;;  %v14273_v22 = vadd.f32 %v6220_v3, %v15982_v23  ;;  %v6463_v29 = vsel %vm14268_vm14, %v6337_v1, 0.0  ;;  %v8750_v47 = vpack.c.bf16 %v6304_v26, %v6306_v33 }
 0x793   :  { %v6481_v4 = vpack.c.bf16 %v6463_v29, %v6461_v40  ;;  %v15992_v26 = vrot.slane %v15535_v20, 3 }
 0x794   :  { %15983 = vst [vmem:[#allocation71_spill] sm:$0xff] %v14273_v22  ;;  %v6118_v61 = vpop.f32.mrf.mxu1  ;;  %v14276_v63 = vadd.f32 %v6114_v32, %v15984_v58 }
 0x795   :  { %v6226_v5 = vpop.f32.mrf.mxu3  ;;  %v6336_v33 = vsel %vm6301_vm8, %v6299_v36, %v15992_v26 }
 0x796   :  { %15985 = vst [vmem:[#allocation72_spill] sm:$0xff] %v14276_v63 }
 0x797   :  { %v6167_v3 = vpop.f32.mrf.mxu2 }
 0x798   :  { %v6222_v34 = vadd.f32 %v6221_v10, %v6167_v3 }
 0x799   :  { %v6062_v23 = vpop.f32.mrf.mxu0 }
 0x79a   :  { %v6117_v15 = vadd.f32 %v6116_v62, %v6062_v23  ;;  %v14291_v1 = vadd.f32 %v6222_v34, %v13868_v39  ;;  %8799 = vmatmul.msk.bf16.gmra.mxu3 %vm15987_vm13, %v6481_v4 }
 0x79c   :  { %15986 = vst [vmem:[#allocation73_spill] sm:$0xff] %v14291_v1  ;;  %v6693_v32 = vpop.f32.mrf.mxu1  ;;  %v14295_v31 = vadd.f32 %v6117_v15, %v13872_v2  ;;  %8751 = vmatmul.msk.bf16.gmra.mxu0 %vm8749_vm3, %v8750_v47  ;;  %8787 = vmatmul.msk.bf16.gmra.mxu2 %vm8749_vm3, %v8750_v47  ;;  %v6302_v2 = vsel %vm6301_vm8, %v6297_v55, %v6299_v36 }
 0x79d   :  { %v6801_v54 = vpop.f32.mrf.mxu3  ;;  %v8753_v3 = vpack.c.bf16 %v6336_v33, %v6302_v2 }
 0x79e   :  { %15988 = vst [vmem:[#allocation31_spill] sm:$0xff] %v14295_v31 }
 0x79f   :  { %8763 = vmatmul.msk.bf16.gmra.mxu1 %vm15989_vm10, %v6481_v4  ;;  %v6170_v10 = vpop.f32.mrf.mxu2 }
 0x7a0   :  { %v6225_v28 = vadd.f32 %v6224_v52, %v6170_v10 }
 0x7a1   :  { %v6064_v58 = vpop.f32.mrf.mxu0 }
 0x7a2   :  { %v6119_v62 = vadd.f32 %v6118_v61, %v6064_v58  ;;  %v14300_v39 = vadd.f32 %v6225_v28, %v13899_v37 }
 0x7a4   :  { %15990 = vst [vmem:[#allocation32_spill] sm:$0xff] %v14300_v39  ;;  %v6695_v40 = vpop.f32.mrf.mxu1  ;;  %v14303_v29 = vadd.f32 %v6119_v62, %v13902_v9 }
 0x7a5   :  { %v6803_v52 = vpop.f32.mrf.mxu3 }
 0x7a6   :  { %15991 = vst [vmem:[#allocation74_spill] sm:$0xff] %v14303_v29 }
 0x7a7   :  { %v6172_v4 = vpop.f32.mrf.mxu2 }
 0x7a8   :  { %v6227_v49 = vadd.f32 %v6226_v5, %v6172_v4 }
 0x7a9   :  { %v6639_v61 = vpop.f32.mrf.mxu0 }
 0x7aa   :  { %v6694_v37 = vadd.f32 %v6693_v32, %v6639_v61  ;;  %v14316_v9 = vadd.f32 %v6227_v49, %v13919_v8 }
 0x7ac   :  { %15993 = vst [vmem:[#allocation75_spill] sm:$0xff] %v14316_v9  ;;  %v6698_v55 = vpop.f32.mrf.mxu1  ;;  %v14319_v20 = vadd.f32 %v6694_v37, %v13923_v27  ;;  %8754 = vmatmul.msk.bf16.gmra.mxu0 %vm8752_vm7, %v8753_v3  ;;  %8790 = vmatmul.msk.bf16.gmra.mxu2 %vm8752_vm7, %v8753_v3 }
 0x7ad   :  { %v6806_v16 = vpop.f32.mrf.mxu3 }
 0x7ae   :  { %15994 = vst [vmem:[#allocation8_spill] sm:$0xff] %v14319_v20  ;;  %v6930_v29 = vmul.f32 %v14319_v20, %v14319_v20 }
 0x7af   :  { %v6747_v47 = vpop.f32.mrf.mxu2 }
 0x7b0   :  { %v6802_v34 = vadd.f32 %v6801_v54, %v6747_v47 }
 0x7b1   :  { %v6641_v5 = vpop.f32.mrf.mxu0 }
 0x7b2   :  { %v6696_v23 = vadd.f32 %v6695_v40, %v6641_v5  ;;  %v14322_v13 = vadd.f32 %v6802_v34, %v13948_v51 }
 0x7b4   :  { %v6700_v45 = vpop.f32.mrf.mxu1  ;;  %v14325_v15 = vadd.f32 %v6696_v23, %v13951_v50  ;;  %v6931_v22 = vmul.f32 %v14322_v13, %v14322_v13 }
 0x7b5   :  { %v6808_v8 = vpop.f32.mrf.mxu3 }
 0x7b6   :  { %15995 = vst [vmem:[#allocation16_spill] sm:$0xff] %v14325_v15  ;;  %v6932_v9 = vmul.f32 %v14325_v15, %v14325_v15  ;;  %v6882_v12 = vadd.f32 %v14325_v15, %v14319_v20 }
 0x7b7   :  { %v6749_v32 = vpop.f32.mrf.mxu2 }
 0x7b8   :  { %v6804_v10 = vadd.f32 %v6803_v52, %v6749_v32  ;;  %v6966_v7 = vadd.f32 %v6932_v9, %v6930_v29 }
 0x7b9   :  { %v6644_v28 = vpop.f32.mrf.mxu0 }
 0x7ba   :  { %v6699_v27 = vadd.f32 %v6698_v55, %v6644_v28  ;;  %v14328_v58 = vadd.f32 %v6804_v10, %v13968_v38 }
 0x7bc   :  { %15996 = vst [vmem:[#allocation19_spill] sm:$0xff] %v14328_v58  ;;  %v6703_v36 = vpop.f32.mrf.mxu1  ;;  %v14331_v54 = vadd.f32 %v6699_v27, %v13972_v43  ;;  %v6933_v39 = vmul.f32 %v14328_v58, %v14328_v58 }
 0x7bd   :  { %v6811_v62 = vpop.f32.mrf.mxu3 }
 0x7be   :  { %v6934_v1 = vmul.f32 %v14331_v54, %v14331_v54  ;;  %v6989_v18 = vadd.f32 %v6933_v39, %v6931_v22  ;;  %v6883_v21 = vadd.f32 %v6882_v12, %v14331_v54 }
 0x7bf   :  { %v6752_v40 = vpop.f32.mrf.mxu2 }
 0x7c0   :  { %v6807_v51 = vadd.f32 %v6806_v16, %v6752_v40 }
 0x7c1   :  { %v6646_v2 = vpop.f32.mrf.mxu0 }
 0x7c2   :  { %v6701_v26 = vadd.f32 %v6700_v45, %v6646_v2  ;;  %v14334_v50 = vadd.f32 %v6807_v51, %v13996_v53 }
 0x7c4   :  { %v6705_v33 = vpop.f32.mrf.mxu1  ;;  %v14337_v52 = vadd.f32 %v6701_v26, %v13999_v24  ;;  %v6935_v31 = vmul.f32 %v14334_v50, %v14334_v50 }
 0x7c5   :  { %v6813_v4 = vpop.f32.mrf.mxu3 }
 0x7c6   :  { %v6936_v63 = vmul.f32 %v14337_v52, %v14337_v52  ;;  %v6990_v9 = vadd.f32 %v6989_v18, %v6935_v31 }
 0x7c7   :  { %v6754_v3 = vpop.f32.mrf.mxu2 }
 0x7c8   :  { %v6809_v38 = vadd.f32 %v6808_v8, %v6754_v3 }
 0x7c9   :  { %v6649_v49 = vpop.f32.mrf.mxu0 }
 0x7ca   :  { %v6704_v61 = vadd.f32 %v6703_v36, %v6649_v49  ;;  %v14340_v43 = vadd.f32 %v6809_v38, %v14014_v19 }
 0x7cc   :  { %v6708_v37 = vpop.f32.mrf.mxu1  ;;  %v14343_v55 = vadd.f32 %v6704_v61, %v14018_v0  ;;  %v6937_v6 = vmul.f32 %v14340_v43, %v14340_v43 }
 0x7cd   :  { %v6816_v16 = vpop.f32.mrf.mxu3 }
 0x7ce   :  { %v6938_v15 = vmul.f32 %v14343_v55, %v14343_v55 }
 0x7cf   :  { %v6757_v47 = vpop.f32.mrf.mxu2 }
 0x7d0   :  { %v6812_v53 = vadd.f32 %v6811_v62, %v6757_v47 }
 0x7d1   :  { %v6651_v34 = vpop.f32.mrf.mxu0 }
 0x7d2   :  { %v6706_v5 = vadd.f32 %v6705_v33, %v6651_v34  ;;  %v14346_v24 = vadd.f32 %v6812_v53, %v14042_v25 }
 0x7d4   :  { %v6710_v23 = vpop.f32.mrf.mxu1  ;;  %v14349_v45 = vadd.f32 %v6706_v5, %v14045_v56  ;;  %v6939_v12 = vmul.f32 %v14346_v24, %v14346_v24 }
 0x7d5   :  { %v6818_v8 = vpop.f32.mrf.mxu3 }
 0x7d7   :  { %v6759_v32 = vpop.f32.mrf.mxu2 }
 0x7d8   :  { %v6814_v19 = vadd.f32 %v6813_v4, %v6759_v32 }
 0x7d9   :  { %v6654_v10 = vpop.f32.mrf.mxu0 }
 0x7da   :  { %v6709_v28 = vadd.f32 %v6708_v37, %v6654_v10  ;;  %v14352_v0 = vadd.f32 %v6814_v19, %v14060_v17 }
 0x7dc   :  { %v6713_v27 = vpop.f32.mrf.mxu1  ;;  %v14355_v36 = vadd.f32 %v6709_v28, %v14064_v48 }
 0x7dd   :  { %v14357_v62 = vpop.f32.mrf.mxu3 }
 0x7df   :  { %v6762_v25 = vpop.f32.mrf.mxu2 }
 0x7e0   :  { %v6817_v40 = vadd.f32 %v6816_v16, %v6762_v25 }
 0x7e1   :  { %v6656_v51 = vpop.f32.mrf.mxu0 }
 0x7e2   :  { %v14360_v56 = vadd.f32 %v6817_v40, %v14088_v30 }
 0x7e4   :  { %v6715_v2 = vpop.f32.mrf.mxu1 }
 0x7e5   :  { %v14362_v33 = vpop.f32.mrf.mxu3 }
 0x7e7   :  { %v6764_v26 = vpop.f32.mrf.mxu2 }
 0x7e9   :  { %v6659_v4 = vpop.f32.mrf.mxu0 }
 0x7ec   :  { %v6718_v3 = vpop.f32.mrf.mxu1 }
 0x7ed   :  { %v14366_v49 = vpop.f32.mrf.mxu3 }
 0x7ef   :  { %v14364_v17 = vpop.f32.mrf.mxu2 }
 0x7f1   :  { %v6661_v38 = vpop.f32.mrf.mxu0 }
 0x7f2   :  { %v6716_v18 = vadd.f32 %v6715_v2, %v6661_v38 }
 0x7f4   :  { %v14368_v48 = vpop.f32.mrf.mxu1 }
 0x7f5   :  { %v14372_v16 = vpop.f32.mrf.mxu3 }
 0x7f6   :  { %15997 = vst [vmem:[#allocation12_spill] sm:$0xff] %v14372_v16  ;;  %v6884_v16 = vadd.f32 %v6883_v21, %v14337_v52  ;;  %v6991_v21 = vadd.f32 %v6990_v9, %v6937_v6 }
 0x7f7   :  { %v14370_v61 = vpop.f32.mrf.mxu2 }
 0x7f9   :  { %v6664_v37 = vpop.f32.mrf.mxu0 }
 0x7fc   :  { %v14374_v30 = vpop.f32.mrf.mxu1 }
 0x7fd   :  { %v14378_v34 = vpop.f32.mrf.mxu3 }
 0x7fe   :  { %15998 = vst [vmem:[#allocation34_spill] sm:$0xff] %v14378_v34  ;;  %v6711_v34 = vadd.f32 %v6710_v23, %v6656_v51 }
 0x7ff   :  { %v14376_v47 = vpop.f32.mrf.mxu2 }
 0x800   :  { %v14429_v51 = vadd.f32 %v6711_v34, %v14091_v44  ;;  %v6992_v44 = vadd.f32 %v6991_v21, %v6939_v12  ;;  %v6822_v34 = vadd.f32 %v14357_v62, %v14364_v17  ;;  %v6824_v12 = vadd.f32 %v14362_v33, %v14370_v61 }
 0x801   :  { %v6666_v53 = vpop.f32.mrf.mxu0 }
 0x804   :  { %v14380_v5 = vpop.f32.mrf.mxu1 }
 0x805   :  { %v14388_v28 = vpop.f32.mrf.mxu3 }
 0x806   :  { %16001 = vst [vmem:[#allocation21_spill] sm:$0xff] %v14388_v28  ;;  %v6905_v28 = vadd.f32 %v14328_v58, %v14322_v13 }
 0x807   :  { %v14382_v32 = vpop.f32.mrf.mxu2 }
 0x808   :  { %15999 = vst [vmem:[#allocation42_spill] sm:$0xff] %v14382_v32  ;;  %v6906_v29 = vadd.f32 %v6905_v28, %v14334_v50  ;;  %v6714_v32 = vadd.f32 %v6713_v27, %v6659_v4  ;;  %v6885_v27 = vadd.f32 %v6884_v16, %v14343_v55  ;;  %v6941_v4 = vmul.f32 %v14352_v0, %v14352_v0 }
 0x809   :  { %v14384_v19 = vpop.f32.mrf.mxu0  ;;  %v6719_v28 = vadd.f32 %v6718_v3, %v6664_v37  ;;  %v6944_v16 = vmul.f32 %v14429_v51, %v14429_v51  ;;  %v6943_v37 = vmul.f32 %v14360_v56, %v14360_v56 }
 0x80a   :  { %v6907_v23 = vadd.f32 %v6906_v29, %v14340_v43  ;;  %v6886_v2 = vadd.f32 %v6885_v27, %v14349_v45  ;;  %v14450_v29 = vadd.f32 %v6716_v18, %v14137_v14 }
 0x80b   :  { %v14461_v62 = vadd.f32 %v6719_v28, %v14156_v35  ;;  %v6827_v35 = vadd.f32 %v14366_v49, %v14376_v47 }
 0x80c   :  { %v14392_v40 = vpop.f32.mrf.mxu1  ;;  %v6887_v3 = vadd.f32 %v6886_v2, %v14355_v36  ;;  %v6948_v33 = vmul.f32 %v14450_v29, %v14450_v29 }
 0x80d   :  { %v14425_v39 = vpop.f32.mrf.mxu3  ;;  %v14496_v28 = vadd.f32 %v6827_v35, %v14180_v46 }
 0x80f   :  { %v14386_v10 = vpop.f32.mrf.mxu2 }
 0x810   :  { %16000 = vst [vmem:[#allocation58_spill] sm:$0xff] %v14386_v10  ;;  %v6967_v10 = vadd.f32 %v6966_v7, %v6934_v1  ;;  %v6940_v7 = vmul.f32 %v14349_v45, %v14349_v45  ;;  %v6819_v1 = vadd.f32 %v6818_v8, %v6764_v26  ;;  %v6942_v8 = vmul.f32 %v14355_v36, %v14355_v36 }
 0x811   :  { %v14390_v25 = vpop.f32.mrf.mxu0  ;;  %v14438_v26 = vadd.f32 %v6714_v32, %v14110_v41  ;;  %v6993_v41 = vadd.f32 %v6992_v44, %v6941_v4  ;;  %v6950_v4 = vmul.f32 %v14461_v62, %v14461_v62  ;;  %v16003_v44 = vld [vmem:[#allocation12_spill] sm:$0xff] }
 0x812   :  { %v6968_v22 = vadd.f32 %v6967_v10, %v6936_v63  ;;  %v6908_v10 = vadd.f32 %v6907_v23, %v14346_v24  ;;  %v14442_v6 = vadd.f32 %v6819_v1, %v14106_v60  ;;  %v6721_v60 = vadd.f32 %v14368_v48, %v6666_v53 }
 0x813   :  { %v6724_v48 = vadd.f32 %v14374_v30, %v14384_v19  ;;  %v14470_v23 = vadd.f32 %v6822_v34, %v14134_v59  ;;  %v6994_v61 = vadd.f32 %v6993_v41, %v6943_v37  ;;  %v6726_v27 = vadd.f32 %v14380_v5, %v14390_v25  ;;  %v16006_v37 = vld [vmem:[#allocation34_spill] sm:$0xff] }
 0x814   :  { %v6730_v31 = vpop.f32.mrf.mxu1  ;;  %v6969_v63 = vadd.f32 %v6968_v22, %v6938_v15  ;;  %v6909_v15 = vadd.f32 %v6908_v10, %v14352_v0  ;;  %v6946_v22 = vmul.f32 %v14438_v26, %v14438_v26  ;;  %v6945_v1 = vmul.f32 %v14442_v6, %v14442_v6 }
 0x815   :  { %v14478_v21 = vadd.f32 %v6721_v60, %v14183_v11  ;;  %v6838_v30 = vpop.f32.mrf.mxu3  ;;  %v14490_v11 = vadd.f32 %v6724_v48, %v14202_v57  ;;  %v6947_v5 = vmul.f32 %v14470_v23, %v14470_v23  ;;  %v16008_v48 = vld [vmem:[#allocation66_spill] sm:$0xff] }
 0x816   :  { %v6970_v38 = vadd.f32 %v6969_v63, %v6940_v7  ;;  %v6910_v17 = vadd.f32 %v6909_v15, %v14360_v56  ;;  %v6888_v7 = vadd.f32 %v6887_v3, %v14429_v51  ;;  %v14484_v63 = vadd.f32 %v6824_v12, %v14152_v42  ;;  %v16002_v42 = vld [vmem:[#allocation42_spill] sm:$0xff] }
 0x817   :  { %v14417_v20 = vpop.f32.mrf.mxu2  ;;  %v6995_v47 = vadd.f32 %v6994_v61, %v6945_v1  ;;  %v6829_v2 = vadd.f32 %v16003_v44, %v16002_v42  ;;  %v6952_v15 = vmul.f32 %v14478_v21, %v14478_v21  ;;  %v16005_v3 = vld [vmem:[#allocation58_spill] sm:$0xff]  ;;  %v6954_v12 = vmul.f32 %v14490_v11, %v14490_v11  ;;  %v16012_v44 = vld [vmem:[#allocation31_spill] sm:$0xff] }
 0x818   :  { %v6971_v9 = vadd.f32 %v6970_v38, %v6942_v8  ;;  %v6889_v18 = vadd.f32 %v6888_v7, %v14438_v26  ;;  %v6911_v19 = vadd.f32 %v6910_v17, %v14442_v6  ;;  %v6949_v41 = vmul.f32 %v14484_v63, %v14484_v63  ;;  %v16007_v17 = vld [vmem:[#allocation70_spill] sm:$0xff] }
 0x819   :  { %v6674_v58 = vpop.f32.mrf.mxu0  ;;  %v6832_v60 = vadd.f32 %v16006_v37, %v16005_v3  ;;  %v6951_v1 = vmul.f32 %v14496_v28, %v14496_v28 }
 0x81a   :  { %v6972_v53 = vadd.f32 %v6971_v9, %v6944_v16  ;;  %v6890_v10 = vadd.f32 %v6889_v18, %v14450_v29  ;;  %v6729_v8 = vadd.f32 %v14392_v40, %v6674_v58  ;;  %v16004_v16 = vld [vmem:[#allocation68_spill] sm:$0xff]  ;;  %v6912_v40 = vadd.f32 %v6911_v19, %v14470_v23 }
 0x81b   :  { %v14504_v57 = vadd.f32 %v6726_v27, %v16004_v16  ;;  %v16010_v19 = vld [vmem:[#allocation72_spill] sm:$0xff]  ;;  %v16013_v16 = vld [vmem:[#allocation69_spill] sm:$0xff] }
 0x81c   :  { %v6973_v59 = vadd.f32 %v6972_v53, %v6946_v22  ;;  %v6733_v49 = vpop.f32.mrf.mxu1  ;;  %v6891_v38 = vadd.f32 %v6890_v10, %v14461_v62  ;;  %v14515_v7 = vadd.f32 %v6729_v8, %v16007_v17  ;;  %v14520_v53 = vadd.f32 %v6829_v2, %v16008_v48 }
 0x81d   :  { %v6956_v27 = vmul.f32 %v14504_v57, %v14504_v57  ;;  %v6841_v42 = vpop.f32.mrf.mxu3 }
 0x81e   :  { %v6974_v25 = vadd.f32 %v6973_v59, %v6948_v33  ;;  %v6892_v22 = vadd.f32 %v6891_v38, %v14478_v21  ;;  %v16009_v33 = vld [vmem:[#allocation21_spill] sm:$0xff] }
 0x81f   :  { %v6782_v32 = vpop.f32.mrf.mxu2  ;;  %v6834_v35 = vadd.f32 %v16009_v33, %v14417_v20 }
 0x820   :  { %v6975_v46 = vadd.f32 %v6974_v25, %v6950_v4  ;;  %v6893_v18 = vadd.f32 %v6892_v22, %v14490_v11  ;;  %v6913_v4 = vadd.f32 %v6912_v40, %v14484_v63  ;;  %v6837_v8 = vadd.f32 %v14425_v39, %v6782_v32  ;;  %v16014_v22 = vld [vmem:[#allocation71_spill] sm:$0xff] }
 0x821   :  { %v6676_v14 = vpop.f32.mrf.mxu0  ;;  %v6958_v25 = vmul.f32 %v14515_v7, %v14515_v7 }
 0x822   :  { %v6731_v34 = vadd.f32 %v6730_v31, %v6676_v14  ;;  %v6996_v14 = vadd.f32 %v6995_v47, %v6947_v5  ;;  %v6976_v61 = vadd.f32 %v6975_v46, %v6952_v15  ;;  %v16011_v47 = vld [vmem:[#allocation67_spill] sm:$0xff]  ;;  %v6894_v20 = vadd.f32 %v6893_v18, %v14504_v57 }
 0x823   :  { %v14532_v10 = vadd.f32 %v6832_v60, %v16011_v47  ;;  %v6914_v38 = vadd.f32 %v6913_v4, %v14496_v28  ;;  %v6953_v15 = vmul.f32 %v14520_v53, %v14520_v53  ;;  %v16016_v4 = vld [vmem:[#allocation74_spill] sm:$0xff] }
 0x824   :  { %v14528_v59 = vadd.f32 %v6731_v34, %v16010_v19  ;;  %v6977_v5 = vadd.f32 %v6976_v61, %v6954_v12  ;;  %v14545_v34 = vadd.f32 %v6834_v35, %v16013_v16  ;;  %v6735_v39 = vpop.f32.mrf.mxu1  ;;  %v6895_v46 = vadd.f32 %v6894_v20, %v14515_v7  ;;  %v16015_v61 = vld [vmem:[#allocation73_spill] sm:$0xff]  ;;  %v16017_v20 = vld [vmem:[#allocation32_spill] sm:$0xff] }
 0x825   :  { %v6915_v60 = vadd.f32 %v6914_v38, %v14520_v53  ;;  %v14554_v12 = vadd.f32 %v6837_v8, %v16014_v22 }
 0x826   :  { %v6960_v3 = vmul.f32 %v14528_v59, %v14528_v59  ;;  %v6957_v35 = vmul.f32 %v14545_v34, %v14545_v34 }
 0x827   :  { %v6784_v58 = vpop.f32.mrf.mxu2  ;;  %v6916_v33 = vadd.f32 %v6915_v60, %v14532_v10 }
 0x828   :  { %v6839_v40 = vadd.f32 %v6838_v30, %v6784_v58  ;;  %v6896_v58 = vadd.f32 %v6895_v46, %v14528_v59 }
 0x829   :  { %v6679_v9 = vpop.f32.mrf.mxu0  ;;  %v6917_v8 = vadd.f32 %v6916_v33, %v14545_v34 }
 0x82a   :  { %v6734_v31 = vadd.f32 %v6733_v49, %v6679_v9  ;;  %v6997_v49 = vadd.f32 %v6996_v14, %v6949_v41  ;;  %v6978_v41 = vadd.f32 %v6977_v5, %v6956_v27  ;;  %v6955_v9 = vmul.f32 %v14532_v10, %v14532_v10 }
 0x82b   :  { %v14563_v18 = vadd.f32 %v6839_v40, %v16015_v61  ;;  %v6959_v5 = vmul.f32 %v14554_v12, %v14554_v12  ;;  %v6918_v16 = vadd.f32 %v6917_v8, %v14554_v12 }
 0x82c   :  { %v14539_v2 = vadd.f32 %v6734_v31, %v16012_v44  ;;  %v6998_v32 = vadd.f32 %v6997_v49, %v6951_v1  ;;  %v6979_v30 = vadd.f32 %v6978_v41, %v6958_v25 }
 0x82d   :  { %v6961_v40 = vmul.f32 %v14563_v18, %v14563_v18 }
 0x82e   :  { %v6962_v14 = vmul.f32 %v14539_v2, %v14539_v2  ;;  %v6999_v48 = vadd.f32 %v6998_v32, %v6953_v15  ;;  %v6980_v27 = vadd.f32 %v6979_v30, %v6960_v3  ;;  %v6897_v19 = vadd.f32 %v6896_v58, %v14539_v2  ;;  %v16018_v58 = vld [vmem:[#allocation75_spill] sm:$0xff] }
 0x82f   :  { %v6787_v37 = vpop.f32.mrf.mxu2 }
 0x830   :  { %v6842_v17 = vadd.f32 %v6841_v42, %v6787_v37  ;;  %v7000_v47 = vadd.f32 %v6999_v48, %v6955_v9  ;;  %v6981_v42 = vadd.f32 %v6980_v27, %v6962_v14  ;;  %v6919_v37 = vadd.f32 %v6918_v16, %v14563_v18 }
 0x831   :  { %v6681_v31 = vpop.f32.mrf.mxu0 }
 0x832   :  { %v6736_v1 = vadd.f32 %v6735_v39, %v6681_v31  ;;  %v14573_v25 = vadd.f32 %v6842_v17, %v16017_v20  ;;  %v7001_v15 = vadd.f32 %v7000_v47, %v6957_v35  ;;  %v6843_v39 = vpop.f32.mrf.mxu3 }
 0x834   :  { %v14567_v49 = vadd.f32 %v6736_v1, %v16016_v4  ;;  %v7002_v3 = vadd.f32 %v7001_v15, %v6959_v5  ;;  %v6963_v60 = vmul.f32 %v14573_v25, %v14573_v25  ;;  %v6920_v30 = vadd.f32 %v6919_v37, %v14573_v25 }
 0x836   :  { %v6898_v44 = vadd.f32 %v6897_v19, %v14567_v49  ;;  %v6964_v38 = vmul.f32 %v14567_v49, %v14567_v49  ;;  %v7003_v31 = vadd.f32 %v7002_v3, %v6961_v40 }
 0x837   :  { %v6789_v46 = vpop.f32.mrf.mxu2 }
 0x838   :  { %v6899_v32 = vrot.slane %v6898_v44, 4  ;;  %v6982_v41 = vadd.f32 %v6981_v42, %v6964_v38  ;;  %v6844_v9 = vadd.f32 %v6843_v39, %v6789_v46  ;;  %v7004_v33 = vadd.f32 %v7003_v31, %v6963_v60 }
 0x83a   :  { %v6900_v22 = vadd.f32 %v6899_v32, %v6898_v44  ;;  %v6983_v17 = vrot.slane %v6982_v41, 4  ;;  %v14586_v14 = vadd.f32 %v6844_v9, %v16018_v58 }
 0x83c   :  { %v6901_v1 = vrot.slane %v6900_v22, 2  ;;  %v6984_v48 = vadd.f32 %v6983_v17, %v6982_v41  ;;  %v6921_v35 = vadd.f32 %v6920_v30, %v14586_v14  ;;  %v6965_v61 = vmul.f32 %v14586_v14, %v14586_v14 }
 0x83e   :  { %v6902_v27 = vadd.f32 %v6901_v1, %v6900_v22  ;;  %v6985_v19 = vrot.slane %v6984_v48, 2  ;;  %v6922_v4 = vrot.slane %v6921_v35, 4  ;;  %v7005_v47 = vadd.f32 %v7004_v33, %v6965_v61 }
 0x840   :  { %v6903_v8 = vrot.slane %v6902_v27, 1  ;;  %v6986_v5 = vadd.f32 %v6985_v19, %v6984_v48  ;;  %v6923_v20 = vadd.f32 %v6922_v4, %v6921_v35  ;;  %v7006_v42 = vrot.slane %v7005_v47, 4 }
 0x842   :  { %v6904_v44 = vadd.f32 %v6903_v8, %v6902_v27  ;;  %v6987_v38 = vrot.slane %v6986_v5, 1  ;;  %v6924_v15 = vrot.slane %v6923_v20, 2  ;;  %v7007_v16 = vadd.f32 %v7006_v42, %v7005_v47 }
 0x844   :  { %v6928_v40 = vmul.f32 0.0069444445, %v6904_v44  ;;  %v6988_v39 = vadd.f32 %v6987_v38, %v6986_v5  ;;  %v6925_v32 = vadd.f32 %v6924_v15, %v6923_v20  ;;  %v7008_v41 = vrot.slane %v7007_v16, 2 }
 0x846   :  { %v7012_v46 = vmul.f32 0.0069444445, %v6988_v39  ;;  %v7014_v3 = vmul.f32 %v6928_v40, %v6928_v40  ;;  %v6926_v37 = vrot.slane %v6925_v32, 1  ;;  %v7009_v60 = vadd.f32 %v7008_v41, %v7007_v16 }
 0x848   :  { %v7016_v9 = vsub.f32 %v7012_v46, %v7014_v3  ;;  %v6927_v22 = vadd.f32 %v6926_v37, %v6925_v32  ;;  %v7010_v17 = vrot.slane %v7009_v60, 1  ;;  %v16020_v37 = vld [vmem:[#allocation38_spill] sm:$0xff] }
 0x84a   :  { %v7018_v31 = vmax.f32 %v7016_v9, 0.0  ;;  %v6929_v30 = vmul.f32 0.0069444445, %v6927_v22  ;;  %v7011_v58 = vadd.f32 %v7010_v17, %v7009_v60 }
 0x84c   :  { %v7020_v1 = vadd.f32 0.001, %v7018_v31  ;;  %v7013_v48 = vmul.f32 0.0069444445, %v7011_v58  ;;  %v7015_v33 = vmul.f32 %v6929_v30, %v6929_v30 }
 0x84e   :  { %9096 = vrsqrt.f32 %v7020_v1  ;;  %v7017_v35 = vsub.f32 %v7013_v48, %v7015_v33  ;;  %vm7028_vm12 = vweird.f32 %v7020_v1 }
 0x850   :  { %v7019_v61 = vmax.f32 %v7017_v35, 0.0  ;;  %v16023_v35 = vld [vmem:[#allocation8_spill] sm:$0xff] }
 0x852   :  { %v7021_v27 = vadd.f32 0.001, %v7019_v61 }
 0x854   :  { %v9097_v19 = vpop.eup %9096  ;;  %9098 = vrsqrt.f32 %v7021_v27  ;;  %vm7038_vm1 = vweird.f32 %v7021_v27 }
 0x855   :  { %v7023_v4 = vmul.f32 %v9097_v19, %v7020_v1  ;;  %vm7029_vm4 = vweird.f32 %v9097_v19  ;;  %v16022_v1 = vld [vmem:[#allocation39_spill] sm:$0xff] }
 0x856   :  { %vm7030_vm0 = vmor %vm7028_vm12, %vm7029_vm4 }
 0x857   :  { %v7024_v47 = vmul.f32 %v9097_v19, %v7023_v4 }
 0x859   :  { %v7025_v5 = vmul.f32 0.5, %v7024_v47 }
 0x85a   :  { %v9099_v8 = vpop.eup %9098 }
 0x85b   :  { %v7033_v20 = vmul.f32 %v9099_v8, %v7021_v27  ;;  %v7026_v44 = vsub.f32 1.5, %v7025_v5  ;;  %vm7039_vm8 = vweird.f32 %v9099_v8 }
 0x85c   :  { %vm7040_vm11 = vmor %vm7038_vm1, %vm7039_vm8 }
 0x85d   :  { %v7034_v42 = vmul.f32 %v9099_v8, %v7033_v20  ;;  %v7027_v16 = vmul.f32 %v9097_v19, %v7026_v44 }
 0x85f   :  { %v7035_v38 = vmul.f32 0.5, %v7034_v42  ;;  %v7031_v46 = vsel %vm7030_vm0, %v9097_v19, %v7027_v16  ;;  %v16024_v19 = vld [vmem:[#allocation16_spill] sm:$0xff] }
 0x861   :  { %v7036_v15 = vsub.f32 1.5, %v7035_v38 }
 0x863   :  { %v7037_v39 = vmul.f32 %v9099_v8, %v7036_v15 }
 0x865   :  { %v7041_v32 = vsel %vm7040_vm11, %v9099_v8, %v7037_v39  ;;  %v16025_v8 = vld [vmem:[#allocation19_spill] sm:$0xff] }
 0x866   :  { %v7044_v41 = vrot.slane %v7041_v32, 7 }
 0x868   :  { %v7045_v3 = vsel %vm16019_vm6, %v7031_v46, %v7044_v41 }
 0x869   :  { %v7047_v60 = vmul.f32 %v7045_v3, %v16020_v37 }
 0x86b   :  { %v14593_v9 = vperm.slane %v7047_v60, 0  ;;  %v14595_v22 = vperm.slane %v7047_v60, 1 }
 0x86d   :  { %v7054_v17 = vmul.f32 %v14595_v22, %v6929_v30  ;;  %v7053_v31 = vmul.f32 %v14593_v9, %v6928_v40  ;;  %v7061_v61 = vmul.f32 %v14593_v9, %v16023_v35  ;;  %v7062_v27 = vmul.f32 %v14595_v22, %v14322_v13 }
 0x86e   :  { %v7063_v4 = vmul.f32 %v14593_v9, %v16024_v19  ;;  %v7096_v47 = vmul.f32 %v14595_v22, %v14586_v14  ;;  %v7064_v5 = vmul.f32 %v14595_v22, %v16025_v8  ;;  %v7065_v20 = vmul.f32 %v14593_v9, %v14331_v54 }
 0x86f   :  { %v7057_v58 = vrot.slane %v7054_v17, 7  ;;  %v7066_v38 = vmul.f32 %v14595_v22, %v14334_v50  ;;  %v7067_v15 = vmul.f32 %v14593_v9, %v14337_v52  ;;  %v7068_v54 = vmul.f32 %v14595_v22, %v14340_v43 }
 0x870   :  { %v7069_v50 = vmul.f32 %v14593_v9, %v14343_v55  ;;  %v7070_v32 = vmul.f32 %v14595_v22, %v14346_v24  ;;  %v7071_v41 = vmul.f32 %v14593_v9, %v14349_v45  ;;  %v7072_v46 = vmul.f32 %v14595_v22, %v14352_v0 }
 0x871   :  { %v7058_v48 = vsel %vm16021_vm2, %v7053_v31, %v7057_v58  ;;  %v7073_v3 = vmul.f32 %v14593_v9, %v14355_v36  ;;  %v7074_v0 = vmul.f32 %v14595_v22, %v14360_v56  ;;  %v7075_v36 = vmul.f32 %v14593_v9, %v14429_v51 }
 0x872   :  { %v7060_v33 = vsub.f32 %v16022_v1, %v7058_v48  ;;  %v7076_v31 = vmul.f32 %v14595_v22, %v14442_v6  ;;  %v7077_v58 = vmul.f32 %v14593_v9, %v14438_v26  ;;  %v7078_v48 = vmul.f32 %v14595_v22, %v14470_v23 }
 0x873   :  { %v7079_v1 = vmul.f32 %v14593_v9, %v14450_v29  ;;  %v7081_v35 = vmul.f32 %v14593_v9, %v14461_v62  ;;  %v7084_v19 = vmul.f32 %v14595_v22, %v14520_v53  ;;  %v7087_v8 = vmul.f32 %v14593_v9, %v14504_v57 }
 0x874   :  { %v14609_v30 = vperm.slane %v7060_v33, 0  ;;  %v14611_v40 = vperm.slane %v7060_v33, 1  ;;  %v7080_v33 = vmul.f32 %v14595_v22, %v14484_v63 }
 0x876   :  { %v7102_v42 = vadd.f32 %v14609_v30, %v7061_v61  ;;  %v7103_v13 = vadd.f32 %v14611_v40, %v7062_v27  ;;  %v7104_v44 = vadd.f32 %v14609_v30, %v7063_v4  ;;  %v7105_v14 = vadd.f32 %v14611_v40, %v7064_v5 }
 0x877   :  { %v7106_v16 = vadd.f32 %v14609_v30, %v7065_v20  ;;  %v7107_v39 = vadd.f32 %v14611_v40, %v7066_v38  ;;  %v7108_v52 = vadd.f32 %v14609_v30, %v7067_v15  ;;  %v7109_v43 = vadd.f32 %v14611_v40, %v7068_v54 }
 0x878   :  { %7138 = vst [vmem:[%s14829_s5] sm:$0xff] %v7102_v42  ;;  %v7110_v55 = vadd.f32 %v14609_v30, %v7069_v50  ;;  %v7111_v24 = vadd.f32 %v14611_v40, %v7070_v32  ;;  %v7112_v45 = vadd.f32 %v14609_v30, %v7071_v41  ;;  %v14663_v37 = vadd.f32 %v14611_v40, %v7096_v47 }
 0x879   :  { %7139 = vst [vmem:[%s14829_s5 + $0x8] sm:$0xff] %v7103_v13  ;;  %v7113_v60 = vadd.f32 %v14611_v40, %v7072_v46  ;;  %v7114_v17 = vadd.f32 %v14609_v30, %v7073_v3  ;;  %v7115_v56 = vadd.f32 %v14611_v40, %v7074_v0  ;;  %v7116_v51 = vadd.f32 %v14609_v30, %v7075_v36 }
 0x87a   :  { %7140 = vst [vmem:[%s14829_s5 + $0x10] sm:$0xff] %v7104_v44  ;;  %v7117_v6 = vadd.f32 %v14611_v40, %v7076_v31  ;;  %v7118_v26 = vadd.f32 %v14609_v30, %v7077_v58  ;;  %v7119_v23 = vadd.f32 %v14611_v40, %v7078_v48  ;;  %v7120_v29 = vadd.f32 %v14609_v30, %v7079_v1 }
 0x87b   :  { %7141 = vst [vmem:[%s14829_s5 + $0x18] sm:$0xff] %v7105_v14  ;;  %v7082_v61 = vmul.f32 %v14595_v22, %v14496_v28  ;;  %v7121_v63 = vadd.f32 %v14611_v40, %v7080_v33  ;;  %v7083_v27 = vmul.f32 %v14593_v9, %v14478_v21  ;;  %v7122_v62 = vadd.f32 %v14609_v30, %v7081_v35 }
 0x87c   :  { %7142 = vst [vmem:[%s14829_s5 + $0x20] sm:$0xff] %v7106_v16  ;;  %v7085_v4 = vmul.f32 %v14593_v9, %v14490_v11  ;;  %v7086_v47 = vmul.f32 %v14595_v22, %v14532_v10  ;;  %v7125_v53 = vadd.f32 %v14611_v40, %v7084_v19  ;;  %v7088_v5 = vmul.f32 %v14595_v22, %v14545_v34 }
 0x87d   :  { %7143 = vst [vmem:[%s14829_s5 + $0x28] sm:$0xff] %v7107_v39  ;;  %v7123_v28 = vadd.f32 %v14611_v40, %v7082_v61  ;;  %v7124_v21 = vadd.f32 %v14609_v30, %v7083_v27  ;;  %v7089_v20 = vmul.f32 %v14593_v9, %v14515_v7  ;;  %v7128_v57 = vadd.f32 %v14609_v30, %v7087_v8 }
 0x87e   :  { %7144 = vst [vmem:[%s14829_s5 + $0x30] sm:$0xff] %v7108_v52  ;;  %v7126_v11 = vadd.f32 %v14609_v30, %v7085_v4  ;;  %v7127_v10 = vadd.f32 %v14611_v40, %v7086_v47  ;;  %v7090_v42 = vmul.f32 %v14595_v22, %v14554_v12  ;;  %v7129_v34 = vadd.f32 %v14611_v40, %v7088_v5 }
 0x87f   :  { %7145 = vst [vmem:[%s14829_s5 + $0x38] sm:$0xff] %v7109_v43  ;;  %v7091_v13 = vmul.f32 %v14593_v9, %v14528_v59  ;;  %v7130_v7 = vadd.f32 %v14609_v30, %v7089_v20  ;;  %v7092_v44 = vmul.f32 %v14595_v22, %v14563_v18  ;;  %v7093_v38 = vmul.f32 %v14593_v9, %v14539_v2 }
 0x880   :  { %7146 = vst [vmem:[%s14829_s5 + $0x40] sm:$0xff] %v7110_v55  ;;  %v7131_v12 = vadd.f32 %v14611_v40, %v7090_v42  ;;  %v7094_v14 = vmul.f32 %v14595_v22, %v14573_v25  ;;  %v7095_v15 = vmul.f32 %v14593_v9, %v14567_v49 }
 0x881   :  { %7147 = vst [vmem:[%s14829_s5 + $0x48] sm:$0xff] %v7111_v24  ;;  %v7132_v59 = vadd.f32 %v14609_v30, %v7091_v13  ;;  %v7133_v18 = vadd.f32 %v14611_v40, %v7092_v44  ;;  %v7134_v2 = vadd.f32 %v14609_v30, %v7093_v38 }
 0x882   :  { %7148 = vst [vmem:[%s14829_s5 + $0x50] sm:$0xff] %v7112_v45  ;;  %v7135_v16 = vadd.f32 %v14611_v40, %v7094_v14  ;;  %v7136_v25 = vadd.f32 %v14609_v30, %v7095_v15 }
 0x883   :  { %7149 = vst [vmem:[%s14829_s5 + $0x58] sm:$0xff] %v7113_v60 }
 0x884   :  { %7150 = vst [vmem:[%s14829_s5 + $0x60] sm:$0xff] %v7114_v17 }
 0x885   :  { %7151 = vst [vmem:[%s14829_s5 + $0x68] sm:$0xff] %v7115_v56 }
 0x886   :  { %7152 = vst [vmem:[%s14829_s5 + $0x70] sm:$0xff] %v7116_v51 }
 0x887   :  { %7153 = vst [vmem:[%s14829_s5 + $0x78] sm:$0xff] %v7117_v6 }
 0x888   :  { %7154 = vst [vmem:[%s14829_s5 + $0x80] sm:$0xff] %v7118_v26 }
 0x889   :  { %7155 = vst [vmem:[%s14829_s5 + $0x88] sm:$0xff] %v7119_v23 }
 0x88a   :  { %7156 = vst [vmem:[%s14829_s5 + $0x90] sm:$0xff] %v7120_v29 }
 0x88b   :  { %7157 = vst [vmem:[%s14829_s5 + $0x98] sm:$0xff] %v7121_v63 }
 0x88c   :  { %7158 = vst [vmem:[%s14829_s5 + $0xa0] sm:$0xff] %v7122_v62 }
 0x88d   :  { %7159 = vst [vmem:[%s14829_s5 + $0xa8] sm:$0xff] %v7123_v28 }
 0x88e   :  { %7160 = vst [vmem:[%s14829_s5 + $0xb0] sm:$0xff] %v7124_v21 }
 0x88f   :  { %7161 = vst [vmem:[%s14829_s5 + $0xb8] sm:$0xff] %v7125_v53 }
 0x890   :  { %7162 = vst [vmem:[%s14829_s5 + $0xc0] sm:$0xff] %v7126_v11 }
 0x891   :  { %7163 = vst [vmem:[%s14829_s5 + $0xc8] sm:$0xff] %v7127_v10 }
 0x892   :  { %7164 = vst [vmem:[%s14829_s5 + $0xd0] sm:$0xff] %v7128_v57 }
 0x893   :  { %7165 = vst [vmem:[%s14829_s5 + $0xd8] sm:$0xff] %v7129_v34 }
 0x894   :  { %7166 = vst [vmem:[%s14829_s5 + $0xe0] sm:$0xff] %v7130_v7 }
 0x895   :  { %7167 = vst [vmem:[%s14829_s5 + $0xe8] sm:$0xff] %v7131_v12 }
 0x896   :  { %7168 = vst [vmem:[%s14829_s5 + $0xf0] sm:$0xff] %v7132_v59 }
 0x897   :  { %7169 = vst [vmem:[%s14829_s5 + $0xf8] sm:$0xff] %v7133_v18 }
 0x898   :  { %7170 = vst [vmem:[%s14829_s5 + $0x100] sm:$0xff] %v7134_v2 }
 0x899   :  { %7171 = vst [vmem:[%s14829_s5 + $0x108] sm:$0xff] %v7135_v16 }
 0x89a   :  { %7172 = vst [vmem:[%s14829_s5 + $0x110] sm:$0xff] %v7136_v25 }
 0x89b   :  { %7173 = vst [vmem:[%s14829_s5 + $0x118] sm:$0xff] %v14663_v37 }
 0x89c   :  { %7178 = vsyncmov [#allocation3] }
 0x89f   :  { %s7179_s14 = vpop.sfrf %7178 }
 0x8a0   :  { %p8800_p0 = scmp.ne.s32.totalorder %s7179_s14, 0 }
 0x8a2   :  { %7183 = shalt.err (%p8800_p0)  }

</bundles_post_ra>
